<compile_context>
chip_gen: v7x
topology: tpu7x:2x2x1
jax: 0.10.0
libtpu: 0.0.40
codegen_flags: <defaults>
</compile_context>

<pallas_src>
import functools
import math

import jax
import jax.numpy as jnp
from jax.experimental import pallas as pl
from jax.experimental.pallas import tpu as pltpu

CONFIG = dict(
    image_size=(16, 16),
    hidden_size=32,
    num_heads=4,
    mlp_dim=64,
    num_layers=2,
    dropout_rate=0.0,
    attention_dropout_rate=0.0,
)
IN_CHANNELS = 192        # hard-coded in Embeddings(in_channels=192)
PATCH = 2                # patch_size = (2, 2), stride = (2, 2)
LN_EPS = 1e-6
WEIGHT_DTYPE = jnp.bfloat16   # matmul-operand dtype (f32 accumulation)


def _gelu_exact(x):
    # matches torch.nn.functional.gelu (erf formulation, not tanh approx)
    return 0.5 * x * (1.0 + jax.lax.erf(x / jnp.sqrt(2.0).astype(x.dtype)))


def _layer_norm(v, g, b):
    mu = jnp.mean(v, axis=-1, keepdims=True)
    var = jnp.mean(jnp.square(v - mu), axis=-1, keepdims=True)
    return (v - mu) * jax.lax.rsqrt(var + LN_EPS) * g + b


# ---------------------------------------------------------------------------
# Fused kernel: patch embed -> L encoder blocks -> final LN -> Get2D transpose
# ---------------------------------------------------------------------------
def transformer_kernel(xp_ref, cw_ref, cb_ref, pos_ref,
                       ln1g_ref, ln1b_ref, wqkv_ref, bqkv_ref, wo_ref, bo_ref,
                       ln2g_ref, ln2b_ref, w1_ref, b1_ref, w2_ref, b2_ref,
                       encg_ref, encb_ref, o_ref,
                       *, num_layers, num_heads, head_dim, seq_len, batch_block):
    Bb, N, NH, HD = batch_block, seq_len, num_heads, head_dim
    H = NH * HD
    Mtok = Bb * N                                     # tokens in this block

    # -------- patch embedding + position embedding --------
    xp = xp_ref[...].reshape(Mtok, -1)                # (Bb*N, Cp) bf16
    emb = jnp.dot(xp, cw_ref[...], preferred_element_type=jnp.float32)
    x = (emb.reshape(Bb, N, H) + cb_ref[...] + pos_ref[...]).reshape(Mtok, H)

    scale = 1.0 / math.sqrt(HD)

    # -------- encoder blocks (static layer loop; weights resident) --------
    for l in range(num_layers):
        # ---- attention sub-block ----
        h_res = x
        xn = _layer_norm(x, ln1g_ref[l], ln1b_ref[l])
        qkv = jnp.dot(xn.astype(WEIGHT_DTYPE), wqkv_ref[l],
                      preferred_element_type=jnp.float32) + bqkv_ref[l]   # (Mtok, 3H)
        q3 = qkv[:, 0 * H:1 * H].reshape(Bb, N, H)
        k3 = qkv[:, 1 * H:2 * H].reshape(Bb, N, H)
        v3 = qkv[:, 2 * H:3 * H].reshape(Bb, N, H)

        wo = wo_ref[l]                                # (H, H) bf16
        attn = jnp.zeros((Mtok, H), jnp.float32)
        for hh in range(NH):                          # static unrolled head loop
            sl = slice(hh * HD, (hh + 1) * HD)
            qh = q3[:, :, sl].astype(WEIGHT_DTYPE)    # (Bb, N, HD)
            kh = k3[:, :, sl].astype(WEIGHT_DTYPE)
            vh = v3[:, :, sl].astype(WEIGHT_DTYPE)
            # scores: contract last dims, batch over Bb (no explicit transpose)
            s = jax.lax.dot_general(qh, kh, (((2,), (2,)), ((0,), (0,))),
                                    preferred_element_type=jnp.float32) * scale
            s = s - jnp.max(s, axis=-1, keepdims=True)        # stable softmax
            p = jnp.exp(s)
            p = p * pl.reciprocal(jnp.sum(p, axis=-1, keepdims=True), approx=True)
            ctx = jax.lax.dot_general(p.astype(WEIGHT_DTYPE), vh,
                                      (((2,), (1,)), ((0,), (0,))),
                                      preferred_element_type=jnp.float32)  # (Bb,N,HD)
            # accumulate directly into the output projection (no lane concat)
            attn = attn + jnp.dot(ctx.reshape(Mtok, HD).astype(WEIGHT_DTYPE),
                                  wo[sl, :], preferred_element_type=jnp.float32)
        x = attn + bo_ref[l] + h_res

        # ---- MLP sub-block ----
        h_res = x
        xn = _layer_norm(x, ln2g_ref[l], ln2b_ref[l])
        y = jnp.dot(xn.astype(WEIGHT_DTYPE), w1_ref[l],
                    preferred_element_type=jnp.float32) + b1_ref[l]
        y = _gelu_exact(y)
        y = jnp.dot(y.astype(WEIGHT_DTYPE), w2_ref[l],
                    preferred_element_type=jnp.float32) + b2_ref[l]
        x = y + h_res

    # -------- final encoder LayerNorm --------
    x = _layer_norm(x, encg_ref[...], encb_ref[...])          # (Mtok, H)

    # -------- Get2D: emit (Bb, H, N) lane-dense (transpose done in-kernel) ----
    x3 = x.reshape(Bb, N, H)
    for b in range(Bb):
        o_ref[b] = jnp.transpose(x3[b]).astype(o_ref.dtype)   # (H, N)


# ---------------------------------------------------------------------------
# Parameters (deterministic synthetic init — shapes match the PyTorch module)
# ---------------------------------------------------------------------------
def init_params(key):
    H = CONFIG['hidden_size']
    M = CONFIG['mlp_dim']
    L = CONFIG['num_layers']
    h2 = CONFIG['image_size'][0] // PATCH
    w2 = CONFIG['image_size'][1] // PATCH
    N = h2 * w2
    Cp = IN_CHANNELS * PATCH * PATCH

    def dense(k, fan_in, fan_out):
        # xavier-uniform-style init, stored as (in, out) (== PyTorch W.T)
        lim = math.sqrt(6.0 / (fan_in + fan_out))
        return jax.random.uniform(k, (fan_in, fan_out), jnp.float32, -lim, lim)

    keys = iter(jax.random.split(key, 8 * L + 4))

    wqkv, bqkv, wo, bo = [], [], [], []
    w1, b1, w2, b2 = [], [], [], []
    ln1g, ln1b, ln2g, ln2b = [], [], [], []
    for _ in range(L):
        wq = dense(next(keys), H, H)
        wk = dense(next(keys), H, H)
        wv = dense(next(keys), H, H)
        wqkv.append(jnp.concatenate([wq, wk, wv], axis=1))    # fused (H, 3H)
        bqkv.append(jnp.zeros((1, 3 * H), jnp.float32))
        wo.append(dense(next(keys), H, H))
        bo.append(jnp.zeros((1, H), jnp.float32))
        w1.append(dense(next(keys), H, M))
        b1.append(jax.random.normal(next(keys), (1, M), jnp.float32) * 1e-6)
        w2.append(dense(next(keys), M, H))
        b2.append(jax.random.normal(next(keys), (1, H), jnp.float32) * 1e-6)
        ln1g.append(jnp.ones((1, H), jnp.float32))
        ln1b.append(jnp.zeros((1, H), jnp.float32))
        ln2g.append(jnp.ones((1, H), jnp.float32))
        ln2b.append(jnp.zeros((1, H), jnp.float32))

    return dict(
        conv_w=dense(next(keys), Cp, H).astype(WEIGHT_DTYPE),   # Conv2d w as (C*kh*kw, H)
        conv_b=jax.random.normal(next(keys), (1, H), jnp.float32) * 0.02,
        pos=jnp.zeros((N, H), jnp.float32),                     # nn.Parameter(zeros(1,N,H))
        ln1_g=jnp.stack(ln1g), ln1_b=jnp.stack(ln1b),
        wqkv=jnp.stack(wqkv).astype(WEIGHT_DTYPE), bqkv=jnp.stack(bqkv),
        wo=jnp.stack(wo).astype(WEIGHT_DTYPE), bo=jnp.stack(bo),
        ln2_g=jnp.stack(ln2g), ln2_b=jnp.stack(ln2b),
        w1=jnp.stack(w1).astype(WEIGHT_DTYPE), b1=jnp.stack(b1),
        w2=jnp.stack(w2).astype(WEIGHT_DTYPE), b2=jnp.stack(b2),
        enc_ln_g=jnp.ones((1, H), jnp.float32),
        enc_ln_b=jnp.zeros((1, H), jnp.float32),
    )


# ---------------------------------------------------------------------------
# Forward pass (single fused pallas_call)
# ---------------------------------------------------------------------------
def transformer_forward(params, x, *, batch_block=None):
    B, C, Himg, Wimg = x.shape
    h2, w2 = Himg // PATCH, Wimg // PATCH
    N = h2 * w2
    Hd = CONFIG['hidden_size']
    Md = CONFIG['mlp_dim']
    NH = CONFIG['num_heads']
    HD = Hd // NH
    L = CONFIG['num_layers']
    Cp = C * PATCH * PATCH

    # Default: fold the whole batch into one block (best for v5e/v6e, M=B*N).
    # On v7x, pass batch_block=1 to keep a size-B "parallel" grid axis feeding
    # both TensorCores.
    Bb = B if batch_block is None else batch_block
    assert B % Bb == 0

    # ---- glue: extract non-overlapping 2x2 patches, matching Conv2d(k=2,s=2)
    # weight flattening order (c, kh, kw); patch order = row-major (oy, ox),
    # identical to x.flatten(2).transpose(-1,-2).  Cast to bf16 to halve the
    # HBM write of the largest tensor.
    # TODO(synk): patchify is a small XLA HBM copy (~200 KB bf16); folding it
    # into the kernel would need strided spatial gathers with a 16-lane layout.
    xp = x.reshape(B, C, h2, PATCH, w2, PATCH)
    xp = xp.transpose(0, 2, 4, 1, 3, 5).reshape(B, N, Cp).astype(WEIGHT_DTYPE)

    kernel = functools.partial(
        transformer_kernel, num_layers=L, num_heads=NH, head_dim=HD,
        seq_len=N, batch_block=Bb)

    b3 = lambda b: (b, 0, 0)       # batch-blocked arrays
    c2 = lambda b: (0, 0)          # resident 2-D params
    c3 = lambda b: (0, 0, 0)       # resident stacked (L, ..) params

    out = pl.pallas_call(
        kernel,
        out_shape=jax.ShapeDtypeStruct((B, Hd, N), jnp.float32),
        grid=(B // Bb,),
        in_specs=[
            pl.BlockSpec((Bb, N, Cp), b3),            # patch matrix
            pl.BlockSpec((Cp, Hd), c2),               # conv weight
            pl.BlockSpec((1, Hd), c2),                # conv bias
            pl.BlockSpec((N, Hd), c2),                # position embeddings
            pl.BlockSpec((L, 1, Hd), c3),             # ln1 gamma
            pl.BlockSpec((L, 1, Hd), c3),             # ln1 beta
            pl.BlockSpec((L, Hd, 3 * Hd), c3),        # fused Wqkv
            pl.BlockSpec((L, 1, 3 * Hd), c3),         # fused bqkv
            pl.BlockSpec((L, Hd, Hd), c3),            # Wo
            pl.BlockSpec((L, 1, Hd), c3),             # bo
            pl.BlockSpec((L, 1, Hd), c3),             # ln2 gamma
            pl.BlockSpec((L, 1, Hd), c3),             # ln2 beta
            pl.BlockSpec((L, Hd, Md), c3),            # fc1 W
            pl.BlockSpec((L, 1, Md), c3),             # fc1 b
            pl.BlockSpec((L, Md, Hd), c3),            # fc2 W
            pl.BlockSpec((L, 1, Hd), c3),             # fc2 b
            pl.BlockSpec((1, Hd), c2),                # encoder_norm gamma
            pl.BlockSpec((1, Hd), c2),                # encoder_norm beta
        ],
        out_specs=pl.BlockSpec((Bb, Hd, N), b3),
        compiler_params=pltpu.CompilerParams(dimension_semantics=("parallel",)),
    )(xp, params['conv_w'], params['conv_b'], params['pos'],
      params['ln1_g'], params['ln1_b'], params['wqkv'], params['bqkv'],
      params['wo'], params['bo'], params['ln2_g'], params['ln2_b'],
      params['w1'], params['b1'], params['w2'], params['b2'],
      params['enc_ln_g'], params['enc_ln_b'])

    # (B, Hd, N) -> (B, Hd, h2, w2): pure metadata reshape, no transpose.
    return out.reshape(B, Hd, h2, w2)


# ---------------------------------------------------------------------------
# Pure-JAX reference (f32 math on the same bf16-stored weights)
# ---------------------------------------------------------------------------
def transformer_reference(params, x):
    B, C, Hi, Wi = x.shape
    h2, w2 = Hi // PATCH, Wi // PATCH
    N = h2 * w2
    Hd = CONFIG['hidden_size']
    NH = CONFIG['num_heads']
    HD = Hd // NH
    Cp = C * PATCH * PATCH
    f32 = lambda a: a.astype(jnp.float32)

    xp = x.reshape(B, C, h2, PATCH, w2, PATCH).transpose(0, 2, 4, 1, 3, 5)
    xp = f32(xp.reshape(B, N, Cp).astype(WEIGHT_DTYPE))
    h = xp @ f32(params['conv_w']) + params['conv_b'] + params['pos']

    def ln(v, g, b):
        mu = v.mean(-1, keepdims=True)
        var = ((v - mu) ** 2).mean(-1, keepdims=True)
        return (v - mu) / jnp.sqrt(var + LN_EPS) * g + b

    for l in range(CONFIG['num_layers']):
        res = h
        xn = ln(h, params['ln1_g'][l], params['ln1_b'][l])
        qkv = xn @ f32(params['wqkv'][l]) + params['bqkv'][l]
        q, k, v = jnp.split(qkv, 3, axis=-1)
        heads = lambda t: t.reshape(B, N, NH, HD).transpose(0, 2, 1, 3)
        qh, kh, vh = heads(q), heads(k), heads(v)
        s = jnp.einsum('bhqd,bhkd->bhqk', qh, kh) / math.sqrt(HD)
        p = jax.nn.softmax(s, axis=-1)
        ctx = jnp.einsum('bhqk,bhkd->bhqd', p, vh)
        ctx = ctx.transpose(0, 2, 1, 3).reshape(B, N, Hd)
        h = ctx @ f32(params['wo'][l]) + params['bo'][l] + res
        res = h
        xn = ln(h, params['ln2_g'][l], params['ln2_b'][l])
        y = xn @ f32(params['w1'][l]) + params['b1'][l]
        y = 0.5 * y * (1.0 + jax.lax.erf(y / jnp.sqrt(2.0)))
        h = y @ f32(params['w2'][l]) + params['b2'][l] + res

    enc = ln(h, params['enc_ln_g'], params['enc_ln_b'])
    return enc.transpose(0, 2, 1).reshape(B, Hd, h2, w2)


if __name__ == "__main__":
    key = jax.random.PRNGKey(0)
    pkey, xkey = jax.random.split(key)
    params = init_params(pkey)

    B = 2
    x = jax.random.normal(
        xkey, (B, IN_CHANNELS, CONFIG['image_size'][0], CONFIG['image_size'][1]),
        jnp.float32)

    fwd = jax.jit(transformer_forward)
    out = jax.block_until_ready(fwd(params, x))

    h2 = CONFIG['image_size'][0] // PATCH
    w2 = CONFIG['image_size'][1] // PATCH
    assert out.shape == (B, CONFIG['hidden_size'], h2, w2), out.shape
    assert bool(jnp.all(jnp.isfinite(out)))

    # semantics check vs. pure-JAX f32 reference (bf16 matmul operands in the
    # kernel => loose tolerance; catches structural/layout errors only)
    ref = transformer_reference(params, x)
    assert float(jnp.max(jnp.abs(out - ref))) < 0.3

    print("KERNEL_OK")
</pallas_src>

<mosaic_0001>
module attributes {stable_mosaic.version = 11 : i64} {
  func.func @transformer_kernel(%arg0: i32, %arg1: memref<2x64x768xbf16, #tpu.memory_space<vmem>>, %arg2: memref<768x32xbf16, #tpu.memory_space<vmem>>, %arg3: memref<1x32xf32, #tpu.memory_space<vmem>>, %arg4: memref<64x32xf32, #tpu.memory_space<vmem>>, %arg5: memref<2x1x32xf32, #tpu.memory_space<vmem>>, %arg6: memref<2x1x32xf32, #tpu.memory_space<vmem>>, %arg7: memref<2x32x96xbf16, #tpu.memory_space<vmem>>, %arg8: memref<2x1x96xf32, #tpu.memory_space<vmem>>, %arg9: memref<2x32x32xbf16, #tpu.memory_space<vmem>>, %arg10: memref<2x1x32xf32, #tpu.memory_space<vmem>>, %arg11: memref<2x1x32xf32, #tpu.memory_space<vmem>>, %arg12: memref<2x1x32xf32, #tpu.memory_space<vmem>>, %arg13: memref<2x32x64xbf16, #tpu.memory_space<vmem>>, %arg14: memref<2x1x64xf32, #tpu.memory_space<vmem>>, %arg15: memref<2x64x32xbf16, #tpu.memory_space<vmem>>, %arg16: memref<2x1x32xf32, #tpu.memory_space<vmem>>, %arg17: memref<1x32xf32, #tpu.memory_space<vmem>>, %arg18: memref<1x32xf32, #tpu.memory_space<vmem>>, %arg19: memref<2x32x64xf32, #tpu.memory_space<vmem>>) attributes {dimension_semantics = [#tpu.dimension_semantics<parallel>], iteration_bounds = array<i64: 1>, scalar_prefetch = 0 : i64, scratch_operands = 0 : i64, tpu.core_type = #tpu.core_type<tc>, window_params = [{transform_indices = @transform_0, window_bounds = array<i64: 2, 64, 768>}, {pipeline_mode = #tpu.pipeline_mode<synchronous>, transform_indices = @transform_1, window_bounds = array<i64: 768, 32>}, {pipeline_mode = #tpu.pipeline_mode<synchronous>, transform_indices = @transform_2, window_bounds = array<i64: 1, 32>}, {pipeline_mode = #tpu.pipeline_mode<synchronous>, transform_indices = @transform_3, window_bounds = array<i64: 64, 32>}, {pipeline_mode = #tpu.pipeline_mode<synchronous>, transform_indices = @transform_4, window_bounds = array<i64: 2, 1, 32>}, {pipeline_mode = #tpu.pipeline_mode<synchronous>, transform_indices = @transform_5, window_bounds = array<i64: 2, 1, 32>}, {pipeline_mode = #tpu.pipeline_mode<synchronous>, transform_indices = @transform_6, window_bounds = array<i64: 2, 32, 96>}, {pipeline_mode = #tpu.pipeline_mode<synchronous>, transform_indices = @transform_7, window_bounds = array<i64: 2, 1, 96>}, {pipeline_mode = #tpu.pipeline_mode<synchronous>, transform_indices = @transform_8, window_bounds = array<i64: 2, 32, 32>}, {pipeline_mode = #tpu.pipeline_mode<synchronous>, transform_indices = @transform_9, window_bounds = array<i64: 2, 1, 32>}, {pipeline_mode = #tpu.pipeline_mode<synchronous>, transform_indices = @transform_10, window_bounds = array<i64: 2, 1, 32>}, {pipeline_mode = #tpu.pipeline_mode<synchronous>, transform_indices = @transform_11, window_bounds = array<i64: 2, 1, 32>}, {pipeline_mode = #tpu.pipeline_mode<synchronous>, transform_indices = @transform_12, window_bounds = array<i64: 2, 32, 64>}, {pipeline_mode = #tpu.pipeline_mode<synchronous>, transform_indices = @transform_13, window_bounds = array<i64: 2, 1, 64>}, {pipeline_mode = #tpu.pipeline_mode<synchronous>, transform_indices = @transform_14, window_bounds = array<i64: 2, 64, 32>}, {pipeline_mode = #tpu.pipeline_mode<synchronous>, transform_indices = @transform_15, window_bounds = array<i64: 2, 1, 32>}, {pipeline_mode = #tpu.pipeline_mode<synchronous>, transform_indices = @transform_16, window_bounds = array<i64: 1, 32>}, {pipeline_mode = #tpu.pipeline_mode<synchronous>, transform_indices = @transform_17, window_bounds = array<i64: 1, 32>}, {transform_indices = @transform_18, window_bounds = array<i64: 2, 32, 64>}]} {
    %c0 = arith.constant 0 : index
    %c0_0 = arith.constant 0 : index
    %c0_1 = arith.constant 0 : index
    %0 = vector.load %arg1[%c0, %c0_0, %c0_1] : memref<2x64x768xbf16, #tpu.memory_space<vmem>>, vector<2x64x768xbf16>
    %1 = vector.shape_cast %0 : vector<2x64x768xbf16> to vector<128x768xbf16>
    %c0_2 = arith.constant 0 : index
    %c0_3 = arith.constant 0 : index
    %2 = vector.load %arg2[%c0_2, %c0_3] : memref<768x32xbf16, #tpu.memory_space<vmem>>, vector<768x32xbf16>
    %cst = arith.constant dense<0.000000e+00> : vector<128x32xf32>
    %3 = tpu.matmul %1, %2, %cst {dimension_numbers = #tpu.dot_dimension_numbers<[1], [0], [0], [1], [0, 0, 1, 1], [], []>} : vector<128x768xbf16>, vector<768x32xbf16>, vector<128x32xf32> -> vector<128x32xf32>
    %4 = vector.shape_cast %3 : vector<128x32xf32> to vector<2x64x32xf32>
    %c0_4 = arith.constant 0 : index
    %c0_5 = arith.constant 0 : index
    %5 = vector.load %arg3[%c0_4, %c0_5] : memref<1x32xf32, #tpu.memory_space<vmem>>, vector<1x32xf32>
    %6 = vector.shape_cast %5 : vector<1x32xf32> to vector<1x1x32xf32>
    %7 = vector.broadcast %6 : vector<1x1x32xf32> to vector<2x64x32xf32>
    %8 = arith.addf %4, %7 : vector<2x64x32xf32>
    %c0_6 = arith.constant 0 : index
    %c0_7 = arith.constant 0 : index
    %9 = vector.load %arg4[%c0_6, %c0_7] : memref<64x32xf32, #tpu.memory_space<vmem>>, vector<64x32xf32>
    %10 = vector.shape_cast %9 : vector<64x32xf32> to vector<1x64x32xf32>
    %11 = vector.broadcast %10 : vector<1x64x32xf32> to vector<2x64x32xf32>
    %12 = arith.addf %8, %11 : vector<2x64x32xf32>
    %13 = vector.shape_cast %12 : vector<2x64x32xf32> to vector<128x32xf32>
    %c0_8 = arith.constant 0 : index
    %c0_9 = arith.constant 0 : index
    %c0_10 = arith.constant 0 : index
    %14 = vector.load %arg5[%c0_8, %c0_9, %c0_10] : memref<2x1x32xf32, #tpu.memory_space<vmem>>, vector<1x1x32xf32>
    %15 = vector.shape_cast %14 : vector<1x1x32xf32> to vector<1x32xf32>
    %c0_11 = arith.constant 0 : index
    %c0_12 = arith.constant 0 : index
    %c0_13 = arith.constant 0 : index
    %16 = vector.load %arg6[%c0_11, %c0_12, %c0_13] : memref<2x1x32xf32, #tpu.memory_space<vmem>>, vector<1x1x32xf32>
    %17 = vector.shape_cast %16 : vector<1x1x32xf32> to vector<1x32xf32>
    %cst_14 = arith.constant dense<0.000000e+00> : vector<128xf32>
    %18 = vector.multi_reduction <add>, %13, %cst_14 [1] : vector<128x32xf32> to vector<128xf32>
    %19 = vector.shape_cast %18 : vector<128xf32> to vector<128x1xf32>
    %cst_15 = arith.constant 3.200000e+01 : f32
    %20 = vector.broadcast %cst_15 : f32 to vector<128x1xf32>
    %21 = arith.divf %19, %20 : vector<128x1xf32>
    %22 = vector.broadcast %21 : vector<128x1xf32> to vector<128x32xf32>
    %23 = arith.subf %13, %22 : vector<128x32xf32>
    %24 = arith.mulf %23, %23 : vector<128x32xf32>
    %cst_16 = arith.constant dense<0.000000e+00> : vector<128xf32>
    %25 = vector.multi_reduction <add>, %24, %cst_16 [1] : vector<128x32xf32> to vector<128xf32>
    %26 = vector.shape_cast %25 : vector<128xf32> to vector<128x1xf32>
    %cst_17 = arith.constant 3.200000e+01 : f32
    %27 = vector.broadcast %cst_17 : f32 to vector<128x1xf32>
    %28 = arith.divf %26, %27 : vector<128x1xf32>
    %29 = vector.broadcast %21 : vector<128x1xf32> to vector<128x32xf32>
    %30 = arith.subf %13, %29 : vector<128x32xf32>
    %cst_18 = arith.constant 9.99999997E-7 : f32
    %31 = vector.broadcast %cst_18 : f32 to vector<128x1xf32>
    %32 = arith.addf %28, %31 : vector<128x1xf32>
    %33 = math.rsqrt %32 : vector<128x1xf32>
    %34 = vector.broadcast %33 : vector<128x1xf32> to vector<128x32xf32>
    %35 = arith.mulf %30, %34 : vector<128x32xf32>
    %36 = vector.broadcast %15 : vector<1x32xf32> to vector<128x32xf32>
    %37 = arith.mulf %35, %36 : vector<128x32xf32>
    %38 = vector.broadcast %17 : vector<1x32xf32> to vector<128x32xf32>
    %39 = arith.addf %37, %38 : vector<128x32xf32>
    %40 = arith.truncf %39 : vector<128x32xf32> to vector<128x32xbf16>
    %c0_19 = arith.constant 0 : index
    %c0_20 = arith.constant 0 : index
    %c0_21 = arith.constant 0 : index
    %41 = vector.load %arg7[%c0_19, %c0_20, %c0_21] : memref<2x32x96xbf16, #tpu.memory_space<vmem>>, vector<1x32x96xbf16>
    %42 = vector.shape_cast %41 : vector<1x32x96xbf16> to vector<32x96xbf16>
    %cst_22 = arith.constant dense<0.000000e+00> : vector<128x96xf32>
    %43 = tpu.matmul %40, %42, %cst_22 {dimension_numbers = #tpu.dot_dimension_numbers<[1], [0], [0], [1], [0, 0, 1, 1], [], []>} : vector<128x32xbf16>, vector<32x96xbf16>, vector<128x96xf32> -> vector<128x96xf32>
    %c0_23 = arith.constant 0 : index
    %c0_24 = arith.constant 0 : index
    %c0_25 = arith.constant 0 : index
    %44 = vector.load %arg8[%c0_23, %c0_24, %c0_25] : memref<2x1x96xf32, #tpu.memory_space<vmem>>, vector<1x1x96xf32>
    %45 = vector.shape_cast %44 : vector<1x1x96xf32> to vector<1x96xf32>
    %46 = vector.broadcast %45 : vector<1x96xf32> to vector<128x96xf32>
    %47 = arith.addf %43, %46 : vector<128x96xf32>
    %48 = vector.extract_strided_slice %47 {offsets = [0, 0], sizes = [128, 32], strides = [1, 1]} : vector<128x96xf32> to vector<128x32xf32>
    %49 = vector.shape_cast %48 : vector<128x32xf32> to vector<2x64x32xf32>
    %50 = vector.extract_strided_slice %47 {offsets = [0, 32], sizes = [128, 32], strides = [1, 1]} : vector<128x96xf32> to vector<128x32xf32>
    %51 = vector.shape_cast %50 : vector<128x32xf32> to vector<2x64x32xf32>
    %52 = vector.extract_strided_slice %47 {offsets = [0, 64], sizes = [128, 32], strides = [1, 1]} : vector<128x96xf32> to vector<128x32xf32>
    %53 = vector.shape_cast %52 : vector<128x32xf32> to vector<2x64x32xf32>
    %c0_26 = arith.constant 0 : index
    %c0_27 = arith.constant 0 : index
    %c0_28 = arith.constant 0 : index
    %54 = vector.load %arg9[%c0_26, %c0_27, %c0_28] : memref<2x32x32xbf16, #tpu.memory_space<vmem>>, vector<1x32x32xbf16>
    %55 = vector.shape_cast %54 : vector<1x32x32xbf16> to vector<32x32xbf16>
    %cst_29 = arith.constant 0.000000e+00 : f32
    %56 = vector.broadcast %cst_29 : f32 to vector<128x32xf32>
    %57 = vector.extract_strided_slice %49 {offsets = [0, 0, 0], sizes = [2, 64, 8], strides = [1, 1, 1]} : vector<2x64x32xf32> to vector<2x64x8xf32>
    %58 = arith.truncf %57 : vector<2x64x8xf32> to vector<2x64x8xbf16>
    %59 = vector.extract_strided_slice %51 {offsets = [0, 0, 0], sizes = [2, 64, 8], strides = [1, 1, 1]} : vector<2x64x32xf32> to vector<2x64x8xf32>
    %60 = arith.truncf %59 : vector<2x64x8xf32> to vector<2x64x8xbf16>
    %61 = vector.extract_strided_slice %53 {offsets = [0, 0, 0], sizes = [2, 64, 8], strides = [1, 1, 1]} : vector<2x64x32xf32> to vector<2x64x8xf32>
    %62 = arith.truncf %61 : vector<2x64x8xf32> to vector<2x64x8xbf16>
    %cst_30 = arith.constant dense<0.000000e+00> : vector<2x64x64xf32>
    %63 = tpu.matmul %58, %60, %cst_30 {dimension_numbers = #tpu.dot_dimension_numbers<[2], [2], [1], [1], [0, 0, 0, 1, 1, 1], [0], [0]>} : vector<2x64x8xbf16>, vector<2x64x8xbf16>, vector<2x64x64xf32> -> vector<2x64x64xf32>
    %cst_31 = arith.constant 0.353553385 : f32
    %64 = vector.broadcast %cst_31 : f32 to vector<2x64x64xf32>
    %65 = arith.mulf %63, %64 : vector<2x64x64xf32>
    %cst_32 = arith.constant dense<0xFF800000> : vector<2x64xf32>
    %66 = vector.multi_reduction <maximumf>, %65, %cst_32 [2] : vector<2x64x64xf32> to vector<2x64xf32>
    %67 = vector.shape_cast %66 : vector<2x64xf32> to vector<2x64x1xf32>
    %68 = vector.broadcast %67 : vector<2x64x1xf32> to vector<2x64x64xf32>
    %69 = arith.subf %65, %68 : vector<2x64x64xf32>
    %70 = math.exp %69 : vector<2x64x64xf32>
    %cst_33 = arith.constant dense<0.000000e+00> : vector<2x64xf32>
    %71 = vector.multi_reduction <add>, %70, %cst_33 [2] : vector<2x64x64xf32> to vector<2x64xf32>
    %72 = vector.shape_cast %71 : vector<2x64xf32> to vector<2x64x1xf32>
    %73 = tpu.reciprocal %72 {approx = true} : vector<2x64x1xf32> -> vector<2x64x1xf32>
    %74 = vector.broadcast %73 : vector<2x64x1xf32> to vector<2x64x64xf32>
    %75 = arith.mulf %70, %74 : vector<2x64x64xf32>
    %76 = arith.truncf %75 : vector<2x64x64xf32> to vector<2x64x64xbf16>
    %cst_34 = arith.constant dense<0.000000e+00> : vector<2x64x8xf32>
    %77 = tpu.matmul %76, %62, %cst_34 {dimension_numbers = #tpu.dot_dimension_numbers<[2], [1], [1], [2], [0, 0, 0, 1, 1, 2], [0], [0]>} : vector<2x64x64xbf16>, vector<2x64x8xbf16>, vector<2x64x8xf32> -> vector<2x64x8xf32>
    %78 = vector.shape_cast %77 : vector<2x64x8xf32> to vector<128x8xf32>
    %79 = arith.truncf %78 : vector<128x8xf32> to vector<128x8xbf16>
    %80 = vector.extract_strided_slice %55 {offsets = [0, 0], sizes = [8, 32], strides = [1, 1]} : vector<32x32xbf16> to vector<8x32xbf16>
    %cst_35 = arith.constant dense<0.000000e+00> : vector<128x32xf32>
    %81 = tpu.matmul %79, %80, %cst_35 {dimension_numbers = #tpu.dot_dimension_numbers<[1], [0], [0], [1], [0, 0, 1, 1], [], []>} : vector<128x8xbf16>, vector<8x32xbf16>, vector<128x32xf32> -> vector<128x32xf32>
    %82 = arith.addf %56, %81 : vector<128x32xf32>
    %83 = vector.extract_strided_slice %49 {offsets = [0, 0, 8], sizes = [2, 64, 8], strides = [1, 1, 1]} : vector<2x64x32xf32> to vector<2x64x8xf32>
    %84 = arith.truncf %83 : vector<2x64x8xf32> to vector<2x64x8xbf16>
    %85 = vector.extract_strided_slice %51 {offsets = [0, 0, 8], sizes = [2, 64, 8], strides = [1, 1, 1]} : vector<2x64x32xf32> to vector<2x64x8xf32>
    %86 = arith.truncf %85 : vector<2x64x8xf32> to vector<2x64x8xbf16>
    %87 = vector.extract_strided_slice %53 {offsets = [0, 0, 8], sizes = [2, 64, 8], strides = [1, 1, 1]} : vector<2x64x32xf32> to vector<2x64x8xf32>
    %88 = arith.truncf %87 : vector<2x64x8xf32> to vector<2x64x8xbf16>
    %cst_36 = arith.constant dense<0.000000e+00> : vector<2x64x64xf32>
    %89 = tpu.matmul %84, %86, %cst_36 {dimension_numbers = #tpu.dot_dimension_numbers<[2], [2], [1], [1], [0, 0, 0, 1, 1, 1], [0], [0]>} : vector<2x64x8xbf16>, vector<2x64x8xbf16>, vector<2x64x64xf32> -> vector<2x64x64xf32>
    %cst_37 = arith.constant 0.353553385 : f32
    %90 = vector.broadcast %cst_37 : f32 to vector<2x64x64xf32>
    %91 = arith.mulf %89, %90 : vector<2x64x64xf32>
    %cst_38 = arith.constant dense<0xFF800000> : vector<2x64xf32>
    %92 = vector.multi_reduction <maximumf>, %91, %cst_38 [2] : vector<2x64x64xf32> to vector<2x64xf32>
    %93 = vector.shape_cast %92 : vector<2x64xf32> to vector<2x64x1xf32>
    %94 = vector.broadcast %93 : vector<2x64x1xf32> to vector<2x64x64xf32>
    %95 = arith.subf %91, %94 : vector<2x64x64xf32>
    %96 = math.exp %95 : vector<2x64x64xf32>
    %cst_39 = arith.constant dense<0.000000e+00> : vector<2x64xf32>
    %97 = vector.multi_reduction <add>, %96, %cst_39 [2] : vector<2x64x64xf32> to vector<2x64xf32>
    %98 = vector.shape_cast %97 : vector<2x64xf32> to vector<2x64x1xf32>
    %99 = tpu.reciprocal %98 {approx = true} : vector<2x64x1xf32> -> vector<2x64x1xf32>
    %100 = vector.broadcast %99 : vector<2x64x1xf32> to vector<2x64x64xf32>
    %101 = arith.mulf %96, %100 : vector<2x64x64xf32>
    %102 = arith.truncf %101 : vector<2x64x64xf32> to vector<2x64x64xbf16>
    %cst_40 = arith.constant dense<0.000000e+00> : vector<2x64x8xf32>
    %103 = tpu.matmul %102, %88, %cst_40 {dimension_numbers = #tpu.dot_dimension_numbers<[2], [1], [1], [2], [0, 0, 0, 1, 1, 2], [0], [0]>} : vector<2x64x64xbf16>, vector<2x64x8xbf16>, vector<2x64x8xf32> -> vector<2x64x8xf32>
    %104 = vector.shape_cast %103 : vector<2x64x8xf32> to vector<128x8xf32>
    %105 = arith.truncf %104 : vector<128x8xf32> to vector<128x8xbf16>
    %106 = vector.extract_strided_slice %55 {offsets = [8, 0], sizes = [8, 32], strides = [1, 1]} : vector<32x32xbf16> to vector<8x32xbf16>
    %cst_41 = arith.constant dense<0.000000e+00> : vector<128x32xf32>
    %107 = tpu.matmul %105, %106, %cst_41 {dimension_numbers = #tpu.dot_dimension_numbers<[1], [0], [0], [1], [0, 0, 1, 1], [], []>} : vector<128x8xbf16>, vector<8x32xbf16>, vector<128x32xf32> -> vector<128x32xf32>
    %108 = arith.addf %82, %107 : vector<128x32xf32>
    %109 = vector.extract_strided_slice %49 {offsets = [0, 0, 16], sizes = [2, 64, 8], strides = [1, 1, 1]} : vector<2x64x32xf32> to vector<2x64x8xf32>
    %110 = arith.truncf %109 : vector<2x64x8xf32> to vector<2x64x8xbf16>
    %111 = vector.extract_strided_slice %51 {offsets = [0, 0, 16], sizes = [2, 64, 8], strides = [1, 1, 1]} : vector<2x64x32xf32> to vector<2x64x8xf32>
    %112 = arith.truncf %111 : vector<2x64x8xf32> to vector<2x64x8xbf16>
    %113 = vector.extract_strided_slice %53 {offsets = [0, 0, 16], sizes = [2, 64, 8], strides = [1, 1, 1]} : vector<2x64x32xf32> to vector<2x64x8xf32>
    %114 = arith.truncf %113 : vector<2x64x8xf32> to vector<2x64x8xbf16>
    %cst_42 = arith.constant dense<0.000000e+00> : vector<2x64x64xf32>
    %115 = tpu.matmul %110, %112, %cst_42 {dimension_numbers = #tpu.dot_dimension_numbers<[2], [2], [1], [1], [0, 0, 0, 1, 1, 1], [0], [0]>} : vector<2x64x8xbf16>, vector<2x64x8xbf16>, vector<2x64x64xf32> -> vector<2x64x64xf32>
    %cst_43 = arith.constant 0.353553385 : f32
    %116 = vector.broadcast %cst_43 : f32 to vector<2x64x64xf32>
    %117 = arith.mulf %115, %116 : vector<2x64x64xf32>
    %cst_44 = arith.constant dense<0xFF800000> : vector<2x64xf32>
    %118 = vector.multi_reduction <maximumf>, %117, %cst_44 [2] : vector<2x64x64xf32> to vector<2x64xf32>
    %119 = vector.shape_cast %118 : vector<2x64xf32> to vector<2x64x1xf32>
    %120 = vector.broadcast %119 : vector<2x64x1xf32> to vector<2x64x64xf32>
    %121 = arith.subf %117, %120 : vector<2x64x64xf32>
    %122 = math.exp %121 : vector<2x64x64xf32>
    %cst_45 = arith.constant dense<0.000000e+00> : vector<2x64xf32>
    %123 = vector.multi_reduction <add>, %122, %cst_45 [2] : vector<2x64x64xf32> to vector<2x64xf32>
    %124 = vector.shape_cast %123 : vector<2x64xf32> to vector<2x64x1xf32>
    %125 = tpu.reciprocal %124 {approx = true} : vector<2x64x1xf32> -> vector<2x64x1xf32>
    %126 = vector.broadcast %125 : vector<2x64x1xf32> to vector<2x64x64xf32>
    %127 = arith.mulf %122, %126 : vector<2x64x64xf32>
    %128 = arith.truncf %127 : vector<2x64x64xf32> to vector<2x64x64xbf16>
    %cst_46 = arith.constant dense<0.000000e+00> : vector<2x64x8xf32>
    %129 = tpu.matmul %128, %114, %cst_46 {dimension_numbers = #tpu.dot_dimension_numbers<[2], [1], [1], [2], [0, 0, 0, 1, 1, 2], [0], [0]>} : vector<2x64x64xbf16>, vector<2x64x8xbf16>, vector<2x64x8xf32> -> vector<2x64x8xf32>
    %130 = vector.shape_cast %129 : vector<2x64x8xf32> to vector<128x8xf32>
    %131 = arith.truncf %130 : vector<128x8xf32> to vector<128x8xbf16>
    %132 = vector.extract_strided_slice %55 {offsets = [16, 0], sizes = [8, 32], strides = [1, 1]} : vector<32x32xbf16> to vector<8x32xbf16>
    %cst_47 = arith.constant dense<0.000000e+00> : vector<128x32xf32>
    %133 = tpu.matmul %131, %132, %cst_47 {dimension_numbers = #tpu.dot_dimension_numbers<[1], [0], [0], [1], [0, 0, 1, 1], [], []>} : vector<128x8xbf16>, vector<8x32xbf16>, vector<128x32xf32> -> vector<128x32xf32>
    %134 = arith.addf %108, %133 : vector<128x32xf32>
    %135 = vector.extract_strided_slice %49 {offsets = [0, 0, 24], sizes = [2, 64, 8], strides = [1, 1, 1]} : vector<2x64x32xf32> to vector<2x64x8xf32>
    %136 = arith.truncf %135 : vector<2x64x8xf32> to vector<2x64x8xbf16>
    %137 = vector.extract_strided_slice %51 {offsets = [0, 0, 24], sizes = [2, 64, 8], strides = [1, 1, 1]} : vector<2x64x32xf32> to vector<2x64x8xf32>
    %138 = arith.truncf %137 : vector<2x64x8xf32> to vector<2x64x8xbf16>
    %139 = vector.extract_strided_slice %53 {offsets = [0, 0, 24], sizes = [2, 64, 8], strides = [1, 1, 1]} : vector<2x64x32xf32> to vector<2x64x8xf32>
    %140 = arith.truncf %139 : vector<2x64x8xf32> to vector<2x64x8xbf16>
    %cst_48 = arith.constant dense<0.000000e+00> : vector<2x64x64xf32>
    %141 = tpu.matmul %136, %138, %cst_48 {dimension_numbers = #tpu.dot_dimension_numbers<[2], [2], [1], [1], [0, 0, 0, 1, 1, 1], [0], [0]>} : vector<2x64x8xbf16>, vector<2x64x8xbf16>, vector<2x64x64xf32> -> vector<2x64x64xf32>
    %cst_49 = arith.constant 0.353553385 : f32
    %142 = vector.broadcast %cst_49 : f32 to vector<2x64x64xf32>
    %143 = arith.mulf %141, %142 : vector<2x64x64xf32>
    %cst_50 = arith.constant dense<0xFF800000> : vector<2x64xf32>
    %144 = vector.multi_reduction <maximumf>, %143, %cst_50 [2] : vector<2x64x64xf32> to vector<2x64xf32>
    %145 = vector.shape_cast %144 : vector<2x64xf32> to vector<2x64x1xf32>
    %146 = vector.broadcast %145 : vector<2x64x1xf32> to vector<2x64x64xf32>
    %147 = arith.subf %143, %146 : vector<2x64x64xf32>
    %148 = math.exp %147 : vector<2x64x64xf32>
    %cst_51 = arith.constant dense<0.000000e+00> : vector<2x64xf32>
    %149 = vector.multi_reduction <add>, %148, %cst_51 [2] : vector<2x64x64xf32> to vector<2x64xf32>
    %150 = vector.shape_cast %149 : vector<2x64xf32> to vector<2x64x1xf32>
    %151 = tpu.reciprocal %150 {approx = true} : vector<2x64x1xf32> -> vector<2x64x1xf32>
    %152 = vector.broadcast %151 : vector<2x64x1xf32> to vector<2x64x64xf32>
    %153 = arith.mulf %148, %152 : vector<2x64x64xf32>
    %154 = arith.truncf %153 : vector<2x64x64xf32> to vector<2x64x64xbf16>
    %cst_52 = arith.constant dense<0.000000e+00> : vector<2x64x8xf32>
    %155 = tpu.matmul %154, %140, %cst_52 {dimension_numbers = #tpu.dot_dimension_numbers<[2], [1], [1], [2], [0, 0, 0, 1, 1, 2], [0], [0]>} : vector<2x64x64xbf16>, vector<2x64x8xbf16>, vector<2x64x8xf32> -> vector<2x64x8xf32>
    %156 = vector.shape_cast %155 : vector<2x64x8xf32> to vector<128x8xf32>
    %157 = arith.truncf %156 : vector<128x8xf32> to vector<128x8xbf16>
    %158 = vector.extract_strided_slice %55 {offsets = [24, 0], sizes = [8, 32], strides = [1, 1]} : vector<32x32xbf16> to vector<8x32xbf16>
    %cst_53 = arith.constant dense<0.000000e+00> : vector<128x32xf32>
    %159 = tpu.matmul %157, %158, %cst_53 {dimension_numbers = #tpu.dot_dimension_numbers<[1], [0], [0], [1], [0, 0, 1, 1], [], []>} : vector<128x8xbf16>, vector<8x32xbf16>, vector<128x32xf32> -> vector<128x32xf32>
    %160 = arith.addf %134, %159 : vector<128x32xf32>
    %c0_54 = arith.constant 0 : index
    %c0_55 = arith.constant 0 : index
    %c0_56 = arith.constant 0 : index
    %161 = vector.load %arg10[%c0_54, %c0_55, %c0_56] : memref<2x1x32xf32, #tpu.memory_space<vmem>>, vector<1x1x32xf32>
    %162 = vector.shape_cast %161 : vector<1x1x32xf32> to vector<1x32xf32>
    %163 = vector.broadcast %162 : vector<1x32xf32> to vector<128x32xf32>
    %164 = arith.addf %160, %163 : vector<128x32xf32>
    %165 = arith.addf %164, %13 : vector<128x32xf32>
    %c0_57 = arith.constant 0 : index
    %c0_58 = arith.constant 0 : index
    %c0_59 = arith.constant 0 : index
    %166 = vector.load %arg11[%c0_57, %c0_58, %c0_59] : memref<2x1x32xf32, #tpu.memory_space<vmem>>, vector<1x1x32xf32>
    %167 = vector.shape_cast %166 : vector<1x1x32xf32> to vector<1x32xf32>
    %c0_60 = arith.constant 0 : index
    %c0_61 = arith.constant 0 : index
    %c0_62 = arith.constant 0 : index
    %168 = vector.load %arg12[%c0_60, %c0_61, %c0_62] : memref<2x1x32xf32, #tpu.memory_space<vmem>>, vector<1x1x32xf32>
    %169 = vector.shape_cast %168 : vector<1x1x32xf32> to vector<1x32xf32>
    %cst_63 = arith.constant dense<0.000000e+00> : vector<128xf32>
    %170 = vector.multi_reduction <add>, %165, %cst_63 [1] : vector<128x32xf32> to vector<128xf32>
    %171 = vector.shape_cast %170 : vector<128xf32> to vector<128x1xf32>
    %cst_64 = arith.constant 3.200000e+01 : f32
    %172 = vector.broadcast %cst_64 : f32 to vector<128x1xf32>
    %173 = arith.divf %171, %172 : vector<128x1xf32>
    %174 = vector.broadcast %173 : vector<128x1xf32> to vector<128x32xf32>
    %175 = arith.subf %165, %174 : vector<128x32xf32>
    %176 = arith.mulf %175, %175 : vector<128x32xf32>
    %cst_65 = arith.constant dense<0.000000e+00> : vector<128xf32>
    %177 = vector.multi_reduction <add>, %176, %cst_65 [1] : vector<128x32xf32> to vector<128xf32>
    %178 = vector.shape_cast %177 : vector<128xf32> to vector<128x1xf32>
    %cst_66 = arith.constant 3.200000e+01 : f32
    %179 = vector.broadcast %cst_66 : f32 to vector<128x1xf32>
    %180 = arith.divf %178, %179 : vector<128x1xf32>
    %181 = vector.broadcast %173 : vector<128x1xf32> to vector<128x32xf32>
    %182 = arith.subf %165, %181 : vector<128x32xf32>
    %cst_67 = arith.constant 9.99999997E-7 : f32
    %183 = vector.broadcast %cst_67 : f32 to vector<128x1xf32>
    %184 = arith.addf %180, %183 : vector<128x1xf32>
    %185 = math.rsqrt %184 : vector<128x1xf32>
    %186 = vector.broadcast %185 : vector<128x1xf32> to vector<128x32xf32>
    %187 = arith.mulf %182, %186 : vector<128x32xf32>
    %188 = vector.broadcast %167 : vector<1x32xf32> to vector<128x32xf32>
    %189 = arith.mulf %187, %188 : vector<128x32xf32>
    %190 = vector.broadcast %169 : vector<1x32xf32> to vector<128x32xf32>
    %191 = arith.addf %189, %190 : vector<128x32xf32>
    %192 = arith.truncf %191 : vector<128x32xf32> to vector<128x32xbf16>
    %c0_68 = arith.constant 0 : index
    %c0_69 = arith.constant 0 : index
    %c0_70 = arith.constant 0 : index
    %193 = vector.load %arg13[%c0_68, %c0_69, %c0_70] : memref<2x32x64xbf16, #tpu.memory_space<vmem>>, vector<1x32x64xbf16>
    %194 = vector.shape_cast %193 : vector<1x32x64xbf16> to vector<32x64xbf16>
    %cst_71 = arith.constant dense<0.000000e+00> : vector<128x64xf32>
    %195 = tpu.matmul %192, %194, %cst_71 {dimension_numbers = #tpu.dot_dimension_numbers<[1], [0], [0], [1], [0, 0, 1, 1], [], []>} : vector<128x32xbf16>, vector<32x64xbf16>, vector<128x64xf32> -> vector<128x64xf32>
    %c0_72 = arith.constant 0 : index
    %c0_73 = arith.constant 0 : index
    %c0_74 = arith.constant 0 : index
    %196 = vector.load %arg14[%c0_72, %c0_73, %c0_74] : memref<2x1x64xf32, #tpu.memory_space<vmem>>, vector<1x1x64xf32>
    %197 = vector.shape_cast %196 : vector<1x1x64xf32> to vector<1x64xf32>
    %198 = vector.broadcast %197 : vector<1x64xf32> to vector<128x64xf32>
    %199 = arith.addf %195, %198 : vector<128x64xf32>
    %cst_75 = arith.constant 5.000000e-01 : f32
    %200 = vector.broadcast %cst_75 : f32 to vector<128x64xf32>
    %201 = arith.mulf %200, %199 : vector<128x64xf32>
    %cst_76 = arith.constant 2.000000e+00 : f32
    %202 = math.sqrt %cst_76 : f32
    %203 = vector.broadcast %202 : f32 to vector<128x64xf32>
    %204 = arith.divf %199, %203 : vector<128x64xf32>
    %205 = math.erf %204 : vector<128x64xf32>
    %cst_77 = arith.constant 1.000000e+00 : f32
    %206 = vector.broadcast %cst_77 : f32 to vector<128x64xf32>
    %207 = arith.addf %206, %205 : vector<128x64xf32>
    %208 = arith.mulf %201, %207 : vector<128x64xf32>
    %209 = arith.truncf %208 : vector<128x64xf32> to vector<128x64xbf16>
    %c0_78 = arith.constant 0 : index
    %c0_79 = arith.constant 0 : index
    %c0_80 = arith.constant 0 : index
    %210 = vector.load %arg15[%c0_78, %c0_79, %c0_80] : memref<2x64x32xbf16, #tpu.memory_space<vmem>>, vector<1x64x32xbf16>
    %211 = vector.shape_cast %210 : vector<1x64x32xbf16> to vector<64x32xbf16>
    %cst_81 = arith.constant dense<0.000000e+00> : vector<128x32xf32>
    %212 = tpu.matmul %209, %211, %cst_81 {dimension_numbers = #tpu.dot_dimension_numbers<[1], [0], [0], [1], [0, 0, 1, 1], [], []>} : vector<128x64xbf16>, vector<64x32xbf16>, vector<128x32xf32> -> vector<128x32xf32>
    %c0_82 = arith.constant 0 : index
    %c0_83 = arith.constant 0 : index
    %c0_84 = arith.constant 0 : index
    %213 = vector.load %arg16[%c0_82, %c0_83, %c0_84] : memref<2x1x32xf32, #tpu.memory_space<vmem>>, vector<1x1x32xf32>
    %214 = vector.shape_cast %213 : vector<1x1x32xf32> to vector<1x32xf32>
    %215 = vector.broadcast %214 : vector<1x32xf32> to vector<128x32xf32>
    %216 = arith.addf %212, %215 : vector<128x32xf32>
    %217 = arith.addf %216, %165 : vector<128x32xf32>
    %c1 = arith.constant 1 : index
    %c0_85 = arith.constant 0 : index
    %c0_86 = arith.constant 0 : index
    %218 = vector.load %arg5[%c1, %c0_85, %c0_86] : memref<2x1x32xf32, #tpu.memory_space<vmem>>, vector<1x1x32xf32>
    %219 = vector.shape_cast %218 : vector<1x1x32xf32> to vector<1x32xf32>
    %c1_87 = arith.constant 1 : index
    %c0_88 = arith.constant 0 : index
    %c0_89 = arith.constant 0 : index
    %220 = vector.load %arg6[%c1_87, %c0_88, %c0_89] : memref<2x1x32xf32, #tpu.memory_space<vmem>>, vector<1x1x32xf32>
    %221 = vector.shape_cast %220 : vector<1x1x32xf32> to vector<1x32xf32>
    %cst_90 = arith.constant dense<0.000000e+00> : vector<128xf32>
    %222 = vector.multi_reduction <add>, %217, %cst_90 [1] : vector<128x32xf32> to vector<128xf32>
    %223 = vector.shape_cast %222 : vector<128xf32> to vector<128x1xf32>
    %cst_91 = arith.constant 3.200000e+01 : f32
    %224 = vector.broadcast %cst_91 : f32 to vector<128x1xf32>
    %225 = arith.divf %223, %224 : vector<128x1xf32>
    %226 = vector.broadcast %225 : vector<128x1xf32> to vector<128x32xf32>
    %227 = arith.subf %217, %226 : vector<128x32xf32>
    %228 = arith.mulf %227, %227 : vector<128x32xf32>
    %cst_92 = arith.constant dense<0.000000e+00> : vector<128xf32>
    %229 = vector.multi_reduction <add>, %228, %cst_92 [1] : vector<128x32xf32> to vector<128xf32>
    %230 = vector.shape_cast %229 : vector<128xf32> to vector<128x1xf32>
    %cst_93 = arith.constant 3.200000e+01 : f32
    %231 = vector.broadcast %cst_93 : f32 to vector<128x1xf32>
    %232 = arith.divf %230, %231 : vector<128x1xf32>
    %233 = vector.broadcast %225 : vector<128x1xf32> to vector<128x32xf32>
    %234 = arith.subf %217, %233 : vector<128x32xf32>
    %cst_94 = arith.constant 9.99999997E-7 : f32
    %235 = vector.broadcast %cst_94 : f32 to vector<128x1xf32>
    %236 = arith.addf %232, %235 : vector<128x1xf32>
    %237 = math.rsqrt %236 : vector<128x1xf32>
    %238 = vector.broadcast %237 : vector<128x1xf32> to vector<128x32xf32>
    %239 = arith.mulf %234, %238 : vector<128x32xf32>
    %240 = vector.broadcast %219 : vector<1x32xf32> to vector<128x32xf32>
    %241 = arith.mulf %239, %240 : vector<128x32xf32>
    %242 = vector.broadcast %221 : vector<1x32xf32> to vector<128x32xf32>
    %243 = arith.addf %241, %242 : vector<128x32xf32>
    %244 = arith.truncf %243 : vector<128x32xf32> to vector<128x32xbf16>
    %c1_95 = arith.constant 1 : index
    %c0_96 = arith.constant 0 : index
    %c0_97 = arith.constant 0 : index
    %245 = vector.load %arg7[%c1_95, %c0_96, %c0_97] : memref<2x32x96xbf16, #tpu.memory_space<vmem>>, vector<1x32x96xbf16>
    %246 = vector.shape_cast %245 : vector<1x32x96xbf16> to vector<32x96xbf16>
    %cst_98 = arith.constant dense<0.000000e+00> : vector<128x96xf32>
    %247 = tpu.matmul %244, %246, %cst_98 {dimension_numbers = #tpu.dot_dimension_numbers<[1], [0], [0], [1], [0, 0, 1, 1], [], []>} : vector<128x32xbf16>, vector<32x96xbf16>, vector<128x96xf32> -> vector<128x96xf32>
    %c1_99 = arith.constant 1 : index
    %c0_100 = arith.constant 0 : index
    %c0_101 = arith.constant 0 : index
    %248 = vector.load %arg8[%c1_99, %c0_100, %c0_101] : memref<2x1x96xf32, #tpu.memory_space<vmem>>, vector<1x1x96xf32>
    %249 = vector.shape_cast %248 : vector<1x1x96xf32> to vector<1x96xf32>
    %250 = vector.broadcast %249 : vector<1x96xf32> to vector<128x96xf32>
    %251 = arith.addf %247, %250 : vector<128x96xf32>
    %252 = vector.extract_strided_slice %251 {offsets = [0, 0], sizes = [128, 32], strides = [1, 1]} : vector<128x96xf32> to vector<128x32xf32>
    %253 = vector.shape_cast %252 : vector<128x32xf32> to vector<2x64x32xf32>
    %254 = vector.extract_strided_slice %251 {offsets = [0, 32], sizes = [128, 32], strides = [1, 1]} : vector<128x96xf32> to vector<128x32xf32>
    %255 = vector.shape_cast %254 : vector<128x32xf32> to vector<2x64x32xf32>
    %256 = vector.extract_strided_slice %251 {offsets = [0, 64], sizes = [128, 32], strides = [1, 1]} : vector<128x96xf32> to vector<128x32xf32>
    %257 = vector.shape_cast %256 : vector<128x32xf32> to vector<2x64x32xf32>
    %c1_102 = arith.constant 1 : index
    %c0_103 = arith.constant 0 : index
    %c0_104 = arith.constant 0 : index
    %258 = vector.load %arg9[%c1_102, %c0_103, %c0_104] : memref<2x32x32xbf16, #tpu.memory_space<vmem>>, vector<1x32x32xbf16>
    %259 = vector.shape_cast %258 : vector<1x32x32xbf16> to vector<32x32xbf16>
    %cst_105 = arith.constant 0.000000e+00 : f32
    %260 = vector.broadcast %cst_105 : f32 to vector<128x32xf32>
    %261 = vector.extract_strided_slice %253 {offsets = [0, 0, 0], sizes = [2, 64, 8], strides = [1, 1, 1]} : vector<2x64x32xf32> to vector<2x64x8xf32>
    %262 = arith.truncf %261 : vector<2x64x8xf32> to vector<2x64x8xbf16>
    %263 = vector.extract_strided_slice %255 {offsets = [0, 0, 0], sizes = [2, 64, 8], strides = [1, 1, 1]} : vector<2x64x32xf32> to vector<2x64x8xf32>
    %264 = arith.truncf %263 : vector<2x64x8xf32> to vector<2x64x8xbf16>
    %265 = vector.extract_strided_slice %257 {offsets = [0, 0, 0], sizes = [2, 64, 8], strides = [1, 1, 1]} : vector<2x64x32xf32> to vector<2x64x8xf32>
    %266 = arith.truncf %265 : vector<2x64x8xf32> to vector<2x64x8xbf16>
    %cst_106 = arith.constant dense<0.000000e+00> : vector<2x64x64xf32>
    %267 = tpu.matmul %262, %264, %cst_106 {dimension_numbers = #tpu.dot_dimension_numbers<[2], [2], [1], [1], [0, 0, 0, 1, 1, 1], [0], [0]>} : vector<2x64x8xbf16>, vector<2x64x8xbf16>, vector<2x64x64xf32> -> vector<2x64x64xf32>
    %cst_107 = arith.constant 0.353553385 : f32
    %268 = vector.broadcast %cst_107 : f32 to vector<2x64x64xf32>
    %269 = arith.mulf %267, %268 : vector<2x64x64xf32>
    %cst_108 = arith.constant dense<0xFF800000> : vector<2x64xf32>
    %270 = vector.multi_reduction <maximumf>, %269, %cst_108 [2] : vector<2x64x64xf32> to vector<2x64xf32>
    %271 = vector.shape_cast %270 : vector<2x64xf32> to vector<2x64x1xf32>
    %272 = vector.broadcast %271 : vector<2x64x1xf32> to vector<2x64x64xf32>
    %273 = arith.subf %269, %272 : vector<2x64x64xf32>
    %274 = math.exp %273 : vector<2x64x64xf32>
    %cst_109 = arith.constant dense<0.000000e+00> : vector<2x64xf32>
    %275 = vector.multi_reduction <add>, %274, %cst_109 [2] : vector<2x64x64xf32> to vector<2x64xf32>
    %276 = vector.shape_cast %275 : vector<2x64xf32> to vector<2x64x1xf32>
    %277 = tpu.reciprocal %276 {approx = true} : vector<2x64x1xf32> -> vector<2x64x1xf32>
    %278 = vector.broadcast %277 : vector<2x64x1xf32> to vector<2x64x64xf32>
    %279 = arith.mulf %274, %278 : vector<2x64x64xf32>
    %280 = arith.truncf %279 : vector<2x64x64xf32> to vector<2x64x64xbf16>
    %cst_110 = arith.constant dense<0.000000e+00> : vector<2x64x8xf32>
    %281 = tpu.matmul %280, %266, %cst_110 {dimension_numbers = #tpu.dot_dimension_numbers<[2], [1], [1], [2], [0, 0, 0, 1, 1, 2], [0], [0]>} : vector<2x64x64xbf16>, vector<2x64x8xbf16>, vector<2x64x8xf32> -> vector<2x64x8xf32>
    %282 = vector.shape_cast %281 : vector<2x64x8xf32> to vector<128x8xf32>
    %283 = arith.truncf %282 : vector<128x8xf32> to vector<128x8xbf16>
    %284 = vector.extract_strided_slice %259 {offsets = [0, 0], sizes = [8, 32], strides = [1, 1]} : vector<32x32xbf16> to vector<8x32xbf16>
    %cst_111 = arith.constant dense<0.000000e+00> : vector<128x32xf32>
    %285 = tpu.matmul %283, %284, %cst_111 {dimension_numbers = #tpu.dot_dimension_numbers<[1], [0], [0], [1], [0, 0, 1, 1], [], []>} : vector<128x8xbf16>, vector<8x32xbf16>, vector<128x32xf32> -> vector<128x32xf32>
    %286 = arith.addf %260, %285 : vector<128x32xf32>
    %287 = vector.extract_strided_slice %253 {offsets = [0, 0, 8], sizes = [2, 64, 8], strides = [1, 1, 1]} : vector<2x64x32xf32> to vector<2x64x8xf32>
    %288 = arith.truncf %287 : vector<2x64x8xf32> to vector<2x64x8xbf16>
    %289 = vector.extract_strided_slice %255 {offsets = [0, 0, 8], sizes = [2, 64, 8], strides = [1, 1, 1]} : vector<2x64x32xf32> to vector<2x64x8xf32>
    %290 = arith.truncf %289 : vector<2x64x8xf32> to vector<2x64x8xbf16>
    %291 = vector.extract_strided_slice %257 {offsets = [0, 0, 8], sizes = [2, 64, 8], strides = [1, 1, 1]} : vector<2x64x32xf32> to vector<2x64x8xf32>
    %292 = arith.truncf %291 : vector<2x64x8xf32> to vector<2x64x8xbf16>
    %cst_112 = arith.constant dense<0.000000e+00> : vector<2x64x64xf32>
    %293 = tpu.matmul %288, %290, %cst_112 {dimension_numbers = #tpu.dot_dimension_numbers<[2], [2], [1], [1], [0, 0, 0, 1, 1, 1], [0], [0]>} : vector<2x64x8xbf16>, vector<2x64x8xbf16>, vector<2x64x64xf32> -> vector<2x64x64xf32>
    %cst_113 = arith.constant 0.353553385 : f32
    %294 = vector.broadcast %cst_113 : f32 to vector<2x64x64xf32>
    %295 = arith.mulf %293, %294 : vector<2x64x64xf32>
    %cst_114 = arith.constant dense<0xFF800000> : vector<2x64xf32>
    %296 = vector.multi_reduction <maximumf>, %295, %cst_114 [2] : vector<2x64x64xf32> to vector<2x64xf32>
    %297 = vector.shape_cast %296 : vector<2x64xf32> to vector<2x64x1xf32>
    %298 = vector.broadcast %297 : vector<2x64x1xf32> to vector<2x64x64xf32>
    %299 = arith.subf %295, %298 : vector<2x64x64xf32>
    %300 = math.exp %299 : vector<2x64x64xf32>
    %cst_115 = arith.constant dense<0.000000e+00> : vector<2x64xf32>
    %301 = vector.multi_reduction <add>, %300, %cst_115 [2] : vector<2x64x64xf32> to vector<2x64xf32>
    %302 = vector.shape_cast %301 : vector<2x64xf32> to vector<2x64x1xf32>
    %303 = tpu.reciprocal %302 {approx = true} : vector<2x64x1xf32> -> vector<2x64x1xf32>
    %304 = vector.broadcast %303 : vector<2x64x1xf32> to vector<2x64x64xf32>
    %305 = arith.mulf %300, %304 : vector<2x64x64xf32>
    %306 = arith.truncf %305 : vector<2x64x64xf32> to vector<2x64x64xbf16>
    %cst_116 = arith.constant dense<0.000000e+00> : vector<2x64x8xf32>
    %307 = tpu.matmul %306, %292, %cst_116 {dimension_numbers = #tpu.dot_dimension_numbers<[2], [1], [1], [2], [0, 0, 0, 1, 1, 2], [0], [0]>} : vector<2x64x64xbf16>, vector<2x64x8xbf16>, vector<2x64x8xf32> -> vector<2x64x8xf32>
    %308 = vector.shape_cast %307 : vector<2x64x8xf32> to vector<128x8xf32>
    %309 = arith.truncf %308 : vector<128x8xf32> to vector<128x8xbf16>
    %310 = vector.extract_strided_slice %259 {offsets = [8, 0], sizes = [8, 32], strides = [1, 1]} : vector<32x32xbf16> to vector<8x32xbf16>
    %cst_117 = arith.constant dense<0.000000e+00> : vector<128x32xf32>
    %311 = tpu.matmul %309, %310, %cst_117 {dimension_numbers = #tpu.dot_dimension_numbers<[1], [0], [0], [1], [0, 0, 1, 1], [], []>} : vector<128x8xbf16>, vector<8x32xbf16>, vector<128x32xf32> -> vector<128x32xf32>
    %312 = arith.addf %286, %311 : vector<128x32xf32>
    %313 = vector.extract_strided_slice %253 {offsets = [0, 0, 16], sizes = [2, 64, 8], strides = [1, 1, 1]} : vector<2x64x32xf32> to vector<2x64x8xf32>
    %314 = arith.truncf %313 : vector<2x64x8xf32> to vector<2x64x8xbf16>
    %315 = vector.extract_strided_slice %255 {offsets = [0, 0, 16], sizes = [2, 64, 8], strides = [1, 1, 1]} : vector<2x64x32xf32> to vector<2x64x8xf32>
    %316 = arith.truncf %315 : vector<2x64x8xf32> to vector<2x64x8xbf16>
    %317 = vector.extract_strided_slice %257 {offsets = [0, 0, 16], sizes = [2, 64, 8], strides = [1, 1, 1]} : vector<2x64x32xf32> to vector<2x64x8xf32>
    %318 = arith.truncf %317 : vector<2x64x8xf32> to vector<2x64x8xbf16>
    %cst_118 = arith.constant dense<0.000000e+00> : vector<2x64x64xf32>
    %319 = tpu.matmul %314, %316, %cst_118 {dimension_numbers = #tpu.dot_dimension_numbers<[2], [2], [1], [1], [0, 0, 0, 1, 1, 1], [0], [0]>} : vector<2x64x8xbf16>, vector<2x64x8xbf16>, vector<2x64x64xf32> -> vector<2x64x64xf32>
    %cst_119 = arith.constant 0.353553385 : f32
    %320 = vector.broadcast %cst_119 : f32 to vector<2x64x64xf32>
    %321 = arith.mulf %319, %320 : vector<2x64x64xf32>
    %cst_120 = arith.constant dense<0xFF800000> : vector<2x64xf32>
    %322 = vector.multi_reduction <maximumf>, %321, %cst_120 [2] : vector<2x64x64xf32> to vector<2x64xf32>
    %323 = vector.shape_cast %322 : vector<2x64xf32> to vector<2x64x1xf32>
    %324 = vector.broadcast %323 : vector<2x64x1xf32> to vector<2x64x64xf32>
    %325 = arith.subf %321, %324 : vector<2x64x64xf32>
    %326 = math.exp %325 : vector<2x64x64xf32>
    %cst_121 = arith.constant dense<0.000000e+00> : vector<2x64xf32>
    %327 = vector.multi_reduction <add>, %326, %cst_121 [2] : vector<2x64x64xf32> to vector<2x64xf32>
    %328 = vector.shape_cast %327 : vector<2x64xf32> to vector<2x64x1xf32>
    %329 = tpu.reciprocal %328 {approx = true} : vector<2x64x1xf32> -> vector<2x64x1xf32>
    %330 = vector.broadcast %329 : vector<2x64x1xf32> to vector<2x64x64xf32>
    %331 = arith.mulf %326, %330 : vector<2x64x64xf32>
    %332 = arith.truncf %331 : vector<2x64x64xf32> to vector<2x64x64xbf16>
    %cst_122 = arith.constant dense<0.000000e+00> : vector<2x64x8xf32>
    %333 = tpu.matmul %332, %318, %cst_122 {dimension_numbers = #tpu.dot_dimension_numbers<[2], [1], [1], [2], [0, 0, 0, 1, 1, 2], [0], [0]>} : vector<2x64x64xbf16>, vector<2x64x8xbf16>, vector<2x64x8xf32> -> vector<2x64x8xf32>
    %334 = vector.shape_cast %333 : vector<2x64x8xf32> to vector<128x8xf32>
    %335 = arith.truncf %334 : vector<128x8xf32> to vector<128x8xbf16>
    %336 = vector.extract_strided_slice %259 {offsets = [16, 0], sizes = [8, 32], strides = [1, 1]} : vector<32x32xbf16> to vector<8x32xbf16>
    %cst_123 = arith.constant dense<0.000000e+00> : vector<128x32xf32>
    %337 = tpu.matmul %335, %336, %cst_123 {dimension_numbers = #tpu.dot_dimension_numbers<[1], [0], [0], [1], [0, 0, 1, 1], [], []>} : vector<128x8xbf16>, vector<8x32xbf16>, vector<128x32xf32> -> vector<128x32xf32>
    %338 = arith.addf %312, %337 : vector<128x32xf32>
    %339 = vector.extract_strided_slice %253 {offsets = [0, 0, 24], sizes = [2, 64, 8], strides = [1, 1, 1]} : vector<2x64x32xf32> to vector<2x64x8xf32>
    %340 = arith.truncf %339 : vector<2x64x8xf32> to vector<2x64x8xbf16>
    %341 = vector.extract_strided_slice %255 {offsets = [0, 0, 24], sizes = [2, 64, 8], strides = [1, 1, 1]} : vector<2x64x32xf32> to vector<2x64x8xf32>
    %342 = arith.truncf %341 : vector<2x64x8xf32> to vector<2x64x8xbf16>
    %343 = vector.extract_strided_slice %257 {offsets = [0, 0, 24], sizes = [2, 64, 8], strides = [1, 1, 1]} : vector<2x64x32xf32> to vector<2x64x8xf32>
    %344 = arith.truncf %343 : vector<2x64x8xf32> to vector<2x64x8xbf16>
    %cst_124 = arith.constant dense<0.000000e+00> : vector<2x64x64xf32>
    %345 = tpu.matmul %340, %342, %cst_124 {dimension_numbers = #tpu.dot_dimension_numbers<[2], [2], [1], [1], [0, 0, 0, 1, 1, 1], [0], [0]>} : vector<2x64x8xbf16>, vector<2x64x8xbf16>, vector<2x64x64xf32> -> vector<2x64x64xf32>
    %cst_125 = arith.constant 0.353553385 : f32
    %346 = vector.broadcast %cst_125 : f32 to vector<2x64x64xf32>
    %347 = arith.mulf %345, %346 : vector<2x64x64xf32>
    %cst_126 = arith.constant dense<0xFF800000> : vector<2x64xf32>
    %348 = vector.multi_reduction <maximumf>, %347, %cst_126 [2] : vector<2x64x64xf32> to vector<2x64xf32>
    %349 = vector.shape_cast %348 : vector<2x64xf32> to vector<2x64x1xf32>
    %350 = vector.broadcast %349 : vector<2x64x1xf32> to vector<2x64x64xf32>
    %351 = arith.subf %347, %350 : vector<2x64x64xf32>
    %352 = math.exp %351 : vector<2x64x64xf32>
    %cst_127 = arith.constant dense<0.000000e+00> : vector<2x64xf32>
    %353 = vector.multi_reduction <add>, %352, %cst_127 [2] : vector<2x64x64xf32> to vector<2x64xf32>
    %354 = vector.shape_cast %353 : vector<2x64xf32> to vector<2x64x1xf32>
    %355 = tpu.reciprocal %354 {approx = true} : vector<2x64x1xf32> -> vector<2x64x1xf32>
    %356 = vector.broadcast %355 : vector<2x64x1xf32> to vector<2x64x64xf32>
    %357 = arith.mulf %352, %356 : vector<2x64x64xf32>
    %358 = arith.truncf %357 : vector<2x64x64xf32> to vector<2x64x64xbf16>
    %cst_128 = arith.constant dense<0.000000e+00> : vector<2x64x8xf32>
    %359 = tpu.matmul %358, %344, %cst_128 {dimension_numbers = #tpu.dot_dimension_numbers<[2], [1], [1], [2], [0, 0, 0, 1, 1, 2], [0], [0]>} : vector<2x64x64xbf16>, vector<2x64x8xbf16>, vector<2x64x8xf32> -> vector<2x64x8xf32>
    %360 = vector.shape_cast %359 : vector<2x64x8xf32> to vector<128x8xf32>
    %361 = arith.truncf %360 : vector<128x8xf32> to vector<128x8xbf16>
    %362 = vector.extract_strided_slice %259 {offsets = [24, 0], sizes = [8, 32], strides = [1, 1]} : vector<32x32xbf16> to vector<8x32xbf16>
    %cst_129 = arith.constant dense<0.000000e+00> : vector<128x32xf32>
    %363 = tpu.matmul %361, %362, %cst_129 {dimension_numbers = #tpu.dot_dimension_numbers<[1], [0], [0], [1], [0, 0, 1, 1], [], []>} : vector<128x8xbf16>, vector<8x32xbf16>, vector<128x32xf32> -> vector<128x32xf32>
    %364 = arith.addf %338, %363 : vector<128x32xf32>
    %c1_130 = arith.constant 1 : index
    %c0_131 = arith.constant 0 : index
    %c0_132 = arith.constant 0 : index
    %365 = vector.load %arg10[%c1_130, %c0_131, %c0_132] : memref<2x1x32xf32, #tpu.memory_space<vmem>>, vector<1x1x32xf32>
    %366 = vector.shape_cast %365 : vector<1x1x32xf32> to vector<1x32xf32>
    %367 = vector.broadcast %366 : vector<1x32xf32> to vector<128x32xf32>
    %368 = arith.addf %364, %367 : vector<128x32xf32>
    %369 = arith.addf %368, %217 : vector<128x32xf32>
    %c1_133 = arith.constant 1 : index
    %c0_134 = arith.constant 0 : index
    %c0_135 = arith.constant 0 : index
    %370 = vector.load %arg11[%c1_133, %c0_134, %c0_135] : memref<2x1x32xf32, #tpu.memory_space<vmem>>, vector<1x1x32xf32>
    %371 = vector.shape_cast %370 : vector<1x1x32xf32> to vector<1x32xf32>
    %c1_136 = arith.constant 1 : index
    %c0_137 = arith.constant 0 : index
    %c0_138 = arith.constant 0 : index
    %372 = vector.load %arg12[%c1_136, %c0_137, %c0_138] : memref<2x1x32xf32, #tpu.memory_space<vmem>>, vector<1x1x32xf32>
    %373 = vector.shape_cast %372 : vector<1x1x32xf32> to vector<1x32xf32>
    %cst_139 = arith.constant dense<0.000000e+00> : vector<128xf32>
    %374 = vector.multi_reduction <add>, %369, %cst_139 [1] : vector<128x32xf32> to vector<128xf32>
    %375 = vector.shape_cast %374 : vector<128xf32> to vector<128x1xf32>
    %cst_140 = arith.constant 3.200000e+01 : f32
    %376 = vector.broadcast %cst_140 : f32 to vector<128x1xf32>
    %377 = arith.divf %375, %376 : vector<128x1xf32>
    %378 = vector.broadcast %377 : vector<128x1xf32> to vector<128x32xf32>
    %379 = arith.subf %369, %378 : vector<128x32xf32>
    %380 = arith.mulf %379, %379 : vector<128x32xf32>
    %cst_141 = arith.constant dense<0.000000e+00> : vector<128xf32>
    %381 = vector.multi_reduction <add>, %380, %cst_141 [1] : vector<128x32xf32> to vector<128xf32>
    %382 = vector.shape_cast %381 : vector<128xf32> to vector<128x1xf32>
    %cst_142 = arith.constant 3.200000e+01 : f32
    %383 = vector.broadcast %cst_142 : f32 to vector<128x1xf32>
    %384 = arith.divf %382, %383 : vector<128x1xf32>
    %385 = vector.broadcast %377 : vector<128x1xf32> to vector<128x32xf32>
    %386 = arith.subf %369, %385 : vector<128x32xf32>
    %cst_143 = arith.constant 9.99999997E-7 : f32
    %387 = vector.broadcast %cst_143 : f32 to vector<128x1xf32>
    %388 = arith.addf %384, %387 : vector<128x1xf32>
    %389 = math.rsqrt %388 : vector<128x1xf32>
    %390 = vector.broadcast %389 : vector<128x1xf32> to vector<128x32xf32>
    %391 = arith.mulf %386, %390 : vector<128x32xf32>
    %392 = vector.broadcast %371 : vector<1x32xf32> to vector<128x32xf32>
    %393 = arith.mulf %391, %392 : vector<128x32xf32>
    %394 = vector.broadcast %373 : vector<1x32xf32> to vector<128x32xf32>
    %395 = arith.addf %393, %394 : vector<128x32xf32>
    %396 = arith.truncf %395 : vector<128x32xf32> to vector<128x32xbf16>
    %c1_144 = arith.constant 1 : index
    %c0_145 = arith.constant 0 : index
    %c0_146 = arith.constant 0 : index
    %397 = vector.load %arg13[%c1_144, %c0_145, %c0_146] : memref<2x32x64xbf16, #tpu.memory_space<vmem>>, vector<1x32x64xbf16>
    %398 = vector.shape_cast %397 : vector<1x32x64xbf16> to vector<32x64xbf16>
    %cst_147 = arith.constant dense<0.000000e+00> : vector<128x64xf32>
    %399 = tpu.matmul %396, %398, %cst_147 {dimension_numbers = #tpu.dot_dimension_numbers<[1], [0], [0], [1], [0, 0, 1, 1], [], []>} : vector<128x32xbf16>, vector<32x64xbf16>, vector<128x64xf32> -> vector<128x64xf32>
    %c1_148 = arith.constant 1 : index
    %c0_149 = arith.constant 0 : index
    %c0_150 = arith.constant 0 : index
    %400 = vector.load %arg14[%c1_148, %c0_149, %c0_150] : memref<2x1x64xf32, #tpu.memory_space<vmem>>, vector<1x1x64xf32>
    %401 = vector.shape_cast %400 : vector<1x1x64xf32> to vector<1x64xf32>
    %402 = vector.broadcast %401 : vector<1x64xf32> to vector<128x64xf32>
    %403 = arith.addf %399, %402 : vector<128x64xf32>
    %cst_151 = arith.constant 5.000000e-01 : f32
    %404 = vector.broadcast %cst_151 : f32 to vector<128x64xf32>
    %405 = arith.mulf %404, %403 : vector<128x64xf32>
    %cst_152 = arith.constant 2.000000e+00 : f32
    %406 = math.sqrt %cst_152 : f32
    %407 = vector.broadcast %406 : f32 to vector<128x64xf32>
    %408 = arith.divf %403, %407 : vector<128x64xf32>
    %409 = math.erf %408 : vector<128x64xf32>
    %cst_153 = arith.constant 1.000000e+00 : f32
    %410 = vector.broadcast %cst_153 : f32 to vector<128x64xf32>
    %411 = arith.addf %410, %409 : vector<128x64xf32>
    %412 = arith.mulf %405, %411 : vector<128x64xf32>
    %413 = arith.truncf %412 : vector<128x64xf32> to vector<128x64xbf16>
    %c1_154 = arith.constant 1 : index
    %c0_155 = arith.constant 0 : index
    %c0_156 = arith.constant 0 : index
    %414 = vector.load %arg15[%c1_154, %c0_155, %c0_156] : memref<2x64x32xbf16, #tpu.memory_space<vmem>>, vector<1x64x32xbf16>
    %415 = vector.shape_cast %414 : vector<1x64x32xbf16> to vector<64x32xbf16>
    %cst_157 = arith.constant dense<0.000000e+00> : vector<128x32xf32>
    %416 = tpu.matmul %413, %415, %cst_157 {dimension_numbers = #tpu.dot_dimension_numbers<[1], [0], [0], [1], [0, 0, 1, 1], [], []>} : vector<128x64xbf16>, vector<64x32xbf16>, vector<128x32xf32> -> vector<128x32xf32>
    %c1_158 = arith.constant 1 : index
    %c0_159 = arith.constant 0 : index
    %c0_160 = arith.constant 0 : index
    %417 = vector.load %arg16[%c1_158, %c0_159, %c0_160] : memref<2x1x32xf32, #tpu.memory_space<vmem>>, vector<1x1x32xf32>
    %418 = vector.shape_cast %417 : vector<1x1x32xf32> to vector<1x32xf32>
    %419 = vector.broadcast %418 : vector<1x32xf32> to vector<128x32xf32>
    %420 = arith.addf %416, %419 : vector<128x32xf32>
    %421 = arith.addf %420, %369 : vector<128x32xf32>
    %c0_161 = arith.constant 0 : index
    %c0_162 = arith.constant 0 : index
    %422 = vector.load %arg17[%c0_161, %c0_162] : memref<1x32xf32, #tpu.memory_space<vmem>>, vector<1x32xf32>
    %c0_163 = arith.constant 0 : index
    %c0_164 = arith.constant 0 : index
    %423 = vector.load %arg18[%c0_163, %c0_164] : memref<1x32xf32, #tpu.memory_space<vmem>>, vector<1x32xf32>
    %cst_165 = arith.constant dense<0.000000e+00> : vector<128xf32>
    %424 = vector.multi_reduction <add>, %421, %cst_165 [1] : vector<128x32xf32> to vector<128xf32>
    %425 = vector.shape_cast %424 : vector<128xf32> to vector<128x1xf32>
    %cst_166 = arith.constant 3.200000e+01 : f32
    %426 = vector.broadcast %cst_166 : f32 to vector<128x1xf32>
    %427 = arith.divf %425, %426 : vector<128x1xf32>
    %428 = vector.broadcast %427 : vector<128x1xf32> to vector<128x32xf32>
    %429 = arith.subf %421, %428 : vector<128x32xf32>
    %430 = arith.mulf %429, %429 : vector<128x32xf32>
    %cst_167 = arith.constant dense<0.000000e+00> : vector<128xf32>
    %431 = vector.multi_reduction <add>, %430, %cst_167 [1] : vector<128x32xf32> to vector<128xf32>
    %432 = vector.shape_cast %431 : vector<128xf32> to vector<128x1xf32>
    %cst_168 = arith.constant 3.200000e+01 : f32
    %433 = vector.broadcast %cst_168 : f32 to vector<128x1xf32>
    %434 = arith.divf %432, %433 : vector<128x1xf32>
    %435 = vector.broadcast %427 : vector<128x1xf32> to vector<128x32xf32>
    %436 = arith.subf %421, %435 : vector<128x32xf32>
    %cst_169 = arith.constant 9.99999997E-7 : f32
    %437 = vector.broadcast %cst_169 : f32 to vector<128x1xf32>
    %438 = arith.addf %434, %437 : vector<128x1xf32>
    %439 = math.rsqrt %438 : vector<128x1xf32>
    %440 = vector.broadcast %439 : vector<128x1xf32> to vector<128x32xf32>
    %441 = arith.mulf %436, %440 : vector<128x32xf32>
    %442 = vector.broadcast %422 : vector<1x32xf32> to vector<128x32xf32>
    %443 = arith.mulf %441, %442 : vector<128x32xf32>
    %444 = vector.broadcast %423 : vector<1x32xf32> to vector<128x32xf32>
    %445 = arith.addf %443, %444 : vector<128x32xf32>
    %446 = vector.shape_cast %445 : vector<128x32xf32> to vector<2x64x32xf32>
    %447 = vector.extract_strided_slice %446 {offsets = [0, 0, 0], sizes = [1, 64, 32], strides = [1, 1, 1]} : vector<2x64x32xf32> to vector<1x64x32xf32>
    %448 = vector.shape_cast %447 : vector<1x64x32xf32> to vector<64x32xf32>
    %449 = tpu.transpose %448, [1, 0] : vector<64x32xf32> -> vector<32x64xf32>
    %c0_170 = arith.constant 0 : index
    %c0_171 = arith.constant 0 : index
    %c0_172 = arith.constant 0 : index
    %450 = vector.load %arg19[%c0_170, %c0_171, %c0_172] : memref<2x32x64xf32, #tpu.memory_space<vmem>>, vector<1x32x64xf32>
    %451 = vector.shape_cast %450 : vector<1x32x64xf32> to vector<32x64xf32>
    %452 = vector.shape_cast %449 : vector<32x64xf32> to vector<1x32x64xf32>
    tpu.vector_store %arg19[%c0_170, %c0_171, %c0_172], %452 {strides = array<i32>} : memref<2x32x64xf32, #tpu.memory_space<vmem>>, vector<1x32x64xf32>,
    %453 = vector.extract_strided_slice %446 {offsets = [1, 0, 0], sizes = [1, 64, 32], strides = [1, 1, 1]} : vector<2x64x32xf32> to vector<1x64x32xf32>
    %454 = vector.shape_cast %453 : vector<1x64x32xf32> to vector<64x32xf32>
    %455 = tpu.transpose %454, [1, 0] : vector<64x32xf32> -> vector<32x64xf32>
    %c1_173 = arith.constant 1 : index
    %c0_174 = arith.constant 0 : index
    %c0_175 = arith.constant 0 : index
    %456 = vector.load %arg19[%c1_173, %c0_174, %c0_175] : memref<2x32x64xf32, #tpu.memory_space<vmem>>, vector<1x32x64xf32>
    %457 = vector.shape_cast %456 : vector<1x32x64xf32> to vector<32x64xf32>
    %458 = vector.shape_cast %455 : vector<32x64xf32> to vector<1x32x64xf32>
    tpu.vector_store %arg19[%c1_173, %c0_174, %c0_175], %458 {strides = array<i32>} : memref<2x32x64xf32, #tpu.memory_space<vmem>>, vector<1x32x64xf32>,
    return
  }
  func.func @transform_0(%arg0: i32) -> (i32, i32, i32) {
    %c0_i32 = arith.constant 0 : i32
    %c0_i32_0 = arith.constant 0 : i32
    %c0_i32_1 = arith.constant 0 : i32
    return %arg0, %c0_i32, %c0_i32_0 : i32, i32, i32
  }
  func.func @transform_1(%arg0: i32) -> (i32, i32) {
    %c0_i32 = arith.constant 0 : i32
    %c0_i32_0 = arith.constant 0 : i32
    %c0_i32_1 = arith.constant 0 : i32
    return %c0_i32, %c0_i32_0 : i32, i32
  }
  func.func @transform_2(%arg0: i32) -> (i32, i32) {
    %c0_i32 = arith.constant 0 : i32
    %c0_i32_0 = arith.constant 0 : i32
    %c0_i32_1 = arith.constant 0 : i32
    return %c0_i32, %c0_i32_0 : i32, i32
  }
  func.func @transform_3(%arg0: i32) -> (i32, i32) {
    %c0_i32 = arith.constant 0 : i32
    %c0_i32_0 = arith.constant 0 : i32
    %c0_i32_1 = arith.constant 0 : i32
    return %c0_i32, %c0_i32_0 : i32, i32
  }
  func.func @transform_4(%arg0: i32) -> (i32, i32, i32) {
    %c0_i32 = arith.constant 0 : i32
    %c0_i32_0 = arith.constant 0 : i32
    %c0_i32_1 = arith.constant 0 : i32
    %c0_i32_2 = arith.constant 0 : i32
    return %c0_i32, %c0_i32_0, %c0_i32_1 : i32, i32, i32
  }
  func.func @transform_5(%arg0: i32) -> (i32, i32, i32) {
    %c0_i32 = arith.constant 0 : i32
    %c0_i32_0 = arith.constant 0 : i32
    %c0_i32_1 = arith.constant 0 : i32
    %c0_i32_2 = arith.constant 0 : i32
    return %c0_i32, %c0_i32_0, %c0_i32_1 : i32, i32, i32
  }
  func.func @transform_6(%arg0: i32) -> (i32, i32, i32) {
    %c0_i32 = arith.constant 0 : i32
    %c0_i32_0 = arith.constant 0 : i32
    %c0_i32_1 = arith.constant 0 : i32
    %c0_i32_2 = arith.constant 0 : i32
    return %c0_i32, %c0_i32_0, %c0_i32_1 : i32, i32, i32
  }
  func.func @transform_7(%arg0: i32) -> (i32, i32, i32) {
    %c0_i32 = arith.constant 0 : i32
    %c0_i32_0 = arith.constant 0 : i32
    %c0_i32_1 = arith.constant 0 : i32
    %c0_i32_2 = arith.constant 0 : i32
    return %c0_i32, %c0_i32_0, %c0_i32_1 : i32, i32, i32
  }
  func.func @transform_8(%arg0: i32) -> (i32, i32, i32) {
    %c0_i32 = arith.constant 0 : i32
    %c0_i32_0 = arith.constant 0 : i32
    %c0_i32_1 = arith.constant 0 : i32
    %c0_i32_2 = arith.constant 0 : i32
    return %c0_i32, %c0_i32_0, %c0_i32_1 : i32, i32, i32
  }
  func.func @transform_9(%arg0: i32) -> (i32, i32, i32) {
    %c0_i32 = arith.constant 0 : i32
    %c0_i32_0 = arith.constant 0 : i32
    %c0_i32_1 = arith.constant 0 : i32
    %c0_i32_2 = arith.constant 0 : i32
    return %c0_i32, %c0_i32_0, %c0_i32_1 : i32, i32, i32
  }
  func.func @transform_10(%arg0: i32) -> (i32, i32, i32) {
    %c0_i32 = arith.constant 0 : i32
    %c0_i32_0 = arith.constant 0 : i32
    %c0_i32_1 = arith.constant 0 : i32
    %c0_i32_2 = arith.constant 0 : i32
    return %c0_i32, %c0_i32_0, %c0_i32_1 : i32, i32, i32
  }
  func.func @transform_11(%arg0: i32) -> (i32, i32, i32) {
    %c0_i32 = arith.constant 0 : i32
    %c0_i32_0 = arith.constant 0 : i32
    %c0_i32_1 = arith.constant 0 : i32
    %c0_i32_2 = arith.constant 0 : i32
    return %c0_i32, %c0_i32_0, %c0_i32_1 : i32, i32, i32
  }
  func.func @transform_12(%arg0: i32) -> (i32, i32, i32) {
    %c0_i32 = arith.constant 0 : i32
    %c0_i32_0 = arith.constant 0 : i32
    %c0_i32_1 = arith.constant 0 : i32
    %c0_i32_2 = arith.constant 0 : i32
    return %c0_i32, %c0_i32_0, %c0_i32_1 : i32, i32, i32
  }
  func.func @transform_13(%arg0: i32) -> (i32, i32, i32) {
    %c0_i32 = arith.constant 0 : i32
    %c0_i32_0 = arith.constant 0 : i32
    %c0_i32_1 = arith.constant 0 : i32
    %c0_i32_2 = arith.constant 0 : i32
    return %c0_i32, %c0_i32_0, %c0_i32_1 : i32, i32, i32
  }
  func.func @transform_14(%arg0: i32) -> (i32, i32, i32) {
    %c0_i32 = arith.constant 0 : i32
    %c0_i32_0 = arith.constant 0 : i32
    %c0_i32_1 = arith.constant 0 : i32
    %c0_i32_2 = arith.constant 0 : i32
    return %c0_i32, %c0_i32_0, %c0_i32_1 : i32, i32, i32
  }
  func.func @transform_15(%arg0: i32) -> (i32, i32, i32) {
    %c0_i32 = arith.constant 0 : i32
    %c0_i32_0 = arith.constant 0 : i32
    %c0_i32_1 = arith.constant 0 : i32
    %c0_i32_2 = arith.constant 0 : i32
    return %c0_i32, %c0_i32_0, %c0_i32_1 : i32, i32, i32
  }
  func.func @transform_16(%arg0: i32) -> (i32, i32) {
    %c0_i32 = arith.constant 0 : i32
    %c0_i32_0 = arith.constant 0 : i32
    %c0_i32_1 = arith.constant 0 : i32
    return %c0_i32, %c0_i32_0 : i32, i32
  }
  func.func @transform_17(%arg0: i32) -> (i32, i32) {
    %c0_i32 = arith.constant 0 : i32
    %c0_i32_0 = arith.constant 0 : i32
    %c0_i32_1 = arith.constant 0 : i32
    return %c0_i32, %c0_i32_0 : i32, i32
  }
  func.func @transform_18(%arg0: i32) -> (i32, i32, i32) {
    %c0_i32 = arith.constant 0 : i32
    %c0_i32_0 = arith.constant 0 : i32
    %c0_i32_1 = arith.constant 0 : i32
    return %arg0, %c0_i32, %c0_i32_0 : i32, i32, i32
  }
}

</mosaic_0001>

<bundles_post_ra>
// kernel: transformer_forward.1
= control target key start
LH: loop header
LB: loop body
LE: loop exit
PB: predicated region body
PF: predicated region fallthrough
CT: control target
= control target key end

     0   :  { %vm1072_vm0 = vcmask 261120   ;;  %vm1502_vm1 = vcmask 64512   ;;  %s12321_s28 = smov 64   ;;  %vm1709_vm2 = vcmask 523264   ;;  %s12323_s30 = smov 120   ;;  %vm2700_vm3 = vcmask 1043456   ;;  %s16460_s1 = inlined_call_operand.vmem [shape: bf16[768,32], index: 1, kind: input, shape index: {}]   ;;  %s16461_s0 = inlined_call_operand.vmem [shape: bf16[2,64,768], index: 0, kind: input, shape index: {}]   ;;  %s16462_s2 = inlined_call_operand.vmem [shape: f32[1,32], index: 2, kind: input, shape index: {}]   ;;  %s16463_s3 = inlined_call_operand.vmem [shape: f32[64,32], index: 3, kind: input, shape index: {}]   ;;  %s16464_s6 = inlined_call_operand.vmem [shape: bf16[2,32,96], index: 6, kind: input, shape index: {}]   ;;  %s16465_s4 = inlined_call_operand.vmem [shape: f32[2,1,32], index: 4, kind: input, shape index: {}]   ;;  %s16466_s5 = inlined_call_operand.vmem [shape: f32[2,1,32], index: 5, kind: input, shape index: {}]   ;;  %s16467_s7 = inlined_call_operand.vmem [shape: f32[2,1,96], index: 7, kind: input, shape index: {}]   ;;  %s16468_s8 = inlined_call_operand.vmem [shape: bf16[2,32,32], index: 8, kind: input, shape index: {}]   ;;  %s16469_s9 = inlined_call_operand.vmem [shape: f32[2,1,32], index: 9, kind: input, shape index: {}]   ;;  %s16470_s12 = inlined_call_operand.vmem [shape: bf16[2,32,64], index: 12, kind: input, shape index: {}]   ;;  %s16471_s10 = inlined_call_operand.vmem [shape: f32[2,1,32], index: 10, kind: input, shape index: {}]   ;;  %s16472_s11 = inlined_call_operand.vmem [shape: f32[2,1,32], index: 11, kind: input, shape index: {}]   ;;  %s16473_s14 = inlined_call_operand.vmem [shape: bf16[2,64,32], index: 14, kind: input, shape index: {}]   ;;  %s16474_s13 = inlined_call_operand.vmem [shape: f32[2,1,64], index: 13, kind: input, shape index: {}]   ;;  %s16475_s15 = inlined_call_operand.vmem [shape: f32[2,1,32], index: 15, kind: input, shape index: {}]   ;;  %s16476_s16 = inlined_call_operand.vmem [shape: f32[1,32], index: 16, kind: input, shape index: {}]   ;;  %s16477_s17 = inlined_call_operand.vmem [shape: f32[1,32], index: 17, kind: input, shape index: {}]   ;;  %s16478_s18 = inlined_call_operand.vmem [shape: f32[2,32,64], index: 18, kind: output, shape index: {}]  }
   0x1   :  { %16521 = sst [smem:[#allocation20_spill]] %s16460_s1  ;;  %s12325_s19 = smov 80  }
   0x2   :  { %16522 = sst [smem:[#allocation21_spill]] %s16461_s0  ;;  %s16524_s29 = sld [smem:[#allocation20_spill]] }
   0x3   :  { %16523 = sst [smem:[#allocation22_spill]] %s16462_s2  ;;  %s16525_s23 = sld [smem:[#allocation21_spill]] }
   0x4   :  { %s16526_s1 = sld [smem:[#allocation22_spill]]  ;;  %s12327_s0 = smov 48  }
   0x5   :  { %s12328_s24 = smov 72   ;;  %s16501_s27 = smov 104  }
   0x6   :  { %s16499_s20 = smov 40  }
   0x8   :  { %v11448_v0 = vld [vmem:[%s16524_s29 + $0x40] sm:$0xff]   ;;  %v11452_v4 = vld [vmem:[%s16524_s29 + $0x48] sm:$0xff]   ;;  %v11456_v8 = vld [vmem:[%s16524_s29 + $0x50] sm:$0xff]  }
   0x9   :  { %v11449_v1 = vld [vmem:[%s16524_s29 + $0xc0] sm:$0xff]   ;;  %9884 = vmatprep.subr.bf16.mxu0 %v11448_v0  ;;  %v11453_v5 = vld [vmem:[%s16524_s29 + $0xc8] sm:$0xff]   ;;  %v11457_v9 = vld [vmem:[%s16524_s29 + $0xd0] sm:$0xff]  }
   0xa   :  { %v11450_v2 = vld [vmem:[%s16524_s29] sm:$0xff]   ;;  %9948 = vmatprep.subr.bf16.mxu1 %v11449_v1  ;;  %v11454_v6 = vld [vmem:[%s16524_s29 + $0x8] sm:$0xff]   ;;  %v11458_v10 = vld [vmem:[%s16524_s29 + $0x10] sm:$0xff]  }
   0xb   :  { %v11451_v3 = vld [vmem:[%s16524_s29 + $0x80] sm:$0xff]   ;;  %9885 = vmatpush3.bf16.msra.mxu0 %v11450_v2  ;;  %v11455_v7 = vld [vmem:[%s16524_s29 + $0x88] sm:$0xff]   ;;  %v11459_v11 = vld [vmem:[%s16524_s29 + $0x90] sm:$0xff]  }
   0xc   :  { %9949 = vmatpush3.bf16.msra.mxu1 %v11451_v3  ;;  %9886 = vmatprep.subr.bf16.mxu0 %v11452_v4  ;;  %v11460_v12 = vld [vmem:[%s16524_s29 + $0x58] sm:$0xff]   ;;  %v11464_v16 = vld [vmem:[%s16524_s29 + $0x60] sm:$0xff]   ;;  %v11468_v20 = vld [vmem:[%s16524_s29 + $0x68] sm:$0xff]  }
   0xd   :  { %9950 = vmatprep.subr.bf16.mxu1 %v11453_v5  ;;  %v11461_v13 = vld [vmem:[%s16524_s29 + $0xd8] sm:$0xff]   ;;  %v11465_v17 = vld [vmem:[%s16524_s29 + $0xe0] sm:$0xff]   ;;  %v11469_v21 = vld [vmem:[%s16524_s29 + $0xe8] sm:$0xff]  }
   0xe   :  { %v11462_v14 = vld [vmem:[%s16524_s29 + $0x18] sm:$0xff]   ;;  %v11466_v18 = vld [vmem:[%s16524_s29 + $0x20] sm:$0xff]   ;;  %v11470_v22 = vld [vmem:[%s16524_s29 + $0x28] sm:$0xff]  }
   0xf   :  { %9887 = vmatpush3.bf16.msra.mxu0 %v11454_v6  ;;  %v11463_v15 = vld [vmem:[%s16524_s29 + $0x98] sm:$0xff]   ;;  %v11467_v19 = vld [vmem:[%s16524_s29 + $0xa0] sm:$0xff]   ;;  %v11471_v23 = vld [vmem:[%s16524_s29 + $0xa8] sm:$0xff]  }
  0x10   :  { %9951 = vmatpush3.bf16.msra.mxu1 %v11455_v7  ;;  %9888 = vmatprep.subr.bf16.mxu0 %v11456_v8  ;;  %v11472_v24 = vld [vmem:[%s16524_s29 + $0x70] sm:$0xff]   ;;  %v11476_v28 = vld [vmem:[%s16524_s29 + $0x78] sm:$0xff]   ;;  %v11483_v34 = vld [vmem:[%s16525_s23 + $0x8] ss:$24 sps:$4 sm:$0xff]  }
  0x11   :  { %9952 = vmatprep.subr.bf16.mxu1 %v11457_v9  ;;  %v11473_v25 = vld [vmem:[%s16524_s29 + $0xf0] sm:$0xff]   ;;  %v11477_v29 = vld [vmem:[%s16524_s29 + $0xf8] sm:$0xff]   ;;  %v11485_v35 = vld [vmem:[%s16525_s23 + $0xc] ss:$24 sps:$4 sm:$0xff]  }
  0x12   :  { %v11474_v26 = vld [vmem:[%s16524_s29 + $0x30] sm:$0xff]   ;;  %v11478_v30 = vld [vmem:[%s16524_s29 + $0x38] sm:$0xff]   ;;  %861 = vmatprep.mubr.bf16.mxu1 %v11485_v35  ;;  %v11498_v41 = vld [vmem:[%s16524_s29 + $0x140] sm:$0xff]  }
  0x13   :  { %9889 = vmatpush3.bf16.msra.mxu0 %v11458_v10  ;;  %v11475_v27 = vld [vmem:[%s16524_s29 + $0xb0] sm:$0xff]   ;;  %v11479_v31 = vld [vmem:[%s16524_s29 + $0xb8] sm:$0xff]   ;;  %v11499_v42 = vld [vmem:[%s16524_s29 + $0x100] sm:$0xff]  }
  0x14   :  { %9953 = vmatpush3.bf16.msra.mxu1 %v11459_v11  ;;  %9890 = vmatprep.subr.bf16.mxu0 %v11460_v12  ;;  %v11480_v32 = vld [vmem:[%s16525_s23] ss:$24 sps:$4 sm:$0xff]   ;;  %v11482_v33 = vld [vmem:[%s16525_s23 + $0x4] ss:$24 sps:$4 sm:$0xff]   ;;  %v11486_v36 = vld [vmem:[%s16525_s23 + $0x34] ss:$24 sps:$4 sm:$0xff]  }
  0x15   :  { %9954 = vmatprep.subr.bf16.mxu1 %v11461_v13  ;;  %764 = vmatprep.mubr.bf16.mxu0 %v11482_v33  ;;  %v11488_v37 = vld [vmem:[%s16525_s23 + $0x3c] ss:$24 sps:$4 sm:$0xff]   ;;  %v11490_v38 = vld [vmem:[%s16525_s23 + $0x30] ss:$24 sps:$4 sm:$0xff]   ;;  %v11494_v43 = vld [vmem:[%s16525_s23 + $0x6c] ss:$24 sps:$4 sm:$0xff]  }
  0x16   :  { %v11491_v39 = vld [vmem:[%s16525_s23 + $0x38] ss:$24 sps:$4 sm:$0xff]   ;;  %v11492_v40 = vld [vmem:[%s16525_s23 + $0x64] ss:$24 sps:$4 sm:$0xff]   ;;  %v11506_v44 = vld [vmem:[%s16524_s29 + $0x148] sm:$0xff]  }
  0x17   :  { %9891 = vmatpush3.bf16.msra.mxu0 %v11462_v14  ;;  %v11507_v45 = vld [vmem:[%s16524_s29 + $0x108] sm:$0xff]   ;;  %v11496_v46 = vld [vmem:[%s16525_s23 + $0x60] ss:$24 sps:$4 sm:$0xff]   ;;  %v11502_v49 = vld [vmem:[%s16525_s23 + $0x9c] ss:$24 sps:$4 sm:$0xff]  }
  0x18   :  { %9955 = vmatpush3.bf16.msra.mxu1 %v11463_v15  ;;  %9892 = vmatprep.subr.bf16.mxu0 %v11464_v16  ;;  %v11497_v47 = vld [vmem:[%s16525_s23 + $0x68] ss:$24 sps:$4 sm:$0xff]   ;;  %v11500_v48 = vld [vmem:[%s16525_s23 + $0x94] ss:$24 sps:$4 sm:$0xff]   ;;  %v11522_v53 = vld [vmem:[%s16524_s29 + $0x158] sm:$0xff]  }
  0x19   :  { %9956 = vmatprep.subr.bf16.mxu1 %v11465_v17  ;;  %v11514_v50 = vld [vmem:[%s16524_s29 + $0x150] sm:$0xff]   ;;  %v11523_v54 = vld [vmem:[%s16524_s29 + $0x118] sm:$0xff]   ;;  %v11510_v57 = vld [vmem:[%s16525_s23 + $0xcc] ss:$24 sps:$4 sm:$0xff]  }
  0x1a   :  { %v11515_v51 = vld [vmem:[%s16524_s29 + $0x110] sm:$0xff]   ;;  %v11508_v56 = vld [vmem:[%s16525_s23 + $0xc4] ss:$24 sps:$4 sm:$0xff]   ;;  %v11532_v60 = vld [vmem:[%s16524_s29 + $0x168] sm:$0xff]  }
  0x1b   :  { %9893 = vmatpush3.bf16.msra.mxu0 %v11466_v18  ;;  %v11504_v52 = vld [vmem:[%s16525_s23 + $0x90] ss:$24 sps:$4 sm:$0xff]   ;;  %v11530_v58 = vld [vmem:[%s16524_s29 + $0x160] sm:$0xff]   ;;  %v11516_v0 = vld [vmem:[%s16525_s23 + $0xf4] ss:$24 sps:$4 sm:$0xff]  }
  0x1c   :  { %9957 = vmatpush3.bf16.msra.mxu1 %v11467_v19  ;;  %9894 = vmatprep.subr.bf16.mxu0 %v11468_v20  ;;  %v11505_v55 = vld [vmem:[%s16525_s23 + $0x98] ss:$24 sps:$4 sm:$0xff]   ;;  %v11531_v59 = vld [vmem:[%s16524_s29 + $0x120] sm:$0xff]   ;;  %v11533_v62 = vld [vmem:[%s16524_s29 + $0x128] sm:$0xff]  }
  0x1d   :  { %9958 = vmatprep.subr.bf16.mxu1 %v11469_v21  ;;  %v11512_v61 = vld [vmem:[%s16525_s23 + $0xc0] ss:$24 sps:$4 sm:$0xff]   ;;  %v11518_v1 = vld [vmem:[%s16525_s23 + $0xfc] ss:$24 sps:$4 sm:$0xff]   ;;  %v11520_v5 = vld [vmem:[%s16525_s23 + $0xf0] ss:$24 sps:$4 sm:$0xff]  }
  0x1e   :  { %v11513_v63 = vld [vmem:[%s16525_s23 + $0xc8] ss:$24 sps:$4 sm:$0xff]   ;;  %v11540_v2 = vld [vmem:[%s16524_s29 + $0x170] sm:$0xff]   ;;  %v11542_v4 = vld [vmem:[%s16524_s29 + $0x178] sm:$0xff]  }
  0x1f   :  { %9895 = vmatpush3.bf16.msra.mxu0 %v11470_v22  ;;  %v11541_v3 = vld [vmem:[%s16524_s29 + $0x130] sm:$0xff]   ;;  %v11543_v6 = vld [vmem:[%s16524_s29 + $0x138] sm:$0xff]   ;;  %v11526_v9 = vld [vmem:[%s16525_s23 + $0x12c] ss:$24 sps:$4 sm:$0xff]   ;;  %s12320_s29 = smov 96  }
  0x20   :  { %9959 = vmatpush3.bf16.msra.mxu1 %v11471_v23  ;;  %9896 = vmatprep.subr.bf16.mxu0 %v11472_v24  ;;  %v11521_v7 = vld [vmem:[%s16525_s23 + $0xf8] ss:$24 sps:$4 sm:$0xff]   ;;  %v11524_v8 = vld [vmem:[%s16525_s23 + $0x124] ss:$24 sps:$4 sm:$0xff]   ;;  %v11529_v11 = vld [vmem:[%s16525_s23 + $0x128] ss:$24 sps:$4 sm:$0xff]  }
  0x21   :  { %9960 = vmatprep.subr.bf16.mxu1 %v11473_v25  ;;  %v11528_v10 = vld [vmem:[%s16525_s23 + $0x120] ss:$24 sps:$4 sm:$0xff]   ;;  %v11534_v12 = vld [vmem:[%s16525_s23 + $0x154] ss:$24 sps:$4 sm:$0xff]   ;;  %v11538_v14 = vld [vmem:[%s16525_s23 + $0x150] ss:$24 sps:$4 sm:$0xff]  }
  0x22   :  { %v11536_v13 = vld [vmem:[%s16525_s23 + $0x15c] ss:$24 sps:$4 sm:$0xff]   ;;  %v11539_v15 = vld [vmem:[%s16525_s23 + $0x158] ss:$24 sps:$4 sm:$0xff]  }
  0x23   :  { %9897 = vmatpush3.bf16.msra.mxu0 %v11474_v26  ;;  %v11546_v16 = vld [vmem:[%s16525_s23 + $0x14] ss:$24 sps:$4 sm:$0xff]   ;;  %v11544_v18 = vld [vmem:[%s16525_s23 + $0x10] ss:$24 sps:$4 sm:$0xff]   ;;  %v11550_v20 = vld [vmem:[%s16525_s23 + $0x44] ss:$24 sps:$4 sm:$0xff]  }
  0x24   :  { %9961 = vmatpush3.bf16.msra.mxu1 %v11475_v27  ;;  %9898 = vmatprep.subr.bf16.mxu0 %v11476_v28  ;;  %v11549_v17 = vld [vmem:[%s16525_s23 + $0x134] ss:$24 sps:$4 sm:$0xff]   ;;  %v11547_v19 = vld [vmem:[%s16525_s23 + $0x130] ss:$24 sps:$4 sm:$0xff]   ;;  %v11552_v21 = vld [vmem:[%s16525_s23 + $0x164] ss:$24 sps:$4 sm:$0xff]  }
  0x25   :  { %9962 = vmatprep.subr.bf16.mxu1 %v11477_v29  ;;  %v11554_v22 = vld [vmem:[%s16525_s23 + $0x40] ss:$24 sps:$4 sm:$0xff]   ;;  %v11556_v24 = vld [vmem:[%s16525_s23 + $0x74] ss:$24 sps:$4 sm:$0xff]   ;;  %v11558_v25 = vld [vmem:[%s16525_s23 + $0x70] ss:$24 sps:$4 sm:$0xff]  }
  0x26   :  { %v11555_v23 = vld [vmem:[%s16525_s23 + $0x160] ss:$24 sps:$4 sm:$0xff]   ;;  %v11559_v26 = vld [vmem:[%s16525_s23 + $0xa4] ss:$24 sps:$4 sm:$0xff]   ;;  %v11562_v28 = vld [vmem:[%s16525_s23 + $0xd4] ss:$24 sps:$4 sm:$0xff]  }
  0x27   :  { %9899 = vmatpush3.bf16.msra.mxu0 %v11478_v30  ;;  %v11561_v27 = vld [vmem:[%s16525_s23 + $0xa0] ss:$24 sps:$4 sm:$0xff]   ;;  %v11564_v29 = vld [vmem:[%s16525_s23 + $0xd0] ss:$24 sps:$4 sm:$0xff]   ;;  %v11565_v30 = vld [vmem:[%s16525_s23 + $0x104] ss:$24 sps:$4 sm:$0xff]  }
  0x28   :  { %9963 = vmatpush3.bf16.msra.mxu1 %v11479_v31  ;;  %10012 = vmatprep.subr.bf16.mxu0 %v11498_v41  ;;  %v11567_v31 = vld [vmem:[%s16525_s23 + $0x100] ss:$24 sps:$4 sm:$0xff]   ;;  %s12322_s23 = smov 88  }
  0x29   :  { %11252 = vmatprep.subr.bf16.mxu1 %v11498_v41 }
  0x2a   :  { %765 = vmatmul.mubr.bf16.vlgmr.msra.gmra.mrb[0].mxu0 %v11480_v32 }
  0x2b   :  { %862 = vmatmul.mubr.bf16.vlgmr.msra.gmra.mrb[0].mxu1 %v11483_v34  ;;  %772 = vmatprep.mubr.bf16.mxu0 %v11486_v36 }
  0x2c   :  { %869 = vmatprep.mubr.bf16.mxu1 %v11488_v37  ;;  %10013 = vmatpush3.bf16.msra.mxu0 %v11499_v42 }
  0x2d   :  { %11260 = vmatpush3.bf16.msra.mxu1 %v11499_v42  ;;  %10014 = vmatprep.subr.bf16.mxu0 %v11506_v44 }
  0x2e   :  { %11253 = vmatprep.subr.bf16.mxu1 %v11506_v44 }
  0x30   :  { %10015 = vmatpush3.bf16.msra.mxu0 %v11507_v45 }
  0x31   :  { %11261 = vmatpush3.bf16.msra.mxu1 %v11507_v45  ;;  %10016 = vmatprep.subr.bf16.mxu0 %v11514_v50 }
  0x32   :  { %773 = vmatmul.mubr.bf16.gmra.mrb[4].mxu0 %v11490_v38  ;;  %11254 = vmatprep.subr.bf16.mxu1 %v11514_v50 }
  0x33   :  { %870 = vmatmul.mubr.bf16.gmra.mrb[4].mxu1 %v11491_v39  ;;  %780 = vmatprep.mubr.bf16.mxu0 %v11492_v40 }
  0x34   :  { %877 = vmatprep.mubr.bf16.mxu1 %v11494_v43  ;;  %10017 = vmatpush3.bf16.msra.mxu0 %v11515_v51 }
  0x35   :  { %10018 = vmatprep.subr.bf16.mxu0 %v11522_v53  ;;  %11262 = vmatpush3.bf16.msra.mxu1 %v11515_v51 }
  0x36   :  { %11255 = vmatprep.subr.bf16.mxu1 %v11522_v53 }
  0x38   :  { %10019 = vmatpush3.bf16.msra.mxu0 %v11523_v54 }
  0x39   :  { %11263 = vmatpush3.bf16.msra.mxu1 %v11523_v54  ;;  %10020 = vmatprep.subr.bf16.mxu0 %v11530_v58 }
  0x3a   :  { %781 = vmatmul.mubr.bf16.gmra.mrb[8].mxu0 %v11496_v46  ;;  %11256 = vmatprep.subr.bf16.mxu1 %v11530_v58 }
  0x3b   :  { %878 = vmatmul.mubr.bf16.gmra.mrb[8].mxu1 %v11497_v47  ;;  %788 = vmatprep.mubr.bf16.mxu0 %v11500_v48 }
  0x3c   :  { %885 = vmatprep.mubr.bf16.mxu1 %v11502_v49  ;;  %10021 = vmatpush3.bf16.msra.mxu0 %v11531_v59 }
  0x3d   :  { %11264 = vmatpush3.bf16.msra.mxu1 %v11531_v59  ;;  %10022 = vmatprep.subr.bf16.mxu0 %v11532_v60 }
  0x3e   :  { %11257 = vmatprep.subr.bf16.mxu1 %v11532_v60 }
  0x40   :  { %10023 = vmatpush3.bf16.msra.mxu0 %v11533_v62 }
  0x41   :  { %11265 = vmatpush3.bf16.msra.mxu1 %v11533_v62  ;;  %10024 = vmatprep.subr.bf16.mxu0 %v11540_v2 }
  0x42   :  { %789 = vmatmul.mubr.bf16.gmra.mrb[12].mxu0 %v11504_v52  ;;  %11258 = vmatprep.subr.bf16.mxu1 %v11540_v2 }
  0x43   :  { %886 = vmatmul.mubr.bf16.gmra.mrb[12].mxu1 %v11505_v55  ;;  %796 = vmatprep.mubr.bf16.mxu0 %v11508_v56 }
  0x44   :  { %893 = vmatprep.mubr.bf16.mxu1 %v11510_v57  ;;  %10025 = vmatpush3.bf16.msra.mxu0 %v11541_v3 }
  0x45   :  { %11266 = vmatpush3.bf16.msra.mxu1 %v11541_v3  ;;  %10026 = vmatprep.subr.bf16.mxu0 %v11542_v4 }
  0x46   :  { %11259 = vmatprep.subr.bf16.mxu1 %v11542_v4 }
  0x48   :  { %10027 = vmatpush3.bf16.msra.mxu0 %v11543_v6 }
  0x49   :  { %11267 = vmatpush3.bf16.msra.mxu1 %v11543_v6 }
  0x4a   :  { %797 = vmatmul.mubr.bf16.gmra.mrb[16].mxu0 %v11512_v61 }
  0x4b   :  { %894 = vmatmul.mubr.bf16.gmra.mrb[16].mxu1 %v11513_v63  ;;  %804 = vmatprep.mubr.bf16.mxu0 %v11516_v0 }
  0x4c   :  { %901 = vmatprep.mubr.bf16.mxu1 %v11518_v1 }
  0x52   :  { %805 = vmatmul.mubr.bf16.gmra.mrb[20].mxu0 %v11520_v5 }
  0x53   :  { %902 = vmatmul.mubr.bf16.gmra.mrb[20].mxu1 %v11521_v7  ;;  %812 = vmatprep.mubr.bf16.mxu0 %v11524_v8 }
  0x54   :  { %909 = vmatprep.mubr.bf16.mxu1 %v11526_v9 }
  0x5a   :  { %813 = vmatmul.mubr.bf16.gmra.mrb[24].mxu0 %v11528_v10 }
  0x5b   :  { %910 = vmatmul.mubr.bf16.gmra.mrb[24].mxu1 %v11529_v11  ;;  %820 = vmatprep.mubr.bf16.mxu0 %v11534_v12 }
  0x5c   :  { %917 = vmatprep.mubr.bf16.mxu1 %v11536_v13 }
  0x62   :  { %821 = vmatmul.mubr.bf16.gmra.mrb[28].mxu0 %v11538_v14 }
  0x63   :  { %918 = vmatmul.mubr.bf16.gmra.mrb[28].mxu1 %v11539_v15  ;;  %958 = vmatprep.mubr.bf16.mxu0 %v11546_v16 }
  0x64   :  { %1006 = vmatprep.mubr.bf16.mxu1 %v11549_v17 }
  0x6a   :  { %959 = vmatmul.mubr.bf16.vlgmr.msra.gmra.mrb[32].mxu0 %v11544_v18 }
  0x6b   :  { %1007 = vmatmul.mubr.bf16.vlgmr.msra.gmra.mrb[32].mxu1 %v11547_v19  ;;  %966 = vmatprep.mubr.bf16.mxu0 %v11550_v20 }
  0x6c   :  { %1014 = vmatprep.mubr.bf16.mxu1 %v11552_v21 }
  0x72   :  { %967 = vmatmul.mubr.bf16.gmra.mrb[36].mxu0 %v11554_v22 }
  0x73   :  { %1015 = vmatmul.mubr.bf16.gmra.mrb[36].mxu1 %v11555_v23  ;;  %974 = vmatprep.mubr.bf16.mxu0 %v11556_v24 }
  0x7a   :  { %975 = vmatmul.mubr.bf16.gmra.mrb[40].mxu0 %v11558_v25 }
  0x7b   :  { %982 = vmatprep.mubr.bf16.mxu0 %v11559_v26 }
  0x82   :  { %983 = vmatmul.mubr.bf16.gmra.mrb[44].mxu0 %v11561_v27 }
  0x83   :  { %990 = vmatprep.mubr.bf16.mxu0 %v11562_v28 }
  0x8a   :  { %991 = vmatmul.mubr.bf16.gmra.mrb[48].mxu0 %v11564_v29 }
  0x8b   :  { %998 = vmatprep.mubr.bf16.mxu0 %v11565_v30 }
  0x92   :  { %999 = vmatmul.mubr.bf16.gmra.mrb[52].mxu0 %v11567_v31 }
  0xfd   :  { %v9900_v32 = vpop.f32.mrb[0].mxu0 }
  0xfe   :  { %v9964_v33 = vpop.f32.mrb[0].mxu1  ;;  %v9901_v34 = vpop.f32.mrb[1].mxu0 }
  0xff   :  { %v9902_v35 = vadd.f32 %v9901_v34, %v9900_v32  ;;  %v9965_v36 = vpop.f32.mrb[1].mxu1  ;;  %v9903_v37 = vpop.f32.mrb[2].mxu0 }
 0x100   :  { %v9966_v38 = vadd.f32 %v9965_v36, %v9964_v33  ;;  %v9967_v39 = vpop.f32.mrb[2].mxu1  ;;  %v9904_v40 = vpop.f32.mrb[3].mxu0 }
 0x101   :  { %v9905_v41 = vadd.f32 %v9904_v40, %v9903_v37  ;;  %v9968_v42 = vpop.f32.mrb[3].mxu1 }
 0x102   :  { %v12714_v43 = vadd.f32 %v9966_v38, %v9902_v35  ;;  %v9969_v44 = vadd.f32 %v9968_v42, %v9967_v39 }
 0x104   :  { %v12716_v45 = vadd.f32 %v9969_v44, %v9905_v41 }
 0x105   :  { %v9906_v46 = vpop.f32.mrb[4].mxu0 }
 0x106   :  { %v9970_v47 = vpop.f32.mrb[4].mxu1  ;;  %v9907_v48 = vpop.f32.mrb[5].mxu0 }
 0x107   :  { %v9908_v49 = vadd.f32 %v9907_v48, %v9906_v46  ;;  %v9971_v50 = vpop.f32.mrb[5].mxu1  ;;  %v9909_v51 = vpop.f32.mrb[6].mxu0 }
 0x108   :  { %v9972_v52 = vadd.f32 %v9971_v50, %v9970_v47  ;;  %v9973_v53 = vpop.f32.mrb[6].mxu1  ;;  %v9910_v54 = vpop.f32.mrb[7].mxu0 }
 0x109   :  { %v9911_v55 = vadd.f32 %v9910_v54, %v9909_v51  ;;  %v9974_v56 = vpop.f32.mrb[7].mxu1 }
 0x10a   :  { %v12718_v57 = vadd.f32 %v9972_v52, %v9908_v49  ;;  %v9975_v58 = vadd.f32 %v9974_v56, %v9973_v53 }
 0x10c   :  { %v12720_v59 = vadd.f32 %v9975_v58, %v9911_v55 }
 0x10d   :  { %v9912_v60 = vpop.f32.mrb[8].mxu0 }
 0x10e   :  { %v9976_v61 = vpop.f32.mrb[8].mxu1  ;;  %v9913_v62 = vpop.f32.mrb[9].mxu0 }
 0x10f   :  { %v9914_v63 = vadd.f32 %v9913_v62, %v9912_v60  ;;  %v9977_v0 = vpop.f32.mrb[9].mxu1  ;;  %v9915_v1 = vpop.f32.mrb[10].mxu0 }
 0x110   :  { %v9978_v2 = vadd.f32 %v9977_v0, %v9976_v61  ;;  %v9979_v3 = vpop.f32.mrb[10].mxu1  ;;  %v9916_v4 = vpop.f32.mrb[11].mxu0 }
 0x111   :  { %v9917_v5 = vadd.f32 %v9916_v4, %v9915_v1  ;;  %v9980_v6 = vpop.f32.mrb[11].mxu1 }
 0x112   :  { %v12722_v7 = vadd.f32 %v9978_v2, %v9914_v63  ;;  %v9981_v8 = vadd.f32 %v9980_v6, %v9979_v3 }
 0x114   :  { %v12724_v9 = vadd.f32 %v9981_v8, %v9917_v5 }
 0x115   :  { %v9918_v10 = vpop.f32.mrb[12].mxu0 }
 0x116   :  { %v9982_v11 = vpop.f32.mrb[12].mxu1  ;;  %v9919_v12 = vpop.f32.mrb[13].mxu0 }
 0x117   :  { %v9920_v13 = vadd.f32 %v9919_v12, %v9918_v10  ;;  %v9983_v14 = vpop.f32.mrb[13].mxu1  ;;  %v9921_v15 = vpop.f32.mrb[14].mxu0 }
 0x118   :  { %v9984_v16 = vadd.f32 %v9983_v14, %v9982_v11  ;;  %v9985_v17 = vpop.f32.mrb[14].mxu1  ;;  %v9922_v18 = vpop.f32.mrb[15].mxu0 }
 0x119   :  { %v9923_v19 = vadd.f32 %v9922_v18, %v9921_v15  ;;  %v9986_v20 = vpop.f32.mrb[15].mxu1 }
 0x11a   :  { %v12726_v21 = vadd.f32 %v9984_v16, %v9920_v13  ;;  %v9987_v22 = vadd.f32 %v9986_v20, %v9985_v17 }
 0x11c   :  { %v12728_v23 = vadd.f32 %v9987_v22, %v9923_v19 }
 0x11d   :  { %v9924_v24 = vpop.f32.mrb[16].mxu0 }
 0x11e   :  { %v9988_v25 = vpop.f32.mrb[16].mxu1  ;;  %v9925_v26 = vpop.f32.mrb[17].mxu0 }
 0x11f   :  { %v9926_v27 = vadd.f32 %v9925_v26, %v9924_v24  ;;  %v9989_v28 = vpop.f32.mrb[17].mxu1  ;;  %v9927_v29 = vpop.f32.mrb[18].mxu0 }
 0x120   :  { %v9990_v30 = vadd.f32 %v9989_v28, %v9988_v25  ;;  %v9991_v31 = vpop.f32.mrb[18].mxu1  ;;  %v9928_v32 = vpop.f32.mrb[19].mxu0 }
 0x121   :  { %v9929_v33 = vadd.f32 %v9928_v32, %v9927_v29  ;;  %v9992_v34 = vpop.f32.mrb[19].mxu1 }
 0x122   :  { %v12730_v35 = vadd.f32 %v9990_v30, %v9926_v27  ;;  %v9993_v36 = vadd.f32 %v9992_v34, %v9991_v31  ;;  %v12741_v30 = vld [vmem:[%s16526_s1] ss:$0 sm:$0xff]  ;;  %s12324_s1 = smov 56  }
 0x124   :  { %v12732_v37 = vadd.f32 %v9993_v36, %v9929_v33 }
 0x125   :  { %v9930_v38 = vpop.f32.mrb[20].mxu0 }
 0x126   :  { %v9994_v39 = vpop.f32.mrb[20].mxu1  ;;  %v9931_v40 = vpop.f32.mrb[21].mxu0 }
 0x127   :  { %v9932_v41 = vadd.f32 %v9931_v40, %v9930_v38  ;;  %v9995_v42 = vpop.f32.mrb[21].mxu1  ;;  %v9933_v44 = vpop.f32.mrb[22].mxu0 }
 0x128   :  { %v9996_v46 = vadd.f32 %v9995_v42, %v9994_v39  ;;  %v9997_v47 = vpop.f32.mrb[22].mxu1  ;;  %v9934_v48 = vpop.f32.mrb[23].mxu0 }
 0x129   :  { %v9935_v49 = vadd.f32 %v9934_v48, %v9933_v44  ;;  %v9998_v50 = vpop.f32.mrb[23].mxu1 }
 0x12a   :  { %v12734_v51 = vadd.f32 %v9996_v46, %v9932_v41  ;;  %v9999_v52 = vadd.f32 %v9998_v50, %v9997_v47  ;;  %v12749_v41 = vld [vmem:[%s16463_s3] sm:$0xff] }
 0x12c   :  { %v12736_v53 = vadd.f32 %v9999_v52, %v9935_v49 }
 0x12d   :  { %v9936_v54 = vpop.f32.mrb[24].mxu0 }
 0x12e   :  { %v10000_v55 = vpop.f32.mrb[24].mxu1  ;;  %v9937_v56 = vpop.f32.mrb[25].mxu0 }
 0x12f   :  { %v9938_v58 = vadd.f32 %v9937_v56, %v9936_v54  ;;  %v10001_v60 = vpop.f32.mrb[25].mxu1  ;;  %v9939_v61 = vpop.f32.mrb[26].mxu0 }
 0x130   :  { %v10002_v62 = vadd.f32 %v10001_v60, %v10000_v55  ;;  %v10003_v63 = vpop.f32.mrb[26].mxu1  ;;  %v9940_v0 = vpop.f32.mrb[27].mxu0 }
 0x131   :  { %v9941_v1 = vadd.f32 %v9940_v0, %v9939_v61  ;;  %v10004_v2 = vpop.f32.mrb[27].mxu1 }
 0x132   :  { %v912_v3 = vadd.f32 %v10002_v62, %v9938_v58  ;;  %v10005_v4 = vadd.f32 %v10004_v2, %v10003_v63 }
 0x134   :  { %v915_v5 = vadd.f32 %v10005_v4, %v9941_v1  ;;  %v12775_v4 = vld [vmem:[%s16463_s3 + $0x10] sm:$0xff] }
 0x135   :  { %v9942_v6 = vpop.f32.mrb[28].mxu0 }
 0x136   :  { %v10006_v8 = vpop.f32.mrb[28].mxu1  ;;  %v9943_v10 = vpop.f32.mrb[29].mxu0 }
 0x137   :  { %v9944_v11 = vadd.f32 %v9943_v10, %v9942_v6  ;;  %v10007_v12 = vpop.f32.mrb[29].mxu1  ;;  %v9945_v13 = vpop.f32.mrb[30].mxu0 }
 0x138   :  { %v10008_v14 = vadd.f32 %v10007_v12, %v10006_v8  ;;  %v10009_v15 = vpop.f32.mrb[30].mxu1  ;;  %v9946_v16 = vpop.f32.mrb[31].mxu0 }
 0x139   :  { %v9947_v17 = vadd.f32 %v9946_v16, %v9945_v13  ;;  %v10010_v18 = vpop.f32.mrb[31].mxu1 }
 0x13a   :  { %v920_v19 = vadd.f32 %v10008_v14, %v9944_v11  ;;  %v10011_v20 = vadd.f32 %v10010_v18, %v10009_v15 }
 0x13c   :  { %v923_v22 = vadd.f32 %v10011_v20, %v9947_v17 }
 0x13d   :  { %v10028_v24 = vpop.f32.mrb[32].mxu0 }
 0x13e   :  { %v10064_v25 = vpop.f32.mrb[32].mxu1  ;;  %v10029_v26 = vpop.f32.mrb[33].mxu0 }
 0x13f   :  { %v10030_v27 = vadd.f32 %v10029_v26, %v10028_v24  ;;  %v10065_v28 = vpop.f32.mrb[33].mxu1  ;;  %v10031_v29 = vpop.f32.mrb[34].mxu0  ;;  %v1050_v26 = vld [vmem:[%s16463_s3 + $0x20] sm:$0xff] }
 0x140   :  { %v10066_v31 = vadd.f32 %v10065_v28, %v10064_v25  ;;  %v10067_v32 = vpop.f32.mrb[34].mxu1  ;;  %v10032_v33 = vpop.f32.mrb[35].mxu0 }
 0x141   :  { %v961_v34 = vadd.f32 %v10030_v27, %v12714_v43  ;;  %v10033_v36 = vadd.f32 %v10032_v33, %v10031_v29  ;;  %v10068_v38 = vpop.f32.mrb[35].mxu1  ;;  %v12758_v43 = vld [vmem:[%s16463_s3 + $0x8] sm:$0xff] }
 0x142   :  { %v12744_v39 = vadd.f32 %v10066_v31, %v912_v3  ;;  %v10069_v40 = vadd.f32 %v10068_v38, %v10067_v32 }
 0x143   :  { %v1030_v42 = vadd.f32 %v12741_v30, %v961_v34  ;;  %v964_v44 = vadd.f32 %v10033_v36, %v12716_v45 }
 0x144   :  { %v12753_v46 = vadd.f32 %v10069_v40, %v915_v5 }
 0x145   :  { %v1031_v47 = vadd.f32 %v12741_v30, %v964_v44  ;;  %v10034_v48 = vpop.f32.mrb[36].mxu0  ;;  %v12762_v49 = vadd.f32 %v12749_v41, %v1030_v42 }
 0x146   :  { %v10070_v50 = vpop.f32.mrb[36].mxu1  ;;  %v10035_v52 = vpop.f32.mrb[37].mxu0 }
 0x147   :  { %16527 = vst [vmem:[#allocation2_spill] sm:$0xff] %v12762_v49  ;;  %v10036_v54 = vadd.f32 %v10035_v52, %v10034_v48  ;;  %v10071_v55 = vpop.f32.mrb[37].mxu1  ;;  %v10037_v56 = vpop.f32.mrb[38].mxu0  ;;  %v1073_v45 = vsel %vm1072_vm0, %v12762_v49, 0.0  ;;  %v12767_v58 = vadd.f32 %v12758_v43, %v1031_v47  ;;  %v1052_v48 = vld [vmem:[%s16463_s3 + $0x30] sm:$0xff] }
 0x148   :  { %v10072_v60 = vadd.f32 %v10071_v55, %v10070_v50  ;;  %v10073_v61 = vpop.f32.mrb[38].mxu1  ;;  %v10038_v62 = vpop.f32.mrb[39].mxu0  ;;  %1074 = vadd.xlane.f32.xlu0 %v1073_v45 }
 0x149   :  { %16528 = vst [vmem:[#allocation3_spill] sm:$0xff] %v12767_v58  ;;  %v969_v63 = vadd.f32 %v10036_v54, %v12718_v57  ;;  %v10039_v0 = vadd.f32 %v10038_v62, %v10037_v56  ;;  %v10074_v1 = vpop.f32.mrb[39].mxu1  ;;  %v1076_v8 = vsel %vm1072_vm0, %v12767_v58, 0.0  ;;  %v12786_v57 = vld [vmem:[%s16463_s3 + $0x18] sm:$0xff] }
 0x14a   :  { %v12770_v2 = vadd.f32 %v10072_v60, %v920_v19  ;;  %v10075_v3 = vadd.f32 %v10074_v1, %v10073_v61 }
 0x14b   :  { %v1032_v5 = vadd.f32 %v12741_v30, %v969_v63  ;;  %v972_v6 = vadd.f32 %v10039_v0, %v12720_v59 }
 0x14c   :  { %v12781_v10 = vadd.f32 %v10075_v3, %v923_v22  ;;  %1077 = vadd.xlane.f32.xlu0 %v1076_v8 }
 0x14d   :  { %v1033_v11 = vadd.f32 %v12741_v30, %v972_v6  ;;  %v10040_v12 = vpop.f32.mrb[40].mxu0  ;;  %v12790_v13 = vadd.f32 %v12775_v4, %v1032_v5 }
 0x14e   :  { %v10041_v14 = vpop.f32.mrb[41].mxu0 }
 0x14f   :  { %16529 = vst [vmem:[#allocation4_spill] sm:$0xff] %v12790_v13  ;;  %v10042_v15 = vadd.f32 %v10041_v14, %v10040_v12  ;;  %v10043_v59 = vpop.f32.mrb[42].mxu0  ;;  %v1079_v16 = vsel %vm1072_vm0, %v12790_v13, 0.0  ;;  %v12795_v17 = vadd.f32 %v12786_v57, %v1033_v11 }
 0x150   :  { %v10044_v18 = vpop.f32.mrb[43].mxu0  ;;  %1080 = vadd.xlane.f32.xlu1 %v1079_v16 }
 0x151   :  { %16530 = vst [vmem:[#allocation5_spill] sm:$0xff] %v12795_v17  ;;  %v977_v19 = vadd.f32 %v10042_v15, %v12722_v7  ;;  %v10045_v20 = vadd.f32 %v10044_v18, %v10043_v59  ;;  %v1082_v25 = vsel %vm1072_vm0, %v12795_v17, 0.0  ;;  %v1051_v7 = vld [vmem:[%s16463_s3 + $0x28] sm:$0xff] }
 0x153   :  { %v1034_v22 = vadd.f32 %v12741_v30, %v977_v19  ;;  %v980_v24 = vadd.f32 %v10045_v20, %v12724_v9 }
 0x154   :  { %1083 = vadd.xlane.f32.xlu1 %v1082_v25 }
 0x155   :  { %v1035_v27 = vadd.f32 %v12741_v30, %v980_v24  ;;  %v10046_v28 = vpop.f32.mrb[44].mxu0  ;;  %v12806_v29 = vadd.f32 %v1050_v26, %v1034_v22 }
 0x156   :  { %v10047_v31 = vpop.f32.mrb[45].mxu0 }
 0x157   :  { %16531 = vst [vmem:[#allocation6_spill] sm:$0xff] %v12806_v29  ;;  %v10048_v32 = vadd.f32 %v10047_v31, %v10046_v28  ;;  %v10049_v9 = vpop.f32.mrb[46].mxu0  ;;  %v1085_v33 = vsel %vm1072_vm0, %v12806_v29, 0.0  ;;  %v12813_v34 = vadd.f32 %v1051_v7, %v1035_v27 }
 0x158   :  { %v10050_v36 = vpop.f32.mrb[47].mxu0  ;;  %1086 = vadd.xlane.f32.xlu0 %v1085_v33 }
 0x159   :  { %16532 = vst [vmem:[#allocation7_spill] sm:$0xff] %v12813_v34  ;;  %v985_v38 = vadd.f32 %v10048_v32, %v12726_v21  ;;  %v10051_v40 = vadd.f32 %v10050_v36, %v10049_v9  ;;  %v1088_v42 = vsel %vm1072_vm0, %v12813_v34, 0.0  ;;  %v1053_v21 = vld [vmem:[%s16463_s3 + $0x38] sm:$0xff]  ;;  %s12326_s3 = smov 112  }
 0x15a   :  { %1089 = vadd.xlane.f32.xlu1 %v1088_v42 }
 0x15b   :  { %v1036_v44 = vadd.f32 %v12741_v30, %v985_v38  ;;  %v988_v47 = vadd.f32 %v10051_v40, %v12728_v23 }
 0x15d   :  { %v1037_v50 = vadd.f32 %v12741_v30, %v988_v47  ;;  %v10052_v52 = vpop.f32.mrb[48].mxu0  ;;  %v12824_v54 = vadd.f32 %v1052_v48, %v1036_v44 }
 0x15e   :  { %v10053_v55 = vpop.f32.mrb[49].mxu0 }
 0x15f   :  { %16533 = vst [vmem:[#allocation8_spill] sm:$0xff] %v12824_v54  ;;  %v10054_v56 = vadd.f32 %v10053_v55, %v10052_v52  ;;  %v10055_v45 = vpop.f32.mrb[50].mxu0  ;;  %v1091_v60 = vsel %vm1072_vm0, %v12824_v54, 0.0  ;;  %v12831_v23 = vadd.f32 %v1053_v21, %v1037_v50 }
 0x160   :  { %v10056_v61 = vpop.f32.mrb[51].mxu0  ;;  %1092 = vadd.xlane.f32.xlu0 %v1091_v60 }
 0x161   :  { %16534 = vst [vmem:[#allocation9_spill] sm:$0xff] %v12831_v23  ;;  %v993_v62 = vadd.f32 %v10054_v56, %v12730_v35  ;;  %v10057_v63 = vadd.f32 %v10056_v61, %v10055_v45  ;;  %v1094_v0 = vsel %vm1072_vm0, %v12831_v23, 0.0 }
 0x162   :  { %1095 = vadd.xlane.f32.xlu1 %v1094_v0 }
 0x163   :  { %v1038_v1 = vadd.f32 %v12741_v30, %v993_v62  ;;  %v996_v3 = vadd.f32 %v10057_v63, %v12732_v37 }
 0x165   :  { %v1039_v5 = vadd.f32 %v12741_v30, %v996_v3  ;;  %v10058_v6 = vpop.f32.mrb[52].mxu0  ;;  %v12840_v8 = vadd.f32 %v12749_v41, %v1038_v1  ;;  %v1042_v41 = vadd.f32 %v12741_v30, %v12744_v39 }
 0x166   :  { %v10059_v11 = vpop.f32.mrb[53].mxu0 }
 0x167   :  { %16535 = vst [vmem:[#allocation10_spill] sm:$0xff] %v12840_v8  ;;  %v10060_v12 = vadd.f32 %v10059_v11, %v10058_v6  ;;  %v10061_v14 = vpop.f32.mrb[54].mxu0  ;;  %v1097_v35 = vsel %vm1072_vm0, %v12840_v8, 0.0  ;;  %v12845_v15 = vadd.f32 %v12758_v43, %v1039_v5  ;;  %v1043_v43 = vadd.f32 %v12741_v30, %v12753_v46 }
 0x168   :  { %v10062_v59 = vpop.f32.mrb[55].mxu0  ;;  %1098 = vadd.xlane.f32.xlu0 %v1097_v35  ;;  %v12867_v27 = vadd.f32 %v1050_v26, %v1042_v41 }
 0x169   :  { %16536 = vst [vmem:[#allocation11_spill] sm:$0xff] %v12845_v15  ;;  %v1001_v16 = vadd.f32 %v10060_v12, %v12734_v51  ;;  %v10063_v37 = vadd.f32 %v10062_v59, %v10061_v14  ;;  %v1100_v18 = vsel %vm1072_vm0, %v12845_v15, 0.0  ;;  %v1044_v51 = vadd.f32 %v12741_v30, %v12770_v2 }
 0x16a   :  { %1101 = vadd.xlane.f32.xlu1 %v1100_v18  ;;  %16539 = vst [vmem:[#allocation14_spill] sm:$0xff] %v12867_v27  ;;  %v1109_v2 = vsel %vm1072_vm0, %v12867_v27, 0.0 }
 0x16b   :  { %v1040_v19 = vadd.f32 %v12741_v30, %v1001_v16  ;;  %v1004_v20 = vadd.f32 %v10063_v37, %v12736_v53  ;;  %v1045_v53 = vadd.f32 %v12741_v30, %v12781_v10  ;;  %v12877_v28 = vadd.f32 %v1052_v48, %v1044_v51 }
 0x16d   :  { %v1041_v22 = vadd.f32 %v12741_v30, %v1004_v20  ;;  %v12858_v24 = vadd.f32 %v12775_v4, %v1040_v19  ;;  %v12873_v4 = vadd.f32 %v1051_v7, %v1043_v43  ;;  %16541 = vst [vmem:[#allocation16_spill] sm:$0xff] %v12877_v28  ;;  %v12881_v26 = vadd.f32 %v1053_v21, %v1045_v53 }
 0x16e   :  { %v1115_v30 = vsel %vm1072_vm0, %v12877_v28, 0.0 }
 0x16f   :  { %16537 = vst [vmem:[#allocation12_spill] sm:$0xff] %v12858_v24  ;;  %v1103_v25 = vsel %vm1072_vm0, %v12858_v24, 0.0  ;;  %v12865_v39 = vadd.f32 %v12786_v57, %v1041_v22  ;;  %16540 = vst [vmem:[#allocation15_spill] sm:$0xff] %v12873_v4  ;;  %v1112_v57 = vsel %vm1072_vm0, %v12873_v4, 0.0  ;;  %v1118_v10 = vsel %vm1072_vm0, %v12881_v26, 0.0 }
 0x170   :  { %1104 = vadd.xlane.f32.xlu0 %v1103_v25  ;;  %16542 = vst [vmem:[#allocation17_spill] sm:$0xff] %v12881_v26 }
 0x171   :  { %16538 = vst [vmem:[#allocation13_spill] sm:$0xff] %v12865_v39  ;;  %v1106_v46 = vsel %vm1072_vm0, %v12865_v39, 0.0 }
 0x172   :  { %1107 = vadd.xlane.f32.xlu1 %v1106_v46 }
 0x174   :  { %1110 = vadd.xlane.f32.xlu0 %v1109_v2 }
 0x176   :  { %1113 = vadd.xlane.f32.xlu1 %v1112_v57 }
 0x178   :  { %1116 = vadd.xlane.f32.xlu0 %v1115_v30 }
 0x17a   :  { %1119 = vadd.xlane.f32.xlu1 %v1118_v10 }
 0x1d5   :  { %v1075_v31 = vpop.xlane.xlu0 %1074 }
 0x1d6   :  { %v1122_v7 = vmul.f32 0.03125, %v1075_v31 }
 0x1d8   :  { %v12888_v32 = vsub.f32 %v12762_v49, %v1122_v7 }
 0x1d9   :  { %v1078_v9 = vpop.xlane.xlu0 %1077 }
 0x1da   :  { %v1123_v33 = vmul.f32 0.03125, %v1078_v9  ;;  %v1154_v36 = vmul.f32 %v12888_v32, %v12888_v32 }
 0x1dc   :  { %v12893_v38 = vsub.f32 %v12767_v58, %v1123_v33  ;;  %v1170_v40 = vsel %vm1072_vm0, %v1154_v36, 0.0 }
 0x1dd   :  { %v1081_v42 = vpop.xlane.xlu1 %1080  ;;  %1171 = vadd.xlane.f32.xlu0 %v1170_v40 }
 0x1de   :  { %v1124_v44 = vmul.f32 0.03125, %v1081_v42  ;;  %v1155_v47 = vmul.f32 %v12893_v38, %v12893_v38 }
 0x1e0   :  { %v12899_v48 = vsub.f32 %v12790_v13, %v1124_v44  ;;  %v1173_v50 = vsel %vm1072_vm0, %v1155_v47, 0.0 }
 0x1e1   :  { %v1084_v52 = vpop.xlane.xlu1 %1083  ;;  %1174 = vadd.xlane.f32.xlu1 %v1173_v50 }
 0x1e2   :  { %v1125_v55 = vmul.f32 0.03125, %v1084_v52  ;;  %v1156_v21 = vmul.f32 %v12899_v48, %v12899_v48 }
 0x1e4   :  { %v12905_v56 = vsub.f32 %v12795_v17, %v1125_v55  ;;  %v1176_v45 = vsel %vm1072_vm0, %v1156_v21, 0.0 }
 0x1e5   :  { %1177 = vadd.xlane.f32.xlu0 %v1176_v45  ;;  %v1087_v60 = vpop.xlane.xlu0 %1086 }
 0x1e6   :  { %v1126_v61 = vmul.f32 0.03125, %v1087_v60  ;;  %v1157_v62 = vmul.f32 %v12905_v56, %v12905_v56 }
 0x1e7   :  { %v1090_v63 = vpop.xlane.xlu1 %1089 }
 0x1e8   :  { %v12911_v0 = vsub.f32 %v12806_v29, %v1126_v61  ;;  %v1127_v1 = vmul.f32 0.03125, %v1090_v63  ;;  %v1179_v3 = vsel %vm1072_vm0, %v1157_v62, 0.0  ;;  %v11568_v63 = vld [vmem:[%s16464_s6] sm:$0xff]  }
 0x1e9   :  { %1180 = vadd.xlane.f32.xlu1 %v1179_v3  ;;  %10468 = vmatprep.subr.bf16.mxu1 %v11568_v63 }
 0x1ea   :  { %v12915_v5 = vsub.f32 %v12813_v34, %v1127_v1  ;;  %v1158_v6 = vmul.f32 %v12911_v0, %v12911_v0  ;;  %10469 = vmatpush3.bf16.msra.mxu1 %v11568_v63 }
 0x1ec   :  { %v1182_v11 = vsel %vm1072_vm0, %v1158_v6, 0.0  ;;  %v1159_v12 = vmul.f32 %v12915_v5, %v12915_v5 }
 0x1ed   :  { %1183 = vadd.xlane.f32.xlu0 %v1182_v11  ;;  %v1093_v14 = vpop.xlane.xlu0 %1092 }
 0x1ee   :  { %v1128_v35 = vmul.f32 0.03125, %v1093_v14  ;;  %v1185_v59 = vsel %vm1072_vm0, %v1159_v12, 0.0 }
 0x1ef   :  { %v1096_v16 = vpop.xlane.xlu1 %1095  ;;  %1186 = vadd.xlane.f32.xlu1 %v1185_v59 }
 0x1f0   :  { %v12924_v37 = vsub.f32 %v12824_v54, %v1128_v35  ;;  %v1129_v18 = vmul.f32 0.03125, %v1096_v16 }
 0x1f2   :  { %v12927_v41 = vsub.f32 %v12831_v23, %v1129_v18  ;;  %v1160_v19 = vmul.f32 %v12924_v37, %v12924_v37  ;;  %v11569_v18 = vld [vmem:[%s16464_s6 + $0x8] sm:$0xff]  }
 0x1f3   :  { %10470 = vmatprep.subr.bf16.mxu1 %v11569_v18 }
 0x1f4   :  { %v1188_v20 = vsel %vm1072_vm0, %v1160_v19, 0.0  ;;  %v1161_v43 = vmul.f32 %v12927_v41, %v12927_v41  ;;  %10471 = vmatpush3.bf16.msra.mxu1 %v11569_v18 }
 0x1f5   :  { %1189 = vadd.xlane.f32.xlu0 %v1188_v20  ;;  %v1099_v22 = vpop.xlane.xlu0 %1098 }
 0x1f6   :  { %v1130_v51 = vmul.f32 0.03125, %v1099_v22  ;;  %v1191_v25 = vsel %vm1072_vm0, %v1161_v43, 0.0 }
 0x1f7   :  { %v1102_v53 = vpop.xlane.xlu1 %1101  ;;  %1192 = vadd.xlane.f32.xlu1 %v1191_v25 }
 0x1f8   :  { %v12936_v46 = vsub.f32 %v12840_v8, %v1130_v51  ;;  %v1131_v2 = vmul.f32 0.03125, %v1102_v53 }
 0x1fa   :  { %v12939_v57 = vsub.f32 %v12845_v15, %v1131_v2  ;;  %v1162_v30 = vmul.f32 %v12936_v46, %v12936_v46 }
 0x1fc   :  { %v1194_v10 = vsel %vm1072_vm0, %v1162_v30, 0.0  ;;  %v1163_v31 = vmul.f32 %v12939_v57, %v12939_v57 }
 0x1fd   :  { %1195 = vadd.xlane.f32.xlu0 %v1194_v10  ;;  %v1105_v7 = vpop.xlane.xlu0 %1104 }
 0x1fe   :  { %v1132_v9 = vmul.f32 0.03125, %v1105_v7  ;;  %v1197_v33 = vsel %vm1072_vm0, %v1163_v31, 0.0 }
 0x1ff   :  { %v1108_v36 = vpop.xlane.xlu1 %1107  ;;  %1198 = vadd.xlane.f32.xlu1 %v1197_v33 }
 0x200   :  { %v12948_v40 = vsub.f32 %v12858_v24, %v1132_v9  ;;  %v1133_v42 = vmul.f32 0.03125, %v1108_v36 }
 0x201   :  { %v1111_v44 = vpop.xlane.xlu0 %1110 }
 0x202   :  { %v12951_v47 = vsub.f32 %v12865_v39, %v1133_v42  ;;  %v1134_v50 = vmul.f32 0.03125, %v1111_v44  ;;  %v1164_v52 = vmul.f32 %v12948_v40, %v12948_v40 }
 0x203   :  { %v1114_v55 = vpop.xlane.xlu1 %1113 }
 0x204   :  { %v12956_v21 = vsub.f32 %v12867_v27, %v1134_v50  ;;  %v1135_v45 = vmul.f32 0.03125, %v1114_v55  ;;  %v1200_v60 = vsel %vm1072_vm0, %v1164_v52, 0.0  ;;  %v1165_v61 = vmul.f32 %v12951_v47, %v12951_v47 }
 0x205   :  { %1201 = vadd.xlane.f32.xlu0 %v1200_v60  ;;  %v1117_v62 = vpop.xlane.xlu0 %1116  ;;  %v12993_v60 = vld [vmem:[%s16465_s4] ss:$0 sm:$0xff] }
 0x206   :  { %v12965_v1 = vsub.f32 %v12873_v4, %v1135_v45  ;;  %v1136_v3 = vmul.f32 0.03125, %v1117_v62  ;;  %v1203_v6 = vsel %vm1072_vm0, %v1165_v61, 0.0  ;;  %v1166_v11 = vmul.f32 %v12956_v21, %v12956_v21 }
 0x207   :  { %v1120_v12 = vpop.xlane.xlu1 %1119  ;;  %1204 = vadd.xlane.f32.xlu1 %v1203_v6 }
 0x208   :  { %v12971_v14 = vsub.f32 %v12877_v28, %v1136_v3  ;;  %v1137_v35 = vmul.f32 0.03125, %v1120_v12  ;;  %v1206_v59 = vsel %vm1072_vm0, %v1166_v11, 0.0  ;;  %v1167_v16 = vmul.f32 %v12965_v1, %v12965_v1 }
 0x209   :  { %1207 = vadd.xlane.f32.xlu0 %v1206_v59 }
 0x20a   :  { %v12980_v19 = vsub.f32 %v12881_v26, %v1137_v35  ;;  %v1209_v20 = vsel %vm1072_vm0, %v1167_v16, 0.0  ;;  %v1168_v43 = vmul.f32 %v12971_v14, %v12971_v14  ;;  %v13000_v35 = vld [vmem:[%s16466_s5] ss:$0 sm:$0xff] }
 0x20b   :  { %1210 = vadd.xlane.f32.xlu1 %v1209_v20 }
 0x20c   :  { %v1212_v22 = vsel %vm1072_vm0, %v1168_v43, 0.0  ;;  %v1169_v51 = vmul.f32 %v12980_v19, %v12980_v19 }
 0x20d   :  { %1213 = vadd.xlane.f32.xlu0 %v1212_v22 }
 0x20e   :  { %v1215_v25 = vsel %vm1072_vm0, %v1169_v51, 0.0 }
 0x20f   :  { %1216 = vadd.xlane.f32.xlu1 %v1215_v25 }
 0x26a   :  { %v1172_v53 = vpop.xlane.xlu0 %1171 }
 0x26b   :  { %v1218_v2 = vmul.f32 0.03125, %v1172_v53 }
 0x26d   :  { %v1234_v30 = vadd.f32 1e-06, %v1218_v2 }
 0x26e   :  { %v1175_v10 = vpop.xlane.xlu1 %1174 }
 0x26f   :  { %11584 = vrsqrt.f32 %v1234_v30  ;;  %v1219_v31 = vmul.f32 0.03125, %v1175_v10 }
 0x271   :  { %v1235_v7 = vadd.f32 1e-06, %v1219_v31 }
 0x272   :  { %v1178_v9 = vpop.xlane.xlu0 %1177 }
 0x273   :  { %11586 = vrsqrt.f32 %v1235_v7  ;;  %v1220_v33 = vmul.f32 0.03125, %v1178_v9 }
 0x275   :  { %v1236_v36 = vadd.f32 1e-06, %v1220_v33 }
 0x276   :  { %v1181_v42 = vpop.xlane.xlu1 %1180 }
 0x277   :  { %11588 = vrsqrt.f32 %v1236_v36  ;;  %v1221_v44 = vmul.f32 0.03125, %v1181_v42 }
 0x279   :  { %v11585_v50 = vpop.eup %11584  ;;  %v1237_v52 = vadd.f32 1e-06, %v1221_v44 }
 0x27a   :  { %v1184_v55 = vpop.xlane.xlu0 %1183  ;;  %v1266_v45 = vmul.f32 %v11585_v50, %v12888_v32 }
 0x27b   :  { %11590 = vrsqrt.f32 %v1237_v52  ;;  %v1222_v61 = vmul.f32 0.03125, %v1184_v55 }
 0x27c   :  { %v1187_v62 = vpop.xlane.xlu1 %1186  ;;  %v1288_v12 = vmul.f32 %v12993_v60, %v1266_v45 }
 0x27d   :  { %v11587_v63 = vpop.eup %11586  ;;  %v1238_v3 = vadd.f32 1e-06, %v1222_v61  ;;  %v1223_v6 = vmul.f32 0.03125, %v1187_v62 }
 0x27e   :  { %v1267_v11 = vmul.f32 %v11587_v63, %v12893_v38  ;;  %v1310_v43 = vadd.f32 %v13000_v35, %v1288_v12 }
 0x27f   :  { %11592 = vrsqrt.f32 %v1238_v3  ;;  %v1239_v32 = vadd.f32 1e-06, %v1223_v6 }
 0x280   :  { %v1289_v59 = vmul.f32 %v12993_v60, %v1267_v11 }
 0x281   :  { %v11589_v16 = vpop.eup %11588  ;;  %11594 = vrsqrt.f32 %v1239_v32 }
 0x282   :  { %v1268_v18 = vmul.f32 %v11589_v16, %v12899_v48  ;;  %v1190_v20 = vpop.xlane.xlu0 %1189  ;;  %v1311_v38 = vadd.f32 %v13000_v35, %v1289_v59 }
 0x283   :  { %v1224_v22 = vmul.f32 0.03125, %v1190_v20 }
 0x284   :  { %v1193_v51 = vpop.xlane.xlu1 %1192  ;;  %v1326_v25 = vpack.c.bf16 %v1311_v38, %v1310_v43  ;;  %v1290_v10 = vmul.f32 %v12993_v60, %v1268_v18 }
 0x285   :  { %v11591_v53 = vpop.eup %11590  ;;  %v1240_v2 = vadd.f32 1e-06, %v1224_v22  ;;  %v1225_v30 = vmul.f32 0.03125, %v1193_v51 }
 0x286   :  { %v1269_v31 = vmul.f32 %v11591_v53, %v12905_v56  ;;  %10472 = vmatprep.mubr.msk.bf16.mxu1 %vm1072_vm0, %v1326_v25  ;;  %v1312_v33 = vadd.f32 %v13000_v35, %v1290_v10 }
 0x287   :  { %11596 = vrsqrt.f32 %v1240_v2  ;;  %v1241_v7 = vadd.f32 1e-06, %v1225_v30 }
 0x288   :  { %v1291_v48 = vmul.f32 %v12993_v60, %v1269_v31 }
 0x289   :  { %v11593_v9 = vpop.eup %11592  ;;  %11598 = vrsqrt.f32 %v1241_v7 }
 0x28a   :  { %v1313_v36 = vadd.f32 %v13000_v35, %v1291_v48  ;;  %v1196_v42 = vpop.xlane.xlu0 %1195  ;;  %v1270_v44 = vmul.f32 %v11593_v9, %v12911_v0 }
 0x28b   :  { %v11595_v50 = vpop.eup %11594  ;;  %v1226_v52 = vmul.f32 0.03125, %v1196_v42 }
 0x28c   :  { %v1199_v55 = vpop.xlane.xlu1 %1198  ;;  %v1327_v45 = vpack.c.bf16 %v1313_v36, %v1312_v33  ;;  %v1271_v56 = vmul.f32 %v11595_v50, %v12915_v5  ;;  %v1292_v61 = vmul.f32 %v12993_v60, %v1270_v44 }
 0x28d   :  { %v1242_v62 = vadd.f32 1e-06, %v1226_v52  ;;  %v1227_v63 = vmul.f32 0.03125, %v1199_v55 }
 0x28e   :  { %10473 = vmatmul.mubr.msk.bf16.vlgmr.msra.gmra.mrb[40].mxu1 %vm1072_vm0, %v1327_v45  ;;  %v1293_v3 = vmul.f32 %v12993_v60, %v1271_v56  ;;  %v1314_v11 = vadd.f32 %v13000_v35, %v1292_v61 }
 0x28f   :  { %11600 = vrsqrt.f32 %v1242_v62  ;;  %v1243_v6 = vadd.f32 1e-06, %v1227_v63 }
 0x290   :  { %v1315_v0 = vadd.f32 %v13000_v35, %v1293_v3 }
 0x291   :  { %v11597_v12 = vpop.eup %11596  ;;  %11602 = vrsqrt.f32 %v1243_v6 }
 0x292   :  { %v1202_v32 = vpop.xlane.xlu0 %1201  ;;  %v1328_v59 = vpack.c.bf16 %v1315_v0, %v1314_v11  ;;  %v1272_v5 = vmul.f32 %v11597_v12, %v12924_v37 }
 0x293   :  { %v11599_v16 = vpop.eup %11598  ;;  %v1228_v18 = vmul.f32 0.03125, %v1202_v32 }
 0x294   :  { %v1205_v20 = vpop.xlane.xlu1 %1204  ;;  %10476 = vmatprep.mubr.msk.bf16.mxu1 %vm1072_vm0, %v1328_v59  ;;  %v1273_v43 = vmul.f32 %v11599_v16, %v12927_v41  ;;  %v1294_v38 = vmul.f32 %v12993_v60, %v1272_v5 }
 0x295   :  { %v1244_v22 = vadd.f32 1e-06, %v1228_v18  ;;  %v1229_v51 = vmul.f32 0.03125, %v1205_v20 }
 0x296   :  { %v1208_v25 = vpop.xlane.xlu0 %1207  ;;  %v1295_v53 = vmul.f32 %v12993_v60, %v1273_v43  ;;  %v1316_v37 = vadd.f32 %v13000_v35, %v1294_v38 }
 0x297   :  { %11604 = vrsqrt.f32 %v1244_v22  ;;  %v1245_v2 = vadd.f32 1e-06, %v1229_v51  ;;  %v1230_v30 = vmul.f32 0.03125, %v1208_v25 }
 0x298   :  { %v1211_v10 = vpop.xlane.xlu1 %1210  ;;  %v1317_v31 = vadd.f32 %v13000_v35, %v1295_v53 }
 0x299   :  { %v11601_v7 = vpop.eup %11600  ;;  %11606 = vrsqrt.f32 %v1245_v2  ;;  %v1246_v48 = vadd.f32 1e-06, %v1230_v30  ;;  %v1231_v9 = vmul.f32 0.03125, %v1211_v10 }
 0x29a   :  { %v1214_v41 = vpop.xlane.xlu0 %1213  ;;  %v1329_v33 = vpack.c.bf16 %v1317_v31, %v1316_v37  ;;  %v1274_v36 = vmul.f32 %v11601_v7, %v12936_v46 }
 0x29b   :  { %v11603_v42 = vpop.eup %11602  ;;  %11608 = vrsqrt.f32 %v1246_v48  ;;  %v1247_v44 = vadd.f32 1e-06, %v1231_v9  ;;  %v1232_v50 = vmul.f32 0.03125, %v1214_v41  ;;  %v9580_v9 = vld [vmem:[%s16467_s7] ss:$0 sm:$0xff] }
 0x29c   :  { %v1217_v52 = vpop.xlane.xlu1 %1216  ;;  %10477 = vmatmul.mubr.msk.bf16.gmra.mrb[44].mxu1 %vm1072_vm0, %v1329_v33  ;;  %v1275_v55 = vmul.f32 %v11603_v42, %v12939_v57  ;;  %v1296_v45 = vmul.f32 %v12993_v60, %v1274_v36 }
 0x29d   :  { %11610 = vrsqrt.f32 %v1247_v44  ;;  %v1248_v56 = vadd.f32 1e-06, %v1232_v50  ;;  %v1233_v61 = vmul.f32 0.03125, %v1217_v52 }
 0x29e   :  { %v1297_v62 = vmul.f32 %v12993_v60, %v1275_v55  ;;  %v1318_v46 = vadd.f32 %v13000_v35, %v1296_v45 }
 0x29f   :  { %11612 = vrsqrt.f32 %v1248_v56  ;;  %v1249_v63 = vadd.f32 1e-06, %v1233_v61 }
 0x2a0   :  { %v1319_v3 = vadd.f32 %v13000_v35, %v1297_v62 }
 0x2a1   :  { %v11605_v6 = vpop.eup %11604  ;;  %11614 = vrsqrt.f32 %v1249_v63 }
 0x2a2   :  { %v1330_v11 = vpack.c.bf16 %v1319_v3, %v1318_v46  ;;  %v1276_v0 = vmul.f32 %v11605_v6, %v12948_v40 }
 0x2a3   :  { %v11607_v12 = vpop.eup %11606 }
 0x2a4   :  { %10480 = vmatprep.mubr.msk.bf16.mxu1 %vm1072_vm0, %v1330_v11  ;;  %v1277_v57 = vmul.f32 %v11607_v12, %v12951_v47  ;;  %v1298_v32 = vmul.f32 %v12993_v60, %v1276_v0 }
 0x2a5   :  { %v11609_v59 = vpop.eup %11608 }
 0x2a6   :  { %v1299_v5 = vmul.f32 %v12993_v60, %v1277_v57  ;;  %v1278_v16 = vmul.f32 %v11609_v59, %v12956_v21  ;;  %v1320_v20 = vadd.f32 %v13000_v35, %v1298_v32 }
 0x2a7   :  { %v11611_v18 = vpop.eup %11610 }
 0x2a8   :  { %v1321_v43 = vadd.f32 %v13000_v35, %v1299_v5  ;;  %v1279_v38 = vmul.f32 %v11611_v18, %v12965_v1  ;;  %v1300_v40 = vmul.f32 %v12993_v60, %v1278_v16 }
 0x2a9   :  { %v11613_v22 = vpop.eup %11612 }
 0x2aa   :  { %v1331_v51 = vpack.c.bf16 %v1321_v43, %v1320_v20  ;;  %v1301_v47 = vmul.f32 %v12993_v60, %v1279_v38  ;;  %v1280_v25 = vmul.f32 %v11613_v22, %v12971_v14  ;;  %v1322_v21 = vadd.f32 %v13000_v35, %v1300_v40 }
 0x2ab   :  { %v11615_v53 = vpop.eup %11614 }
 0x2ac   :  { %10481 = vmatmul.mubr.msk.bf16.gmra.mrb[48].mxu1 %vm1072_vm0, %v1331_v51  ;;  %v1323_v2 = vadd.f32 %v13000_v35, %v1301_v47  ;;  %v1281_v30 = vmul.f32 %v11615_v53, %v12980_v19  ;;  %v1302_v10 = vmul.f32 %v12993_v60, %v1280_v25 }
 0x2ae   :  { %v1332_v1 = vpack.c.bf16 %v1323_v2, %v1322_v21  ;;  %v1303_v37 = vmul.f32 %v12993_v60, %v1281_v30  ;;  %v1324_v31 = vadd.f32 %v13000_v35, %v1302_v10 }
 0x2b0   :  { %10484 = vmatprep.mubr.msk.bf16.mxu1 %vm1072_vm0, %v1332_v1  ;;  %v1325_v14 = vadd.f32 %v13000_v35, %v1303_v37 }
 0x2b2   :  { %v1333_v7 = vpack.c.bf16 %v1325_v14, %v1324_v31 }
 0x2b4   :  { %10485 = vmatmul.mubr.msk.bf16.gmra.mrb[52].mxu1 %vm1072_vm0, %v1333_v7 }
 0x361   :  { %v10474_v48 = vpop.f32.mrb[40].mxu1 }
 0x362   :  { %v1415_v19 = vpop.f32.mrb[41].mxu1  ;;  %v1424_v33 = vadd.f32 %v10474_v48, %v9580_v9 }
 0x363   :  { %v10475_v41 = vpop.f32.mrb[42].mxu1  ;;  %v1416_v60 = vadd.f32 %v9580_v9, %v1415_v19 }
 0x364   :  { %v1427_v36 = vadd.f32 %v10475_v41, %v9580_v9  ;;  %v1418_v42 = vpop.f32.mrb[43].mxu1 }
 0x365   :  { %v1419_v44 = vadd.f32 %v9580_v9, %v1418_v42 }
 0x366   :  { %v13058_v50 = vpack.c.bf16 %v1427_v36, %v1424_v33 }
 0x367   :  { %v13060_v52 = vpack.c.bf16 %v1419_v44, %v1416_v60 }
 0x368   :  { %1496 = vrot.lane.b32.xlu1 %v13058_v50, %s12320_s29 }
 0x369   :  { %1494 = vrot.lane.b32.xlu0 %v13060_v52, %s12320_s29  ;;  %10496 = vmatprep.mubr.msk.bf16.mxu1 %vm1502_vm1, %v13060_v52 }
 0x36f   :  { %v10478_v35 = vpop.f32.mrb[44].mxu1 }
 0x370   :  { %v1431_v55 = vpop.f32.mrb[45].mxu1  ;;  %v1440_v56 = vadd.f32 %v10478_v35, %v9580_v9 }
 0x371   :  { %v10479_v45 = vpop.f32.mrb[46].mxu1  ;;  %v1432_v63 = vadd.f32 %v9580_v9, %v1431_v55 }
 0x372   :  { %v1443_v61 = vadd.f32 %v10479_v45, %v9580_v9  ;;  %v1434_v62 = vpop.f32.mrb[47].mxu1 }
 0x373   :  { %v1435_v46 = vadd.f32 %v9580_v9, %v1434_v62 }
 0x374   :  { %v13068_v3 = vpack.c.bf16 %v1443_v61, %v1440_v56 }
 0x375   :  { %v13070_v6 = vpack.c.bf16 %v1435_v46, %v1432_v63 }
 0x376   :  { %16543 = vst [vmem:[#allocation18_spill] sm:$0xff] %v13068_v3  ;;  %1500 = vrot.lane.b32.xlu0 %v13068_v3, %s12320_s29 }
 0x377   :  { %1498 = vrot.lane.b32.xlu1 %v13070_v6, %s12320_s29 }
 0x37f   :  { %v10482_v11 = vpop.f32.mrb[48].mxu1 }
 0x380   :  { %v1447_v0 = vpop.f32.mrb[49].mxu1  ;;  %v1456_v57 = vadd.f32 %v10482_v11, %v9580_v9 }
 0x381   :  { %v10483_v12 = vpop.f32.mrb[50].mxu1  ;;  %v1448_v5 = vadd.f32 %v9580_v9, %v1447_v0 }
 0x382   :  { %v1459_v32 = vadd.f32 %v10483_v12, %v9580_v9  ;;  %v1450_v59 = vpop.f32.mrb[51].mxu1 }
 0x383   :  { %v1451_v16 = vadd.f32 %v9580_v9, %v1450_v59 }
 0x384   :  { %v13076_v18 = vpack.c.bf16 %v1459_v32, %v1456_v57 }
 0x385   :  { %v13078_v20 = vpack.c.bf16 %v1451_v16, %v1448_v5 }
 0x387   :  { %1596 = vrot.lane.b32.xlu1 %v13078_v20, %s12320_s29  ;;  %v10486_v43 = vpop.f32.mrb[52].mxu1  ;;  %10512 = vmatprep.mubr.msk.bf16.mxu0 %vm1502_vm1, %v13078_v20 }
 0x388   :  { %v1463_v38 = vpop.f32.mrb[53].mxu1  ;;  %v1472_v22 = vadd.f32 %v10486_v43, %v9580_v9 }
 0x389   :  { %v10487_v40 = vpop.f32.mrb[54].mxu1  ;;  %v1464_v25 = vadd.f32 %v9580_v9, %v1463_v38 }
 0x38a   :  { %v1475_v51 = vadd.f32 %v10487_v40, %v9580_v9  ;;  %v1466_v47 = vpop.f32.mrb[55].mxu1 }
 0x38b   :  { %v1467_v53 = vadd.f32 %v9580_v9, %v1466_v47  ;;  %1598 = vrot.lane.b32.xlu1 %v13076_v18, %s12320_s29 }
 0x38c   :  { %v13086_v21 = vpack.c.bf16 %v1475_v51, %v1472_v22 }
 0x38d   :  { %v13088_v2 = vpack.c.bf16 %v1467_v53, %v1464_v25 }
 0x38f   :  { %1602 = vrot.lane.b32.xlu1 %v13086_v21, %s12320_s29  ;;  %1600 = vrot.lane.b32.xlu0 %v13088_v2, %s12320_s29 }
 0x393   :  { %1896 = vrot.lane.b32.xlu1 %v13058_v50, %s12321_s28  ;;  %1894 = vrot.lane.b32.xlu0 %v13060_v52, %s12321_s28 }
 0x397   :  { %1900 = vrot.lane.b32.xlu1 %v13068_v3, %s12321_s28  ;;  %1898 = vrot.lane.b32.xlu0 %v13070_v6, %s12321_s28 }
 0x39b   :  { %1983 = vrot.lane.b32.xlu0 %v13078_v20, %s12321_s28 }
 0x3da   :  { %v1497_v1 = vpop.permute.xlu1 %1496 }
 0x3db   :  { %v1495_v30 = vpop.permute.xlu0 %1494  ;;  %v1519_v37 = vsel %vm1502_vm1, %v1497_v1, 0 }
 0x3dc   :  { %11364 = vmatprep.subr.msk.bf16.mxu1 %vm1502_vm1, %v1495_v30  ;;  %v1516_v10 = vsel %vm1502_vm1, %v1495_v30, 0 }
 0x3dd   :  { %10489 = vmatpush3.bf16.xpose.msra.mxu1 %v1516_v10 }
 0x3de   :  { %11365 = vmatprep.subr.msk.bf16.mxu1 %vm1502_vm1, %v1497_v1 }
 0x3e5   :  { %10491 = vmatpush3.bf16.xpose.msra.mxu1 %v1519_v37 }
 0x3e8   :  { %v1501_v7 = vpop.permute.xlu0 %1500 }
 0x3e9   :  { %v1499_v31 = vpop.permute.xlu1 %1498  ;;  %v1525_v48 = vsel %vm1502_vm1, %v1501_v7, 0 }
 0x3ea   :  { %11366 = vmatprep.subr.msk.bf16.mxu1 %vm1502_vm1, %v1499_v31  ;;  %v1522_v14 = vsel %vm1502_vm1, %v1499_v31, 0 }
 0x3ed   :  { %10493 = vmatpush3.bf16.xpose.msra.mxu1 %v1522_v14 }
 0x3ee   :  { %11367 = vmatprep.subr.msk.bf16.mxu1 %vm1502_vm1, %v1501_v7 }
 0x3f5   :  { %10495 = vmatpush3.bf16.xpose.msra.mxu1 %v1525_v48 }
 0x3f9   :  { %v1597_v9 = vpop.permute.xlu1 %1596 }
 0x3fa   :  { %11368 = vmatprep.subr.msk.bf16.mxu0 %vm1502_vm1, %v1597_v9  ;;  %v1617_v19 = vsel %vm1502_vm1, %v1597_v9, 0 }
 0x3fb   :  { %10505 = vmatpush3.bf16.xpose.msra.mxu0 %v1617_v19 }
 0x3fc   :  { %10497 = vmatmul.mubr.msk.bf16.vlgmr.msra.gmra.mrb[56].mxu1 %vm1502_vm1, %v13058_v50 }
 0x3fd   :  { %v1599_v41 = vpop.permute.xlu1 %1598  ;;  %10500 = vmatprep.mubr.msk.bf16.mxu1 %vm1502_vm1, %v13070_v6 }
 0x3fe   :  { %11369 = vmatprep.subr.msk.bf16.mxu0 %vm1502_vm1, %v1599_v41  ;;  %v1620_v42 = vsel %vm1502_vm1, %v1599_v41, 0 }
 0x401   :  { %v1603_v33 = vpop.permute.xlu1 %1602  ;;  %v1601_v36 = vpop.permute.xlu0 %1600 }
 0x402   :  { %v1623_v35 = vsel %vm1502_vm1, %v1601_v36, 0  ;;  %v1626_v56 = vsel %vm1502_vm1, %v1603_v33, 0 }
 0x403   :  { %10507 = vmatpush3.bf16.xpose.msra.mxu0 %v1620_v42 }
 0x404   :  { %10501 = vmatmul.mubr.msk.bf16.gmra.mrb[60].mxu1 %vm1502_vm1, %v13068_v3  ;;  %11370 = vmatprep.subr.msk.bf16.mxu0 %vm1502_vm1, %v1601_v36 }
 0x405   :  { %v1895_v60 = vpop.permute.xlu0 %1894  ;;  %v1897_v44 = vpop.permute.xlu1 %1896 }
 0x406   :  { %10520 = vmatprep.subr.bf16.mxu1 %v1895_v60 }
 0x407   :  { %10521 = vmatpush3.bf16.msra.mxu1 %v1895_v60 }
 0x408   :  { %10522 = vmatprep.subr.bf16.mxu1 %v1897_v44 }
 0x409   :  { %v1899_v55 = vpop.permute.xlu0 %1898  ;;  %v1901_v45 = vpop.permute.xlu1 %1900 }
 0x40b   :  { %10509 = vmatpush3.bf16.xpose.msra.mxu0 %v1623_v35  ;;  %10523 = vmatpush3.bf16.msra.mxu1 %v1897_v44 }
 0x40c   :  { %11371 = vmatprep.subr.msk.bf16.mxu0 %vm1502_vm1, %v1603_v33  ;;  %10524 = vmatprep.subr.bf16.mxu1 %v1899_v55 }
 0x40d   :  { %v13126_v61 = vpop.permute.xlu0 %1983 }
 0x40f   :  { %10525 = vmatpush3.bf16.msra.mxu1 %v1899_v55 }
 0x410   :  { %10526 = vmatprep.subr.bf16.mxu1 %v1901_v45 }
 0x413   :  { %10511 = vmatpush3.bf16.xpose.msra.mxu0 %v1626_v56  ;;  %10527 = vmatpush3.bf16.msra.mxu1 %v1901_v45 }
 0x414   :  { %10536 = vmatprep.subr.bf16.mxu1 %v13126_v61 }
 0x41a   :  { %10513 = vmatmul.mubr.msk.bf16.vlgmr.msra.gmra.mrb[56].mxu0 %vm1502_vm1, %v13076_v18 }
 0x41b   :  { %10516 = vmatprep.mubr.msk.bf16.mxu0 %vm1502_vm1, %v13088_v2 }
 0x422   :  { %10517 = vmatmul.mubr.msk.bf16.gmra.mrb[60].mxu0 %vm1502_vm1, %v13086_v21 }
 0x4cf   :  { %v10498_v62 = vpop.f32.mrb[56].mxu1 }
 0x4d0   :  { %v13135_v63 = vmul.f32 0.35355338, %v10498_v62  ;;  %v1561_v46 = vpop.f32.mrb[57].mxu1 }
 0x4d1   :  { %v10499_v11 = vpop.f32.mrb[58].mxu1  ;;  %v13137_v0 = vmul.f32 0.35355338, %v1561_v46 }
 0x4d2   :  { %v1564_v12 = vpop.f32.mrb[59].mxu1  ;;  %v1716_v57 = vsel %vm1709_vm2, %v13135_v63, -inf  ;;  %v13145_v5 = vmul.f32 0.35355338, %v10499_v11 }
 0x4d3   :  { %v13141_v32 = vmul.f32 0.35355338, %v1564_v12  ;;  %1717 = vmax.xlane.f32.xlu0 %v1716_v57  ;;  %v1710_v16 = vsel %vm1709_vm2, %v13137_v0, -inf }
 0x4d4   :  { %v1719_v25 = vsel %vm1709_vm2, %v13145_v5, -inf }
 0x4d5   :  { %v1713_v59 = vsel %vm1709_vm2, %v13141_v32, -inf }
 0x4d6   :  { %1714 = vmax.xlane.f32.xlu1 %v1713_v59 }
 0x4d7   :  { %1711 = vmax.xlane.f32.xlu0 %v1710_v16  ;;  %v10502_v43 = vpop.f32.mrb[60].mxu1 }
 0x4d8   :  { %v1577_v38 = vpop.f32.mrb[61].mxu1  ;;  %v13149_v22 = vmul.f32 0.35355338, %v10502_v43 }
 0x4d9   :  { %v10503_v40 = vpop.f32.mrb[62].mxu1  ;;  %v13159_v10 = vmul.f32 0.35355338, %v1577_v38 }
 0x4da   :  { %v13151_v51 = vmul.f32 0.35355338, %v10503_v40  ;;  %v1580_v47 = vpop.f32.mrb[63].mxu1  ;;  %v1728_v1 = vsel %vm1709_vm2, %v13149_v22, -inf }
 0x4db   :  { %1720 = vmax.xlane.f32.xlu0 %v1719_v25  ;;  %v13155_v53 = vmul.f32 0.35355338, %v1580_v47  ;;  %v1722_v31 = vsel %vm1709_vm2, %v13159_v10, -inf }
 0x4dc   :  { %v1731_v30 = vsel %vm1709_vm2, %v13151_v51, -inf }
 0x4dd   :  { %1732 = vmax.xlane.f32.xlu1 %v1731_v30  ;;  %v1725_v37 = vsel %vm1709_vm2, %v13155_v53, -inf }
 0x4df   :  { %1729 = vmax.xlane.f32.xlu0 %v1728_v1 }
 0x4e1   :  { %1726 = vmax.xlane.f32.xlu1 %v1725_v37 }
 0x4e3   :  { %1723 = vmax.xlane.f32.xlu0 %v1722_v31 }
 0x4ed   :  { %v10514_v14 = vpop.f32.mrb[56].mxu0 }
 0x4ee   :  { %v13167_v7 = vmul.f32 0.35355338, %v10514_v14  ;;  %v1662_v48 = vpop.f32.mrb[57].mxu0 }
 0x4ef   :  { %v10515_v9 = vpop.f32.mrb[58].mxu0  ;;  %v13169_v19 = vmul.f32 0.35355338, %v1662_v48 }
 0x4f0   :  { %v13171_v41 = vmul.f32 0.35355338, %v10515_v9  ;;  %v1665_v33 = vpop.f32.mrb[59].mxu0  ;;  %v1740_v36 = vsel %vm1709_vm2, %v13167_v7, -inf }
 0x4f1   :  { %1741 = vmax.xlane.f32.xlu0 %v1740_v36  ;;  %v13175_v42 = vmul.f32 0.35355338, %v1665_v33  ;;  %v1734_v44 = vsel %vm1709_vm2, %v13169_v19, -inf }
 0x4f2   :  { %v1743_v60 = vsel %vm1709_vm2, %v13171_v41, -inf }
 0x4f3   :  { %1744 = vmax.xlane.f32.xlu1 %v1743_v60  ;;  %v1737_v45 = vsel %vm1709_vm2, %v13175_v42, -inf }
 0x4f5   :  { %1735 = vmax.xlane.f32.xlu0 %v1734_v44  ;;  %v10518_v35 = vpop.f32.mrb[60].mxu0 }
 0x4f6   :  { %v1678_v55 = vpop.f32.mrb[61].mxu0  ;;  %v13187_v46 = vmul.f32 0.35355338, %v10518_v35 }
 0x4f7   :  { %1738 = vmax.xlane.f32.xlu1 %v1737_v45  ;;  %v10519_v56 = vpop.f32.mrb[62].mxu0  ;;  %v13191_v12 = vmul.f32 0.35355338, %v1678_v55 }
 0x4f8   :  { %v1681_v62 = vpop.f32.mrb[63].mxu0  ;;  %v13189_v11 = vmul.f32 0.35355338, %v10519_v56  ;;  %v1752_v57 = vsel %vm1709_vm2, %v13187_v46, -inf }
 0x4f9   :  { %v13195_v59 = vmul.f32 0.35355338, %v1681_v62  ;;  %v1746_v43 = vsel %vm1709_vm2, %v13191_v12, -inf }
 0x4fa   :  { %v1755_v16 = vsel %vm1709_vm2, %v13189_v11, -inf }
 0x4fb   :  { %v1749_v38 = vsel %vm1709_vm2, %v13195_v59, -inf }
 0x508   :  { %1989 = vrot.lane.b32.xlu1 %v13086_v21, %s12321_s28 }
 0x50b   :  { %1985 = vrot.lane.b32.xlu0 %v13076_v18, %s12321_s28 }
 0x52a   :  { %1753 = vmax.xlane.f32.xlu0 %v1752_v57 }
 0x52c   :  { %1756 = vmax.xlane.f32.xlu1 %v1755_v16 }
 0x52e   :  { %1747 = vmax.xlane.f32.xlu0 %v1746_v43 }
 0x530   :  { %1750 = vmax.xlane.f32.xlu1 %v1749_v38 }
 0x544   :  { %1987 = vrot.lane.b32.xlu0 %v13088_v2, %s12321_s28 }
 0x560   :  { %v1718_v40 = vpop.xlane.xlu0 %1717 }
 0x561   :  { %v1760_v47 = vsub.f32 %v13135_v63, %v1718_v40 }
 0x563   :  { %v1778_v25 = vmul.f32 1.442695, %v1760_v47  ;;  %v1715_v30 = vpop.xlane.xlu1 %1714 }
 0x564   :  { %v1712_v1 = vpop.xlane.xlu0 %1711  ;;  %v1759_v31 = vsub.f32 %v13141_v32, %v1715_v30 }
 0x565   :  { %11616 = vpow2.f32 %v1778_v25  ;;  %v1758_v37 = vsub.f32 %v13137_v0, %v1712_v1 }
 0x566   :  { %v1776_v36 = vmul.f32 1.442695, %v1759_v31 }
 0x567   :  { %v1774_v14 = vmul.f32 1.442695, %v1758_v37 }
 0x568   :  { %v1721_v48 = vpop.xlane.xlu0 %1720 }
 0x569   :  { %11618 = vpow2.f32 %v1774_v14  ;;  %v1761_v9 = vsub.f32 %v13145_v5, %v1721_v48 }
 0x56a   :  { %v1733_v33 = vpop.xlane.xlu1 %1732 }
 0x56b   :  { %v1780_v60 = vmul.f32 1.442695, %v1761_v9  ;;  %v1765_v55 = vsub.f32 %v13151_v51, %v1733_v33 }
 0x56c   :  { %v1730_v44 = vpop.xlane.xlu0 %1729 }
 0x56d   :  { %11620 = vpow2.f32 %v1780_v60  ;;  %v1764_v63 = vsub.f32 %v13149_v22, %v1730_v44  ;;  %v1788_v57 = vmul.f32 1.442695, %v1765_v55 }
 0x56e   :  { %11622 = vpow2.f32 %v1776_v36  ;;  %v1727_v45 = vpop.xlane.xlu1 %1726 }
 0x56f   :  { %v13210_v35 = vpop.eup %11616  ;;  %v1786_v0 = vmul.f32 1.442695, %v1764_v63  ;;  %v1763_v22 = vsub.f32 %v13155_v53, %v1727_v45 }
 0x570   :  { %v1724_v32 = vpop.xlane.xlu0 %1723  ;;  %v1812_v56 = vsel %vm1709_vm2, %v13210_v35, 0.0 }
 0x571   :  { %v1762_v5 = vsub.f32 %v13159_v10, %v1724_v32  ;;  %1813 = vadd.xlane.f32.xlu0 %v1812_v56  ;;  %11624 = vpow2.f32 %v1786_v0  ;;  %v1784_v38 = vmul.f32 1.442695, %v1763_v22 }
 0x573   :  { %v13216_v62 = vpop.eup %11618  ;;  %v1782_v16 = vmul.f32 1.442695, %v1762_v5 }
 0x574   :  { %v1806_v43 = vsel %vm1709_vm2, %v13216_v62, 0.0 }
 0x575   :  { %11626 = vpow2.f32 %v1782_v16  ;;  %1807 = vadd.xlane.f32.xlu0 %v1806_v43 }
 0x576   :  { %11628 = vpow2.f32 %v1788_v57 }
 0x577   :  { %v13221_v51 = vpop.eup %11620  ;;  %11630 = vpow2.f32 %v1784_v38 }
 0x578   :  { %v1815_v10 = vsel %vm1709_vm2, %v13221_v51, 0.0  ;;  %v13225_v40 = vpop.eup %11622 }
 0x579   :  { %1816 = vadd.xlane.f32.xlu1 %v1815_v10  ;;  %v1809_v53 = vsel %vm1709_vm2, %v13225_v40, 0.0 }
 0x57b   :  { %v13229_v47 = vpop.eup %11624 }
 0x57c   :  { %v1824_v31 = vsel %vm1709_vm2, %v13229_v47, 0.0 }
 0x57d   :  { %1810 = vadd.xlane.f32.xlu1 %v1809_v53 }
 0x57e   :  { %v1742_v25 = vpop.xlane.xlu0 %1741 }
 0x57f   :  { %v13231_v30 = vpop.eup %11626  ;;  %v1768_v1 = vsub.f32 %v13167_v7, %v1742_v25 }
 0x580   :  { %v1745_v37 = vpop.xlane.xlu1 %1744  ;;  %v1818_v14 = vsel %vm1709_vm2, %v13231_v30, 0.0  ;;  %v13238_v48 = vpop.eup %11628 }
 0x581   :  { %v1794_v9 = vmul.f32 1.442695, %v1768_v1  ;;  %v1769_v33 = vsub.f32 %v13171_v41, %v1745_v37  ;;  %1825 = vadd.xlane.f32.xlu1 %v1824_v31  ;;  %1819 = vadd.xlane.f32.xlu0 %v1818_v14  ;;  %v1827_v63 = vsel %vm1709_vm2, %v13238_v48, 0.0  ;;  %v13244_v55 = vpop.eup %11630 }
 0x582   :  { %v1736_v36 = vpop.xlane.xlu0 %1735  ;;  %v1821_v32 = vsel %vm1709_vm2, %v13244_v55, 0.0 }
 0x583   :  { %11632 = vpow2.f32 %v1794_v9  ;;  %v1796_v60 = vmul.f32 1.442695, %v1769_v33  ;;  %v1766_v44 = vsub.f32 %v13169_v19, %v1736_v36 }
 0x584   :  { %v1739_v7 = vpop.xlane.xlu1 %1738 }
 0x585   :  { %11634 = vpow2.f32 %v1796_v60  ;;  %v1790_v0 = vmul.f32 1.442695, %v1766_v44  ;;  %v1767_v45 = vsub.f32 %v13175_v42, %v1739_v7  ;;  %1828 = vadd.xlane.f32.xlu1 %v1827_v63 }
 0x586   :  { %v13269_v38 = vpop.permute.xlu0 %1985 }
 0x587   :  { %11636 = vpow2.f32 %v1790_v0  ;;  %v1792_v41 = vmul.f32 1.442695, %v1767_v45 }
 0x588   :  { %v13271_v10 = vpop.permute.xlu1 %1989 }
 0x589   :  { %11638 = vpow2.f32 %v1792_v41  ;;  %1822 = vadd.xlane.f32.xlu1 %v1821_v32 }
 0x58d   :  { %v13249_v56 = vpop.eup %11632 }
 0x58e   :  { %v1836_v19 = vsel %vm1709_vm2, %v13249_v56, 0.0 }
 0x58f   :  { %v13253_v5 = vpop.eup %11634  ;;  %1837 = vadd.xlane.f32.xlu1 %v1836_v19 }
 0x590   :  { %v1839_v42 = vsel %vm1709_vm2, %v13253_v5, 0.0 }
 0x591   :  { %v13255_v57 = vpop.eup %11636 }
 0x592   :  { %v1830_v22 = vsel %vm1709_vm2, %v13255_v57, 0.0 }
 0x593   :  { %v13261_v16 = vpop.eup %11638  ;;  %1840 = vadd.xlane.f32.xlu1 %v1839_v42  ;;  %1831 = vadd.xlane.f32.xlu0 %v1830_v22 }
 0x594   :  { %v1833_v43 = vsel %vm1709_vm2, %v13261_v16, 0.0 }
 0x597   :  { %1834 = vadd.xlane.f32.xlu1 %v1833_v43 }
 0x5a8   :  { %2195 = vrot.lane.b32.xlu1 %v13076_v18, %s12322_s23 }
 0x5ac   :  { %2197 = vrot.lane.b32.xlu1 %v13088_v2, %s12322_s23 }
 0x5b7   :  { %v1754_v53 = vpop.xlane.xlu0 %1753 }
 0x5b8   :  { %v1772_v25 = vsub.f32 %v13187_v46, %v1754_v53 }
 0x5b9   :  { %v1757_v1 = vpop.xlane.xlu1 %1756 }
 0x5ba   :  { %v1802_v37 = vmul.f32 1.442695, %v1772_v25  ;;  %v1773_v31 = vsub.f32 %v13189_v11, %v1757_v1 }
 0x5bb   :  { %v1748_v14 = vpop.xlane.xlu0 %1747 }
 0x5bc   :  { %11640 = vpow2.f32 %v1802_v37  ;;  %v1770_v9 = vsub.f32 %v13191_v12, %v1748_v14  ;;  %v1804_v33 = vmul.f32 1.442695, %v1773_v31 }
 0x5bd   :  { %v1751_v36 = vpop.xlane.xlu1 %1750 }
 0x5be   :  { %v1798_v60 = vmul.f32 1.442695, %v1770_v9  ;;  %v1771_v44 = vsub.f32 %v13195_v59, %v1751_v36 }
 0x5bf   :  { %v1988_v32 = vpop.permute.xlu0 %1987 }
 0x5c0   :  { %11642 = vpow2.f32 %v1798_v60  ;;  %v1800_v7 = vmul.f32 1.442695, %v1771_v44 }
 0x5c1   :  { %11644 = vpow2.f32 %v1804_v33 }
 0x5c2   :  { %11646 = vpow2.f32 %v1800_v7 }
 0x5c6   :  { %v13277_v63 = vpop.eup %11640 }
 0x5c7   :  { %v1848_v46 = vsel %vm1709_vm2, %v13277_v63, 0.0 }
 0x5c8   :  { %1849 = vadd.xlane.f32.xlu0 %v1848_v46 }
 0x5ca   :  { %v13281_v11 = vpop.eup %11642 }
 0x5cb   :  { %v13283_v0 = vpop.eup %11644  ;;  %v1842_v12 = vsel %vm1709_vm2, %v13281_v11, 0.0 }
 0x5cc   :  { %v13287_v45 = vpop.eup %11646  ;;  %1843 = vadd.xlane.f32.xlu0 %v1842_v12  ;;  %v1851_v41 = vsel %vm1709_vm2, %v13283_v0, 0.0 }
 0x5cd   :  { %v1845_v59 = vsel %vm1709_vm2, %v13287_v45, 0.0 }
 0x5d0   :  { %1846 = vadd.xlane.f32.xlu1 %v1845_v59  ;;  %1852 = vadd.xlane.f32.xlu0 %v1851_v41 }
 0x5e1   :  { %2199 = vrot.lane.b32.xlu1 %v13086_v21, %s12322_s23 }
 0x5e5   :  { %2187 = vrot.lane.b32.xlu1 %v13076_v18, %s12323_s30 }
 0x5e6   :  { %2193 = vrot.lane.b32.xlu0 %v13078_v20, %s12322_s23 }
 0x5e9   :  { %2191 = vrot.lane.b32.xlu1 %v13086_v21, %s12323_s30 }
 0x5ea   :  { %2185 = vrot.lane.b32.xlu0 %v13078_v20, %s12323_s30 }
 0x5ed   :  { %2090 = vrot.lane.b32.xlu1 %v13058_v50, %s12322_s23 }
 0x5ee   :  { %2189 = vrot.lane.b32.xlu0 %v13088_v2, %s12323_s30 }
 0x5f1   :  { %2094 = vrot.lane.b32.xlu1 %v13068_v3, %s12322_s23 }
 0x5f2   :  { %2088 = vrot.lane.b32.xlu0 %v13060_v52, %s12322_s23 }
 0x5f5   :  { %2082 = vrot.lane.b32.xlu1 %v13058_v50, %s12323_s30 }
 0x5f6   :  { %2092 = vrot.lane.b32.xlu0 %v13070_v6, %s12322_s23 }
 0x5f9   :  { %2086 = vrot.lane.b32.xlu1 %v13068_v3, %s12323_s30 }
 0x5fa   :  { %2080 = vrot.lane.b32.xlu0 %v13060_v52, %s12323_s30 }
 0x5fd   :  { %2581 = vrot.lane.b32.xlu1 %v13076_v18, %s12324_s1 }
 0x5fe   :  { %2084 = vrot.lane.b32.xlu0 %v13070_v6, %s12323_s30  ;;  %v1814_v19 = vpop.xlane.xlu0 %1813 }
 0x601   :  { %2583 = vrot.lane.b32.xlu1 %v13088_v2, %s12324_s1 }
 0x602   :  { %2579 = vrot.lane.b32.xlu0 %v13078_v20, %s12324_s1  ;;  %v1808_v42 = vpop.xlane.xlu0 %1807 }
 0x605   :  { %2585 = vrot.lane.b32.xlu1 %v13086_v21, %s12324_s1 }
 0x606   :  { %v1817_v22 = vpop.xlane.xlu1 %1816  ;;  %2933 = vrot.lane.b32.xlu0 %v13060_v52, %s12325_s19 }
 0x607   :  { %11648 = vrcp.f32 %v1817_v22 }
 0x608   :  { %11650 = vrcp.f32 %v1808_v42 }
 0x609   :  { %2935 = vrot.lane.b32.xlu1 %v13058_v50, %s12325_s19  ;;  %11652 = vrcp.f32 %v1814_v19 }
 0x60a   :  { %v1811_v43 = vpop.xlane.xlu1 %1810 }
 0x60b   :  { %11654 = vrcp.f32 %v1811_v43 }
 0x60d   :  { %2937 = vrot.lane.b32.xlu1 %v13070_v6, %s12325_s19 }
 0x60e   :  { %v1826_v53 = vpop.xlane.xlu1 %1825  ;;  %v1820_v1 = vpop.xlane.xlu0 %1819 }
 0x611   :  { %2939 = vrot.lane.b32.xlu1 %v13068_v3, %s12325_s19  ;;  %v11649_v25 = vpop.eup %11648 }
 0x612   :  { %v1829_v37 = vpop.xlane.xlu1 %1828  ;;  %v11651_v31 = vpop.eup %11650  ;;  %v1873_v33 = vmul.f32 %v11649_v25, %v13221_v51 }
 0x613   :  { %v11653_v14 = vpop.eup %11652  ;;  %11656 = vrcp.f32 %v1829_v37  ;;  %v1870_v60 = vmul.f32 %v11651_v31, %v13216_v62 }
 0x614   :  { %11658 = vrcp.f32 %v1820_v1  ;;  %v1872_v7 = vmul.f32 %v11653_v14, %v13210_v35 }
 0x615   :  { %v11655_v9 = vpop.eup %11654  ;;  %11660 = vrcp.f32 %v1826_v53 }
 0x616   :  { %v1823_v36 = vpop.xlane.xlu1 %1822  ;;  %v1871_v44 = vmul.f32 %v11655_v9, %v13225_v40  ;;  %v1887_v12 = vpack.c.bf16 %v1873_v33, %v1872_v7 }
 0x617   :  { %11662 = vrcp.f32 %v1823_v36 }
 0x618   :  { %v1886_v46 = vpack.c.bf16 %v1871_v44, %v1870_v60 }
 0x61a   :  { %10528 = vmatprep.mubr.msk.bf16.mxu1 %vm1709_vm2, %v1886_v46 }
 0x61b   :  { %10529 = vmatmul.mubr.msk.bf16.vlgmr.msra.gmra.mrb[64].mxu1 %vm1709_vm2, %v1887_v12 }
 0x61c   :  { %10537 = vmatpush3.bf16.msra.mxu1 %v13126_v61  ;;  %v1838_v59 = vpop.xlane.xlu1 %1837 }
 0x61d   :  { %10538 = vmatprep.subr.bf16.mxu1 %v13269_v38  ;;  %v11657_v51 = vpop.eup %11656 }
 0x61e   :  { %v11659_v41 = vpop.eup %11658  ;;  %v1877_v42 = vmul.f32 %v11657_v51, %v13238_v48 }
 0x61f   :  { %v11661_v19 = vpop.eup %11660  ;;  %v1874_v22 = vmul.f32 %v11659_v41, %v13231_v30 }
 0x620   :  { %10539 = vmatpush3.bf16.msra.mxu1 %v13269_v38  ;;  %v1841_v62 = vpop.xlane.xlu1 %1840  ;;  %v1832_v40 = vpop.xlane.xlu0 %1831  ;;  %v1876_v61 = vmul.f32 %v11661_v19, %v13229_v47 }
 0x621   :  { %v11663_v35 = vpop.eup %11662  ;;  %10540 = vmatprep.subr.bf16.mxu1 %v1988_v32  ;;  %11664 = vrcp.f32 %v1841_v62 }
 0x622   :  { %v1875_v43 = vmul.f32 %v11663_v35, %v13244_v55  ;;  %11666 = vrcp.f32 %v1832_v40  ;;  %v1889_v38 = vpack.c.bf16 %v1877_v42, %v1876_v61 }
 0x623   :  { %11668 = vrcp.f32 %v1838_v59 }
 0x624   :  { %10541 = vmatpush3.bf16.msra.mxu1 %v1988_v32  ;;  %v1835_v53 = vpop.xlane.xlu1 %1834  ;;  %v1888_v25 = vpack.c.bf16 %v1875_v43, %v1874_v22 }
 0x625   :  { %11670 = vrcp.f32 %v1835_v53  ;;  %10542 = vmatprep.subr.bf16.mxu1 %v13271_v10 }
 0x626   :  { %10532 = vmatprep.mubr.msk.bf16.mxu1 %vm1709_vm2, %v1888_v25 }
 0x627   :  { %10533 = vmatmul.mubr.msk.bf16.gmra.mrb[68].mxu1 %vm1709_vm2, %v1889_v38 }
 0x628   :  { %10543 = vmatpush3.bf16.msra.mxu1 %v13271_v10  ;;  %v2196_v33 = vpop.permute.xlu1 %2195 }
 0x629   :  { %v2217_v42 = vsel %vm1502_vm1, %v2196_v33, 0 }
 0x62b   :  { %v11665_v30 = vpop.eup %11664 }
 0x62c   :  { %v11667_v48 = vpop.eup %11666  ;;  %v1881_v47 = vmul.f32 %v11665_v30, %v13253_v5  ;;  %v2198_v36 = vpop.permute.xlu1 %2197 }
 0x62d   :  { %v11669_v55 = vpop.eup %11668  ;;  %v1878_v32 = vmul.f32 %v11667_v48, %v13255_v57 }
 0x62e   :  { %v1880_v31 = vmul.f32 %v11669_v55, %v13249_v56 }
 0x62f   :  { %v11671_v1 = vpop.eup %11670 }
 0x630   :  { %v1879_v37 = vmul.f32 %v11671_v1, %v13261_v16  ;;  %v1891_v9 = vpack.c.bf16 %v1881_v47, %v1880_v31 }
 0x632   :  { %v1890_v14 = vpack.c.bf16 %v1879_v37, %v1878_v32 }
 0x634   :  { %10544 = vmatprep.mubr.msk.bf16.mxu1 %vm1709_vm2, %v1890_v14 }
 0x635   :  { %10545 = vmatmul.mubr.msk.bf16.vlgmr.msra.gmra.mrb[72].mxu1 %vm1709_vm2, %v1891_v9 }
 0x655   :  { %v1850_v10 = vpop.xlane.xlu0 %1849 }
 0x659   :  { %v1844_v60 = vpop.xlane.xlu0 %1843 }
 0x65a   :  { %11672 = vrcp.f32 %v1844_v60 }
 0x65b   :  { %11674 = vrcp.f32 %v1850_v10 }
 0x65d   :  { %v1847_v44 = vpop.xlane.xlu1 %1846  ;;  %v1853_v5 = vpop.xlane.xlu0 %1852 }
 0x65e   :  { %11676 = vrcp.f32 %v1847_v44 }
 0x65f   :  { %11678 = vrcp.f32 %v1853_v5 }
 0x661   :  { %v2200_v57 = vpop.permute.xlu1 %2199  ;;  %v2194_v16 = vpop.permute.xlu0 %2193 }
 0x662   :  { %11376 = vmatprep.subr.msk.bf16.mxu1 %vm1502_vm1, %v2194_v16  ;;  %v2214_v56 = vsel %vm1502_vm1, %v2194_v16, 0  ;;  %v2223_v32 = vsel %vm1502_vm1, %v2200_v57, 0 }
 0x663   :  { %10569 = vmatpush3.bf16.xpose.msra.mxu1 %v2214_v56 }
 0x664   :  { %11377 = vmatprep.subr.msk.bf16.mxu1 %vm1502_vm1, %v2196_v33  ;;  %v11673_v12 = vpop.eup %11672 }
 0x665   :  { %v2188_v7 = vpop.permute.xlu1 %2187  ;;  %v2186_v46 = vpop.permute.xlu0 %2185  ;;  %v1882_v40 = vmul.f32 %v11673_v12, %v13281_v11 }
 0x666   :  { %v11675_v59 = vpop.eup %11674 }
 0x667   :  { %v1884_v22 = vmul.f32 %v11675_v59, %v13277_v63 }
 0x668   :  { %v11677_v51 = vpop.eup %11676 }
 0x669   :  { %v11679_v41 = vpop.eup %11678  ;;  %v2192_v19 = vpop.permute.xlu1 %2191  ;;  %v1883_v35 = vmul.f32 %v11677_v51, %v13287_v45  ;;  %v2220_v45 = vsel %vm1502_vm1, %v2198_v36, 0 }
 0x66a   :  { %v2190_v62 = vpop.permute.xlu0 %2189  ;;  %v1885_v43 = vmul.f32 %v11679_v41, %v13283_v0 }
 0x66b   :  { %10571 = vmatpush3.bf16.xpose.msra.mxu1 %v2217_v42  ;;  %v1892_v61 = vpack.c.bf16 %v1883_v35, %v1882_v40 }
 0x66c   :  { %11378 = vmatprep.subr.msk.bf16.mxu1 %vm1502_vm1, %v2198_v36  ;;  %v1893_v53 = vpack.c.bf16 %v1885_v43, %v1884_v22 }
 0x66d   :  { %v2091_v25 = vpop.permute.xlu1 %2090  ;;  %10548 = vmatprep.mubr.msk.bf16.mxu1 %vm1709_vm2, %v1892_v61 }
 0x66e   :  { %v2089_v38 = vpop.permute.xlu0 %2088  ;;  %10549 = vmatmul.mubr.msk.bf16.gmra.mrb[76].mxu1 %vm1709_vm2, %v1893_v53  ;;  %v2112_v55 = vsel %vm1502_vm1, %v2091_v25, 0 }
 0x66f   :  { %11372 = vmatprep.subr.msk.bf16.mxu0 %vm1502_vm1, %v2089_v38  ;;  %v2109_v11 = vsel %vm1502_vm1, %v2089_v38, 0  ;;  %10576 = vmatprep.mubr.msk.bf16.mxu1 %vm1502_vm1, %v2186_v46 }
 0x670   :  { %10553 = vmatpush3.bf16.xpose.msra.mxu0 %v2109_v11 }
 0x671   :  { %11373 = vmatprep.subr.msk.bf16.mxu0 %vm1502_vm1, %v2091_v25  ;;  %v2095_v63 = vpop.permute.xlu1 %2094 }
 0x672   :  { %v2093_v0 = vpop.permute.xlu0 %2092  ;;  %v2118_v33 = vsel %vm1502_vm1, %v2095_v63, 0 }
 0x673   :  { %10573 = vmatpush3.bf16.xpose.msra.mxu1 %v2220_v45  ;;  %v2115_v31 = vsel %vm1502_vm1, %v2093_v0, 0 }
 0x674   :  { %11379 = vmatprep.subr.msk.bf16.mxu1 %vm1502_vm1, %v2200_v57 }
 0x675   :  { %v2083_v30 = vpop.permute.xlu1 %2082 }
 0x676   :  { %v2081_v48 = vpop.permute.xlu0 %2080 }
 0x677   :  { %10560 = vmatprep.mubr.msk.bf16.mxu0 %vm1502_vm1, %v2081_v48 }
 0x678   :  { %10555 = vmatpush3.bf16.xpose.msra.mxu0 %v2112_v55 }
 0x679   :  { %11374 = vmatprep.subr.msk.bf16.mxu0 %vm1502_vm1, %v2093_v0  ;;  %v2087_v1 = vpop.permute.xlu1 %2086 }
 0x67a   :  { %v2085_v47 = vpop.permute.xlu0 %2084 }
 0x67b   :  { %10575 = vmatpush3.bf16.xpose.msra.mxu1 %v2223_v32 }
 0x67d   :  { %v2582_v14 = vpop.permute.xlu1 %2581 }
 0x67e   :  { %v2580_v37 = vpop.permute.xlu0 %2579 }
 0x67f   :  { %10600 = vmatprep.subr.bf16.mxu1 %v2580_v37 }
 0x680   :  { %10557 = vmatpush3.bf16.xpose.msra.mxu0 %v2115_v31 }
 0x681   :  { %11375 = vmatprep.subr.msk.bf16.mxu0 %vm1502_vm1, %v2095_v63  ;;  %v2584_v9 = vpop.permute.xlu1 %2583 }
 0x682   :  { %10577 = vmatmul.mubr.msk.bf16.vlgmr.msra.gmra.mrb[80].mxu1 %vm1502_vm1, %v2188_v7  ;;  %v13388_v36 = vpop.permute.xlu0 %2933 }
 0x683   :  { %10580 = vmatprep.mubr.msk.bf16.mxu1 %vm1502_vm1, %v2190_v62  ;;  %10601 = vmatpush3.bf16.msra.mxu1 %v2580_v37 }
 0x684   :  { %10602 = vmatprep.subr.bf16.mxu1 %v2582_v14 }
 0x685   :  { %v2586_v10 = vpop.permute.xlu1 %2585 }
 0x687   :  { %10603 = vmatpush3.bf16.msra.mxu1 %v2582_v14 }
 0x688   :  { %10559 = vmatpush3.bf16.xpose.msra.mxu0 %v2118_v33  ;;  %10604 = vmatprep.subr.bf16.mxu1 %v2584_v9 }
 0x68a   :  { %10581 = vmatmul.mubr.msk.bf16.gmra.mrb[84].mxu1 %vm1502_vm1, %v2192_v19 }
 0x68b   :  { %10605 = vmatpush3.bf16.msra.mxu1 %v2584_v9 }
 0x68c   :  { %10606 = vmatprep.subr.bf16.mxu1 %v2586_v10 }
 0x68f   :  { %10561 = vmatmul.mubr.msk.bf16.vlgmr.msra.gmra.mrb[64].mxu0 %vm1502_vm1, %v2083_v30  ;;  %10607 = vmatpush3.bf16.msra.mxu1 %v2586_v10 }
 0x690   :  { %10564 = vmatprep.mubr.msk.bf16.mxu0 %vm1502_vm1, %v2085_v47  ;;  %11382 = vmatprep.subr.msk.bf16.mxu1 %vm1502_vm1, %v13388_v36 }
 0x697   :  { %10565 = vmatmul.mubr.msk.bf16.gmra.mrb[68].mxu0 %vm1502_vm1, %v2087_v1 }
 0x6ee   :  { %v13394_v60 = vpop.f32.mrb[64].mxu1 }
 0x6ef   :  { %v13396_v44 = vpop.f32.mrb[65].mxu1 }
 0x6f0   :  { %v13398_v5 = vpop.f32.mrb[66].mxu1 }
 0x6f1   :  { %v13402_v16 = vpop.f32.mrb[67].mxu1 }
 0x6fa   :  { %v13406_v7 = vpop.f32.mrb[68].mxu1 }
 0x6fb   :  { %v13408_v46 = vpop.f32.mrb[69].mxu1 }
 0x6fc   :  { %v13410_v12 = vpop.f32.mrb[70].mxu1 }
 0x6fd   :  { %v13414_v51 = vpop.f32.mrb[71].mxu1 }
 0x708   :  { %v13418_v19 = vpop.f32.mrb[72].mxu1 }
 0x709   :  { %v13420_v62 = vpop.f32.mrb[73].mxu1 }
 0x70a   :  { %v13422_v40 = vpop.f32.mrb[74].mxu1 }
 0x70b   :  { %v13426_v42 = vpop.f32.mrb[75].mxu1 }
 0x741   :  { %v13430_v43 = vpop.f32.mrb[76].mxu1 }
 0x742   :  { %v13432_v61 = vpop.f32.mrb[77].mxu1 }
 0x743   :  { %v13434_v53 = vpop.f32.mrb[78].mxu1 }
 0x744   :  { %v13438_v38 = vpop.f32.mrb[79].mxu1 }
 0x755   :  { %v10578_v63 = vpop.f32.mrb[80].mxu1 }
 0x756   :  { %v2300_v0 = vmul.f32 0.35355338, %v10578_v63  ;;  %v2259_v45 = vpop.f32.mrb[81].mxu1 }
 0x757   :  { %v10579_v30 = vpop.f32.mrb[82].mxu1  ;;  %v2298_v48 = vmul.f32 0.35355338, %v2259_v45 }
 0x758   :  { %v2262_v55 = vpop.f32.mrb[83].mxu1  ;;  %v2336_v1 = vsel %vm1709_vm2, %v2300_v0, -inf  ;;  %v2301_v37 = vmul.f32 0.35355338, %v10579_v30 }
 0x759   :  { %v2299_v47 = vmul.f32 0.35355338, %v2262_v55  ;;  %2337 = vmax.xlane.f32.xlu0 %v2336_v1  ;;  %v2330_v31 = vsel %vm1709_vm2, %v2298_v48, -inf }
 0x75a   :  { %v2339_v45 = vsel %vm1709_vm2, %v2301_v37, -inf }
 0x75b   :  { %v2333_v32 = vsel %vm1709_vm2, %v2299_v47, -inf }
 0x75c   :  { %2334 = vmax.xlane.f32.xlu1 %v2333_v32 }
 0x75d   :  { %2331 = vmax.xlane.f32.xlu0 %v2330_v31  ;;  %v10582_v14 = vpop.f32.mrb[84].mxu1 }
 0x75e   :  { %v2275_v9 = vpop.f32.mrb[85].mxu1  ;;  %v2304_v10 = vmul.f32 0.35355338, %v10582_v14 }
 0x75f   :  { %v10583_v33 = vpop.f32.mrb[86].mxu1  ;;  %v2302_v31 = vmul.f32 0.35355338, %v2275_v9  ;;  %v13470_v9 = vpop.permute.xlu1 %2935 }
 0x760   :  { %v2305_v63 = vmul.f32 0.35355338, %v10583_v33  ;;  %v2278_v25 = vpop.f32.mrb[87].mxu1  ;;  %v2348_v14 = vsel %vm1709_vm2, %v2304_v10, -inf }
 0x761   :  { %2340 = vmax.xlane.f32.xlu0 %v2339_v45  ;;  %v2303_v55 = vmul.f32 0.35355338, %v2278_v25  ;;  %v2342_v45 = vsel %vm1709_vm2, %v2302_v31, -inf }
 0x762   :  { %v13446_v11 = vpop.f32.mrb[64].mxu0  ;;  %v2351_v30 = vsel %vm1709_vm2, %v2305_v63, -inf }
 0x763   :  { %v13448_v1 = vpop.f32.mrb[65].mxu0  ;;  %2352 = vmax.xlane.f32.xlu1 %v2351_v30  ;;  %v2345_v33 = vsel %vm1709_vm2, %v2303_v55, -inf }
 0x764   :  { %v13451_v32 = vpop.f32.mrb[66].mxu0 }
 0x765   :  { %v13453_v35 = vpop.f32.mrb[67].mxu0  ;;  %2349 = vmax.xlane.f32.xlu0 %v2348_v14  ;;  %v13472_v14 = vpop.permute.xlu1 %2937 }
 0x767   :  { %2346 = vmax.xlane.f32.xlu1 %v2345_v33 }
 0x769   :  { %2343 = vmax.xlane.f32.xlu0 %v2342_v45  ;;  %v13474_v33 = vpop.permute.xlu1 %2939 }
 0x76a   :  { %v13458_v25 = vpop.f32.mrb[68].mxu0 }
 0x76b   :  { %v13460_v22 = vpop.f32.mrb[69].mxu0 }
 0x76c   :  { %v13462_v59 = vpop.f32.mrb[70].mxu0 }
 0x76d   :  { %v13464_v30 = vpop.f32.mrb[71].mxu0 }
 0x778   :  { %3038 = vrot.lane.b32.xlu1 %v13078_v20, %s12325_s19 }
 0x77f   :  { %2925 = vrot.lane.b32.xlu0 %v13060_v52, %s12326_s3 }
 0x7e6   :  { %v2338_v45 = vpop.xlane.xlu0 %2337 }
 0x7e7   :  { %v2364_v41 = vsub.f32 %v2300_v0, %v2338_v45 }
 0x7e9   :  { %v2390_v57 = vmul.f32 1.442695, %v2364_v41  ;;  %v2335_v56 = vpop.xlane.xlu1 %2334 }
 0x7ea   :  { %v2332_v26 = vpop.xlane.xlu0 %2331  ;;  %v2363_v28 = vsub.f32 %v2299_v47, %v2335_v56 }
 0x7eb   :  { %11680 = vpow2.f32 %v2390_v57  ;;  %v2362_v4 = vsub.f32 %v2298_v48, %v2332_v26 }
 0x7ec   :  { %v2388_v8 = vmul.f32 1.442695, %v2363_v28 }
 0x7ed   :  { %v2386_v27 = vmul.f32 1.442695, %v2362_v4 }
 0x7ee   :  { %v2341_v39 = vpop.xlane.xlu0 %2340 }
 0x7ef   :  { %11682 = vpow2.f32 %v2386_v27  ;;  %v2365_v15 = vsub.f32 %v2301_v37, %v2341_v39 }
 0x7f0   :  { %v2353_v24 = vpop.xlane.xlu1 %2352 }
 0x7f1   :  { %v2392_v23 = vmul.f32 1.442695, %v2365_v15  ;;  %v2369_v41 = vsub.f32 %v2305_v63, %v2353_v24 }
 0x7f2   :  { %v2350_v54 = vpop.xlane.xlu0 %2349 }
 0x7f3   :  { %11684 = vpow2.f32 %v2392_v23  ;;  %v2368_v34 = vsub.f32 %v2304_v10, %v2350_v54  ;;  %v2400_v15 = vmul.f32 1.442695, %v2369_v41  ;;  %v13516_v41 = vmul.f32 0.35355338, %v13448_v1 }
 0x7f4   :  { %v2347_v29 = vpop.xlane.xlu1 %2346  ;;  %11686 = vpow2.f32 %v2388_v8 }
 0x7f5   :  { %v13476_v13 = vpop.eup %11680  ;;  %v2398_v0 = vmul.f32 1.442695, %v2368_v34  ;;  %v2367_v45 = vsub.f32 %v2303_v55, %v2347_v29  ;;  %v2306_v1 = vsel %vm1709_vm2, %v13516_v41, -inf }
 0x7f6   :  { %v2344_v57 = vpop.xlane.xlu0 %2343  ;;  %v2432_v4 = vsel %vm1709_vm2, %v13476_v13, 0.0 }
 0x7f7   :  { %11688 = vpow2.f32 %v2398_v0  ;;  %v2396_v27 = vmul.f32 1.442695, %v2367_v45  ;;  %v2366_v39 = vsub.f32 %v2302_v31, %v2344_v57  ;;  %2433 = vadd.xlane.f32.xlu0 %v2432_v4  ;;  %v13513_v31 = vmul.f32 0.35355338, %v13453_v35 }
 0x7f8   :  { %v13519_v0 = vmul.f32 0.35355338, %v13460_v22  ;;  %v13524_v57 = vmul.f32 0.35355338, %v13446_v11  ;;  %v13527_v4 = vmul.f32 0.35355338, %v13464_v30 }
 0x7f9   :  { %v13480_v28 = vpop.eup %11682  ;;  %11690 = vpow2.f32 %v2396_v27  ;;  %v2394_v54 = vmul.f32 1.442695, %v2366_v39  ;;  %v2309_v45 = vsel %vm1709_vm2, %v13513_v31, -inf  ;;  %v13534_v22 = vmul.f32 0.35355338, %v13451_v32 }
 0x7fa   :  { %v2426_v23 = vsel %vm1709_vm2, %v13480_v28, 0.0  ;;  %v2318_v35 = vsel %vm1709_vm2, %v13519_v0, -inf  ;;  %v13537_v27 = vmul.f32 0.35355338, %v13458_v25  ;;  %v2321_v11 = vsel %vm1709_vm2, %v13527_v4, -inf }
 0x7fb   :  { %11692 = vpow2.f32 %v2394_v54  ;;  %2427 = vadd.xlane.f32.xlu0 %v2426_v23  ;;  %v2312_v30 = vsel %vm1709_vm2, %v13524_v57, -inf  ;;  %v13544_v39 = vmul.f32 0.35355338, %v13462_v59  ;;  %v2315_v32 = vsel %vm1709_vm2, %v13534_v22, -inf  ;;  %v2926_v59 = vpop.permute.xlu0 %2925  ;;  %v3039_v23 = vpop.permute.xlu1 %3038 }
 0x7fc   :  { %11694 = vpow2.f32 %v2400_v15  ;;  %v2324_v15 = vsel %vm1709_vm2, %v13537_v27, -inf }
 0x7fd   :  { %v13484_v34 = vpop.eup %11684  ;;  %v2327_v25 = vsel %vm1709_vm2, %v13544_v39, -inf }
 0x7fe   :  { %v2435_v29 = vsel %vm1709_vm2, %v13484_v34, 0.0  ;;  %v13488_v8 = vpop.eup %11686 }
 0x7ff   :  { %2436 = vadd.xlane.f32.xlu1 %v2435_v29  ;;  %v2429_v26 = vsel %vm1709_vm2, %v13488_v8, 0.0 }
 0x801   :  { %v13490_v24 = vpop.eup %11688 }
 0x802   :  { %v2444_v56 = vsel %vm1709_vm2, %v13490_v24, 0.0 }
 0x803   :  { %v13496_v48 = vpop.eup %11690  ;;  %2430 = vadd.xlane.f32.xlu1 %v2429_v26  ;;  %2445 = vadd.xlane.f32.xlu0 %v2444_v56 }
 0x804   :  { %v2441_v37 = vsel %vm1709_vm2, %v13496_v48, 0.0 }
 0x805   :  { %v13498_v47 = vpop.eup %11692 }
 0x806   :  { %v2438_v10 = vsel %vm1709_vm2, %v13498_v47, 0.0  ;;  %v13504_v63 = vpop.eup %11694 }
 0x807   :  { %2442 = vadd.xlane.f32.xlu1 %v2441_v37  ;;  %2439 = vadd.xlane.f32.xlu0 %v2438_v10  ;;  %v2447_v55 = vsel %vm1709_vm2, %v13504_v63, 0.0 }
 0x80b   :  { %2448 = vadd.xlane.f32.xlu0 %v2447_v55 }
 0x818   :  { %3040 = vrot.lane.b32.xlu1 %v13076_v18, %s12325_s19 }
 0x821   :  { %2927 = vrot.lane.b32.xlu0 %v13058_v50, %s12326_s3 }
 0x83c   :  { %2310 = vmax.xlane.f32.xlu1 %v2309_v45 }
 0x840   :  { %2319 = vmax.xlane.f32.xlu1 %v2318_v35  ;;  %2307 = vmax.xlane.f32.xlu0 %v2306_v1 }
 0x844   :  { %2322 = vmax.xlane.f32.xlu1 %v2321_v11  ;;  %2313 = vmax.xlane.f32.xlu0 %v2312_v30 }
 0x848   :  { %2325 = vmax.xlane.f32.xlu1 %v2324_v15  ;;  %2316 = vmax.xlane.f32.xlu0 %v2315_v32 }
 0x84c   :  { %2328 = vmax.xlane.f32.xlu1 %v2327_v25 }
 0x85d   :  { %2929 = vrot.lane.b32.xlu1 %v13070_v6, %s12326_s3 }
 0x85e   :  { %3042 = vrot.lane.b32.xlu0 %v13088_v2, %s12325_s19 }
 0x861   :  { %3032 = vrot.lane.b32.xlu1 %v13076_v18, %s12326_s3 }
 0x862   :  { %2931 = vrot.lane.b32.xlu0 %v13068_v3, %s12326_s3 }
 0x865   :  { %3036 = vrot.lane.b32.xlu1 %v13086_v21, %s12326_s3 }
 0x866   :  { %3044 = vrot.lane.b32.xlu0 %v13086_v21, %s12325_s19 }
 0x86a   :  { %3030 = vrot.lane.b32.xlu0 %v13078_v20, %s12326_s3 }
 0x86e   :  { %3034 = vrot.lane.b32.xlu0 %v13088_v2, %s12326_s3 }
 0x884   :  { %v2434_v54 = vpop.xlane.xlu0 %2433 }
 0x888   :  { %v2428_v29 = vpop.xlane.xlu0 %2427 }
 0x88c   :  { %v2437_v26 = vpop.xlane.xlu1 %2436 }
 0x88d   :  { %11696 = vrcp.f32 %v2437_v26 }
 0x88e   :  { %11698 = vrcp.f32 %v2428_v29 }
 0x88f   :  { %11700 = vrcp.f32 %v2434_v54 }
 0x890   :  { %v2431_v56 = vpop.xlane.xlu1 %2430  ;;  %v2446_v37 = vpop.xlane.xlu0 %2445 }
 0x891   :  { %11702 = vrcp.f32 %v2431_v56 }
 0x894   :  { %v2443_v10 = vpop.xlane.xlu1 %2442  ;;  %v2440_v55 = vpop.xlane.xlu0 %2439 }
 0x895   :  { %11704 = vrcp.f32 %v2443_v10 }
 0x896   :  { %11706 = vrcp.f32 %v2440_v55 }
 0x897   :  { %11708 = vrcp.f32 %v2446_v37  ;;  %v11697_v45 = vpop.eup %11696 }
 0x898   :  { %v2449_v35 = vpop.xlane.xlu0 %2448  ;;  %v11699_v1 = vpop.eup %11698  ;;  %v2477_v15 = vmul.f32 %v11697_v45, %v13484_v34  ;;  %v2954_v34 = vsel %vm1502_vm1, %v13388_v36, 0  ;;  %v2957_v36 = vsel %vm1502_vm1, %v13470_v9, 0 }
 0x899   :  { %11710 = vrcp.f32 %v2449_v35  ;;  %v11701_v11 = vpop.eup %11700  ;;  %v2474_v32 = vmul.f32 %v11699_v1, %v13480_v28 }
 0x89a   :  { %v2476_v54 = vmul.f32 %v11701_v11, %v13476_v13 }
 0x89b   :  { %v11703_v30 = vpop.eup %11702 }
 0x89c   :  { %v2475_v25 = vmul.f32 %v11703_v30, %v13488_v8  ;;  %v2487_v56 = vpack.c.bf16 %v2477_v15, %v2476_v54 }
 0x89e   :  { %v2486_v29 = vpack.c.bf16 %v2475_v25, %v2474_v32 }
 0x89f   :  { %v11705_v26 = vpop.eup %11704 }
 0x8a0   :  { %v11707_v10 = vpop.eup %11706  ;;  %10608 = vmatprep.mubr.msk.bf16.mxu1 %vm1709_vm2, %v2486_v29  ;;  %v2479_v37 = vmul.f32 %v11705_v26, %v13496_v48 }
 0x8a1   :  { %v11709_v55 = vpop.eup %11708  ;;  %10609 = vmatmul.mubr.msk.bf16.vlgmr.msra.gmra.mrb[88].mxu1 %vm1709_vm2, %v2487_v56  ;;  %v2478_v28 = vmul.f32 %v11707_v10, %v13498_v47  ;;  %v2960_v47 = vsel %vm1502_vm1, %v13472_v14, 0 }
 0x8a2   :  { %10653 = vmatpush3.bf16.xpose.msra.mxu1 %v2954_v34  ;;  %v2480_v45 = vmul.f32 %v11709_v55, %v13490_v24  ;;  %v2963_v24 = vsel %vm1502_vm1, %v13474_v33, 0 }
 0x8a3   :  { %v11711_v8 = vpop.eup %11710  ;;  %11383 = vmatprep.subr.msk.bf16.mxu1 %vm1502_vm1, %v13470_v9  ;;  %v2488_v13 = vpack.c.bf16 %v2479_v37, %v2478_v28  ;;  %v2928_v9 = vpop.permute.xlu0 %2927 }
 0x8a4   :  { %v2481_v35 = vmul.f32 %v11711_v8, %v13504_v63  ;;  %v3059_v63 = vsel %vm1502_vm1, %v3039_v23, 0 }
 0x8a5   :  { %10612 = vmatprep.mubr.msk.bf16.mxu1 %vm1709_vm2, %v2488_v13 }
 0x8a6   :  { %v2489_v48 = vpack.c.bf16 %v2481_v35, %v2480_v45 }
 0x8a9   :  { %10613 = vmatmul.mubr.msk.bf16.gmra.mrb[92].mxu1 %vm1709_vm2, %v2489_v48 }
 0x8aa   :  { %10655 = vmatpush3.bf16.xpose.msra.mxu1 %v2957_v36  ;;  %10660 = vmatprep.mubr.msk.bf16.mxu1 %vm1502_vm1, %v2926_v59  ;;  %v3041_v59 = vpop.permute.xlu1 %3040 }
 0x8ab   :  { %11384 = vmatprep.subr.msk.bf16.mxu1 %vm1502_vm1, %v13472_v14  ;;  %v3062_v1 = vsel %vm1502_vm1, %v3041_v59, 0 }
 0x8b2   :  { %10657 = vmatpush3.bf16.xpose.msra.mxu1 %v2960_v47 }
 0x8b3   :  { %11385 = vmatprep.subr.msk.bf16.mxu1 %vm1502_vm1, %v13474_v33 }
 0x8ba   :  { %10659 = vmatpush3.bf16.xpose.msra.mxu1 %v2963_v24 }
 0x8bb   :  { %11386 = vmatprep.subr.msk.bf16.mxu1 %vm1502_vm1, %v3039_v23 }
 0x8c1   :  { %10661 = vmatmul.mubr.msk.bf16.vlgmr.msra.gmra.mrb[96].mxu1 %vm1502_vm1, %v2928_v9 }
 0x8c2   :  { %10669 = vmatpush3.bf16.xpose.msra.mxu1 %v3059_v63 }
 0x8c3   :  { %11387 = vmatprep.subr.msk.bf16.mxu1 %vm1502_vm1, %v3041_v59 }
 0x8c9   :  { %v2311_v14 = vpop.xlane.xlu1 %2310 }
 0x8ca   :  { %v2355_v11 = vsub.f32 %v13513_v31, %v2311_v14  ;;  %10671 = vmatpush3.bf16.xpose.msra.mxu1 %v3062_v1 }
 0x8cc   :  { %v2372_v30 = vmul.f32 1.442695, %v2355_v11 }
 0x8cd   :  { %v2320_v33 = vpop.xlane.xlu1 %2319  ;;  %v2308_v15 = vpop.xlane.xlu0 %2307 }
 0x8ce   :  { %11712 = vpow2.f32 %v2372_v30  ;;  %v2354_v32 = vsub.f32 %v13516_v41, %v2308_v15  ;;  %v2358_v37 = vsub.f32 %v13519_v0, %v2320_v33 }
 0x8d0   :  { %v2370_v25 = vmul.f32 1.442695, %v2354_v32  ;;  %v2378_v8 = vmul.f32 1.442695, %v2358_v37 }
 0x8d1   :  { %v2323_v54 = vpop.xlane.xlu1 %2322  ;;  %v2314_v29 = vpop.xlane.xlu0 %2313 }
 0x8d2   :  { %v2359_v23 = vsub.f32 %v13527_v4, %v2323_v54  ;;  %v2356_v26 = vsub.f32 %v13524_v57, %v2314_v29  ;;  %11714 = vpow2.f32 %v2370_v25 }
 0x8d4   :  { %v2380_v56 = vmul.f32 1.442695, %v2359_v23  ;;  %v2374_v10 = vmul.f32 1.442695, %v2356_v26 }
 0x8d5   :  { %v2326_v31 = vpop.xlane.xlu1 %2325  ;;  %v2317_v55 = vpop.xlane.xlu0 %2316 }
 0x8d6   :  { %11716 = vpow2.f32 %v2380_v56  ;;  %v2357_v34 = vsub.f32 %v13534_v22, %v2317_v55  ;;  %v2360_v13 = vsub.f32 %v13537_v27, %v2326_v31 }
 0x8d7   :  { %11718 = vpow2.f32 %v2374_v10 }
 0x8d8   :  { %v13606_v28 = vpop.eup %11712  ;;  %v2376_v41 = vmul.f32 1.442695, %v2357_v34  ;;  %v2382_v36 = vmul.f32 1.442695, %v2360_v13 }
 0x8d9   :  { %v2329_v4 = vpop.xlane.xlu1 %2328  ;;  %v3043_v45 = vpop.permute.xlu0 %3042  ;;  %v2405_v57 = vsel %vm1709_vm2, %v13606_v28, 0.0 }
 0x8da   :  { %v2361_v35 = vsub.f32 %v13544_v39, %v2329_v4  ;;  %2406 = vadd.xlane.f32.xlu1 %v2405_v57  ;;  %11388 = vmatprep.subr.msk.bf16.mxu1 %vm1502_vm1, %v3043_v45  ;;  %v3065_v0 = vsel %vm1502_vm1, %v3043_v45, 0  ;;  %11720 = vpow2.f32 %v2376_v41 }
 0x8db   :  { %10673 = vmatpush3.bf16.xpose.msra.mxu1 %v3065_v0  ;;  %11722 = vpow2.f32 %v2378_v8 }
 0x8dc   :  { %v2384_v22 = vmul.f32 1.442695, %v2361_v35  ;;  %v13614_v48 = vpop.eup %11714 }
 0x8dd   :  { %v2930_v27 = vpop.permute.xlu1 %2929  ;;  %v2932_v47 = vpop.permute.xlu0 %2931  ;;  %v2402_v39 = vsel %vm1709_vm2, %v13614_v48, 0.0 }
 0x8de   :  { %11724 = vpow2.f32 %v2384_v22  ;;  %10664 = vmatprep.mubr.msk.bf16.mxu1 %vm1502_vm1, %v2930_v27  ;;  %2403 = vadd.xlane.f32.xlu0 %v2402_v39 }
 0x8df   :  { %10665 = vmatmul.mubr.msk.bf16.gmra.mrb[100].mxu1 %vm1502_vm1, %v2932_v47  ;;  %11726 = vpow2.f32 %v2382_v36 }
 0x8e0   :  { %v13620_v24 = vpop.eup %11716 }
 0x8e1   :  { %v13622_v9 = vpop.eup %11718  ;;  %v3045_v63 = vpop.permute.xlu0 %3044  ;;  %v2417_v59 = vsel %vm1709_vm2, %v13620_v24, 0.0 }
 0x8e2   :  { %2418 = vadd.xlane.f32.xlu1 %v2417_v59  ;;  %v2408_v14 = vsel %vm1709_vm2, %v13622_v9, 0.0  ;;  %11389 = vmatprep.subr.msk.bf16.mxu1 %vm1502_vm1, %v3045_v63  ;;  %v3068_v1 = vsel %vm1502_vm1, %v3045_v63, 0  ;;  %v3033_v25 = vpop.permute.xlu1 %3032 }
 0x8e3   :  { %2409 = vadd.xlane.f32.xlu0 %v2408_v14  ;;  %10675 = vmatpush3.bf16.xpose.msra.mxu1 %v3068_v1 }
 0x8e4   :  { %v13630_v11 = vpop.eup %11720 }
 0x8e5   :  { %v3031_v30 = vpop.permute.xlu0 %3030  ;;  %v2411_v33 = vsel %vm1709_vm2, %v13630_v11, 0.0  ;;  %v13635_v15 = vpop.eup %11722 }
 0x8e6   :  { %10676 = vmatprep.mubr.msk.bf16.mxu1 %vm1502_vm1, %v3031_v30  ;;  %v2414_v23 = vsel %vm1709_vm2, %v13635_v15, 0.0  ;;  %v3037_v10 = vpop.permute.xlu1 %3036 }
 0x8e7   :  { %2412 = vadd.xlane.f32.xlu0 %v2411_v33 }
 0x8e8   :  { %v13637_v32 = vpop.eup %11724 }
 0x8e9   :  { %v3035_v54 = vpop.permute.xlu0 %3034  ;;  %v2423_v29 = vsel %vm1709_vm2, %v13637_v32, 0.0  ;;  %v13644_v26 = vpop.eup %11726 }
 0x8ea   :  { %2424 = vadd.xlane.f32.xlu1 %v2423_v29  ;;  %10677 = vmatmul.mubr.msk.bf16.vlgmr.msra.gmra.mrb[104].mxu1 %vm1502_vm1, %v3033_v25  ;;  %v2420_v56 = vsel %vm1709_vm2, %v13644_v26, 0.0 }
 0x8eb   :  { %2415 = vadd.xlane.f32.xlu0 %v2414_v23  ;;  %10680 = vmatprep.mubr.msk.bf16.mxu1 %vm1502_vm1, %v3035_v54 }
 0x8ef   :  { %2421 = vadd.xlane.f32.xlu0 %v2420_v56 }
 0x8f2   :  { %10681 = vmatmul.mubr.msk.bf16.gmra.mrb[108].mxu1 %vm1502_vm1, %v3037_v10 }
 0x8fb   :  { %2492 = vrot.lane.b32.xlu1 %v13058_v50, %s12324_s1 }
 0x8ff   :  { %2494 = vrot.lane.b32.xlu1 %v13070_v6, %s12324_s1 }
 0x903   :  { %2496 = vrot.lane.b32.xlu1 %v13068_v3, %s12324_s1 }
 0x905   :  { %2490 = vrot.lane.b32.xlu0 %v13060_v52, %s12324_s1 }
 0x907   :  { %3337 = vrot.lane.b32.xlu1 %v13058_v50, %s12327_s0 }
 0x909   :  { %3335 = vrot.lane.b32.xlu0 %v13060_v52, %s12327_s0 }
 0x90d   :  { %3339 = vrot.lane.b32.xlu0 %v13070_v6, %s12327_s0 }
 0x967   :  { %v2407_v37 = vpop.xlane.xlu1 %2406 }
 0x968   :  { %11728 = vrcp.f32 %v2407_v37 }
 0x96b   :  { %v2404_v31 = vpop.xlane.xlu0 %2403 }
 0x96c   :  { %11730 = vrcp.f32 %v2404_v31 }
 0x96f   :  { %v2419_v34 = vpop.xlane.xlu1 %2418 }
 0x970   :  { %v2410_v55 = vpop.xlane.xlu0 %2409 }
 0x972   :  { %v11729_v13 = vpop.eup %11728 }
 0x973   :  { %v2467_v39 = vmul.f32 %v11729_v13, %v13606_v28 }
 0x974   :  { %v2413_v41 = vpop.xlane.xlu0 %2412  ;;  %v13664_v8 = vpop.f32.mrb[88].mxu1 }
 0x975   :  { %v13666_v4 = vpop.f32.mrb[89].mxu1  ;;  %11732 = vrcp.f32 %v2413_v41 }
 0x976   :  { %v13668_v45 = vpop.f32.mrb[90].mxu1  ;;  %v11731_v57 = vpop.eup %11730 }
 0x977   :  { %v13672_v0 = vpop.f32.mrb[91].mxu1  ;;  %v2425_v22 = vpop.xlane.xlu1 %2424  ;;  %v2466_v47 = vmul.f32 %v11731_v57, %v13614_v48 }
 0x978   :  { %v2416_v27 = vpop.xlane.xlu0 %2415 }
 0x979   :  { %v2482_v63 = vpack.c.bf16 %v2467_v39, %v2466_v47  ;;  %11734 = vrcp.f32 %v2416_v27 }
 0x97a   :  { %11736 = vrcp.f32 %v2410_v55 }
 0x97b   :  { %10592 = vmatprep.mubr.msk.bf16.mxu0 %vm1709_vm2, %v2482_v63  ;;  %v2493_v30 = vpop.permute.xlu1 %2492  ;;  %11738 = vrcp.f32 %v2419_v34 }
 0x97c   :  { %v2422_v59 = vpop.xlane.xlu0 %2421  ;;  %v13679_v14 = vpop.f32.mrb[92].mxu1 }
 0x97d   :  { %v13681_v1 = vpop.f32.mrb[93].mxu1  ;;  %11740 = vrcp.f32 %v2422_v59 }
 0x97e   :  { %v13683_v33 = vpop.f32.mrb[94].mxu1  ;;  %11742 = vrcp.f32 %v2425_v22 }
 0x97f   :  { %v13687_v54 = vpop.f32.mrb[95].mxu1  ;;  %v2495_v29 = vpop.permute.xlu1 %2494 }
 0x980   :  { %v2491_v48 = vpop.permute.xlu0 %2490  ;;  %v11733_v23 = vpop.eup %11732 }
 0x981   :  { %10584 = vmatprep.subr.bf16.mxu0 %v2491_v48  ;;  %v2469_v55 = vmul.f32 %v11733_v23, %v13630_v11 }
 0x982   :  { %10585 = vmatpush3.bf16.msra.mxu0 %v2491_v48 }
 0x983   :  { %10586 = vmatprep.subr.bf16.mxu0 %v2493_v30  ;;  %v11735_v56 = vpop.eup %11734  ;;  %v2497_v37 = vpop.permute.xlu1 %2496 }
 0x984   :  { %v11737_v10 = vpop.eup %11736  ;;  %v2470_v41 = vmul.f32 %v11735_v56, %v13635_v15 }
 0x985   :  { %v11739_v31 = vpop.eup %11738  ;;  %v2468_v34 = vmul.f32 %v11737_v10, %v13622_v9 }
 0x986   :  { %10587 = vmatpush3.bf16.msra.mxu0 %v2493_v30  ;;  %v2471_v13 = vmul.f32 %v11739_v31, %v13620_v24 }
 0x987   :  { %10588 = vmatprep.subr.bf16.mxu0 %v2495_v29  ;;  %v2483_v57 = vpack.c.bf16 %v2469_v55, %v2468_v34  ;;  %v11741_v27 = vpop.eup %11740 }
 0x988   :  { %v2484_v47 = vpack.c.bf16 %v2471_v13, %v2470_v41  ;;  %v11743_v22 = vpop.eup %11742  ;;  %v2472_v39 = vmul.f32 %v11741_v27, %v13644_v26 }
 0x989   :  { %v2473_v15 = vmul.f32 %v11743_v22, %v13637_v32 }
 0x98a   :  { %10589 = vmatpush3.bf16.msra.mxu0 %v2495_v29 }
 0x98b   :  { %10590 = vmatprep.subr.bf16.mxu0 %v2497_v37  ;;  %v2485_v29 = vpack.c.bf16 %v2473_v15, %v2472_v39 }
 0x98e   :  { %10591 = vmatpush3.bf16.msra.mxu0 %v2497_v37 }
 0x991   :  { %10593 = vmatmul.mubr.msk.bf16.vlgmr.msra.gmra.mrb[72].mxu0 %vm1709_vm2, %v2483_v57 }
 0x992   :  { %10596 = vmatprep.mubr.msk.bf16.mxu0 %vm1709_vm2, %v2484_v47 }
 0x994   :  { %v10662_v63 = vpop.f32.mrb[96].mxu1 }
 0x995   :  { %v13698_v11 = vmul.f32 0.35355338, %v10662_v63  ;;  %v2999_v59 = vpop.f32.mrb[97].mxu1 }
 0x996   :  { %v10663_v9 = vpop.f32.mrb[98].mxu1  ;;  %v13701_v30 = vmul.f32 0.35355338, %v2999_v59 }
 0x997   :  { %v3002_v24 = vpop.f32.mrb[99].mxu1  ;;  %v3157_v48 = vsel %vm1709_vm2, %v13698_v11, -inf  ;;  %v13710_v56 = vmul.f32 0.35355338, %v10663_v9 }
 0x998   :  { %v13705_v23 = vmul.f32 0.35355338, %v3002_v24  ;;  %3158 = vmax.xlane.f32.xlu0 %v3157_v48  ;;  %v3151_v32 = vsel %vm1709_vm2, %v13701_v30, -inf }
 0x999   :  { %10597 = vmatmul.mubr.msk.bf16.gmra.mrb[76].mxu0 %vm1709_vm2, %v2485_v29  ;;  %v3160_v10 = vsel %vm1709_vm2, %v13710_v56, -inf }
 0x99a   :  { %v3154_v26 = vsel %vm1709_vm2, %v13705_v23, -inf }
 0x99b   :  { %3155 = vmax.xlane.f32.xlu1 %v3154_v26 }
 0x99c   :  { %3152 = vmax.xlane.f32.xlu0 %v3151_v32 }
 0x9a0   :  { %3161 = vmax.xlane.f32.xlu0 %v3160_v10 }
 0x9b2   :  { %v10666_v37 = vpop.f32.mrb[100].mxu1 }
 0x9b3   :  { %v13716_v31 = vmul.f32 0.35355338, %v10666_v37  ;;  %v3015_v55 = vpop.f32.mrb[101].mxu1 }
 0x9b4   :  { %v10667_v41 = vpop.f32.mrb[102].mxu1  ;;  %v13718_v34 = vmul.f32 0.35355338, %v3015_v55 }
 0x9b5   :  { %v13720_v13 = vmul.f32 0.35355338, %v10667_v41  ;;  %v3018_v57 = vpop.f32.mrb[103].mxu1  ;;  %v3169_v27 = vsel %vm1709_vm2, %v13716_v31, -inf }
 0x9b6   :  { %3170 = vmax.xlane.f32.xlu0 %v3169_v27  ;;  %v13724_v47 = vmul.f32 0.35355338, %v3018_v57  ;;  %v3163_v39 = vsel %vm1709_vm2, %v13718_v34, -inf }
 0x9b7   :  { %v3172_v22 = vsel %vm1709_vm2, %v13720_v13, -inf }
 0x9b8   :  { %3173 = vmax.xlane.f32.xlu1 %v3172_v22  ;;  %v3166_v63 = vsel %vm1709_vm2, %v13724_v47, -inf }
 0x9ba   :  { %3164 = vmax.xlane.f32.xlu0 %v3163_v39 }
 0x9bc   :  { %3167 = vmax.xlane.f32.xlu1 %v3166_v63 }
 0x9bd   :  { %v10678_v59 = vpop.f32.mrb[104].mxu1 }
 0x9be   :  { %v13732_v15 = vmul.f32 0.35355338, %v10678_v59  ;;  %v3104_v9 = vpop.f32.mrb[105].mxu1 }
 0x9bf   :  { %v10679_v24 = vpop.f32.mrb[106].mxu1  ;;  %v13734_v48 = vmul.f32 0.35355338, %v3104_v9 }
 0x9c0   :  { %v13736_v29 = vmul.f32 0.35355338, %v10679_v24  ;;  %v3107_v26 = vpop.f32.mrb[107].mxu1  ;;  %v3181_v32 = vsel %vm1709_vm2, %v13732_v15, -inf }
 0x9c1   :  { %3182 = vmax.xlane.f32.xlu0 %v3181_v32  ;;  %v13740_v10 = vmul.f32 0.35355338, %v3107_v26  ;;  %v3175_v55 = vsel %vm1709_vm2, %v13734_v48, -inf  ;;  %v1479_v26 = vld [vmem:[%s16468_s8 + $0x4] sm:$0xf] }
 0x9c2   :  { %v3184_v37 = vsel %vm1709_vm2, %v13736_v29, -inf  ;;  %11380 = vmatprep.subr.msk.bf16.mxu0 %vm2700_vm3, %v1479_v26  ;;  %v2702_v32 = vsel %vm2700_vm3, %v1479_v26, 0  ;;  %v13786_v26 = vpop.permute.xlu1 %3337 }
 0x9c3   :  { %3185 = vmax.xlane.f32.xlu1 %v3184_v37  ;;  %v3178_v22 = vsel %vm1709_vm2, %v13740_v10, -inf  ;;  %10617 = vmatpush3.bf16.msra.mxu0 %v2702_v32  ;;  %v13768_v37 = vld [vmem:[%s16468_s8] sm:$0xf] }
 0x9c4   :  { %11381 = vmatprep.subr.msk.bf16.mxu0 %vm2700_vm3, %v13768_v37 }
 0x9c5   :  { %3176 = vmax.xlane.f32.xlu0 %v3175_v55  ;;  %v10682_v41 = vpop.f32.mrb[108].mxu1 }
 0x9c6   :  { %v13746_v57 = vmul.f32 0.35355338, %v10682_v41  ;;  %v3120_v27 = vpop.f32.mrb[109].mxu1 }
 0x9c7   :  { %3179 = vmax.xlane.f32.xlu1 %v3178_v22  ;;  %v10683_v39 = vpop.f32.mrb[110].mxu1  ;;  %v13750_v63 = vmul.f32 0.35355338, %v3120_v27 }
 0x9c8   :  { %v3123_v59 = vpop.f32.mrb[111].mxu1  ;;  %v3193_v9 = vsel %vm1709_vm2, %v13746_v57, -inf  ;;  %v13772_v55 = vmul.f32 0.35355338, %v10683_v39 }
 0x9c9   :  { %3194 = vmax.xlane.f32.xlu0 %v3193_v9  ;;  %v3187_v24 = vsel %vm1709_vm2, %v13750_v63, -inf  ;;  %v13774_v41 = vmul.f32 0.35355338, %v3123_v59  ;;  %v13782_v9 = vpop.permute.xlu0 %3335 }
 0x9ca   :  { %v3196_v27 = vsel %vm1709_vm2, %v13772_v55, -inf }
 0x9cb   :  { %v3190_v22 = vsel %vm1709_vm2, %v13774_v41, -inf }
 0x9cd   :  { %3188 = vmax.xlane.f32.xlu0 %v3187_v24  ;;  %v13784_v24 = vpop.permute.xlu0 %3339 }
 0x9d8   :  { %3424 = vrot.lane.b32.xlu1 %v13078_v20, %s12327_s0 }
 0x9e3   :  { %3341 = vrot.lane.b32.xlu0 %v13068_v3, %s12327_s0 }
 0x9fc   :  { %3197 = vmax.xlane.f32.xlu1 %v3196_v27 }
 0xa00   :  { %3191 = vmax.xlane.f32.xlu1 %v3190_v22 }
 0xa11   :  { %3426 = vrot.lane.b32.xlu1 %v13076_v18, %s12327_s0 }
 0xa25   :  { %v3159_v39 = vpop.xlane.xlu0 %3158 }
 0xa26   :  { %v3201_v59 = vsub.f32 %v13698_v11, %v3159_v39 }
 0xa28   :  { %v3219_v32 = vmul.f32 1.442695, %v3201_v59  ;;  %v3156_v25 = vpop.xlane.xlu1 %3155 }
 0xa29   :  { %v3153_v28 = vpop.xlane.xlu0 %3152  ;;  %v3200_v22 = vsub.f32 %v13705_v23, %v3156_v25 }
 0xa2a   :  { %11744 = vpow2.f32 %v3219_v32  ;;  %v3199_v27 = vsub.f32 %v13701_v30, %v3153_v28 }
 0xa2b   :  { %v3217_v17 = vmul.f32 1.442695, %v3200_v22 }
 0xa2c   :  { %v3215_v35 = vmul.f32 1.442695, %v3199_v27 }
 0xa2d   :  { %v3162_v36 = vpop.xlane.xlu0 %3161 }
 0xa2e   :  { %11746 = vpow2.f32 %v3215_v35  ;;  %v3202_v58 = vsub.f32 %v13710_v56, %v3162_v36 }
 0xa30   :  { %v3221_v49 = vmul.f32 1.442695, %v3202_v58 }
 0xa32   :  { %11748 = vpow2.f32 %v3221_v49 }
 0xa33   :  { %11750 = vpow2.f32 %v3217_v17 }
 0xa34   :  { %v13792_v3 = vpop.eup %11744 }
 0xa35   :  { %v3253_v11 = vsel %vm1709_vm2, %v13792_v3, 0.0 }
 0xa36   :  { %3254 = vadd.xlane.f32.xlu0 %v3253_v11 }
 0xa38   :  { %v13796_v39 = vpop.eup %11746 }
 0xa39   :  { %v3247_v25 = vsel %vm1709_vm2, %v13796_v39, 0.0 }
 0xa3a   :  { %3248 = vadd.xlane.f32.xlu0 %v3247_v25 }
 0xa3c   :  { %v13800_v28 = vpop.eup %11748 }
 0xa3d   :  { %v3256_v35 = vsel %vm1709_vm2, %v13800_v28, 0.0  ;;  %v13804_v58 = vpop.eup %11750 }
 0xa3e   :  { %3257 = vadd.xlane.f32.xlu1 %v3256_v35  ;;  %v3250_v49 = vsel %vm1709_vm2, %v13804_v58, 0.0 }
 0xa42   :  { %3251 = vadd.xlane.f32.xlu1 %v3250_v49 }
 0xa43   :  { %v3171_v17 = vpop.xlane.xlu0 %3170 }
 0xa44   :  { %v3205_v36 = vsub.f32 %v13716_v31, %v3171_v17 }
 0xa45   :  { %v3174_v30 = vpop.xlane.xlu1 %3173 }
 0xa46   :  { %v3227_v23 = vmul.f32 1.442695, %v3205_v36  ;;  %v3206_v56 = vsub.f32 %v13720_v13, %v3174_v30 }
 0xa47   :  { %v3165_v59 = vpop.xlane.xlu0 %3164 }
 0xa48   :  { %11752 = vpow2.f32 %v3227_v23  ;;  %v3229_v32 = vmul.f32 1.442695, %v3206_v56  ;;  %v3203_v27 = vsub.f32 %v13718_v34, %v3165_v59 }
 0xa49   :  { %v3168_v22 = vpop.xlane.xlu1 %3167 }
 0xa4a   :  { %11754 = vpow2.f32 %v3229_v32  ;;  %v3223_v11 = vmul.f32 1.442695, %v3203_v27  ;;  %v3204_v25 = vsub.f32 %v13724_v47, %v3168_v22 }
 0xa4c   :  { %11756 = vpow2.f32 %v3223_v11  ;;  %v3225_v35 = vmul.f32 1.442695, %v3204_v25 }
 0xa4e   :  { %11758 = vpow2.f32 %v3225_v35  ;;  %v3183_v49 = vpop.xlane.xlu0 %3182 }
 0xa4f   :  { %v3209_v31 = vsub.f32 %v13732_v15, %v3183_v49 }
 0xa50   :  { %v3186_v17 = vpop.xlane.xlu1 %3185 }
 0xa51   :  { %v3235_v36 = vmul.f32 1.442695, %v3209_v31  ;;  %v3210_v13 = vsub.f32 %v13736_v29, %v3186_v17 }
 0xa52   :  { %v13814_v30 = vpop.eup %11752  ;;  %v3177_v23 = vpop.xlane.xlu0 %3176 }
 0xa53   :  { %11760 = vpow2.f32 %v3235_v36  ;;  %v3207_v34 = vsub.f32 %v13734_v48, %v3177_v23  ;;  %v3265_v56 = vsel %vm1709_vm2, %v13814_v30, 0.0  ;;  %v3237_v32 = vmul.f32 1.442695, %v3210_v13 }
 0xa54   :  { %v13819_v47 = vpop.eup %11754  ;;  %v3180_v59 = vpop.xlane.xlu1 %3179  ;;  %3266 = vadd.xlane.f32.xlu0 %v3265_v56 }
 0xa55   :  { %v3231_v27 = vmul.f32 1.442695, %v3207_v34  ;;  %v3208_v15 = vsub.f32 %v13740_v10, %v3180_v59  ;;  %v3268_v29 = vsel %vm1709_vm2, %v13819_v47, 0.0 }
 0xa56   :  { %v13824_v22 = vpop.eup %11756  ;;  %3269 = vadd.xlane.f32.xlu1 %v3268_v29  ;;  %v3195_v11 = vpop.xlane.xlu0 %3194 }
 0xa57   :  { %11762 = vpow2.f32 %v3231_v27  ;;  %v3213_v48 = vsub.f32 %v13746_v57, %v3195_v11  ;;  %v3259_v25 = vsel %vm1709_vm2, %v13824_v22, 0.0  ;;  %v3233_v31 = vmul.f32 1.442695, %v3208_v15 }
 0xa58   :  { %v13829_v35 = vpop.eup %11758  ;;  %v3425_v49 = vpop.permute.xlu1 %3424  ;;  %3260 = vadd.xlane.f32.xlu0 %v3259_v25  ;;  %11764 = vpow2.f32 %v3237_v32 }
 0xa59   :  { %v3243_v10 = vmul.f32 1.442695, %v3213_v48  ;;  %10700 = vmatprep.subr.bf16.mxu1 %v3425_v49  ;;  %v3262_v17 = vsel %vm1709_vm2, %v13829_v35, 0.0 }
 0xa5a   :  { %10701 = vmatpush3.bf16.msra.mxu1 %v3425_v49  ;;  %3263 = vadd.xlane.f32.xlu1 %v3262_v17  ;;  %v3189_v36 = vpop.xlane.xlu0 %3188 }
 0xa5b   :  { %11766 = vpow2.f32 %v3243_v10  ;;  %v3211_v57 = vsub.f32 %v13750_v63, %v3189_v36  ;;  %v2826_v36 = vsel %vm2700_vm3, %v13768_v37, 0 }
 0xa5c   :  { %11768 = vpow2.f32 %v3233_v31 }
 0xa5d   :  { %v13834_v13 = vpop.eup %11760  ;;  %v3239_v23 = vmul.f32 1.442695, %v3211_v57 }
 0xa5e   :  { %v3277_v34 = vsel %vm1709_vm2, %v13834_v13, 0.0 }
 0xa5f   :  { %11770 = vpow2.f32 %v3239_v23  ;;  %3278 = vadd.xlane.f32.xlu1 %v3277_v34 }
 0xa61   :  { %v13838_v56 = vpop.eup %11762 }
 0xa62   :  { %v3271_v59 = vsel %vm1709_vm2, %v13838_v56, 0.0  ;;  %v13842_v32 = vpop.eup %11764 }
 0xa63   :  { %3272 = vadd.xlane.f32.xlu1 %v3271_v59  ;;  %v3280_v11 = vsel %vm1709_vm2, %v13842_v32, 0.0 }
 0xa64   :  { %v10594_v27 = vpop.f32.mrb[72].mxu0 }
 0xa65   :  { %v13844_v15 = vpop.eup %11766  ;;  %v2548_v63 = vpop.f32.mrb[73].mxu0 }
 0xa66   :  { %v10595_v29 = vpop.f32.mrb[74].mxu0  ;;  %v3289_v48 = vsel %vm1709_vm2, %v13844_v15, 0.0  ;;  %v13850_v25 = vpop.eup %11768 }
 0xa67   :  { %v2669_v49 = vpack.c.bf16 %v10595_v29, %v10594_v27  ;;  %v2551_v31 = vpop.f32.mrb[75].mxu0  ;;  %3281 = vadd.xlane.f32.xlu1 %v3280_v11  ;;  %3290 = vadd.xlane.f32.xlu0 %v3289_v48  ;;  %v3274_v57 = vsel %vm1709_vm2, %v13850_v25, 0.0  ;;  %v16544_v11 = vpack.c.bf16 %v13672_v0, %v13666_v4  ;;  %v16545_v48 = vpack.c.bf16 %v13668_v45, %v13664_v8 }
 0xa68   :  { %v2668_v10 = vpack.c.bf16 %v2551_v31, %v2548_v63  ;;  %v16547_v31 = vpack.c.bf16 %v13683_v33, %v13679_v14  ;;  %v16548_v4 = vpack.c.bf16 %v13402_v16, %v13396_v44  ;;  %v16549_v45 = vpack.c.bf16 %v13398_v5, %v13394_v60 }
 0xa69   :  { %v13852_v17 = vpop.eup %11770  ;;  %v16550_v14 = vpack.c.bf16 %v13414_v51, %v13408_v46  ;;  %v16551_v5 = vpack.c.bf16 %v13410_v12, %v13406_v7  ;;  %v3342_v46 = vpop.permute.xlu0 %3341  ;;  %v16552_v51 = vpack.c.bf16 %v13426_v42, %v13420_v62  ;;  %v16553_v7 = vpack.c.bf16 %v13422_v40, %v13418_v19  ;;  %v1480_v19 = vld [vmem:[%s16468_s8 + $0x8] sm:$0xf]  ;;  %v16556_v40 = vld [vmem:[#allocation18_spill] sm:$0xff] }
 0xa6a   :  { %10618 = vmatprep.mubr.msk.bf16.mxu0 %vm1502_vm1, %v2668_v10  ;;  %v3283_v23 = vsel %vm1709_vm2, %v13852_v17, 0.0  ;;  %v16554_v62 = vpack.c.bf16 %v13438_v38, %v13432_v61 }
 0xa6b   :  { %10619 = vmatmul.mubr.msk.bf16.vlgmr.msra.gmra.mrb[80].mxu0 %vm1502_vm1, %v2669_v49  ;;  %3275 = vadd.xlane.f32.xlu1 %v3274_v57  ;;  %v16546_v49 = vpack.c.bf16 %v13687_v54, %v13681_v1 }
 0xa6c   :  { %10635 = vmatpush3.bf16.msra.mxu0 %v2826_v36  ;;  %v10598_v34 = vpop.f32.mrb[76].mxu0  ;;  %3284 = vadd.xlane.f32.xlu0 %v3283_v23 }
 0xa6d   :  { %10684 = vmatprep.subr.bf16.mxu0 %v13782_v9  ;;  %v2564_v59 = vpop.f32.mrb[77].mxu0 }
 0xa6e   :  { %v10599_v27 = vpop.f32.mrb[78].mxu0 }
 0xa6f   :  { %v2671_v63 = vpack.c.bf16 %v10599_v27, %v10598_v34  ;;  %v2567_v37 = vpop.f32.mrb[79].mxu0 }
 0xa70   :  { %v2670_v29 = vpack.c.bf16 %v2567_v37, %v2564_v59 }
 0xa72   :  { %10622 = vmatprep.mubr.msk.bf16.mxu0 %vm1502_vm1, %v2670_v29 }
 0xa73   :  { %10623 = vmatmul.mubr.msk.bf16.gmra.mrb[84].mxu0 %vm1502_vm1, %v2671_v63  ;;  %v3546_v63 = vsel %vm2700_vm3, %v1480_v19, 0 }
 0xa74   :  { %10626 = vmatprep.mubr.msk.bf16.mxu0 %vm1502_vm1, %v16544_v11 }
 0xa7b   :  { %10627 = vmatmul.mubr.msk.bf16.gmra.mrb[88].mxu0 %vm1502_vm1, %v16545_v48 }
 0xa7c   :  { %10630 = vmatprep.mubr.msk.bf16.mxu0 %vm1502_vm1, %v16546_v49 }
 0xa83   :  { %10631 = vmatmul.mubr.msk.bf16.gmra.mrb[92].mxu0 %vm1502_vm1, %v16547_v31 }
 0xa84   :  { %10636 = vmatprep.mubr.msk.bf16.mxu0 %vm1502_vm1, %v16548_v4 }
 0xa89   :  { %v3198_v0 = vpop.xlane.xlu1 %3197 }
 0xa8a   :  { %v3214_v8 = vsub.f32 %v13772_v55, %v3198_v0 }
 0xa8b   :  { %10637 = vmatmul.mubr.msk.bf16.vlgmr.msra.gmra.mrb[80].mxu0 %vm1502_vm1, %v16549_v45 }
 0xa8c   :  { %v3245_v1 = vmul.f32 1.442695, %v3214_v8  ;;  %10685 = vmatpush3.bf16.msra.mxu0 %v13782_v9  ;;  %10640 = vmatprep.mubr.msk.bf16.mxu0 %vm1502_vm1, %v16550_v14 }
 0xa8d   :  { %10686 = vmatprep.subr.bf16.mxu0 %v13786_v26  ;;  %v3192_v44 = vpop.xlane.xlu1 %3191 }
 0xa8e   :  { %11772 = vpow2.f32 %v3245_v1  ;;  %v3212_v16 = vsub.f32 %v13774_v41, %v3192_v44  ;;  %v16555_v41 = vpack.c.bf16 %v13434_v53, %v13430_v43 }
 0xa90   :  { %v3241_v33 = vmul.f32 1.442695, %v3212_v16  ;;  %10687 = vmatpush3.bf16.msra.mxu0 %v13786_v26 }
 0xa91   :  { %10688 = vmatprep.subr.bf16.mxu0 %v13784_v24  ;;  %v3427_v60 = vpop.permute.xlu1 %3426 }
 0xa92   :  { %11774 = vpow2.f32 %v3241_v33  ;;  %10702 = vmatprep.subr.bf16.mxu1 %v3427_v60 }
 0xa93   :  { %10641 = vmatmul.mubr.msk.bf16.gmra.mrb[84].mxu0 %vm1502_vm1, %v16551_v5  ;;  %10703 = vmatpush3.bf16.msra.mxu1 %v3427_v60 }
 0xa94   :  { %10689 = vmatpush3.bf16.msra.mxu0 %v13784_v24  ;;  %10644 = vmatprep.mubr.msk.bf16.mxu0 %vm1502_vm1, %v16552_v51 }
 0xa95   :  { %10690 = vmatprep.subr.bf16.mxu0 %v3342_v46 }
 0xa98   :  { %v13908_v54 = vpop.eup %11772  ;;  %10691 = vmatpush3.bf16.msra.mxu0 %v3342_v46 }
 0xa99   :  { %v3292_v55 = vsel %vm1709_vm2, %v13908_v54, 0.0  ;;  %11390 = vmatprep.subr.msk.bf16.mxu0 %vm2700_vm3, %v1480_v19 }
 0xa9a   :  { %3293 = vadd.xlane.f32.xlu0 %v3292_v55 }
 0xa9b   :  { %10645 = vmatmul.mubr.msk.bf16.gmra.mrb[88].mxu0 %vm1502_vm1, %v16553_v7 }
 0xa9c   :  { %v13916_v12 = vpop.eup %11774  ;;  %10648 = vmatprep.mubr.msk.bf16.mxu0 %vm1502_vm1, %v16554_v62 }
 0xa9d   :  { %v3286_v42 = vsel %vm1709_vm2, %v13916_v12, 0.0 }
 0xa9e   :  { %3287 = vadd.xlane.f32.xlu1 %v3286_v42 }
 0xaa3   :  { %10649 = vmatmul.mubr.msk.bf16.gmra.mrb[92].mxu0 %vm1502_vm1, %v16555_v41 }
 0xaaf   :  { %3430 = vrot.lane.b32.xlu1 %v13086_v21, %s12327_s0 }
 0xab0   :  { %3428 = vrot.lane.b32.xlu0 %v13088_v2, %s12327_s0 }
 0xab3   :  { %3671 = vrot.lane.b32.xlu1 %v13058_v50, %s12328_s24 }
 0xab4   :  { %3669 = vrot.lane.b32.xlu0 %v13060_v52, %s12328_s24 }
 0xab7   :  { %3774 = vrot.lane.b32.xlu1 %v13078_v20, %s12328_s24 }
 0xab8   :  { %3673 = vrot.lane.b32.xlu0 %v13070_v6, %s12328_s24 }
 0xabb   :  { %3776 = vrot.lane.b32.xlu1 %v13076_v18, %s12328_s24 }
 0xabc   :  { %3675 = vrot.lane.b32.xlu0 %v16556_v40, %s12328_s24 }
 0xabf   :  { %3663 = vrot.lane.b32.xlu1 %v13058_v50, %s16501_s27 }
 0xac0   :  { %3661 = vrot.lane.b32.xlu0 %v13060_v52, %s16501_s27 }
 0xac3   :  { %3665 = vrot.lane.b32.xlu1 %v13070_v6, %s16501_s27  ;;  %v3255_v43 = vpop.xlane.xlu0 %3254 }
 0xac4   :  { %3778 = vrot.lane.b32.xlu0 %v13088_v2, %s12328_s24 }
 0xac7   :  { %3780 = vrot.lane.b32.xlu1 %v13086_v21, %s12328_s24  ;;  %v3249_v61 = vpop.xlane.xlu0 %3248 }
 0xac8   :  { %3667 = vrot.lane.b32.xlu0 %v16556_v40, %s16501_s27 }
 0xacb   :  { %v3258_v53 = vpop.xlane.xlu1 %3257  ;;  %3768 = vrot.lane.b32.xlu1 %v13076_v18, %s16501_s27 }
 0xacc   :  { %3766 = vrot.lane.b32.xlu0 %v13078_v20, %s16501_s27  ;;  %11776 = vrcp.f32 %v3258_v53 }
 0xacd   :  { %11778 = vrcp.f32 %v3249_v61 }
 0xace   :  { %11780 = vrcp.f32 %v3255_v43 }
 0xacf   :  { %v3252_v38 = vpop.xlane.xlu1 %3251  ;;  %3772 = vrot.lane.b32.xlu1 %v13086_v21, %s16501_s27 }
 0xad0   :  { %11782 = vrcp.f32 %v3252_v38  ;;  %3770 = vrot.lane.b32.xlu0 %v13088_v2, %s16501_s27 }
 0xad4   :  { %4071 = vrot.lane.b32.xlu0 %v13060_v52, %s16499_s20 }
 0xad6   :  { %v11777_v9 = vpop.eup %11776 }
 0xad7   :  { %v11779_v24 = vpop.eup %11778  ;;  %v3314_v36 = vmul.f32 %v11777_v9, %v13800_v28 }
 0xad8   :  { %v11781_v26 = vpop.eup %11780  ;;  %v3311_v57 = vmul.f32 %v11779_v24, %v13796_v39 }
 0xad9   :  { %v3313_v34 = vmul.f32 %v11781_v26, %v13792_v3 }
 0xada   :  { %v11783_v10 = vpop.eup %11782 }
 0xadb   :  { %v3312_v23 = vmul.f32 %v11783_v10, %v13804_v58  ;;  %v3328_v27 = vpack.c.bf16 %v3314_v36, %v3313_v34 }
 0xadd   :  { %v3327_v59 = vpack.c.bf16 %v3312_v23, %v3311_v57 }
 0xadf   :  { %10692 = vmatprep.mubr.msk.bf16.mxu0 %vm1709_vm2, %v3327_v59 }
 0xae0   :  { %10693 = vmatmul.mubr.msk.bf16.vlgmr.msra.gmra.mrb[96].mxu0 %vm1709_vm2, %v3328_v27 }
 0xae1   :  { %v3267_v52 = vpop.xlane.xlu0 %3266  ;;  %10717 = vmatpush3.bf16.msra.mxu0 %v3546_v63 }
 0xae3   :  { %v3270_v37 = vpop.xlane.xlu1 %3269 }
 0xae4   :  { %11784 = vrcp.f32 %v3270_v37 }
 0xae5   :  { %v3261_v29 = vpop.xlane.xlu0 %3260 }
 0xae6   :  { %11786 = vrcp.f32 %v3261_v29 }
 0xae7   :  { %11788 = vrcp.f32 %v3267_v52  ;;  %v3264_v39 = vpop.xlane.xlu1 %3263 }
 0xae8   :  { %11790 = vrcp.f32 %v3264_v39 }
 0xaec   :  { %v3279_v28 = vpop.xlane.xlu1 %3278 }
 0xaee   :  { %v11785_v58 = vpop.eup %11784 }
 0xaef   :  { %v3318_v31 = vmul.f32 %v11785_v58, %v13819_v47 }
 0xaf0   :  { %v11787_v3 = vpop.eup %11786  ;;  %v3273_v11 = vpop.xlane.xlu1 %3272 }
 0xaf1   :  { %v11789_v48 = vpop.eup %11788  ;;  %v3315_v4 = vmul.f32 %v11787_v3, %v13824_v22  ;;  %11792 = vrcp.f32 %v3273_v11 }
 0xaf2   :  { %v11791_v49 = vpop.eup %11790  ;;  %v3317_v45 = vmul.f32 %v11789_v48, %v13814_v30 }
 0xaf3   :  { %v3316_v0 = vmul.f32 %v11791_v49, %v13829_v35 }
 0xaf4   :  { %v3282_v8 = vpop.xlane.xlu1 %3281  ;;  %v3330_v14 = vpack.c.bf16 %v3318_v31, %v3317_v45  ;;  %v3291_v35 = vpop.xlane.xlu0 %3290 }
 0xaf5   :  { %v3329_v1 = vpack.c.bf16 %v3316_v0, %v3315_v4 }
 0xaf7   :  { %10696 = vmatprep.mubr.msk.bf16.mxu0 %vm1709_vm2, %v3329_v1 }
 0xaf8   :  { %v3276_v44 = vpop.xlane.xlu1 %3275  ;;  %10697 = vmatmul.mubr.msk.bf16.gmra.mrb[100].mxu0 %vm1709_vm2, %v3330_v14 }
 0xaf9   :  { %11794 = vrcp.f32 %v3276_v44  ;;  %v3285_v30 = vpop.xlane.xlu0 %3284 }
 0xafa   :  { %11796 = vrcp.f32 %v3282_v8 }
 0xafb   :  { %v11793_v16 = vpop.eup %11792  ;;  %11798 = vrcp.f32 %v3279_v28 }
 0xafc   :  { %v3319_v47 = vmul.f32 %v11793_v16, %v13838_v56 }
 0xb03   :  { %v11795_v33 = vpop.eup %11794 }
 0xb04   :  { %v3320_v22 = vmul.f32 %v11795_v33, %v13850_v25  ;;  %v11797_v46 = vpop.eup %11796 }
 0xb05   :  { %v11799_v7 = vpop.eup %11798  ;;  %v3322_v56 = vmul.f32 %v11797_v46, %v13842_v32 }
 0xb06   :  { %v3331_v60 = vpack.c.bf16 %v3320_v22, %v3319_v47  ;;  %v3321_v42 = vmul.f32 %v11799_v7, %v13834_v13 }
 0xb08   :  { %10708 = vmatprep.mubr.msk.bf16.mxu1 %vm1709_vm2, %v3331_v60  ;;  %v3332_v41 = vpack.c.bf16 %v3322_v56, %v3321_v42 }
 0xb27   :  { %v3294_v5 = vpop.xlane.xlu0 %3293 }
 0xb28   :  { %11800 = vrcp.f32 %v3294_v5 }
 0xb29   :  { %11802 = vrcp.f32 %v3285_v30 }
 0xb2a   :  { %11804 = vrcp.f32 %v3291_v35 }
 0xb2b   :  { %v3288_v51 = vpop.xlane.xlu1 %3287  ;;  %v3429_v55 = vpop.permute.xlu0 %3428 }
 0xb2c   :  { %11806 = vrcp.f32 %v3288_v51  ;;  %10704 = vmatprep.subr.bf16.mxu1 %v3429_v55 }
 0xb2d   :  { %10705 = vmatpush3.bf16.msra.mxu1 %v3429_v55 }
 0xb2f   :  { %v3431_v25 = vpop.permute.xlu1 %3430  ;;  %v3670_v62 = vpop.permute.xlu0 %3669 }
 0xb30   :  { %10706 = vmatprep.subr.bf16.mxu1 %v3431_v25  ;;  %v3690_v57 = vsel %vm1502_vm1, %v3670_v62, 0 }
 0xb31   :  { %10707 = vmatpush3.bf16.msra.mxu1 %v3431_v25 }
 0xb32   :  { %11391 = vmatprep.subr.msk.bf16.mxu1 %vm1502_vm1, %v3670_v62  ;;  %v11801_v19 = vpop.eup %11800 }
 0xb33   :  { %v3672_v43 = vpop.permute.xlu1 %3671  ;;  %v3674_v61 = vpop.permute.xlu0 %3673  ;;  %v3326_v24 = vmul.f32 %v11801_v19, %v13908_v54 }
 0xb34   :  { %v11803_v53 = vpop.eup %11802  ;;  %10709 = vmatmul.mubr.msk.bf16.vlgmr.msra.gmra.mrb[112].mxu1 %vm1709_vm2, %v3332_v41  ;;  %v3696_v27 = vsel %vm1502_vm1, %v3674_v61, 0 }
 0xb35   :  { %v11805_v38 = vpop.eup %11804  ;;  %v3323_v10 = vmul.f32 %v11803_v53, %v13852_v17 }
 0xb36   :  { %v11807_v9 = vpop.eup %11806  ;;  %v3325_v36 = vmul.f32 %v11805_v38, %v13844_v15 }
 0xb37   :  { %v3775_v32 = vpop.permute.xlu1 %3774  ;;  %v3676_v26 = vpop.permute.xlu0 %3675  ;;  %v3324_v13 = vmul.f32 %v11807_v9, %v13916_v12  ;;  %v3693_v12 = vsel %vm1502_vm1, %v3672_v43, 0 }
 0xb38   :  { %11395 = vmatprep.subr.msk.bf16.mxu0 %vm1502_vm1, %v3775_v32  ;;  %v3334_v34 = vpack.c.bf16 %v3326_v24, %v3325_v36  ;;  %v3699_v37 = vsel %vm1502_vm1, %v3676_v26, 0  ;;  %v3795_v4 = vsel %vm1502_vm1, %v3775_v32, 0 }
 0xb39   :  { %v3333_v23 = vpack.c.bf16 %v3324_v13, %v3323_v10 }
 0xb3a   :  { %10735 = vmatpush3.bf16.xpose.msra.mxu1 %v3690_v57 }
 0xb3b   :  { %10712 = vmatprep.mubr.msk.bf16.mxu1 %vm1709_vm2, %v3333_v23  ;;  %11392 = vmatprep.subr.msk.bf16.mxu1 %vm1502_vm1, %v3672_v43  ;;  %v3662_v54 = vpop.permute.xlu0 %3661  ;;  %v3777_v52 = vpop.permute.xlu1 %3776 }
 0xb3c   :  { %10713 = vmatmul.mubr.msk.bf16.gmra.mrb[116].mxu1 %vm1709_vm2, %v3334_v34  ;;  %v3798_v0 = vsel %vm1502_vm1, %v3777_v52, 0 }
 0xb3d   :  { %10742 = vmatprep.mubr.msk.bf16.mxu1 %vm1502_vm1, %v3662_v54 }
 0xb3f   :  { %v3779_v17 = vpop.permute.xlu0 %3778  ;;  %v3664_v39 = vpop.permute.xlu1 %3663 }
 0xb40   :  { %v3801_v8 = vsel %vm1502_vm1, %v3779_v17, 0 }
 0xb42   :  { %10737 = vmatpush3.bf16.xpose.msra.mxu1 %v3693_v12 }
 0xb43   :  { %11393 = vmatprep.subr.msk.bf16.mxu1 %vm1502_vm1, %v3674_v61  ;;  %v3668_v15 = vpop.permute.xlu0 %3667  ;;  %v3666_v28 = vpop.permute.xlu1 %3665 }
 0xb47   :  { %v3767_v59 = vpop.permute.xlu0 %3766  ;;  %v3781_v45 = vpop.permute.xlu1 %3780 }
 0xb48   :  { %v3804_v22 = vsel %vm1502_vm1, %v3781_v45, 0 }
 0xb4a   :  { %10739 = vmatpush3.bf16.xpose.msra.mxu1 %v3696_v27 }
 0xb4b   :  { %11394 = vmatprep.subr.msk.bf16.mxu1 %vm1502_vm1, %v3676_v26  ;;  %v3771_v63 = vpop.permute.xlu0 %3770  ;;  %v3769_v41 = vpop.permute.xlu1 %3768 }
 0xb4f   :  { %v4072_v29 = vpop.permute.xlu0 %4071  ;;  %v3773_v19 = vpop.permute.xlu1 %3772 }
 0xb52   :  { %10741 = vmatpush3.bf16.xpose.msra.mxu1 %v3699_v37 }
 0xb53   :  { %10766 = vmatprep.subr.bf16.mxu1 %v4072_v29 }
 0xb59   :  { %10743 = vmatmul.mubr.msk.bf16.vlgmr.msra.gmra.mrb[120].mxu1 %vm1502_vm1, %v3664_v39 }
 0xb5a   :  { %10746 = vmatprep.mubr.msk.bf16.mxu1 %vm1502_vm1, %v3666_v28  ;;  %10767 = vmatpush3.bf16.msra.mxu1 %v4072_v29 }
 0xb61   :  { %10747 = vmatmul.mubr.msk.bf16.gmra.mrb[124].mxu1 %vm1502_vm1, %v3668_v15 }
 0xbb3   :  { %v10694_v58 = vpop.f32.mrb[96].mxu0 }
 0xbb4   :  { %v3393_v3 = vpop.f32.mrb[97].mxu0 }
 0xbb5   :  { %v10695_v11 = vpop.f32.mrb[98].mxu0 }
 0xbb6   :  { %v3514_v48 = vpack.c.bf16 %v10695_v11, %v10694_v58  ;;  %v3396_v49 = vpop.f32.mrb[99].mxu0 }
 0xbb7   :  { %v3513_v31 = vpack.c.bf16 %v3396_v49, %v3393_v3 }
 0xbb9   :  { %10718 = vmatprep.mubr.msk.bf16.mxu0 %vm1502_vm1, %v3513_v31 }
 0xbba   :  { %10719 = vmatmul.mubr.msk.bf16.vlgmr.msra.gmra.mrb[80].mxu0 %vm1502_vm1, %v3514_v48 }
 0xbbb   :  { %10751 = vmatpush3.bf16.xpose.msra.mxu0 %v3795_v4 }
 0xbbc   :  { %11396 = vmatprep.subr.msk.bf16.mxu0 %vm1502_vm1, %v3777_v52 }
 0xbc3   :  { %10753 = vmatpush3.bf16.xpose.msra.mxu0 %v3798_v0 }
 0xbc4   :  { %11397 = vmatprep.subr.msk.bf16.mxu0 %vm1502_vm1, %v3779_v17 }
 0xbcb   :  { %10755 = vmatpush3.bf16.xpose.msra.mxu0 %v3801_v8  ;;  %v10698_v1 = vpop.f32.mrb[100].mxu0 }
 0xbcc   :  { %11398 = vmatprep.subr.msk.bf16.mxu0 %vm1502_vm1, %v3781_v45  ;;  %v3409_v14 = vpop.f32.mrb[101].mxu0 }
 0xbcd   :  { %v10699_v44 = vpop.f32.mrb[102].mxu0 }
 0xbce   :  { %v3516_v16 = vpack.c.bf16 %v10699_v44, %v10698_v1  ;;  %v3412_v33 = vpop.f32.mrb[103].mxu0 }
 0xbcf   :  { %v3515_v47 = vpack.c.bf16 %v3412_v33, %v3409_v14 }
 0xbd1   :  { %10722 = vmatprep.mubr.msk.bf16.mxu0 %vm1502_vm1, %v3515_v47 }
 0xbd2   :  { %10723 = vmatmul.mubr.msk.bf16.gmra.mrb[84].mxu0 %vm1502_vm1, %v3516_v16 }
 0xbd3   :  { %10757 = vmatpush3.bf16.xpose.msra.mxu0 %v3804_v22 }
 0xc07   :  { %v10710_v60 = vpop.f32.mrb[112].mxu1 }
 0xc08   :  { %v3482_v35 = vpop.f32.mrb[113].mxu1 }
 0xc09   :  { %v10711_v30 = vpop.f32.mrb[114].mxu1 }
 0xc0a   :  { %v3518_v5 = vpack.c.bf16 %v10711_v30, %v10710_v60  ;;  %v3485_v46 = vpop.f32.mrb[115].mxu1 }
 0xc0b   :  { %v3517_v51 = vpack.c.bf16 %v3485_v46, %v3482_v35 }
 0xc0d   :  { %10726 = vmatprep.mubr.msk.bf16.mxu0 %vm1502_vm1, %v3517_v51 }
 0xc0e   :  { %10727 = vmatmul.mubr.msk.bf16.gmra.mrb[88].mxu0 %vm1502_vm1, %v3518_v5 }
 0xc0f   :  { %v10714_v55 = vpop.f32.mrb[116].mxu1 }
 0xc10   :  { %v3498_v7 = vpop.f32.mrb[117].mxu1 }
 0xc11   :  { %v10715_v56 = vpop.f32.mrb[118].mxu1 }
 0xc12   :  { %v3520_v25 = vpack.c.bf16 %v10715_v56, %v10714_v55  ;;  %v3501_v62 = vpop.f32.mrb[119].mxu1 }
 0xc13   :  { %v3519_v42 = vpack.c.bf16 %v3501_v62, %v3498_v7 }
 0xc15   :  { %10730 = vmatprep.mubr.msk.bf16.mxu0 %vm1502_vm1, %v3519_v42 }
 0xc16   :  { %10731 = vmatmul.mubr.msk.bf16.gmra.mrb[92].mxu0 %vm1502_vm1, %v3520_v25 }
 0xc17   :  { %10758 = vmatprep.mubr.msk.bf16.mxu0 %vm1502_vm1, %v3767_v59 }
 0xc1e   :  { %10759 = vmatmul.mubr.msk.bf16.vlgmr.msra.gmra.mrb[104].mxu0 %vm1502_vm1, %v3769_v41 }
 0xc1f   :  { %10762 = vmatprep.mubr.msk.bf16.mxu0 %vm1502_vm1, %v3771_v63 }
 0xc26   :  { %10763 = vmatmul.mubr.msk.bf16.gmra.mrb[108].mxu0 %vm1502_vm1, %v3773_v19 }
 0xc2c   :  { %v10744_v43 = vpop.f32.mrb[120].mxu1 }
 0xc2d   :  { %v3873_v61 = vmul.f32 0.35355338, %v10744_v43  ;;  %v3735_v53 = vpop.f32.mrb[121].mxu1 }
 0xc2e   :  { %v10745_v38 = vpop.f32.mrb[122].mxu1  ;;  %v3871_v9 = vmul.f32 0.35355338, %v3735_v53 }
 0xc2f   :  { %v3738_v24 = vpop.f32.mrb[123].mxu1  ;;  %v3893_v32 = vsel %vm1709_vm2, %v3873_v61, -inf  ;;  %v3874_v13 = vmul.f32 0.35355338, %v10745_v38 }
 0xc30   :  { %v3872_v26 = vmul.f32 0.35355338, %v3738_v24  ;;  %3894 = vmax.xlane.f32.xlu0 %v3893_v32  ;;  %v3887_v36 = vsel %vm1709_vm2, %v3871_v9, -inf }
 0xc31   :  { %v3896_v15 = vsel %vm1709_vm2, %v3874_v13, -inf }
 0xc32   :  { %v3890_v10 = vsel %vm1709_vm2, %v3872_v26, -inf }
 0xc33   :  { %3891 = vmax.xlane.f32.xlu1 %v3890_v10 }
 0xc34   :  { %3888 = vmax.xlane.f32.xlu0 %v3887_v36  ;;  %v10748_v57 = vpop.f32.mrb[124].mxu1 }
 0xc35   :  { %v3751_v23 = vpop.f32.mrb[125].mxu1  ;;  %v3877_v54 = vmul.f32 0.35355338, %v10748_v57 }
 0xc36   :  { %v10749_v34 = vpop.f32.mrb[126].mxu1  ;;  %v3875_v63 = vmul.f32 0.35355338, %v3751_v23 }
 0xc37   :  { %v3878_v17 = vmul.f32 0.35355338, %v10749_v34  ;;  %v3754_v12 = vpop.f32.mrb[127].mxu1  ;;  %v3905_v52 = vsel %vm1709_vm2, %v3877_v54, -inf }
 0xc38   :  { %3897 = vmax.xlane.f32.xlu0 %v3896_v15  ;;  %v3876_v59 = vmul.f32 0.35355338, %v3754_v12  ;;  %v3899_v29 = vsel %vm1709_vm2, %v3875_v63, -inf }
 0xc39   :  { %v3908_v27 = vsel %vm1709_vm2, %v3878_v17, -inf }
 0xc3a   :  { %3909 = vmax.xlane.f32.xlu1 %v3908_v27  ;;  %v3902_v37 = vsel %vm1709_vm2, %v3876_v59, -inf }
 0xc3c   :  { %3906 = vmax.xlane.f32.xlu0 %v3905_v52 }
 0xc3e   :  { %3903 = vmax.xlane.f32.xlu1 %v3902_v37 }
 0xc40   :  { %3900 = vmax.xlane.f32.xlu0 %v3899_v29 }
 0xcbd   :  { %v3895_v39 = vpop.xlane.xlu0 %3894 }
 0xcbe   :  { %v3937_v28 = vsub.f32 %v3873_v61, %v3895_v39 }
 0xcc0   :  { %v3955_v58 = vmul.f32 1.442695, %v3937_v28  ;;  %v3892_v3 = vpop.xlane.xlu1 %3891 }
 0xcc1   :  { %v3889_v11 = vpop.xlane.xlu0 %3888  ;;  %v3936_v49 = vsub.f32 %v3872_v26, %v3892_v3 }
 0xcc2   :  { %11808 = vpow2.f32 %v3955_v58  ;;  %v3935_v48 = vsub.f32 %v3871_v9, %v3889_v11 }
 0xcc3   :  { %v3953_v45 = vmul.f32 1.442695, %v3936_v49 }
 0xcc4   :  { %v3951_v31 = vmul.f32 1.442695, %v3935_v48 }
 0xcc5   :  { %v3898_v4 = vpop.xlane.xlu0 %3897 }
 0xcc6   :  { %11810 = vpow2.f32 %v3951_v31  ;;  %v3938_v0 = vsub.f32 %v3874_v13, %v3898_v4 }
 0xcc7   :  { %v3910_v8 = vpop.xlane.xlu1 %3909 }
 0xcc8   :  { %v3957_v1 = vmul.f32 1.442695, %v3938_v0  ;;  %v3942_v14 = vsub.f32 %v3878_v17, %v3910_v8 }
 0xcc9   :  { %v3907_v44 = vpop.xlane.xlu0 %3906 }
 0xcca   :  { %11812 = vpow2.f32 %v3957_v1  ;;  %v3941_v16 = vsub.f32 %v3877_v54, %v3907_v44  ;;  %v3965_v22 = vmul.f32 1.442695, %v3942_v14 }
 0xccb   :  { %v3904_v33 = vpop.xlane.xlu1 %3903  ;;  %11814 = vpow2.f32 %v3953_v45 }
 0xccc   :  { %v14035_v47 = vpop.eup %11808  ;;  %v3963_v60 = vmul.f32 1.442695, %v3941_v16  ;;  %v3940_v35 = vsub.f32 %v3876_v59, %v3904_v33 }
 0xccd   :  { %v3901_v30 = vpop.xlane.xlu0 %3900  ;;  %v3989_v5 = vsel %vm1709_vm2, %v14035_v47, 0.0 }
 0xcce   :  { %11816 = vpow2.f32 %v3963_v60  ;;  %v3939_v46 = vsub.f32 %v3875_v63, %v3901_v30  ;;  %3990 = vadd.xlane.f32.xlu0 %v3989_v5  ;;  %v3961_v55 = vmul.f32 1.442695, %v3940_v35 }
 0xccf   :  { %11818 = vpow2.f32 %v3965_v22 }
 0xcd0   :  { %v14039_v51 = vpop.eup %11810  ;;  %v3959_v7 = vmul.f32 1.442695, %v3939_v46 }
 0xcd1   :  { %v3983_v56 = vsel %vm1709_vm2, %v14039_v51, 0.0 }
 0xcd2   :  { %11820 = vpow2.f32 %v3959_v7  ;;  %3984 = vadd.xlane.f32.xlu0 %v3983_v56 }
 0xcd3   :  { %11822 = vpow2.f32 %v3961_v55 }
 0xcd4   :  { %v14043_v25 = vpop.eup %11812 }
 0xcd5   :  { %v3992_v62 = vsel %vm1709_vm2, %v14043_v25, 0.0  ;;  %v11815_v42 = vpop.eup %11814 }
 0xcd6   :  { %3993 = vadd.xlane.f32.xlu1 %v3992_v62  ;;  %v3986_v19 = vsel %vm1709_vm2, %v11815_v42, 0.0 }
 0xcd8   :  { %v14047_v41 = vpop.eup %11816 }
 0xcd9   :  { %v4001_v43 = vsel %vm1709_vm2, %v14047_v41, 0.0  ;;  %v14052_v61 = vpop.eup %11818 }
 0xcda   :  { %3987 = vadd.xlane.f32.xlu1 %v3986_v19  ;;  %4002 = vadd.xlane.f32.xlu0 %v4001_v43  ;;  %v4004_v38 = vsel %vm1709_vm2, %v14052_v61, 0.0 }
 0xcdc   :  { %v14054_v53 = vpop.eup %11820 }
 0xcdd   :  { %v3995_v9 = vsel %vm1709_vm2, %v14054_v53, 0.0  ;;  %v14060_v24 = vpop.eup %11822 }
 0xcde   :  { %4005 = vadd.xlane.f32.xlu1 %v4004_v38  ;;  %3996 = vadd.xlane.f32.xlu0 %v3995_v9  ;;  %v3998_v32 = vsel %vm1709_vm2, %v14060_v24, 0.0 }
 0xce2   :  { %3999 = vadd.xlane.f32.xlu1 %v3998_v32 }
 0xcf1   :  { %v10760_v26 = vpop.f32.mrb[104].mxu0 }
 0xcf2   :  { %v3881_v10 = vmul.f32 0.35355338, %v10760_v26  ;;  %v3840_v13 = vpop.f32.mrb[105].mxu0 }
 0xcf3   :  { %v10761_v36 = vpop.f32.mrb[106].mxu0  ;;  %v3879_v57 = vmul.f32 0.35355338, %v3840_v13 }
 0xcf4   :  { %v3882_v23 = vmul.f32 0.35355338, %v10761_v36  ;;  %v3843_v34 = vpop.f32.mrb[107].mxu0  ;;  %v3917_v54 = vsel %vm1709_vm2, %v3881_v10, -inf }
 0xcf5   :  { %3918 = vmax.xlane.f32.xlu0 %v3917_v54  ;;  %v3880_v17 = vmul.f32 0.35355338, %v3843_v34  ;;  %v3911_v15 = vsel %vm1709_vm2, %v3879_v57, -inf }
 0xcf6   :  { %v3920_v12 = vsel %vm1709_vm2, %v3882_v23, -inf }
 0xcf7   :  { %3921 = vmax.xlane.f32.xlu1 %v3920_v12  ;;  %v3914_v63 = vsel %vm1709_vm2, %v3880_v17, -inf }
 0xcf9   :  { %v10764_v59 = vpop.f32.mrb[108].mxu0  ;;  %3912 = vmax.xlane.f32.xlu0 %v3911_v15 }
 0xcfa   :  { %v3856_v27 = vpop.f32.mrb[109].mxu0  ;;  %v14072_v29 = vmul.f32 0.35355338, %v10764_v59 }
 0xcfb   :  { %v10765_v52 = vpop.f32.mrb[110].mxu0  ;;  %3915 = vmax.xlane.f32.xlu1 %v3914_v63  ;;  %v14076_v28 = vmul.f32 0.35355338, %v3856_v27 }
 0xcfc   :  { %v3859_v37 = vpop.f32.mrb[111].mxu0  ;;  %v14074_v39 = vmul.f32 0.35355338, %v10765_v52  ;;  %v3929_v58 = vsel %vm1709_vm2, %v14072_v29, -inf }
 0xcfd   :  { %v14080_v3 = vmul.f32 0.35355338, %v3859_v37 }
 0xcfe   :  { %v3932_v11 = vsel %vm1709_vm2, %v14074_v39, -inf }
 0xd0c   :  { %4073 = vrot.lane.b32.xlu1 %v13058_v50, %s16499_s20  ;;  %v3923_v50 = vsel %vm1709_vm2, %v14076_v28, -inf }
 0xd0f   :  { %4075 = vrot.lane.b32.xlu0 %v13070_v6, %s16499_s20  ;;  %v3926_v6 = vsel %vm1709_vm2, %v14080_v3, -inf }
 0xd2e   :  { %3930 = vmax.xlane.f32.xlu0 %v3929_v58 }
 0xd30   :  { %3933 = vmax.xlane.f32.xlu1 %v3932_v11 }
 0xd32   :  { %3924 = vmax.xlane.f32.xlu0 %v3923_v50 }
 0xd34   :  { %3927 = vmax.xlane.f32.xlu1 %v3926_v6 }
 0xd45   :  { %4162 = vrot.lane.b32.xlu1 %v13076_v18, %s16499_s20 }
 0xd48   :  { %4077 = vrot.lane.b32.xlu0 %v16556_v40, %s16499_s20 }
 0xd4c   :  { %4160 = vrot.lane.b32.xlu0 %v13078_v20, %s16499_s20 }
 0xd5b   :  { %v3991_v48 = vpop.xlane.xlu0 %3990 }
 0xd5f   :  { %v3985_v49 = vpop.xlane.xlu0 %3984 }
 0xd60   :  { %11824 = vrcp.f32 %v3985_v49 }
 0xd63   :  { %v3994_v31 = vpop.xlane.xlu1 %3993 }
 0xd67   :  { %v3988_v4 = vpop.xlane.xlu1 %3987  ;;  %v4003_v18 = vpop.xlane.xlu0 %4002 }
 0xd68   :  { %11826 = vrcp.f32 %v3988_v4 }
 0xd6a   :  { %v11825_v0 = vpop.eup %11824 }
 0xd6b   :  { %v4047_v45 = vmul.f32 %v11825_v0, %v14039_v51  ;;  %v4006_v44 = vpop.xlane.xlu1 %4005  ;;  %v3997_v40 = vpop.xlane.xlu0 %3996 }
 0xd6f   :  { %v4000_v16 = vpop.xlane.xlu1 %3999 }
 0xd72   :  { %v11827_v8 = vpop.eup %11826 }
 0xd73   :  { %v4048_v1 = vmul.f32 %v11827_v8, %v11815_v42 }
 0xd75   :  { %v4063_v14 = vpack.c.bf16 %v4048_v1, %v4047_v45 }
 0xd77   :  { %10774 = vmatprep.mubr.msk.bf16.mxu1 %vm1709_vm2, %v4063_v14 }
 0xd82   :  { %v3919_v33 = vpop.xlane.xlu0 %3918 }
 0xd83   :  { %v3945_v20 = vsub.f32 %v3881_v10, %v3919_v33 }
 0xd84   :  { %v3922_v22 = vpop.xlane.xlu1 %3921 }
 0xd85   :  { %v3971_v60 = vmul.f32 1.442695, %v3945_v20  ;;  %v3946_v35 = vsub.f32 %v3882_v23, %v3922_v22 }
 0xd86   :  { %v3913_v30 = vpop.xlane.xlu0 %3912 }
 0xd87   :  { %11828 = vpow2.f32 %v3971_v60  ;;  %v3943_v5 = vsub.f32 %v3879_v57, %v3913_v30  ;;  %v3973_v55 = vmul.f32 1.442695, %v3946_v35 }
 0xd88   :  { %v3916_v46 = vpop.xlane.xlu1 %3915 }
 0xd89   :  { %v3967_v7 = vmul.f32 1.442695, %v3943_v5  ;;  %v3944_v51 = vsub.f32 %v3880_v17, %v3916_v46 }
 0xd8a   :  { %v4076_v42 = vpop.permute.xlu0 %4075 }
 0xd8b   :  { %11830 = vpow2.f32 %v3967_v7  ;;  %v3969_v62 = vmul.f32 1.442695, %v3944_v51 }
 0xd8c   :  { %v4074_v56 = vpop.permute.xlu1 %4073  ;;  %11832 = vpow2.f32 %v3973_v55 }
 0xd8d   :  { %10768 = vmatprep.subr.bf16.mxu1 %v4074_v56  ;;  %11834 = vpow2.f32 %v3969_v62 }
 0xd8e   :  { %10769 = vmatpush3.bf16.msra.mxu1 %v4074_v56  ;;  %11836 = vrcp.f32 %v3994_v31 }
 0xd8f   :  { %10770 = vmatprep.subr.bf16.mxu1 %v4076_v42  ;;  %11838 = vrcp.f32 %v4000_v16 }
 0xd90   :  { %11840 = vrcp.f32 %v3991_v48 }
 0xd91   :  { %v14096_v19 = vpop.eup %11828  ;;  %11842 = vrcp.f32 %v3997_v40 }
 0xd92   :  { %10771 = vmatpush3.bf16.msra.mxu1 %v4076_v42  ;;  %v4013_v43 = vsel %vm1709_vm2, %v14096_v19, 0.0  ;;  %11844 = vrcp.f32 %v4006_v44 }
 0xd93   :  { %4014 = vadd.xlane.f32.xlu1 %v4013_v43  ;;  %11846 = vrcp.f32 %v4003_v18  ;;  %v1481_v43 = vld [vmem:[%s16468_s8 + $0xc] sm:$0xf] }
 0xd95   :  { %v14100_v38 = vpop.eup %11830 }
 0xd96   :  { %v4007_v9 = vsel %vm1709_vm2, %v14100_v38, 0.0  ;;  %v14104_v32 = vpop.eup %11832 }
 0xd97   :  { %4008 = vadd.xlane.f32.xlu1 %v4007_v9  ;;  %v4016_v26 = vsel %vm1709_vm2, %v14104_v32, 0.0  ;;  %v14108_v10 = vpop.eup %11834 }
 0xd98   :  { %v4010_v13 = vsel %vm1709_vm2, %v14108_v10, 0.0  ;;  %v11837_v17 = vpop.eup %11836 }
 0xd99   :  { %v11839_v15 = vpop.eup %11838  ;;  %v4050_v58 = vmul.f32 %v11837_v17, %v14043_v25 }
 0xd9a   :  { %v11841_v63 = vpop.eup %11840 }
 0xd9b   :  { %4017 = vadd.xlane.f32.xlu1 %v4016_v26  ;;  %v11843_v37 = vpop.eup %11842  ;;  %v4049_v6 = vmul.f32 %v11841_v63, %v14035_v47 }
 0xd9c   :  { %v11845_v25 = vpop.eup %11844 }
 0xd9d   :  { %v4064_v49 = vpack.c.bf16 %v4050_v58, %v4049_v6 }
 0xd9f   :  { %4011 = vadd.xlane.f32.xlu1 %v4010_v13  ;;  %v4282_v13 = vsel %vm2700_vm3, %v1481_v43, 0 }
 0xdbb   :  { %v3931_v36 = vpop.xlane.xlu0 %3930 }
 0xdbc   :  { %v3949_v57 = vsub.f32 %v14072_v29, %v3931_v36 }
 0xdbd   :  { %v3934_v23 = vpop.xlane.xlu1 %3933 }
 0xdbe   :  { %v3979_v34 = vmul.f32 1.442695, %v3949_v57  ;;  %v3950_v54 = vsub.f32 %v14074_v39, %v3934_v23  ;;  %v4052_v39 = vmul.f32 %v11839_v15, %v14060_v24 }
 0xdbf   :  { %v3925_v12 = vpop.xlane.xlu0 %3924 }
 0xdc0   :  { %11848 = vpow2.f32 %v3979_v34  ;;  %v3981_v59 = vmul.f32 1.442695, %v3950_v54  ;;  %v3947_v27 = vsub.f32 %v14076_v28, %v3925_v12  ;;  %v4051_v28 = vmul.f32 %v11843_v37, %v14054_v53 }
 0xdc1   :  { %v3928_v52 = vpop.xlane.xlu1 %3927  ;;  %v4054_v53 = vmul.f32 %v11845_v25, %v14052_v61 }
 0xdc2   :  { %11850 = vpow2.f32 %v3981_v59  ;;  %v3975_v29 = vmul.f32 1.442695, %v3947_v27  ;;  %v3948_v11 = vsub.f32 %v14080_v3, %v3928_v52  ;;  %v4065_v4 = vpack.c.bf16 %v4052_v39, %v4051_v28  ;;  %v11847_v3 = vpop.eup %11846 }
 0xdc3   :  { %v4078_v50 = vpop.permute.xlu0 %4077  ;;  %v4053_v45 = vmul.f32 %v11847_v3, %v14047_v41 }
 0xdc4   :  { %11852 = vpow2.f32 %v3975_v29  ;;  %v3977_v48 = vmul.f32 1.442695, %v3948_v11  ;;  %10772 = vmatprep.subr.bf16.mxu1 %v4078_v50 }
 0xdc5   :  { %10773 = vmatpush3.bf16.msra.mxu1 %v4078_v50  ;;  %v4163_v0 = vpop.permute.xlu1 %4162  ;;  %v4066_v44 = vpack.c.bf16 %v4054_v53, %v4053_v45 }
 0xdc6   :  { %11854 = vpow2.f32 %v3977_v48 }
 0xdc7   :  { %v4161_v31 = vpop.permute.xlu0 %4160 }
 0xdc8   :  { %10775 = vmatmul.mubr.msk.bf16.vlgmr.msra.gmra.mrb[128].mxu1 %vm1709_vm2, %v4064_v49  ;;  %10782 = vmatprep.subr.bf16.mxu0 %v4161_v31 }
 0xdc9   :  { %10778 = vmatprep.mubr.msk.bf16.mxu1 %vm1709_vm2, %v4065_v4  ;;  %10783 = vmatpush3.bf16.msra.mxu0 %v4161_v31 }
 0xdca   :  { %v14122_v47 = vpop.eup %11848  ;;  %10784 = vmatprep.subr.bf16.mxu0 %v4163_v0 }
 0xdcb   :  { %v4025_v24 = vsel %vm1709_vm2, %v14122_v47, 0.0 }
 0xdcc   :  { %v11851_v8 = vpop.eup %11850  ;;  %4026 = vadd.xlane.f32.xlu0 %v4025_v24 }
 0xdcd   :  { %10785 = vmatpush3.bf16.msra.mxu0 %v4163_v0  ;;  %v4028_v14 = vsel %vm1709_vm2, %v11851_v8, 0.0 }
 0xdce   :  { %v11853_v1 = vpop.eup %11852 }
 0xdcf   :  { %v4019_v18 = vsel %vm1709_vm2, %v11853_v1, 0.0 }
 0xdd0   :  { %v11855_v40 = vpop.eup %11854  ;;  %4029 = vadd.xlane.f32.xlu0 %v4028_v14  ;;  %4020 = vadd.xlane.f32.xlu1 %v4019_v18 }
 0xdd1   :  { %10779 = vmatmul.mubr.msk.bf16.gmra.mrb[132].mxu1 %vm1709_vm2, %v4066_v44  ;;  %v4022_v16 = vsel %vm1709_vm2, %v11855_v40, 0.0 }
 0xdd4   :  { %4023 = vadd.xlane.f32.xlu0 %v4022_v16 }
 0xde1   :  { %4166 = vrot.lane.b32.xlu1 %v13086_v21, %s16499_s20 }
 0xdea   :  { %4164 = vrot.lane.b32.xlu0 %v13088_v2, %s16499_s20 }
 0xe20   :  { %v4015_v41 = vpop.xlane.xlu1 %4014 }
 0xe24   :  { %v4009_v61 = vpop.xlane.xlu1 %4008 }
 0xe25   :  { %11856 = vrcp.f32 %v4009_v61 }
 0xe28   :  { %v4018_v33 = vpop.xlane.xlu1 %4017 }
 0xe2c   :  { %v4012_v20 = vpop.xlane.xlu1 %4011 }
 0xe2d   :  { %11858 = vrcp.f32 %v4012_v20  ;;  %v16558_v20 = vld [vmem:[#allocation5_spill] sm:$0xff] }
 0xe2e   :  { %11860 = vrcp.f32 %v4018_v33 }
 0xe2f   :  { %v11857_v22 = vpop.eup %11856  ;;  %11862 = vrcp.f32 %v4015_v41  ;;  %v16557_v41 = vld [vmem:[#allocation2_spill] sm:$0xff] }
 0xe30   :  { %v4055_v35 = vmul.f32 %v11857_v22, %v14100_v38 }
 0xe37   :  { %v11859_v60 = vpop.eup %11858 }
 0xe38   :  { %v4056_v30 = vmul.f32 %v11859_v60, %v14108_v10  ;;  %v11861_v7 = vpop.eup %11860  ;;  %v16559_v60 = vld [vmem:[#allocation3_spill] sm:$0xff] }
 0xe39   :  { %v11863_v56 = vpop.eup %11862  ;;  %v4058_v42 = vmul.f32 %v11861_v7, %v14104_v32 }
 0xe3a   :  { %v4067_v5 = vpack.c.bf16 %v4056_v30, %v4055_v35  ;;  %v4057_v9 = vmul.f32 %v11863_v56, %v14096_v19 }
 0xe3c   :  { %10790 = vmatprep.mubr.msk.bf16.mxu0 %vm1709_vm2, %v4067_v5  ;;  %v4068_v10 = vpack.c.bf16 %v4058_v42, %v4057_v9  ;;  %v16560_v5 = vld [vmem:[#allocation4_spill] sm:$0xff] }
 0xe59   :  { %v4027_v46 = vpop.xlane.xlu0 %4026 }
 0xe5d   :  { %v4021_v21 = vpop.xlane.xlu1 %4020  ;;  %v4030_v2 = vpop.xlane.xlu0 %4029 }
 0xe5e   :  { %11864 = vrcp.f32 %v4021_v21 }
 0xe61   :  { %v4024_v55 = vpop.xlane.xlu0 %4023  ;;  %v4167_v62 = vpop.permute.xlu1 %4166 }
 0xe62   :  { %11866 = vrcp.f32 %v4024_v55 }
 0xe63   :  { %11868 = vrcp.f32 %v4030_v2 }
 0xe64   :  { %11870 = vrcp.f32 %v4027_v46 }
 0xe65   :  { %v4165_v51 = vpop.permute.xlu0 %4164 }
 0xe66   :  { %10786 = vmatprep.subr.bf16.mxu0 %v4165_v51 }
 0xe67   :  { %10787 = vmatpush3.bf16.msra.mxu0 %v4165_v51 }
 0xe68   :  { %10788 = vmatprep.subr.bf16.mxu0 %v4167_v62  ;;  %v11865_v38 = vpop.eup %11864 }
 0xe69   :  { %v4059_v57 = vmul.f32 %v11865_v38, %v11853_v1  ;;  %v16561_v38 = vld [vmem:[#allocation6_spill] sm:$0xff] }
 0xe6b   :  { %10789 = vmatpush3.bf16.msra.mxu0 %v4167_v62 }
 0xe6c   :  { %v11867_v26 = vpop.eup %11866  ;;  %11399 = vmatprep.subr.msk.bf16.mxu0 %vm2700_vm3, %v1481_v43 }
 0xe6d   :  { %v11869_v36 = vpop.eup %11868  ;;  %v4060_v23 = vmul.f32 %v11867_v26, %v11855_v40 }
 0xe6e   :  { %10791 = vmatmul.mubr.msk.bf16.vlgmr.msra.gmra.mrb[112].mxu0 %vm1709_vm2, %v4068_v10  ;;  %v11871_v32 = vpop.eup %11870  ;;  %v4062_v54 = vmul.f32 %v11869_v36, %v11851_v8  ;;  %v14161_v8 = vld [vmem:[%s16469_s9] ss:$0 sm:$0xff] }
 0xe6f   :  { %v4069_v34 = vpack.c.bf16 %v4060_v23, %v4059_v57  ;;  %10799 = vmatpush3.bf16.msra.mxu0 %v4282_v13  ;;  %v4061_v19 = vmul.f32 %v11871_v32, %v14122_v47  ;;  %v16562_v13 = vld [vmem:[#allocation7_spill] sm:$0xff]  ;;  %v16563_v57 = vld [vmem:[#allocation8_spill] sm:$0xff] }
 0xe71   :  { %10794 = vmatprep.mubr.msk.bf16.mxu0 %vm1709_vm2, %v4069_v34  ;;  %v4070_v17 = vpack.c.bf16 %v4062_v54, %v4061_v19  ;;  %v16564_v34 = vld [vmem:[#allocation9_spill] sm:$0xff] }
 0xe76   :  { %10795 = vmatmul.mubr.msk.bf16.gmra.mrb[116].mxu0 %vm1709_vm2, %v4070_v17 }
 0xe9b   :  { %v10776_v12 = vpop.f32.mrb[128].mxu1 }
 0xe9c   :  { %v4129_v15 = vpop.f32.mrb[129].mxu1 }
 0xe9d   :  { %v10777_v59 = vpop.f32.mrb[130].mxu1 }
 0xe9e   :  { %v4250_v27 = vpack.c.bf16 %v10777_v59, %v10776_v12  ;;  %v4132_v63 = vpop.f32.mrb[131].mxu1 }
 0xe9f   :  { %v4249_v52 = vpack.c.bf16 %v4132_v63, %v4129_v15 }
 0xea1   :  { %10800 = vmatprep.mubr.msk.bf16.mxu0 %vm1502_vm1, %v4249_v52 }
 0xea2   :  { %10801 = vmatmul.mubr.msk.bf16.vlgmr.msra.gmra.mrb[80].mxu0 %vm1502_vm1, %v4250_v27 }
 0xea4   :  { %v10780_v37 = vpop.f32.mrb[132].mxu1 }
 0xea5   :  { %v4145_v58 = vpop.f32.mrb[133].mxu1 }
 0xea6   :  { %v10781_v29 = vpop.f32.mrb[134].mxu1 }
 0xea7   :  { %v4252_v11 = vpack.c.bf16 %v10781_v29, %v10780_v37  ;;  %v4148_v50 = vpop.f32.mrb[135].mxu1  ;;  %v16565_v29 = vld [vmem:[#allocation10_spill] sm:$0xff] }
 0xea8   :  { %v4251_v39 = vpack.c.bf16 %v4148_v50, %v4145_v58 }
 0xeaa   :  { %10804 = vmatprep.mubr.msk.bf16.mxu0 %vm1502_vm1, %v4251_v39 }
 0xeab   :  { %10805 = vmatmul.mubr.msk.bf16.gmra.mrb[84].mxu0 %vm1502_vm1, %v4252_v11 }
 0xf41   :  { %v10792_v6 = vpop.f32.mrb[112].mxu0 }
 0xf42   :  { %v4218_v48 = vpop.f32.mrb[113].mxu0 }
 0xf43   :  { %v10793_v28 = vpop.f32.mrb[114].mxu0 }
 0xf44   :  { %v4254_v49 = vpack.c.bf16 %v10793_v28, %v10792_v6  ;;  %v4221_v31 = vpop.f32.mrb[115].mxu0 }
 0xf45   :  { %v4253_v4 = vpack.c.bf16 %v4221_v31, %v4218_v48  ;;  %v16566_v48 = vld [vmem:[#allocation12_spill] sm:$0xff] }
 0xf47   :  { %10808 = vmatprep.mubr.msk.bf16.mxu0 %vm1502_vm1, %v4253_v4 }
 0xf48   :  { %10809 = vmatmul.mubr.msk.bf16.gmra.mrb[88].mxu0 %vm1502_vm1, %v4254_v49  ;;  %v16567_v49 = vld [vmem:[#allocation11_spill] sm:$0xff] }
 0xf49   :  { %v10796_v25 = vpop.f32.mrb[116].mxu0 }
 0xf4a   :  { %v4234_v3 = vpop.f32.mrb[117].mxu0 }
 0xf4b   :  { %v10797_v0 = vpop.f32.mrb[118].mxu0 }
 0xf4c   :  { %v4256_v47 = vpack.c.bf16 %v10797_v0, %v10796_v25  ;;  %v4237_v24 = vpop.f32.mrb[119].mxu0 }
 0xf4d   :  { %v4255_v53 = vpack.c.bf16 %v4237_v24, %v4234_v3  ;;  %v16568_v3 = vld [vmem:[#allocation13_spill] sm:$0xff] }
 0xf4f   :  { %10812 = vmatprep.mubr.msk.bf16.mxu0 %vm1502_vm1, %v4255_v53 }
 0xf50   :  { %10813 = vmatmul.mubr.msk.bf16.gmra.mrb[92].mxu0 %vm1502_vm1, %v4256_v47 }
 0xf75   :  { %v10802_v45 = vpop.f32.mrb[80].mxu0 }
 0xf76   :  { %v4318_v1 = vpop.f32.mrb[81].mxu0  ;;  %v4406_v16 = vadd.f32 %v10802_v45, %v14161_v8 }
 0xf77   :  { %v4404_v14 = vadd.f32 %v14161_v8, %v4318_v1  ;;  %v10803_v18 = vpop.f32.mrb[82].mxu0 }
 0xf78   :  { %v4407_v44 = vadd.f32 %v10803_v18, %v14161_v8  ;;  %v4321_v40 = vpop.f32.mrb[83].mxu0  ;;  %v14179_v46 = vadd.f32 %v4406_v16, %v16560_v5 }
 0xf79   :  { %v14167_v61 = vadd.f32 %v4404_v14, %v16557_v41  ;;  %v4405_v33 = vadd.f32 %v14161_v8, %v4321_v40 }
 0xf7a   :  { %v14171_v22 = vadd.f32 %v4407_v44, %v16558_v20  ;;  %v4444_v43 = vsel %vm1072_vm0, %v14179_v46, 0.0 }
 0xf7b   :  { %v14174_v35 = vadd.f32 %v4405_v33, %v16559_v60  ;;  %v4438_v30 = vsel %vm1072_vm0, %v14167_v61, 0.0  ;;  %v16569_v33 = vld [vmem:[#allocation14_spill] sm:$0xff] }
 0xf7c   :  { %4439 = vadd.xlane.f32.xlu1 %v4438_v30  ;;  %v4447_v7 = vsel %vm1072_vm0, %v14171_v22, 0.0 }
 0xf7d   :  { %v4441_v21 = vsel %vm1072_vm0, %v14174_v35, 0.0 }
 0xf7e   :  { %v10806_v2 = vpop.f32.mrb[84].mxu0  ;;  %4442 = vadd.xlane.f32.xlu0 %v4441_v21 }
 0xf7f   :  { %v4334_v55 = vpop.f32.mrb[85].mxu0  ;;  %v4410_v62 = vadd.f32 %v10806_v2, %v14161_v8 }
 0xf80   :  { %v4408_v51 = vadd.f32 %v14161_v8, %v4334_v55  ;;  %v10807_v56 = vpop.f32.mrb[86].mxu0  ;;  %4448 = vadd.xlane.f32.xlu1 %v4447_v7  ;;  %v16570_v7 = vld [vmem:[#allocation16_spill] sm:$0xff] }
 0xf81   :  { %v4337_v42 = vpop.f32.mrb[87].mxu0  ;;  %v4411_v26 = vadd.f32 %v10807_v56, %v14161_v8  ;;  %v14198_v23 = vadd.f32 %v4410_v62, %v16563_v57  ;;  %v16571_v56 = vld [vmem:[#allocation15_spill] sm:$0xff] }
 0xf82   :  { %v14190_v9 = vadd.f32 %v4408_v51, %v16561_v38  ;;  %v4409_v10 = vadd.f32 %v14161_v8, %v4337_v42  ;;  %4445 = vadd.xlane.f32.xlu0 %v4444_v43 }
 0xf83   :  { %v14203_v54 = vadd.f32 %v4411_v26, %v16564_v34  ;;  %v4456_v17 = vsel %vm1072_vm0, %v14198_v23, 0.0  ;;  %v16572_v26 = vld [vmem:[#allocation17_spill] sm:$0xff] }
 0xf84   :  { %v14195_v36 = vadd.f32 %v4409_v10, %v16562_v13  ;;  %v4450_v32 = vsel %vm1072_vm0, %v14190_v9, 0.0 }
 0xf85   :  { %v4459_v12 = vsel %vm1072_vm0, %v14203_v54, 0.0 }
 0xf86   :  { %4451 = vadd.xlane.f32.xlu0 %v4450_v32  ;;  %v4453_v19 = vsel %vm1072_vm0, %v14195_v36, 0.0 }
 0xf87   :  { %4454 = vadd.xlane.f32.xlu1 %v4453_v19 }
 0xf8a   :  { %4457 = vadd.xlane.f32.xlu0 %v4456_v17 }
 0xf8b   :  { %4460 = vadd.xlane.f32.xlu1 %v4459_v12 }
0x1009   :  { %v4440_v6 = vpop.xlane.xlu1 %4439 }
0x100a   :  { %v4486_v53 = vmul.f32 0.03125, %v4440_v6 }
0x100b   :  { %v4443_v59 = vpop.xlane.xlu0 %4442 }
0x100c   :  { %v4487_v40 = vmul.f32 0.03125, %v4443_v59  ;;  %v14243_v21 = vsub.f32 %v14167_v61, %v4486_v53 }
0x100d   :  { %v4449_v16 = vpop.xlane.xlu1 %4448 }
0x100e   :  { %v4489_v38 = vmul.f32 0.03125, %v4449_v16  ;;  %v4518_v19 = vmul.f32 %v14243_v21, %v14243_v21  ;;  %v11571_v16 = vld [vmem:[%s16470_s12 + $0x8] sm:$0xff]  }
0x100f   :  { %v4446_v25 = vpop.xlane.xlu0 %4445 }
0x1010   :  { %v4488_v55 = vmul.f32 0.03125, %v4446_v25  ;;  %v14269_v12 = vsub.f32 %v14171_v22, %v4489_v38 }
0x1012   :  { %v14262_v57 = vsub.f32 %v14179_v46, %v4488_v55 }
0x1013   :  { %v4452_v2 = vpop.xlane.xlu0 %4451 }
0x1014   :  { %v4455_v43 = vpop.xlane.xlu1 %4454  ;;  %v4490_v32 = vmul.f32 0.03125, %v4452_v2 }
0x1017   :  { %v4458_v17 = vpop.xlane.xlu0 %4457 }
0x101b   :  { %v10810_v15 = vpop.f32.mrb[88].mxu0 }
0x101c   :  { %v4350_v27 = vpop.f32.mrb[89].mxu0  ;;  %v4414_v63 = vadd.f32 %v10810_v15, %v14161_v8  ;;  %v4491_v15 = vmul.f32 0.03125, %v4455_v43 }
0x101d   :  { %v4412_v52 = vadd.f32 %v14161_v8, %v4350_v27  ;;  %v10811_v37 = vpop.f32.mrb[90].mxu0 }
0x101e   :  { %v4353_v58 = vpop.f32.mrb[91].mxu0  ;;  %v4415_v50 = vadd.f32 %v10811_v37, %v14161_v8  ;;  %v14219_v28 = vadd.f32 %v4414_v63, %v16566_v48  ;;  %v4461_v63 = vpop.xlane.xlu1 %4460  ;;  %v4492_v37 = vmul.f32 0.03125, %v4458_v17  ;;  %v4521_v48 = vmul.f32 %v14269_v12, %v14269_v12 }
0x101f   :  { %v14214_v11 = vadd.f32 %v4412_v52, %v16565_v29  ;;  %v4413_v39 = vadd.f32 %v14161_v8, %v4353_v58  ;;  %v14276_v52 = vsub.f32 %v14190_v9, %v4490_v32  ;;  %v4534_v58 = vsel %vm1072_vm0, %v4518_v19, 0.0 }
0x1020   :  { %v14227_v0 = vadd.f32 %v4415_v50, %v16568_v3  ;;  %v4468_v44 = vsel %vm1072_vm0, %v14219_v28, 0.0  ;;  %v4520_v29 = vmul.f32 %v14262_v57, %v14262_v57  ;;  %v14282_v50 = vsub.f32 %v14195_v36, %v4491_v15 }
0x1021   :  { %v14222_v31 = vadd.f32 %v4413_v39, %v16567_v49  ;;  %v4462_v4 = vsel %vm1072_vm0, %v14214_v11, 0.0  ;;  %v4493_v39 = vmul.f32 0.03125, %v4461_v63  ;;  %v14288_v49 = vsub.f32 %v14198_v23, %v4492_v37 }
0x1022   :  { %4463 = vadd.xlane.f32.xlu0 %v4462_v4  ;;  %v4471_v5 = vsel %vm1072_vm0, %v14227_v0, 0.0  ;;  %v4540_v4 = vsel %vm1072_vm0, %v4520_v29, 0.0  ;;  %v4522_v25 = vmul.f32 %v14276_v52, %v14276_v52 }
0x1023   :  { %v10814_v47 = vpop.f32.mrb[92].mxu0  ;;  %v4465_v24 = vsel %vm1072_vm0, %v14222_v31, 0.0  ;;  %v14294_v3 = vsub.f32 %v14203_v54, %v4493_v39 }
0x1024   :  { %4466 = vadd.xlane.f32.xlu1 %v4465_v24  ;;  %v4366_v45 = vpop.f32.mrb[93].mxu0  ;;  %v4418_v1 = vadd.f32 %v10814_v47, %v14161_v8  ;;  %v4543_v47 = vsel %vm1072_vm0, %v4521_v48, 0.0  ;;  %v4523_v24 = vmul.f32 %v14282_v50, %v14282_v50  ;;  %v4546_v53 = vsel %vm1072_vm0, %v4522_v25, 0.0 }
0x1025   :  { %v4416_v14 = vadd.f32 %v14161_v8, %v4366_v45  ;;  %v10815_v18 = vpop.f32.mrb[94].mxu0  ;;  %v4524_v45 = vmul.f32 %v14288_v49, %v14288_v49 }
0x1026   :  { %4469 = vadd.xlane.f32.xlu0 %v4468_v44  ;;  %v4369_v41 = vpop.f32.mrb[95].mxu0  ;;  %v4419_v60 = vadd.f32 %v10815_v18, %v14161_v8  ;;  %v14246_v51 = vadd.f32 %v4418_v1, %v16570_v7  ;;  %v4549_v1 = vsel %vm1072_vm0, %v4523_v24, 0.0 }
0x1027   :  { %v14236_v20 = vadd.f32 %v4416_v14, %v16569_v33  ;;  %v4417_v30 = vadd.f32 %v14161_v8, %v4369_v41  ;;  %v14254_v8 = vsub.f32 %v14174_v35, %v4487_v40  ;;  %v4525_v14 = vmul.f32 %v14294_v3, %v14294_v3  ;;  %v11570_v40 = vld [vmem:[%s16470_s12] sm:$0xff]  }
0x1028   :  { %4472 = vadd.xlane.f32.xlu1 %v4471_v5  ;;  %v14257_v10 = vadd.f32 %v4419_v60, %v16572_v26  ;;  %v4480_v34 = vsel %vm1072_vm0, %v14246_v51, 0.0  ;;  %v4552_v18 = vsel %vm1072_vm0, %v4524_v45, 0.0  ;;  %10816 = vmatprep.subr.bf16.mxu1 %v11570_v40 }
0x1029   :  { %v14249_v62 = vadd.f32 %v4417_v30, %v16571_v56  ;;  %v4474_v42 = vsel %vm1072_vm0, %v14236_v20, 0.0  ;;  %v4519_v27 = vmul.f32 %v14254_v8, %v14254_v8  ;;  %v4555_v44 = vsel %vm1072_vm0, %v4525_v14, 0.0  ;;  %10817 = vmatpush3.bf16.msra.mxu1 %v11570_v40 }
0x102a   :  { %4475 = vadd.xlane.f32.xlu0 %v4474_v42  ;;  %v4483_v59 = vsel %vm1072_vm0, %v14257_v10, 0.0  ;;  %10818 = vmatprep.subr.bf16.mxu1 %v11571_v16 }
0x102b   :  { %v4477_v13 = vsel %vm1072_vm0, %v14249_v62, 0.0  ;;  %v4537_v6 = vsel %vm1072_vm0, %v4519_v27, 0.0 }
0x102c   :  { %4478 = vadd.xlane.f32.xlu1 %v4477_v13 }
0x102d   :  { %10819 = vmatpush3.bf16.msra.mxu1 %v11571_v16 }
0x102e   :  { %4481 = vadd.xlane.f32.xlu0 %v4480_v34 }
0x1030   :  { %4484 = vadd.xlane.f32.xlu1 %v4483_v59 }
0x1032   :  { %4535 = vadd.xlane.f32.xlu0 %v4534_v58 }
0x1034   :  { %4538 = vadd.xlane.f32.xlu1 %v4537_v6 }
0x1036   :  { %4541 = vadd.xlane.f32.xlu0 %v4540_v4 }
0x1038   :  { %4544 = vadd.xlane.f32.xlu1 %v4543_v47 }
0x103a   :  { %4547 = vadd.xlane.f32.xlu0 %v4546_v53 }
0x103c   :  { %4550 = vadd.xlane.f32.xlu1 %v4549_v1 }
0x103e   :  { %4553 = vadd.xlane.f32.xlu0 %v4552_v18 }
0x1040   :  { %4556 = vadd.xlane.f32.xlu1 %v4555_v44 }
0x10af   :  { %v4464_v41 = vpop.xlane.xlu0 %4463 }
0x10b0   :  { %v4494_v33 = vmul.f32 0.03125, %v4464_v41 }
0x10b1   :  { %v4467_v60 = vpop.xlane.xlu1 %4466 }
0x10b2   :  { %v14314_v30 = vsub.f32 %v14214_v11, %v4494_v33  ;;  %v4495_v5 = vmul.f32 0.03125, %v4467_v60 }
0x10b3   :  { %v4470_v2 = vpop.xlane.xlu0 %4469 }
0x10b4   :  { %v14317_v55 = vsub.f32 %v14222_v31, %v4495_v5  ;;  %v4496_v7 = vmul.f32 0.03125, %v4470_v2  ;;  %v4526_v56 = vmul.f32 %v14314_v30, %v14314_v30 }
0x10b5   :  { %v4473_v42 = vpop.xlane.xlu1 %4472 }
0x10b6   :  { %v14322_v43 = vsub.f32 %v14219_v28, %v4496_v7  ;;  %v4497_v38 = vmul.f32 0.03125, %v4473_v42  ;;  %v4558_v26 = vsel %vm1072_vm0, %v4526_v56, 0.0  ;;  %v4527_v13 = vmul.f32 %v14317_v55, %v14317_v55 }
0x10b7   :  { %4559 = vadd.xlane.f32.xlu0 %v4558_v26  ;;  %v4476_v32 = vpop.xlane.xlu0 %4475 }
0x10b8   :  { %v14328_v34 = vsub.f32 %v14227_v0, %v4497_v38  ;;  %v4498_v19 = vmul.f32 0.03125, %v4476_v32  ;;  %v4561_v17 = vsel %vm1072_vm0, %v4527_v13, 0.0  ;;  %v4528_v15 = vmul.f32 %v14322_v43, %v14322_v43 }
0x10b9   :  { %4562 = vadd.xlane.f32.xlu1 %v4561_v17  ;;  %v4479_v59 = vpop.xlane.xlu1 %4478 }
0x10ba   :  { %v14334_v27 = vsub.f32 %v14236_v20, %v4498_v19  ;;  %v4499_v63 = vmul.f32 0.03125, %v4479_v59  ;;  %v4564_v37 = vsel %vm1072_vm0, %v4528_v15, 0.0  ;;  %v4529_v58 = vmul.f32 %v14328_v34, %v14328_v34 }
0x10bb   :  { %4565 = vadd.xlane.f32.xlu0 %v4564_v37  ;;  %v4482_v29 = vpop.xlane.xlu0 %4481 }
0x10bc   :  { %v14340_v39 = vsub.f32 %v14249_v62, %v4499_v63  ;;  %v4500_v6 = vmul.f32 0.03125, %v4482_v29  ;;  %v4567_v48 = vsel %vm1072_vm0, %v4529_v58, 0.0  ;;  %v4530_v4 = vmul.f32 %v14334_v27, %v14334_v27 }
0x10bd   :  { %4568 = vadd.xlane.f32.xlu1 %v4567_v48  ;;  %v4485_v25 = vpop.xlane.xlu1 %4484 }
0x10be   :  { %v14346_v47 = vsub.f32 %v14246_v51, %v4500_v6  ;;  %v4501_v24 = vmul.f32 0.03125, %v4485_v25  ;;  %v4570_v53 = vsel %vm1072_vm0, %v4530_v4, 0.0  ;;  %v4531_v45 = vmul.f32 %v14340_v39, %v14340_v39  ;;  %v14364_v4 = vld [vmem:[%s16471_s10] ss:$0 sm:$0xff] }
0x10bf   :  { %4571 = vadd.xlane.f32.xlu0 %v4570_v53  ;;  %v4536_v1 = vpop.xlane.xlu0 %4535 }
0x10c0   :  { %v14352_v14 = vsub.f32 %v14257_v10, %v4501_v24  ;;  %v4582_v18 = vmul.f32 0.03125, %v4536_v1  ;;  %v4573_v44 = vsel %vm1072_vm0, %v4531_v45, 0.0  ;;  %v4532_v40 = vmul.f32 %v14346_v47, %v14346_v47 }
0x10c1   :  { %4574 = vadd.xlane.f32.xlu1 %v4573_v44  ;;  %v4539_v16 = vpop.xlane.xlu1 %4538 }
0x10c2   :  { %v4598_v41 = vadd.f32 1e-06, %v4582_v18  ;;  %v4583_v33 = vmul.f32 0.03125, %v4539_v16  ;;  %v4576_v60 = vsel %vm1072_vm0, %v4532_v40, 0.0  ;;  %v4533_v5 = vmul.f32 %v14352_v14, %v14352_v14  ;;  %v14372_v16 = vld [vmem:[%s16472_s11] ss:$0 sm:$0xff] }
0x10c3   :  { %4577 = vadd.xlane.f32.xlu0 %v4576_v60  ;;  %v4542_v2 = vpop.xlane.xlu0 %4541 }
0x10c4   :  { %11872 = vrsqrt.f32 %v4598_v41  ;;  %v4599_v7 = vadd.f32 1e-06, %v4583_v33  ;;  %v4584_v56 = vmul.f32 0.03125, %v4542_v2  ;;  %v4579_v42 = vsel %vm1072_vm0, %v4533_v5, 0.0 }
0x10c5   :  { %4580 = vadd.xlane.f32.xlu1 %v4579_v42  ;;  %v4545_v38 = vpop.xlane.xlu1 %4544 }
0x10c6   :  { %11874 = vrsqrt.f32 %v4599_v7  ;;  %v4600_v26 = vadd.f32 1e-06, %v4584_v56  ;;  %v4585_v13 = vmul.f32 0.03125, %v4545_v38 }
0x10c7   :  { %v4548_v32 = vpop.xlane.xlu0 %4547 }
0x10c8   :  { %11876 = vrsqrt.f32 %v4600_v26  ;;  %v4601_v19 = vadd.f32 1e-06, %v4585_v13  ;;  %v4586_v17 = vmul.f32 0.03125, %v4548_v32 }
0x10c9   :  { %v4551_v15 = vpop.xlane.xlu1 %4550 }
0x10ca   :  { %11878 = vrsqrt.f32 %v4601_v19  ;;  %v4602_v59 = vadd.f32 1e-06, %v4586_v17  ;;  %v4587_v63 = vmul.f32 0.03125, %v4551_v15 }
0x10cb   :  { %v4554_v37 = vpop.xlane.xlu0 %4553 }
0x10cc   :  { %11880 = vrsqrt.f32 %v4602_v59  ;;  %v4603_v58 = vadd.f32 1e-06, %v4587_v63  ;;  %v4588_v29 = vmul.f32 0.03125, %v4554_v37 }
0x10cd   :  { %v4557_v6 = vpop.xlane.xlu1 %4556 }
0x10ce   :  { %v11873_v48 = vpop.eup %11872  ;;  %11882 = vrsqrt.f32 %v4603_v58  ;;  %v4604_v25 = vadd.f32 1e-06, %v4588_v29  ;;  %v4589_v24 = vmul.f32 0.03125, %v4557_v6 }
0x10cf   :  { %v4630_v53 = vmul.f32 %v11873_v48, %v14243_v21 }
0x10d0   :  { %v11875_v45 = vpop.eup %11874  ;;  %11884 = vrsqrt.f32 %v4604_v25  ;;  %v4605_v1 = vadd.f32 1e-06, %v4589_v24  ;;  %v11572_v24 = vld [vmem:[%s16473_s14] sm:$0xff]  }
0x10d1   :  { %v4631_v18 = vmul.f32 %v11875_v45, %v14254_v8  ;;  %v4652_v44 = vmul.f32 %v14364_v4, %v4630_v53  ;;  %10836 = vmatprep.subr.bf16.mxu1 %v11572_v24  ;;  %v11574_v53 = vld [vmem:[%s16473_s14 + $0x10] sm:$0xff]  }
0x10d2   :  { %v11877_v40 = vpop.eup %11876  ;;  %11886 = vrsqrt.f32 %v4605_v1 }
0x10d3   :  { %v4632_v41 = vmul.f32 %v11877_v40, %v14262_v57  ;;  %v4653_v33 = vmul.f32 %v14364_v4, %v4631_v18  ;;  %v4674_v8 = vadd.f32 %v14372_v16, %v4652_v44  ;;  %v11575_v44 = vld [vmem:[%s16473_s14 + $0x18] sm:$0xff]  }
0x10d4   :  { %v11879_v60 = vpop.eup %11878 }
0x10d5   :  { %v4654_v21 = vmul.f32 %v14364_v4, %v4632_v41  ;;  %v4633_v5 = vmul.f32 %v11879_v60, %v14269_v12  ;;  %v4675_v2 = vadd.f32 %v14372_v16, %v4653_v33 }
0x10d6   :  { %v11881_v7 = vpop.eup %11880 }
0x10d7   :  { %v4655_v56 = vmul.f32 %v14364_v4, %v4633_v5  ;;  %v4690_v42 = vpack.c.bf16 %v4675_v2, %v4674_v8  ;;  %v4634_v38 = vmul.f32 %v11881_v7, %v14276_v52  ;;  %v4676_v57 = vadd.f32 %v14372_v16, %v4654_v21 }
0x10d8   :  { %v11883_v26 = vpop.eup %11882 }
0x10d9   :  { %v4677_v13 = vadd.f32 %v14372_v16, %v4655_v56  ;;  %10820 = vmatprep.mubr.msk.bf16.mxu1 %vm1072_vm0, %v4690_v42  ;;  %v4635_v32 = vmul.f32 %v11883_v26, %v14282_v50  ;;  %v4656_v12 = vmul.f32 %v14364_v4, %v4634_v38 }
0x10da   :  { %v11885_v19 = vpop.eup %11884 }
0x10db   :  { %v4691_v17 = vpack.c.bf16 %v4677_v13, %v4676_v57  ;;  %v4657_v15 = vmul.f32 %v14364_v4, %v4635_v32  ;;  %v4636_v59 = vmul.f32 %v11885_v19, %v14288_v49  ;;  %v4678_v52 = vadd.f32 %v14372_v16, %v4656_v12 }
0x10dc   :  { %v11887_v63 = vpop.eup %11886 }
0x10dd   :  { %10821 = vmatmul.mubr.msk.bf16.vlgmr.msra.gmra.mrb[136].mxu1 %vm1072_vm0, %v4691_v17  ;;  %v4679_v37 = vadd.f32 %v14372_v16, %v4657_v15  ;;  %v4637_v58 = vmul.f32 %v11887_v63, %v14294_v3  ;;  %v4658_v29 = vmul.f32 %v14364_v4, %v4636_v59  ;;  %v11573_v3 = vld [vmem:[%s16473_s14 + $0x8] sm:$0xff]  }
0x10de   :  { %10837 = vmatpush3.bf16.msra.mxu1 %v11572_v24 }
0x10df   :  { %v4692_v50 = vpack.c.bf16 %v4679_v37, %v4678_v52  ;;  %v4659_v6 = vmul.f32 %v14364_v4, %v4637_v58  ;;  %v4680_v48 = vadd.f32 %v14372_v16, %v4658_v29  ;;  %10838 = vmatprep.subr.bf16.mxu1 %v11573_v3 }
0x10e1   :  { %10824 = vmatprep.mubr.msk.bf16.mxu1 %vm1072_vm0, %v4692_v50  ;;  %v4681_v49 = vadd.f32 %v14372_v16, %v4659_v6 }
0x10e2   :  { %10839 = vmatpush3.bf16.msra.mxu1 %v11573_v3 }
0x10e3   :  { %v4693_v25 = vpack.c.bf16 %v4681_v49, %v4680_v48  ;;  %10840 = vmatprep.subr.bf16.mxu1 %v11574_v53 }
0x10e5   :  { %10825 = vmatmul.mubr.msk.bf16.gmra.mrb[140].mxu1 %vm1072_vm0, %v4693_v25 }
0x10e6   :  { %10841 = vmatpush3.bf16.msra.mxu1 %v11574_v53 }
0x10e7   :  { %10842 = vmatprep.subr.bf16.mxu1 %v11575_v44 }
0x10ea   :  { %10843 = vmatpush3.bf16.msra.mxu1 %v11575_v44 }
0x1144   :  { %v4560_v45 = vpop.xlane.xlu0 %4559 }
0x1145   :  { %v4590_v1 = vmul.f32 0.03125, %v4560_v45 }
0x1146   :  { %v4563_v18 = vpop.xlane.xlu1 %4562 }
0x1147   :  { %v4606_v40 = vadd.f32 1e-06, %v4590_v1  ;;  %v4591_v41 = vmul.f32 0.03125, %v4563_v18 }
0x1148   :  { %v4566_v33 = vpop.xlane.xlu0 %4565 }
0x1149   :  { %11888 = vrsqrt.f32 %v4606_v40  ;;  %v4607_v60 = vadd.f32 1e-06, %v4591_v41  ;;  %v4592_v21 = vmul.f32 0.03125, %v4566_v33 }
0x114a   :  { %v4569_v5 = vpop.xlane.xlu1 %4568 }
0x114b   :  { %11890 = vrsqrt.f32 %v4607_v60  ;;  %v4608_v8 = vadd.f32 1e-06, %v4592_v21  ;;  %v4593_v2 = vmul.f32 0.03125, %v4569_v5 }
0x114c   :  { %v4572_v7 = vpop.xlane.xlu0 %4571 }
0x114d   :  { %11892 = vrsqrt.f32 %v4608_v8  ;;  %v4609_v56 = vadd.f32 1e-06, %v4593_v2  ;;  %v4594_v42 = vmul.f32 0.03125, %v4572_v7 }
0x114e   :  { %v4575_v38 = vpop.xlane.xlu1 %4574 }
0x114f   :  { %11894 = vrsqrt.f32 %v4609_v56  ;;  %v4610_v26 = vadd.f32 1e-06, %v4594_v42  ;;  %v4595_v57 = vmul.f32 0.03125, %v4575_v38 }
0x1150   :  { %v4578_v13 = vpop.xlane.xlu0 %4577 }
0x1151   :  { %11896 = vrsqrt.f32 %v4610_v26  ;;  %v4611_v32 = vadd.f32 1e-06, %v4595_v57  ;;  %v4596_v12 = vmul.f32 0.03125, %v4578_v13  ;;  %v14442_v26 = vld [vmem:[%s16474_s13] ss:$0 sm:$0xff] }
0x1152   :  { %v4581_v19 = vpop.xlane.xlu1 %4580 }
0x1153   :  { %v11889_v17 = vpop.eup %11888  ;;  %11898 = vrsqrt.f32 %v4611_v32  ;;  %v4612_v15 = vadd.f32 1e-06, %v4596_v12  ;;  %v4597_v59 = vmul.f32 0.03125, %v4581_v19 }
0x1154   :  { %v4638_v63 = vmul.f32 %v11889_v17, %v14314_v30 }
0x1155   :  { %v11891_v52 = vpop.eup %11890  ;;  %11900 = vrsqrt.f32 %v4612_v15  ;;  %v4613_v37 = vadd.f32 1e-06, %v4597_v59 }
0x1156   :  { %v4639_v58 = vmul.f32 %v11891_v52, %v14317_v55  ;;  %v4660_v29 = vmul.f32 %v14364_v4, %v4638_v63 }
0x1157   :  { %v11893_v50 = vpop.eup %11892  ;;  %11902 = vrsqrt.f32 %v4613_v37 }
0x1158   :  { %v4661_v6 = vmul.f32 %v14364_v4, %v4639_v58  ;;  %v4640_v48 = vmul.f32 %v11893_v50, %v14322_v43  ;;  %v4682_v25 = vadd.f32 %v14372_v16, %v4660_v29 }
0x1159   :  { %v11895_v49 = vpop.eup %11894 }
0x115a   :  { %v4683_v24 = vadd.f32 %v14372_v16, %v4661_v6  ;;  %v4641_v30 = vmul.f32 %v11895_v49, %v14328_v34  ;;  %v4662_v3 = vmul.f32 %v14364_v4, %v4640_v48 }
0x115b   :  { %v11897_v53 = vpop.eup %11896 }
0x115c   :  { %v4694_v45 = vpack.c.bf16 %v4683_v24, %v4682_v25  ;;  %v4663_v55 = vmul.f32 %v14364_v4, %v4641_v30  ;;  %v4642_v1 = vmul.f32 %v11897_v53, %v14334_v27  ;;  %v4684_v43 = vadd.f32 %v14372_v16, %v4662_v3 }
0x115d   :  { %v11899_v18 = vpop.eup %11898 }
0x115e   :  { %10828 = vmatprep.mubr.msk.bf16.mxu1 %vm1072_vm0, %v4694_v45  ;;  %v4685_v44 = vadd.f32 %v14372_v16, %v4663_v55  ;;  %v4643_v40 = vmul.f32 %v11899_v18, %v14340_v39  ;;  %v4664_v41 = vmul.f32 %v14364_v4, %v4642_v1 }
0x115f   :  { %v11901_v34 = vpop.eup %11900 }
0x1160   :  { %v4695_v33 = vpack.c.bf16 %v4685_v44, %v4684_v43  ;;  %v4665_v60 = vmul.f32 %v14364_v4, %v4643_v40  ;;  %v4644_v21 = vmul.f32 %v11901_v34, %v14346_v47  ;;  %v4686_v27 = vadd.f32 %v14372_v16, %v4664_v41 }
0x1161   :  { %v11903_v5 = vpop.eup %11902 }
0x1162   :  { %10829 = vmatmul.mubr.msk.bf16.gmra.mrb[144].mxu1 %vm1072_vm0, %v4695_v33  ;;  %v4687_v8 = vadd.f32 %v14372_v16, %v4665_v60  ;;  %v4645_v2 = vmul.f32 %v11903_v5, %v14352_v14  ;;  %v4666_v7 = vmul.f32 %v14364_v4, %v4644_v21 }
0x1164   :  { %v4696_v39 = vpack.c.bf16 %v4687_v8, %v4686_v27  ;;  %v4667_v56 = vmul.f32 %v14364_v4, %v4645_v2  ;;  %v4688_v42 = vadd.f32 %v14372_v16, %v4666_v7 }
0x1166   :  { %10832 = vmatprep.mubr.msk.bf16.mxu1 %vm1072_vm0, %v4696_v39  ;;  %v4689_v47 = vadd.f32 %v14372_v16, %v4667_v56 }
0x1168   :  { %v4697_v38 = vpack.c.bf16 %v4689_v47, %v4688_v42 }
0x116a   :  { %10833 = vmatmul.mubr.msk.bf16.gmra.mrb[148].mxu1 %vm1072_vm0, %v4697_v38 }
0x11b0   :  { %v10822_v14 = vpop.f32.mrb[136].mxu1 }
0x11b1   :  { %v4788_v57 = vadd.f32 %v10822_v14, %v14442_v26  ;;  %v4779_v13 = vpop.f32.mrb[137].mxu1 }
0x11b2   :  { %v4780_v4 = vadd.f32 %v14442_v26, %v4779_v13  ;;  %v10823_v32 = vpop.f32.mrb[138].mxu1 }
0x11b3   :  { %v4861_v12 = vmul.f32 0.70710677, %v4788_v57  ;;  %v4791_v19 = vadd.f32 %v10823_v32, %v14442_v26  ;;  %v4782_v17 = vpop.f32.mrb[139].mxu1  ;;  %v4844_v44 = vmul.f32 0.5, %v4788_v57 }
0x11b4   :  { %v4859_v16 = vmul.f32 0.70710677, %v4780_v4  ;;  %v4783_v15 = vadd.f32 %v14442_v26, %v4782_v17  ;;  %v4842_v34 = vmul.f32 0.5, %v4780_v4 }
0x11b5   :  { %11904 = verf.f32 %v4861_v12  ;;  %v4862_v59 = vmul.f32 0.70710677, %v4791_v19  ;;  %v4845_v40 = vmul.f32 0.5, %v4791_v19 }
0x11b6   :  { %11906 = verf.f32 %v4859_v16  ;;  %v4860_v63 = vmul.f32 0.70710677, %v4783_v15  ;;  %v4843_v33 = vmul.f32 0.5, %v4783_v15 }
0x11b7   :  { %11908 = verf.f32 %v4862_v59 }
0x11b8   :  { %11910 = verf.f32 %v4860_v63  ;;  %v10826_v52 = vpop.f32.mrb[140].mxu1 }
0x11b9   :  { %v4804_v37 = vadd.f32 %v10826_v52, %v14442_v26  ;;  %v4795_v58 = vpop.f32.mrb[141].mxu1 }
0x11ba   :  { %v4796_v29 = vadd.f32 %v14442_v26, %v4795_v58  ;;  %v10827_v50 = vpop.f32.mrb[142].mxu1 }
0x11bb   :  { %v4865_v6 = vmul.f32 0.70710677, %v4804_v37  ;;  %v4807_v48 = vadd.f32 %v10827_v50, %v14442_v26  ;;  %v4798_v49 = vpop.f32.mrb[143].mxu1  ;;  %v4848_v57 = vmul.f32 0.5, %v4804_v37 }
0x11bc   :  { %v4863_v25 = vmul.f32 0.70710677, %v4796_v29  ;;  %v4799_v24 = vadd.f32 %v14442_v26, %v4798_v49  ;;  %v4846_v4 = vmul.f32 0.5, %v4796_v29 }
0x11bd   :  { %11912 = verf.f32 %v4865_v6  ;;  %v4866_v30 = vmul.f32 0.70710677, %v4807_v48  ;;  %v4849_v13 = vmul.f32 0.5, %v4807_v48 }
0x11be   :  { %11914 = verf.f32 %v4863_v25  ;;  %v4864_v3 = vmul.f32 0.70710677, %v4799_v24  ;;  %v4847_v12 = vmul.f32 0.5, %v4799_v24 }
0x11bf   :  { %v11905_v53 = vpop.eup %11904  ;;  %11916 = verf.f32 %v4866_v30 }
0x11c0   :  { %v11907_v45 = vpop.eup %11906  ;;  %v4893_v55 = vadd.f32 1.0, %v11905_v53  ;;  %11918 = verf.f32 %v4864_v3 }
0x11c1   :  { %v11909_v1 = vpop.eup %11908  ;;  %v4891_v18 = vadd.f32 1.0, %v11907_v45 }
0x11c2   :  { %v11911_v43 = vpop.eup %11910  ;;  %v4894_v41 = vadd.f32 1.0, %v11909_v1  ;;  %v4909_v21 = vmul.f32 %v4893_v55, %v4844_v44 }
0x11c3   :  { %v4892_v60 = vadd.f32 1.0, %v11911_v43  ;;  %v4907_v27 = vmul.f32 %v4891_v18, %v4842_v34 }
0x11c4   :  { %v4910_v5 = vmul.f32 %v4894_v41, %v4845_v40 }
0x11c5   :  { %v4908_v8 = vmul.f32 %v4892_v60, %v4843_v33 }
0x11c6   :  { %v4924_v2 = vpack.c.bf16 %v4910_v5, %v4909_v21 }
0x11c7   :  { %v11913_v7 = vpop.eup %11912  ;;  %v4923_v39 = vpack.c.bf16 %v4908_v8, %v4907_v27 }
0x11c8   :  { %v11915_v56 = vpop.eup %11914  ;;  %v4897_v42 = vadd.f32 1.0, %v11913_v7 }
0x11c9   :  { %v11917_v47 = vpop.eup %11916  ;;  %v4895_v38 = vadd.f32 1.0, %v11915_v56  ;;  %10844 = vmatprep.mubr.msk.bf16.mxu1 %vm1709_vm2, %v4923_v39 }
0x11ca   :  { %v11919_v14 = vpop.eup %11918  ;;  %v4898_v32 = vadd.f32 1.0, %v11917_v47  ;;  %10845 = vmatmul.mubr.msk.bf16.vlgmr.msra.gmra.mrb[152].mxu1 %vm1709_vm2, %v4924_v2  ;;  %v4913_v17 = vmul.f32 %v4897_v42, %v4848_v57 }
0x11cb   :  { %v4896_v19 = vadd.f32 1.0, %v11919_v14  ;;  %v4911_v15 = vmul.f32 %v4895_v38, %v4846_v4 }
0x11cc   :  { %v4914_v16 = vmul.f32 %v4898_v32, %v4849_v13 }
0x11cd   :  { %v4912_v59 = vmul.f32 %v4896_v19, %v4847_v12 }
0x11ce   :  { %v4926_v63 = vpack.c.bf16 %v4914_v16, %v4913_v17 }
0x11cf   :  { %v4925_v52 = vpack.c.bf16 %v4912_v59, %v4911_v15 }
0x11d1   :  { %10848 = vmatprep.mubr.msk.bf16.mxu1 %vm1709_vm2, %v4925_v52 }
0x11d2   :  { %10849 = vmatmul.mubr.msk.bf16.gmra.mrb[156].mxu1 %vm1709_vm2, %v4926_v63 }
0x1235   :  { %v10830_v58 = vpop.f32.mrb[144].mxu1 }
0x1236   :  { %v4820_v37 = vadd.f32 %v10830_v58, %v14442_v26  ;;  %v4811_v50 = vpop.f32.mrb[145].mxu1 }
0x1237   :  { %v4812_v6 = vadd.f32 %v14442_v26, %v4811_v50  ;;  %v10831_v48 = vpop.f32.mrb[146].mxu1 }
0x1238   :  { %v4869_v29 = vmul.f32 0.70710677, %v4820_v37  ;;  %v4823_v49 = vadd.f32 %v10831_v48, %v14442_v26  ;;  %v4814_v25 = vpop.f32.mrb[147].mxu1  ;;  %v4852_v56 = vmul.f32 0.5, %v4820_v37 }
0x1239   :  { %v4867_v24 = vmul.f32 0.70710677, %v4812_v6  ;;  %v4815_v30 = vadd.f32 %v14442_v26, %v4814_v25  ;;  %v4850_v38 = vmul.f32 0.5, %v4812_v6 }
0x123a   :  { %11920 = verf.f32 %v4869_v29  ;;  %v4870_v3 = vmul.f32 0.70710677, %v4823_v49  ;;  %v4853_v42 = vmul.f32 0.5, %v4823_v49 }
0x123b   :  { %11922 = verf.f32 %v4867_v24  ;;  %v4868_v53 = vmul.f32 0.70710677, %v4815_v30  ;;  %v4851_v14 = vmul.f32 0.5, %v4815_v30 }
0x123c   :  { %11924 = verf.f32 %v4870_v3 }
0x123d   :  { %11926 = verf.f32 %v4868_v53  ;;  %v10834_v45 = vpop.f32.mrb[148].mxu1 }
0x123e   :  { %v4836_v55 = vadd.f32 %v10834_v45, %v14442_v26  ;;  %v4827_v1 = vpop.f32.mrb[149].mxu1  ;;  %v14471_v45 = vld [vmem:[%s16475_s15] ss:$0 sm:$0xff] }
0x123f   :  { %v4828_v18 = vadd.f32 %v14442_v26, %v4827_v1  ;;  %v10835_v43 = vpop.f32.mrb[150].mxu1 }
0x1240   :  { %v4873_v44 = vmul.f32 0.70710677, %v4836_v55  ;;  %v4839_v40 = vadd.f32 %v10835_v43, %v14442_v26  ;;  %v4830_v41 = vpop.f32.mrb[151].mxu1  ;;  %v4856_v58 = vmul.f32 0.5, %v4836_v55 }
0x1241   :  { %v4871_v34 = vmul.f32 0.70710677, %v4828_v18  ;;  %v4831_v33 = vadd.f32 %v14442_v26, %v4830_v41  ;;  %v4854_v6 = vmul.f32 0.5, %v4828_v18 }
0x1242   :  { %11928 = verf.f32 %v4873_v44  ;;  %v4874_v60 = vmul.f32 0.70710677, %v4839_v40  ;;  %v4857_v37 = vmul.f32 0.5, %v4839_v40 }
0x1243   :  { %11930 = verf.f32 %v4871_v34  ;;  %v4872_v21 = vmul.f32 0.70710677, %v4831_v33  ;;  %v4855_v48 = vmul.f32 0.5, %v4831_v33 }
0x1244   :  { %v11921_v5 = vpop.eup %11920  ;;  %11932 = verf.f32 %v4874_v60 }
0x1245   :  { %v11923_v27 = vpop.eup %11922  ;;  %v4901_v8 = vadd.f32 1.0, %v11921_v5  ;;  %11934 = verf.f32 %v4872_v21 }
0x1246   :  { %v11925_v2 = vpop.eup %11924  ;;  %v4899_v7 = vadd.f32 1.0, %v11923_v27 }
0x1247   :  { %v11927_v39 = vpop.eup %11926  ;;  %v4902_v47 = vadd.f32 1.0, %v11925_v2  ;;  %v4917_v13 = vmul.f32 %v4901_v8, %v4852_v56 }
0x1248   :  { %v4900_v57 = vadd.f32 1.0, %v11927_v39  ;;  %v4915_v32 = vmul.f32 %v4899_v7, %v4850_v38 }
0x1249   :  { %v4918_v26 = vmul.f32 %v4902_v47, %v4853_v42 }
0x124a   :  { %v4916_v4 = vmul.f32 %v4900_v57, %v4851_v14 }
0x124b   :  { %v4928_v12 = vpack.c.bf16 %v4918_v26, %v4917_v13 }
0x124c   :  { %v11929_v19 = vpop.eup %11928  ;;  %v4927_v17 = vpack.c.bf16 %v4916_v4, %v4915_v32 }
0x124d   :  { %v11931_v16 = vpop.eup %11930  ;;  %v4905_v15 = vadd.f32 1.0, %v11929_v19 }
0x124e   :  { %v11933_v59 = vpop.eup %11932  ;;  %v4903_v63 = vadd.f32 1.0, %v11931_v16  ;;  %10852 = vmatprep.mubr.msk.bf16.mxu1 %vm1709_vm2, %v4927_v17 }
0x124f   :  { %v11935_v52 = vpop.eup %11934  ;;  %v4906_v50 = vadd.f32 1.0, %v11933_v59  ;;  %10853 = vmatmul.mubr.msk.bf16.gmra.mrb[160].mxu1 %vm1709_vm2, %v4928_v12  ;;  %v4921_v49 = vmul.f32 %v4905_v15, %v4856_v58 }
0x1250   :  { %v4904_v29 = vadd.f32 1.0, %v11935_v52  ;;  %v4919_v24 = vmul.f32 %v4903_v63, %v4854_v6 }
0x1251   :  { %v4922_v25 = vmul.f32 %v4906_v50, %v4857_v37 }
0x1252   :  { %v4920_v30 = vmul.f32 %v4904_v29, %v4855_v48 }
0x1253   :  { %v4930_v3 = vpack.c.bf16 %v4922_v25, %v4921_v49 }
0x1254   :  { %v4929_v53 = vpack.c.bf16 %v4920_v30, %v4919_v24 }
0x1256   :  { %10856 = vmatprep.mubr.msk.bf16.mxu1 %vm1709_vm2, %v4929_v53 }
0x1257   :  { %10857 = vmatmul.mubr.msk.bf16.gmra.mrb[164].mxu1 %vm1709_vm2, %v4930_v3 }
0x129d   :  { %v10846_v55 = vpop.f32.mrb[152].mxu1 }
0x129e   :  { %v5028_v1 = vpop.f32.mrb[153].mxu1  ;;  %v5037_v18 = vadd.f32 %v10846_v55, %v14471_v45 }
0x129f   :  { %v5029_v43 = vadd.f32 %v14471_v45, %v5028_v1  ;;  %v10847_v44 = vpop.f32.mrb[154].mxu1 }
0x12a0   :  { %v5031_v40 = vpop.f32.mrb[155].mxu1  ;;  %v5040_v34 = vadd.f32 %v10847_v44, %v14471_v45  ;;  %v14481_v60 = vadd.f32 %v5037_v18, %v14179_v46 }
0x12a1   :  { %v14476_v41 = vadd.f32 %v5029_v43, %v14167_v61  ;;  %v5032_v33 = vadd.f32 %v14471_v45, %v5031_v40 }
0x12a2   :  { %16574 = vst [vmem:[#allocation2_spill] sm:$0xff] %v14481_v60  ;;  %v14489_v27 = vadd.f32 %v5040_v34, %v14171_v22 }
0x12a3   :  { %16573 = vst [vmem:[#allocation18_spill] sm:$0xff] %v14476_v41  ;;  %v14484_v21 = vadd.f32 %v5032_v33, %v14174_v35  ;;  %v5111_v5 = vsel %vm1072_vm0, %v14476_v41, 0.0  ;;  %v5117_v35 = vsel %vm1072_vm0, %v14481_v60, 0.0 }
0x12a4   :  { %5112 = vadd.xlane.f32.xlu0 %v5111_v5  ;;  %16576 = vst [vmem:[#allocation3_spill] sm:$0xff] %v14489_v27  ;;  %v5120_v38 = vsel %vm1072_vm0, %v14489_v27, 0.0 }
0x12a5   :  { %16575 = vst [vmem:[#allocation5_spill] sm:$0xff] %v14484_v21  ;;  %v10850_v8 = vpop.f32.mrb[156].mxu1  ;;  %v5114_v61 = vsel %vm1072_vm0, %v14484_v21, 0.0 }
0x12a6   :  { %v5044_v2 = vpop.f32.mrb[157].mxu1  ;;  %5115 = vadd.xlane.f32.xlu1 %v5114_v61  ;;  %v5053_v7 = vadd.f32 %v10850_v8, %v14471_v45 }
0x12a7   :  { %v5045_v46 = vadd.f32 %v14471_v45, %v5044_v2  ;;  %v10851_v39 = vpop.f32.mrb[158].mxu1 }
0x12a8   :  { %v5047_v56 = vpop.f32.mrb[159].mxu1  ;;  %5118 = vadd.xlane.f32.xlu0 %v5117_v35  ;;  %v5056_v22 = vadd.f32 %v10851_v39, %v14471_v45  ;;  %v14505_v14 = vadd.f32 %v5053_v7, %v14198_v23 }
0x12a9   :  { %v14498_v42 = vadd.f32 %v5045_v46, %v14190_v9  ;;  %v5048_v47 = vadd.f32 %v14471_v45, %v5047_v56 }
0x12aa   :  { %5121 = vadd.xlane.f32.xlu1 %v5120_v38  ;;  %16578 = vst [vmem:[#allocation6_spill] sm:$0xff] %v14505_v14  ;;  %v14513_v9 = vadd.f32 %v5056_v22, %v14203_v54  ;;  %v5129_v32 = vsel %vm1072_vm0, %v14505_v14, 0.0 }
0x12ab   :  { %16577 = vst [vmem:[#allocation4_spill] sm:$0xff] %v14498_v42  ;;  %v14508_v57 = vadd.f32 %v5048_v47, %v14195_v36  ;;  %v5123_v13 = vsel %vm1072_vm0, %v14498_v42, 0.0 }
0x12ac   :  { %5124 = vadd.xlane.f32.xlu0 %v5123_v13  ;;  %16580 = vst [vmem:[#allocation8_spill] sm:$0xff] %v14513_v9  ;;  %v5132_v23 = vsel %vm1072_vm0, %v14513_v9, 0.0 }
0x12ad   :  { %16579 = vst [vmem:[#allocation7_spill] sm:$0xff] %v14508_v57  ;;  %v5126_v26 = vsel %vm1072_vm0, %v14508_v57, 0.0 }
0x12ae   :  { %5127 = vadd.xlane.f32.xlu1 %v5126_v26 }
0x12b0   :  { %5130 = vadd.xlane.f32.xlu0 %v5129_v32 }
0x12b2   :  { %5133 = vadd.xlane.f32.xlu1 %v5132_v23 }
0x1322   :  { %v10854_v36 = vpop.f32.mrb[160].mxu1 }
0x1323   :  { %v5060_v4 = vpop.f32.mrb[161].mxu1  ;;  %v5069_v12 = vadd.f32 %v10854_v36, %v14471_v45 }
0x1324   :  { %v5061_v19 = vadd.f32 %v14471_v45, %v5060_v4  ;;  %v10855_v54 = vpop.f32.mrb[162].mxu1 }
0x1325   :  { %v5063_v17 = vpop.f32.mrb[163].mxu1  ;;  %v5072_v15 = vadd.f32 %v10855_v54, %v14471_v45  ;;  %v14529_v63 = vadd.f32 %v5069_v12, %v14219_v28 }
0x1326   :  { %v14524_v16 = vadd.f32 %v5061_v19, %v14214_v11  ;;  %v5064_v59 = vadd.f32 %v14471_v45, %v5063_v17 }
0x1327   :  { %16582 = vst [vmem:[#allocation10_spill] sm:$0xff] %v14529_v63  ;;  %v14537_v37 = vadd.f32 %v5072_v15, %v14227_v0 }
0x1328   :  { %16581 = vst [vmem:[#allocation9_spill] sm:$0xff] %v14524_v16  ;;  %v14532_v52 = vadd.f32 %v5064_v59, %v14222_v31  ;;  %v5135_v58 = vsel %vm1072_vm0, %v14524_v16, 0.0  ;;  %v5141_v31 = vsel %vm1072_vm0, %v14529_v63, 0.0 }
0x1329   :  { %5136 = vadd.xlane.f32.xlu0 %v5135_v58  ;;  %16584 = vst [vmem:[#allocation11_spill] sm:$0xff] %v14537_v37  ;;  %v5144_v30 = vsel %vm1072_vm0, %v14537_v37, 0.0 }
0x132a   :  { %16583 = vst [vmem:[#allocation12_spill] sm:$0xff] %v14532_v52  ;;  %v10858_v50 = vpop.f32.mrb[164].mxu1  ;;  %v5138_v11 = vsel %vm1072_vm0, %v14532_v52, 0.0 }
0x132b   :  { %5139 = vadd.xlane.f32.xlu1 %v5138_v11  ;;  %v5076_v6 = vpop.f32.mrb[165].mxu1  ;;  %v5085_v48 = vadd.f32 %v10858_v50, %v14471_v45 }
0x132c   :  { %v5077_v28 = vadd.f32 %v14471_v45, %v5076_v6  ;;  %v10859_v29 = vpop.f32.mrb[166].mxu1 }
0x132d   :  { %5142 = vadd.xlane.f32.xlu0 %v5141_v31  ;;  %v5079_v49 = vpop.f32.mrb[167].mxu1  ;;  %v5088_v0 = vadd.f32 %v10859_v29, %v14471_v45  ;;  %v14553_v3 = vadd.f32 %v5085_v48, %v14246_v51 }
0x132e   :  { %v14546_v25 = vadd.f32 %v5077_v28, %v14236_v20  ;;  %v5080_v24 = vadd.f32 %v14471_v45, %v5079_v49  ;;  %v11576_v49 = vld [vmem:[%s16464_s6 + $0x10] sm:$0xff]  }
0x132f   :  { %5145 = vadd.xlane.f32.xlu1 %v5144_v30  ;;  %16586 = vst [vmem:[#allocation14_spill] sm:$0xff] %v14553_v3  ;;  %v14561_v20 = vadd.f32 %v5088_v0, %v14257_v10  ;;  %10860 = vmatprep.subr.bf16.mxu0 %v11576_v49  ;;  %v11577_v0 = vld [vmem:[%s16464_s6 + $0x18] sm:$0xff]  }
0x1330   :  { %16585 = vst [vmem:[#allocation13_spill] sm:$0xff] %v14546_v25  ;;  %v14556_v53 = vadd.f32 %v5080_v24, %v14249_v62  ;;  %v5147_v55 = vsel %vm1072_vm0, %v14546_v25, 0.0  ;;  %v5153_v62 = vsel %vm1072_vm0, %v14553_v3, 0.0  ;;  %10861 = vmatpush3.bf16.msra.mxu0 %v11576_v49 }
0x1331   :  { %v5113_v1 = vpop.xlane.xlu0 %5112  ;;  %5148 = vadd.xlane.f32.xlu0 %v5147_v55  ;;  %16588 = vst [vmem:[#allocation15_spill] sm:$0xff] %v14561_v20  ;;  %v5156_v33 = vsel %vm1072_vm0, %v14561_v20, 0.0  ;;  %10862 = vmatprep.subr.bf16.mxu0 %v11577_v0 }
0x1332   :  { %16587 = vst [vmem:[#allocation16_spill] sm:$0xff] %v14556_v53  ;;  %v5159_v18 = vmul.f32 0.03125, %v5113_v1  ;;  %v5150_v45 = vsel %vm1072_vm0, %v14556_v53, 0.0 }
0x1333   :  { %v5116_v43 = vpop.xlane.xlu1 %5115  ;;  %5151 = vadd.xlane.f32.xlu1 %v5150_v45 }
0x1334   :  { %v14566_v51 = vsub.f32 %v14476_v41, %v5159_v18  ;;  %v5160_v44 = vmul.f32 0.03125, %v5116_v43  ;;  %10863 = vmatpush3.bf16.msra.mxu0 %v11577_v0 }
0x1335   :  { %v5119_v40 = vpop.xlane.xlu0 %5118  ;;  %5154 = vadd.xlane.f32.xlu0 %v5153_v62 }
0x1336   :  { %v14571_v34 = vsub.f32 %v14484_v21, %v5160_v44  ;;  %v5161_v10 = vmul.f32 0.03125, %v5119_v40  ;;  %v5191_v5 = vmul.f32 %v14566_v51, %v14566_v51 }
0x1337   :  { %v5122_v8 = vpop.xlane.xlu1 %5121  ;;  %5157 = vadd.xlane.f32.xlu1 %v5156_v33 }
0x1338   :  { %v14578_v61 = vsub.f32 %v14481_v60, %v5161_v10  ;;  %v5162_v2 = vmul.f32 0.03125, %v5122_v8  ;;  %v5207_v7 = vsel %vm1072_vm0, %v5191_v5, 0.0  ;;  %v5192_v46 = vmul.f32 %v14571_v34, %v14571_v34 }
0x1339   :  { %v5125_v39 = vpop.xlane.xlu0 %5124  ;;  %5208 = vadd.xlane.f32.xlu0 %v5207_v7 }
0x133a   :  { %v14584_v35 = vsub.f32 %v14489_v27, %v5162_v2  ;;  %v5163_v56 = vmul.f32 0.03125, %v5125_v39  ;;  %v5210_v22 = vsel %vm1072_vm0, %v5192_v46, 0.0  ;;  %v5193_v47 = vmul.f32 %v14578_v61, %v14578_v61 }
0x133b   :  { %v5128_v38 = vpop.xlane.xlu1 %5127  ;;  %5211 = vadd.xlane.f32.xlu1 %v5210_v22 }
0x133c   :  { %v14590_v13 = vsub.f32 %v14498_v42, %v5163_v56  ;;  %v5164_v26 = vmul.f32 0.03125, %v5128_v38  ;;  %v5213_v32 = vsel %vm1072_vm0, %v5193_v47, 0.0  ;;  %v5194_v23 = vmul.f32 %v14584_v35, %v14584_v35 }
0x133d   :  { %v5131_v36 = vpop.xlane.xlu0 %5130  ;;  %5214 = vadd.xlane.f32.xlu0 %v5213_v32 }
0x133e   :  { %v14596_v4 = vsub.f32 %v14508_v57, %v5164_v26  ;;  %v5165_v12 = vmul.f32 0.03125, %v5131_v36  ;;  %v5216_v19 = vsel %vm1072_vm0, %v5194_v23, 0.0  ;;  %v5195_v54 = vmul.f32 %v14590_v13, %v14590_v13 }
0x133f   :  { %v5134_v17 = vpop.xlane.xlu1 %5133  ;;  %5217 = vadd.xlane.f32.xlu1 %v5216_v19 }
0x1340   :  { %v14602_v15 = vsub.f32 %v14505_v14, %v5165_v12  ;;  %v5166_v59 = vmul.f32 0.03125, %v5134_v17  ;;  %v5219_v58 = vsel %vm1072_vm0, %v5195_v54, 0.0  ;;  %v5196_v50 = vmul.f32 %v14596_v4, %v14596_v4 }
0x1341   :  { %5220 = vadd.xlane.f32.xlu0 %v5219_v58 }
0x1342   :  { %v14608_v11 = vsub.f32 %v14513_v9, %v5166_v59  ;;  %v5222_v6 = vsel %vm1072_vm0, %v5196_v50, 0.0  ;;  %v5197_v48 = vmul.f32 %v14602_v15, %v14602_v15 }
0x1343   :  { %5223 = vadd.xlane.f32.xlu1 %v5222_v6 }
0x1344   :  { %v5225_v28 = vsel %vm1072_vm0, %v5197_v48, 0.0  ;;  %v5198_v29 = vmul.f32 %v14608_v11, %v14608_v11 }
0x1345   :  { %5226 = vadd.xlane.f32.xlu0 %v5225_v28 }
0x1346   :  { %v5228_v31 = vsel %vm1072_vm0, %v5198_v29, 0.0 }
0x1347   :  { %5229 = vadd.xlane.f32.xlu1 %v5228_v31 }
0x13b6   :  { %v5137_v24 = vpop.xlane.xlu0 %5136 }
0x13b7   :  { %v5167_v30 = vmul.f32 0.03125, %v5137_v24 }
0x13b8   :  { %v5140_v55 = vpop.xlane.xlu1 %5139 }
0x13b9   :  { %v14624_v1 = vsub.f32 %v14524_v16, %v5167_v30  ;;  %v5168_v18 = vmul.f32 0.03125, %v5140_v55 }
0x13ba   :  { %v5143_v45 = vpop.xlane.xlu0 %5142 }
0x13bb   :  { %v14627_v43 = vsub.f32 %v14532_v52, %v5168_v18  ;;  %v5169_v44 = vmul.f32 0.03125, %v5143_v45  ;;  %v5199_v62 = vmul.f32 %v14624_v1, %v14624_v1 }
0x13bc   :  { %v5146_v40 = vpop.xlane.xlu1 %5145 }
0x13bd   :  { %v14632_v10 = vsub.f32 %v14529_v63, %v5169_v44  ;;  %v5170_v33 = vmul.f32 0.03125, %v5146_v40  ;;  %v5231_v5 = vsel %vm1072_vm0, %v5199_v62, 0.0  ;;  %v5200_v8 = vmul.f32 %v14627_v43, %v14627_v43 }
0x13be   :  { %5232 = vadd.xlane.f32.xlu0 %v5231_v5  ;;  %v5149_v2 = vpop.xlane.xlu0 %5148 }
0x13bf   :  { %v14638_v7 = vsub.f32 %v14537_v37, %v5170_v33  ;;  %v5171_v46 = vmul.f32 0.03125, %v5149_v2  ;;  %v5234_v39 = vsel %vm1072_vm0, %v5200_v8, 0.0  ;;  %v5201_v56 = vmul.f32 %v14632_v10, %v14632_v10 }
0x13c0   :  { %5235 = vadd.xlane.f32.xlu1 %v5234_v39  ;;  %v5152_v22 = vpop.xlane.xlu1 %5151 }
0x13c1   :  { %v14644_v47 = vsub.f32 %v14546_v25, %v5171_v46  ;;  %v5172_v38 = vmul.f32 0.03125, %v5152_v22  ;;  %v5237_v26 = vsel %vm1072_vm0, %v5201_v56, 0.0  ;;  %v5202_v32 = vmul.f32 %v14638_v7, %v14638_v7 }
0x13c2   :  { %5238 = vadd.xlane.f32.xlu0 %v5237_v26  ;;  %v5155_v23 = vpop.xlane.xlu0 %5154 }
0x13c3   :  { %v14650_v36 = vsub.f32 %v14556_v53, %v5172_v38  ;;  %v5173_v12 = vmul.f32 0.03125, %v5155_v23  ;;  %v5240_v19 = vsel %vm1072_vm0, %v5202_v32, 0.0  ;;  %v5203_v54 = vmul.f32 %v14644_v47, %v14644_v47 }
0x13c4   :  { %5241 = vadd.xlane.f32.xlu1 %v5240_v19  ;;  %v5158_v17 = vpop.xlane.xlu1 %5157 }
0x13c5   :  { %v14656_v59 = vsub.f32 %v14553_v3, %v5173_v12  ;;  %v5174_v58 = vmul.f32 0.03125, %v5158_v17  ;;  %v5243_v50 = vsel %vm1072_vm0, %v5203_v54, 0.0  ;;  %v5204_v6 = vmul.f32 %v14650_v36, %v14650_v36  ;;  %v14674_v54 = vld [vmem:[%s16465_s4 + $0x1] ss:$0 sm:$0xff] }
0x13c6   :  { %5244 = vadd.xlane.f32.xlu0 %v5243_v50  ;;  %v5209_v48 = vpop.xlane.xlu0 %5208 }
0x13c7   :  { %v14662_v28 = vsub.f32 %v14561_v20, %v5174_v58  ;;  %v5255_v29 = vmul.f32 0.03125, %v5209_v48  ;;  %v5246_v31 = vsel %vm1072_vm0, %v5204_v6, 0.0  ;;  %v5205_v49 = vmul.f32 %v14656_v59, %v14656_v59 }
0x13c8   :  { %5247 = vadd.xlane.f32.xlu1 %v5246_v31  ;;  %v5212_v0 = vpop.xlane.xlu1 %5211 }
0x13c9   :  { %v5271_v24 = vadd.f32 1e-06, %v5255_v29  ;;  %v5256_v30 = vmul.f32 0.03125, %v5212_v0  ;;  %v5249_v55 = vsel %vm1072_vm0, %v5205_v49, 0.0  ;;  %v5206_v18 = vmul.f32 %v14662_v28, %v14662_v28  ;;  %v14682_v0 = vld [vmem:[%s16466_s5 + $0x1] ss:$0 sm:$0xff] }
0x13ca   :  { %5250 = vadd.xlane.f32.xlu0 %v5249_v55  ;;  %v5215_v45 = vpop.xlane.xlu0 %5214 }
0x13cb   :  { %11936 = vrsqrt.f32 %v5271_v24  ;;  %v5272_v44 = vadd.f32 1e-06, %v5256_v30  ;;  %v5257_v62 = vmul.f32 0.03125, %v5215_v45  ;;  %v5252_v40 = vsel %vm1072_vm0, %v5206_v18, 0.0 }
0x13cc   :  { %5253 = vadd.xlane.f32.xlu1 %v5252_v40  ;;  %v5218_v33 = vpop.xlane.xlu1 %5217 }
0x13cd   :  { %11938 = vrsqrt.f32 %v5272_v44  ;;  %v5273_v5 = vadd.f32 1e-06, %v5257_v62  ;;  %v5258_v8 = vmul.f32 0.03125, %v5218_v33 }
0x13ce   :  { %v5221_v2 = vpop.xlane.xlu0 %5220 }
0x13cf   :  { %11940 = vrsqrt.f32 %v5273_v5  ;;  %v5274_v46 = vadd.f32 1e-06, %v5258_v8  ;;  %v5259_v39 = vmul.f32 0.03125, %v5221_v2 }
0x13d0   :  { %v5224_v56 = vpop.xlane.xlu1 %5223 }
0x13d1   :  { %11942 = vrsqrt.f32 %v5274_v46  ;;  %v5275_v22 = vadd.f32 1e-06, %v5259_v39  ;;  %v5260_v38 = vmul.f32 0.03125, %v5224_v56 }
0x13d2   :  { %v5227_v26 = vpop.xlane.xlu0 %5226 }
0x13d3   :  { %11944 = vrsqrt.f32 %v5275_v22  ;;  %v5276_v32 = vadd.f32 1e-06, %v5260_v38  ;;  %v5261_v23 = vmul.f32 0.03125, %v5227_v26 }
0x13d4   :  { %v5230_v12 = vpop.xlane.xlu1 %5229 }
0x13d5   :  { %v11937_v19 = vpop.eup %11936  ;;  %11946 = vrsqrt.f32 %v5276_v32  ;;  %v5277_v17 = vadd.f32 1e-06, %v5261_v23  ;;  %v5262_v58 = vmul.f32 0.03125, %v5230_v12 }
0x13d6   :  { %v5303_v50 = vmul.f32 %v11937_v19, %v14566_v51 }
0x13d7   :  { %v11939_v6 = vpop.eup %11938  ;;  %11948 = vrsqrt.f32 %v5277_v17  ;;  %v5278_v48 = vadd.f32 1e-06, %v5262_v58 }
0x13d8   :  { %v5304_v29 = vmul.f32 %v11939_v6, %v14571_v34  ;;  %v5325_v31 = vmul.f32 %v14674_v54, %v5303_v50 }
0x13d9   :  { %v11941_v49 = vpop.eup %11940  ;;  %11950 = vrsqrt.f32 %v5278_v48 }
0x13da   :  { %v5305_v24 = vmul.f32 %v11941_v49, %v14578_v61  ;;  %v5326_v30 = vmul.f32 %v14674_v54, %v5304_v29  ;;  %v5347_v34 = vadd.f32 %v14682_v0, %v5325_v31 }
0x13db   :  { %v11943_v55 = vpop.eup %11942 }
0x13dc   :  { %v5327_v51 = vmul.f32 %v14674_v54, %v5305_v24  ;;  %v5306_v18 = vmul.f32 %v11943_v55, %v14584_v35  ;;  %v5348_v45 = vadd.f32 %v14682_v0, %v5326_v30 }
0x13dd   :  { %v11945_v44 = vpop.eup %11944 }
0x13de   :  { %v5328_v62 = vmul.f32 %v14674_v54, %v5306_v18  ;;  %v5363_v40 = vpack.c.bf16 %v5348_v45, %v5347_v34  ;;  %v5307_v33 = vmul.f32 %v11945_v44, %v14590_v13  ;;  %v5349_v61 = vadd.f32 %v14682_v0, %v5327_v51 }
0x13df   :  { %v11947_v5 = vpop.eup %11946 }
0x13e0   :  { %v5350_v8 = vadd.f32 %v14682_v0, %v5328_v62  ;;  %10864 = vmatprep.mubr.msk.bf16.mxu0 %vm1072_vm0, %v5363_v40  ;;  %v5308_v2 = vmul.f32 %v11947_v5, %v14596_v4  ;;  %v5329_v35 = vmul.f32 %v14674_v54, %v5307_v33 }
0x13e1   :  { %v11949_v46 = vpop.eup %11948 }
0x13e2   :  { %v5364_v39 = vpack.c.bf16 %v5350_v8, %v5349_v61  ;;  %v5330_v56 = vmul.f32 %v14674_v54, %v5308_v2  ;;  %v5309_v22 = vmul.f32 %v11949_v46, %v14602_v15  ;;  %v5351_v13 = vadd.f32 %v14682_v0, %v5329_v35 }
0x13e3   :  { %v11951_v38 = vpop.eup %11950 }
0x13e4   :  { %10865 = vmatmul.mubr.msk.bf16.vlgmr.msra.gmra.mrb[120].mxu0 %vm1072_vm0, %v5364_v39  ;;  %v5352_v26 = vadd.f32 %v14682_v0, %v5330_v56  ;;  %v5310_v32 = vmul.f32 %v11951_v38, %v14608_v11  ;;  %v5331_v23 = vmul.f32 %v14674_v54, %v5309_v22 }
0x13e6   :  { %v5365_v4 = vpack.c.bf16 %v5352_v26, %v5351_v13  ;;  %v5332_v12 = vmul.f32 %v14674_v54, %v5310_v32  ;;  %v5353_v19 = vadd.f32 %v14682_v0, %v5331_v23 }
0x13e8   :  { %10868 = vmatprep.mubr.msk.bf16.mxu0 %vm1072_vm0, %v5365_v4  ;;  %v5354_v15 = vadd.f32 %v14682_v0, %v5332_v12 }
0x13ea   :  { %v5366_v17 = vpack.c.bf16 %v5354_v15, %v5353_v19 }
0x13ec   :  { %10869 = vmatmul.mubr.msk.bf16.gmra.mrb[124].mxu0 %vm1072_vm0, %v5366_v17 }
0x144b   :  { %v5233_v58 = vpop.xlane.xlu0 %5232 }
0x144c   :  { %v5263_v50 = vmul.f32 0.03125, %v5233_v58 }
0x144d   :  { %v5236_v6 = vpop.xlane.xlu1 %5235 }
0x144e   :  { %v5279_v48 = vadd.f32 1e-06, %v5263_v50  ;;  %v5264_v29 = vmul.f32 0.03125, %v5236_v6 }
0x144f   :  { %v5239_v11 = vpop.xlane.xlu0 %5238 }
0x1450   :  { %11952 = vrsqrt.f32 %v5279_v48  ;;  %v5280_v31 = vadd.f32 1e-06, %v5264_v29  ;;  %v5265_v49 = vmul.f32 0.03125, %v5239_v11 }
0x1451   :  { %v5242_v24 = vpop.xlane.xlu1 %5241 }
0x1452   :  { %11954 = vrsqrt.f32 %v5280_v31  ;;  %v5281_v30 = vadd.f32 1e-06, %v5265_v49  ;;  %v5266_v55 = vmul.f32 0.03125, %v5242_v24 }
0x1453   :  { %v5245_v51 = vpop.xlane.xlu0 %5244 }
0x1454   :  { %11956 = vrsqrt.f32 %v5281_v30  ;;  %v5282_v18 = vadd.f32 1e-06, %v5266_v55  ;;  %v5267_v34 = vmul.f32 0.03125, %v5245_v51 }
0x1455   :  { %v5248_v45 = vpop.xlane.xlu1 %5247 }
0x1456   :  { %11958 = vrsqrt.f32 %v5282_v18  ;;  %v5283_v44 = vadd.f32 1e-06, %v5267_v34  ;;  %v5268_v62 = vmul.f32 0.03125, %v5248_v45 }
0x1457   :  { %v5251_v40 = vpop.xlane.xlu0 %5250 }
0x1458   :  { %11960 = vrsqrt.f32 %v5283_v44  ;;  %v5284_v33 = vadd.f32 1e-06, %v5268_v62  ;;  %v5269_v5 = vmul.f32 0.03125, %v5251_v40  ;;  %v9723_v62 = vld [vmem:[%s16467_s7 + $0x1] ss:$0 sm:$0xff] }
0x1459   :  { %v5254_v61 = vpop.xlane.xlu1 %5253 }
0x145a   :  { %v11953_v8 = vpop.eup %11952  ;;  %11962 = vrsqrt.f32 %v5284_v33  ;;  %v5285_v2 = vadd.f32 1e-06, %v5269_v5  ;;  %v5270_v35 = vmul.f32 0.03125, %v5254_v61 }
0x145b   :  { %v5311_v46 = vmul.f32 %v11953_v8, %v14624_v1 }
0x145c   :  { %v11955_v39 = vpop.eup %11954  ;;  %11964 = vrsqrt.f32 %v5285_v2  ;;  %v5286_v56 = vadd.f32 1e-06, %v5270_v35 }
0x145d   :  { %v5312_v22 = vmul.f32 %v11955_v39, %v14627_v43  ;;  %v5333_v38 = vmul.f32 %v14674_v54, %v5311_v46 }
0x145e   :  { %v11957_v13 = vpop.eup %11956  ;;  %11966 = vrsqrt.f32 %v5286_v56 }
0x145f   :  { %v5334_v26 = vmul.f32 %v14674_v54, %v5312_v22  ;;  %v5313_v32 = vmul.f32 %v11957_v13, %v14632_v10  ;;  %v5355_v4 = vadd.f32 %v14682_v0, %v5333_v38 }
0x1460   :  { %v11959_v23 = vpop.eup %11958 }
0x1461   :  { %v5356_v12 = vadd.f32 %v14682_v0, %v5334_v26  ;;  %v5314_v1 = vmul.f32 %v11959_v23, %v14638_v7  ;;  %v5335_v19 = vmul.f32 %v14674_v54, %v5313_v32 }
0x1462   :  { %v11961_v15 = vpop.eup %11960 }
0x1463   :  { %v5367_v17 = vpack.c.bf16 %v5356_v12, %v5355_v4  ;;  %v5336_v43 = vmul.f32 %v14674_v54, %v5314_v1  ;;  %v5315_v58 = vmul.f32 %v11961_v15, %v14644_v47  ;;  %v5357_v10 = vadd.f32 %v14682_v0, %v5335_v19 }
0x1464   :  { %v11963_v50 = vpop.eup %11962 }
0x1465   :  { %10872 = vmatprep.mubr.msk.bf16.mxu0 %vm1072_vm0, %v5367_v17  ;;  %v5358_v6 = vadd.f32 %v14682_v0, %v5336_v43  ;;  %v5316_v48 = vmul.f32 %v11963_v50, %v14650_v36  ;;  %v5337_v29 = vmul.f32 %v14674_v54, %v5315_v58 }
0x1466   :  { %v11965_v7 = vpop.eup %11964 }
0x1467   :  { %v5368_v11 = vpack.c.bf16 %v5358_v6, %v5357_v10  ;;  %v5338_v31 = vmul.f32 %v14674_v54, %v5316_v48  ;;  %v5317_v49 = vmul.f32 %v11965_v7, %v14656_v59  ;;  %v5359_v47 = vadd.f32 %v14682_v0, %v5337_v29 }
0x1468   :  { %v11967_v24 = vpop.eup %11966 }
0x1469   :  { %10873 = vmatmul.mubr.msk.bf16.gmra.mrb[128].mxu0 %vm1072_vm0, %v5368_v11  ;;  %v5360_v30 = vadd.f32 %v14682_v0, %v5338_v31  ;;  %v5318_v55 = vmul.f32 %v11967_v24, %v14662_v28  ;;  %v5339_v51 = vmul.f32 %v14674_v54, %v5317_v49 }
0x146b   :  { %v5369_v36 = vpack.c.bf16 %v5360_v30, %v5359_v47  ;;  %v5340_v18 = vmul.f32 %v14674_v54, %v5318_v55  ;;  %v5361_v34 = vadd.f32 %v14682_v0, %v5339_v51 }
0x146d   :  { %10876 = vmatprep.mubr.msk.bf16.mxu0 %vm1072_vm0, %v5369_v36  ;;  %v5362_v59 = vadd.f32 %v14682_v0, %v5340_v18 }
0x146f   :  { %v5370_v45 = vpack.c.bf16 %v5362_v59, %v5361_v34 }
0x1471   :  { %10877 = vmatmul.mubr.msk.bf16.gmra.mrb[132].mxu0 %vm1072_vm0, %v5370_v45 }
0x14b7   :  { %v10866_v44 = vpop.f32.mrb[120].mxu0 }
0x14b8   :  { %v5454_v28 = vpop.f32.mrb[121].mxu0  ;;  %v5463_v33 = vadd.f32 %v10866_v44, %v9723_v62 }
0x14b9   :  { %v10867_v40 = vpop.f32.mrb[122].mxu0  ;;  %v5455_v54 = vadd.f32 %v9723_v62, %v5454_v28 }
0x14ba   :  { %v5466_v5 = vadd.f32 %v10867_v40, %v9723_v62  ;;  %v5457_v61 = vpop.f32.mrb[123].mxu0 }
0x14bb   :  { %v5458_v8 = vadd.f32 %v9723_v62, %v5457_v61 }
0x14bc   :  { %v14740_v2 = vpack.c.bf16 %v5466_v5, %v5463_v33 }
0x14bd   :  { %v14742_v35 = vpack.c.bf16 %v5458_v8, %v5455_v54 }
0x14bf   :  { %v10870_v0 = vpop.f32.mrb[124].mxu0  ;;  %10888 = vmatprep.mubr.msk.bf16.mxu1 %vm1502_vm1, %v14742_v35 }
0x14c0   :  { %v5470_v46 = vpop.f32.mrb[125].mxu0  ;;  %v5479_v56 = vadd.f32 %v10870_v0, %v9723_v62 }
0x14c1   :  { %v10871_v39 = vpop.f32.mrb[126].mxu0  ;;  %v5471_v13 = vadd.f32 %v9723_v62, %v5470_v46 }
0x14c2   :  { %v5482_v22 = vadd.f32 %v10871_v39, %v9723_v62  ;;  %v5473_v38 = vpop.f32.mrb[127].mxu0 }
0x14c3   :  { %v5474_v26 = vadd.f32 %v9723_v62, %v5473_v38 }
0x14c4   :  { %v14746_v32 = vpack.c.bf16 %v5482_v22, %v5479_v56 }
0x14c5   :  { %v14748_v23 = vpack.c.bf16 %v5474_v26, %v5471_v13 }
0x153c   :  { %v10874_v4 = vpop.f32.mrb[128].mxu0 }
0x153d   :  { %v5486_v12 = vpop.f32.mrb[129].mxu0  ;;  %v5495_v19 = vadd.f32 %v10874_v4, %v9723_v62 }
0x153e   :  { %v10875_v1 = vpop.f32.mrb[130].mxu0  ;;  %v5487_v43 = vadd.f32 %v9723_v62, %v5486_v12 }
0x153f   :  { %v5498_v15 = vadd.f32 %v10875_v1, %v9723_v62  ;;  %v5489_v17 = vpop.f32.mrb[131].mxu0 }
0x1540   :  { %v5490_v58 = vadd.f32 %v9723_v62, %v5489_v17 }
0x1541   :  { %v14750_v50 = vpack.c.bf16 %v5498_v15, %v5495_v19 }
0x1542   :  { %v14752_v10 = vpack.c.bf16 %v5490_v58, %v5487_v43 }
0x1543   :  { %5637 = vrot.lane.b32.xlu1 %v14750_v50, %s12320_s29 }
0x1544   :  { %5635 = vrot.lane.b32.xlu0 %v14752_v10, %s12320_s29  ;;  %v10878_v6 = vpop.f32.mrb[132].mxu0  ;;  %10904 = vmatprep.mubr.msk.bf16.mxu0 %vm1502_vm1, %v14752_v10 }
0x1545   :  { %v5502_v48 = vpop.f32.mrb[133].mxu0  ;;  %v5511_v7 = vadd.f32 %v10878_v6, %v9723_v62 }
0x1546   :  { %v10879_v29 = vpop.f32.mrb[134].mxu0  ;;  %v5503_v49 = vadd.f32 %v9723_v62, %v5502_v48 }
0x1547   :  { %v5514_v11 = vadd.f32 %v10879_v29, %v9723_v62  ;;  %v5505_v31 = vpop.f32.mrb[135].mxu0 }
0x1548   :  { %v5506_v24 = vadd.f32 %v9723_v62, %v5505_v31  ;;  %5534 = vrot.lane.b32.xlu0 %v14742_v35, %s12320_s29 }
0x1549   :  { %v14762_v47 = vpack.c.bf16 %v5514_v11, %v5511_v7 }
0x154a   :  { %v14764_v30 = vpack.c.bf16 %v5506_v24, %v5503_v49 }
0x154c   :  { %5538 = vrot.lane.b32.xlu0 %v14748_v23, %s12320_s29  ;;  %5639 = vrot.lane.b32.xlu1 %v14764_v30, %s12320_s29 }
0x1550   :  { %6021 = vrot.lane.b32.xlu0 %v14752_v10, %s12321_s28  ;;  %5641 = vrot.lane.b32.xlu1 %v14762_v47, %s12320_s29 }
0x1554   :  { %5536 = vrot.lane.b32.xlu1 %v14740_v2, %s12320_s29 }
0x1558   :  { %5540 = vrot.lane.b32.xlu1 %v14746_v32, %s12320_s29 }
0x155c   :  { %6023 = vrot.lane.b32.xlu1 %v14750_v50, %s12321_s28 }
0x1560   :  { %6027 = vrot.lane.b32.xlu1 %v14762_v47, %s12321_s28 }
0x1564   :  { %6025 = vrot.lane.b32.xlu1 %v14764_v30, %s12321_s28 }
0x15b5   :  { %v5638_v36 = vpop.permute.xlu1 %5637 }
0x15b6   :  { %v5636_v55 = vpop.permute.xlu0 %5635  ;;  %v5659_v45 = vsel %vm1502_vm1, %v5638_v36, 0 }
0x15b7   :  { %11404 = vmatprep.subr.msk.bf16.mxu0 %vm1502_vm1, %v5636_v55  ;;  %v5656_v51 = vsel %vm1502_vm1, %v5636_v55, 0 }
0x15b8   :  { %10897 = vmatpush3.bf16.xpose.msra.mxu0 %v5656_v51 }
0x15b9   :  { %11405 = vmatprep.subr.msk.bf16.mxu0 %vm1502_vm1, %v5638_v36 }
0x15ba   :  { %v5535_v18 = vpop.permute.xlu0 %5534 }
0x15bb   :  { %11400 = vmatprep.subr.msk.bf16.mxu1 %vm1502_vm1, %v5535_v18  ;;  %v5555_v34 = vsel %vm1502_vm1, %v5535_v18, 0 }
0x15bc   :  { %10881 = vmatpush3.bf16.xpose.msra.mxu1 %v5555_v34 }
0x15be   :  { %v5640_v59 = vpop.permute.xlu1 %5639  ;;  %v5539_v33 = vpop.permute.xlu0 %5538 }
0x15bf   :  { %v5662_v40 = vsel %vm1502_vm1, %v5640_v59, 0  ;;  %v5561_v61 = vsel %vm1502_vm1, %v5539_v33, 0 }
0x15c0   :  { %10899 = vmatpush3.bf16.xpose.msra.mxu0 %v5659_v45 }
0x15c1   :  { %11406 = vmatprep.subr.msk.bf16.mxu0 %vm1502_vm1, %v5640_v59 }
0x15c2   :  { %v5642_v44 = vpop.permute.xlu1 %5641  ;;  %v6022_v8 = vpop.permute.xlu0 %6021 }
0x15c3   :  { %v5665_v54 = vsel %vm1502_vm1, %v5642_v44, 0 }
0x15c6   :  { %v5537_v62 = vpop.permute.xlu1 %5536 }
0x15c7   :  { %11401 = vmatprep.subr.msk.bf16.mxu1 %vm1502_vm1, %v5537_v62  ;;  %v5558_v28 = vsel %vm1502_vm1, %v5537_v62, 0 }
0x15c8   :  { %10883 = vmatpush3.bf16.xpose.msra.mxu1 %v5558_v28  ;;  %10901 = vmatpush3.bf16.xpose.msra.mxu0 %v5662_v40 }
0x15c9   :  { %11402 = vmatprep.subr.msk.bf16.mxu1 %vm1502_vm1, %v5539_v33  ;;  %11407 = vmatprep.subr.msk.bf16.mxu0 %vm1502_vm1, %v5642_v44 }
0x15ca   :  { %v5541_v5 = vpop.permute.xlu1 %5540 }
0x15cb   :  { %v5564_v39 = vsel %vm1502_vm1, %v5541_v5, 0 }
0x15ce   :  { %v6024_v0 = vpop.permute.xlu1 %6023 }
0x15d0   :  { %10885 = vmatpush3.bf16.xpose.msra.mxu1 %v5561_v61  ;;  %10903 = vmatpush3.bf16.xpose.msra.mxu0 %v5665_v54 }
0x15d1   :  { %11403 = vmatprep.subr.msk.bf16.mxu1 %vm1502_vm1, %v5541_v5  ;;  %10928 = vmatprep.subr.bf16.mxu0 %v6022_v8 }
0x15d2   :  { %v6028_v46 = vpop.permute.xlu1 %6027 }
0x15d6   :  { %v6026_v56 = vpop.permute.xlu1 %6025 }
0x15d7   :  { %10905 = vmatmul.mubr.msk.bf16.vlgmr.msra.gmra.mrb[136].mxu0 %vm1502_vm1, %v14750_v50 }
0x15d8   :  { %10887 = vmatpush3.bf16.xpose.msra.mxu1 %v5564_v39  ;;  %10908 = vmatprep.mubr.msk.bf16.mxu0 %vm1502_vm1, %v14764_v30 }
0x15d9   :  { %10929 = vmatpush3.bf16.msra.mxu0 %v6022_v8 }
0x15da   :  { %10930 = vmatprep.subr.bf16.mxu0 %v6024_v0 }
0x15dd   :  { %10931 = vmatpush3.bf16.msra.mxu0 %v6024_v0 }
0x15de   :  { %10932 = vmatprep.subr.bf16.mxu0 %v6026_v56 }
0x15df   :  { %10889 = vmatmul.mubr.msk.bf16.vlgmr.msra.gmra.mrb[168].mxu1 %vm1502_vm1, %v14740_v2  ;;  %10909 = vmatmul.mubr.msk.bf16.gmra.mrb[140].mxu0 %vm1502_vm1, %v14762_v47 }
0x15e0   :  { %10892 = vmatprep.mubr.msk.bf16.mxu1 %vm1502_vm1, %v14748_v23 }
0x15e1   :  { %10933 = vmatpush3.bf16.msra.mxu0 %v6026_v56 }
0x15e2   :  { %10934 = vmatprep.subr.bf16.mxu0 %v6028_v46 }
0x15e5   :  { %10935 = vmatpush3.bf16.msra.mxu0 %v6028_v46 }
0x15e7   :  { %10893 = vmatmul.mubr.msk.bf16.gmra.mrb[172].mxu1 %vm1502_vm1, %v14746_v32 }
0x16aa   :  { %v10906_v22 = vpop.f32.mrb[136].mxu0 }
0x16ab   :  { %v5742_v38 = vmul.f32 0.35355338, %v10906_v22  ;;  %v5701_v13 = vpop.f32.mrb[137].mxu0 }
0x16ac   :  { %v10907_v26 = vpop.f32.mrb[138].mxu0  ;;  %v5740_v4 = vmul.f32 0.35355338, %v5701_v13 }
0x16ad   :  { %v5704_v12 = vpop.f32.mrb[139].mxu0  ;;  %v5778_v1 = vsel %vm1709_vm2, %v5742_v38, -inf  ;;  %v5743_v17 = vmul.f32 0.35355338, %v10907_v26 }
0x16ae   :  { %v5741_v19 = vmul.f32 0.35355338, %v5704_v12  ;;  %5779 = vmax.xlane.f32.xlu0 %v5778_v1  ;;  %v5772_v43 = vsel %vm1709_vm2, %v5740_v4, -inf }
0x16af   :  { %v5781_v55 = vsel %vm1709_vm2, %v5743_v17, -inf }
0x16b0   :  { %v5775_v15 = vsel %vm1709_vm2, %v5741_v19, -inf }
0x16b1   :  { %5776 = vmax.xlane.f32.xlu1 %v5775_v15 }
0x16b2   :  { %5773 = vmax.xlane.f32.xlu0 %v5772_v43  ;;  %v14815_v58 = vpop.f32.mrb[168].mxu1  ;;  %v10910_v6 = vpop.f32.mrb[140].mxu0 }
0x16b3   :  { %v14817_v48 = vpop.f32.mrb[169].mxu1  ;;  %v5717_v29 = vpop.f32.mrb[141].mxu0  ;;  %v5746_v31 = vmul.f32 0.35355338, %v10910_v6 }
0x16b4   :  { %v14819_v7 = vpop.f32.mrb[170].mxu1  ;;  %v10911_v11 = vpop.f32.mrb[142].mxu0  ;;  %v5744_v51 = vmul.f32 0.35355338, %v5717_v29 }
0x16b5   :  { %v14821_v49 = vpop.f32.mrb[171].mxu1  ;;  %v5720_v24 = vpop.f32.mrb[143].mxu0  ;;  %v5790_v36 = vsel %vm1709_vm2, %v5746_v31, -inf  ;;  %v5747_v62 = vmul.f32 0.35355338, %v10911_v11 }
0x16b6   :  { %5782 = vmax.xlane.f32.xlu0 %v5781_v55  ;;  %v5784_v44 = vsel %vm1709_vm2, %v5744_v51, -inf  ;;  %v5745_v28 = vmul.f32 0.35355338, %v5720_v24 }
0x16b7   :  { %v5793_v40 = vsel %vm1709_vm2, %v5747_v62, -inf }
0x16b8   :  { %v5787_v33 = vsel %vm1709_vm2, %v5745_v28, -inf }
0x16ba   :  { %5791 = vmax.xlane.f32.xlu0 %v5790_v36  ;;  %v14825_v18 = vpop.f32.mrb[172].mxu1 }
0x16bb   :  { %v14827_v34 = vpop.f32.mrb[173].mxu1 }
0x16bc   :  { %v14829_v59 = vpop.f32.mrb[174].mxu1 }
0x16bd   :  { %v14831_v45 = vpop.f32.mrb[175].mxu1 }
0x16be   :  { %5785 = vmax.xlane.f32.xlu0 %v5784_v44 }
0x16c2   :  { %6233 = vrot.lane.b32.xlu1 %v14750_v50, %s12322_s23 }
0x16c6   :  { %6235 = vrot.lane.b32.xlu1 %v14764_v30, %s12322_s23 }
0x16d4   :  { %6231 = vrot.lane.b32.xlu0 %v14752_v10, %s12322_s23 }
0x16ea   :  { %5794 = vmax.xlane.f32.xlu1 %v5793_v40 }
0x16ee   :  { %5788 = vmax.xlane.f32.xlu1 %v5787_v33 }
0x16ff   :  { %6237 = vrot.lane.b32.xlu1 %v14762_v47, %s12322_s23 }
0x173b   :  { %v5780_v5 = vpop.xlane.xlu0 %5779 }
0x173c   :  { %v5806_v61 = vsub.f32 %v5742_v38, %v5780_v5 }
0x173e   :  { %v5832_v54 = vmul.f32 1.442695, %v5806_v61  ;;  %v5777_v8 = vpop.xlane.xlu1 %5776 }
0x173f   :  { %v5774_v0 = vpop.xlane.xlu0 %5773  ;;  %v5805_v39 = vsub.f32 %v5741_v19, %v5777_v8 }
0x1740   :  { %11968 = vpow2.f32 %v5832_v54  ;;  %v5804_v46 = vsub.f32 %v5740_v4, %v5774_v0 }
0x1741   :  { %v5830_v26 = vmul.f32 1.442695, %v5805_v39 }
0x1742   :  { %v5828_v56 = vmul.f32 1.442695, %v5804_v46  ;;  %v14866_v55 = vpop.permute.xlu1 %6233 }
0x1743   :  { %v5783_v22 = vpop.xlane.xlu0 %5782 }
0x1744   :  { %11970 = vpow2.f32 %v5828_v56  ;;  %v5807_v13 = vsub.f32 %v5743_v17, %v5783_v22 }
0x1746   :  { %v5834_v12 = vmul.f32 1.442695, %v5807_v13  ;;  %v14868_v44 = vpop.permute.xlu1 %6235 }
0x1747   :  { %v5792_v1 = vpop.xlane.xlu0 %5791 }
0x1748   :  { %11972 = vpow2.f32 %v5834_v12  ;;  %v5810_v36 = vsub.f32 %v5746_v31, %v5792_v1  ;;  %v14890_v1 = vmul.f32 0.35355338, %v14815_v58  ;;  %v14906_v58 = vmul.f32 0.35355338, %v14821_v49 }
0x1749   :  { %11974 = vpow2.f32 %v5830_v26  ;;  %v14885_v26 = vmul.f32 0.35355338, %v14817_v48 }
0x174a   :  { %v14844_v15 = vpop.eup %11968  ;;  %v5840_v40 = vmul.f32 1.442695, %v5810_v36 }
0x174b   :  { %v5786_v43 = vpop.xlane.xlu0 %5785  ;;  %v5874_v38 = vsel %vm1709_vm2, %v14844_v15, 0.0 }
0x174c   :  { %5875 = vadd.xlane.f32.xlu0 %v5874_v38  ;;  %v5808_v33 = vsub.f32 %v5744_v51, %v5786_v43  ;;  %11976 = vpow2.f32 %v5840_v40  ;;  %v5748_v43 = vsel %vm1709_vm2, %v14885_v26, -inf  ;;  %v14895_v38 = vmul.f32 0.35355338, %v14819_v7 }
0x174d   :  { %v5751_v7 = vsel %vm1709_vm2, %v14906_v58, -inf }
0x174e   :  { %v14848_v6 = vpop.eup %11970  ;;  %v5836_v5 = vmul.f32 1.442695, %v5808_v33  ;;  %v5757_v48 = vsel %vm1709_vm2, %v14895_v38, -inf }
0x174f   :  { %v14850_v4 = vpop.permute.xlu0 %6231  ;;  %v5868_v19 = vsel %vm1709_vm2, %v14848_v6, 0.0 }
0x1750   :  { %5869 = vadd.xlane.f32.xlu0 %v5868_v19  ;;  %11412 = vmatprep.subr.msk.bf16.mxu0 %vm1502_vm1, %v14850_v4  ;;  %11978 = vpow2.f32 %v5836_v5  ;;  %v5754_v19 = vsel %vm1709_vm2, %v14890_v1, -inf }
0x1752   :  { %v14856_v17 = vpop.eup %11972 }
0x1753   :  { %v5877_v29 = vsel %vm1709_vm2, %v14856_v17, 0.0  ;;  %v14860_v11 = vpop.eup %11974 }
0x1754   :  { %5878 = vadd.xlane.f32.xlu1 %v5877_v29  ;;  %v5871_v24 = vsel %vm1709_vm2, %v14860_v11, 0.0  ;;  %v14911_v29 = vmul.f32 0.35355338, %v14831_v45 }
0x1756   :  { %v14870_v56 = vpop.eup %11976  ;;  %v5763_v36 = vsel %vm1709_vm2, %v14911_v29, -inf }
0x1757   :  { %v5886_v31 = vsel %vm1709_vm2, %v14870_v56, 0.0 }
0x1758   :  { %5872 = vadd.xlane.f32.xlu1 %v5871_v24  ;;  %v14914_v24 = vmul.f32 0.35355338, %v14825_v18 }
0x175a   :  { %v14874_v22 = vpop.eup %11978  ;;  %v5766_v40 = vsel %vm1709_vm2, %v14914_v24, -inf }
0x175b   :  { %v5880_v51 = vsel %vm1709_vm2, %v14874_v22, 0.0 }
0x1766   :  { %6223 = vrot.lane.b32.xlu0 %v14752_v10, %s12323_s30 }
0x1777   :  { %v5795_v61 = vpop.xlane.xlu1 %5794 }
0x1778   :  { %v5811_v54 = vsub.f32 %v5747_v62, %v5795_v61 }
0x177a   :  { %v5842_v8 = vmul.f32 1.442695, %v5811_v54 }
0x177b   :  { %v5789_v0 = vpop.xlane.xlu1 %5788 }
0x177c   :  { %v5809_v46 = vsub.f32 %v5745_v28, %v5789_v0  ;;  %11980 = vpow2.f32 %v5842_v8 }
0x177e   :  { %v5838_v39 = vmul.f32 1.442695, %v5809_v46 }
0x177f   :  { %v6238_v33 = vpop.permute.xlu1 %6237 }
0x1780   :  { %11982 = vpow2.f32 %v5838_v39  ;;  %v14924_v39 = vmul.f32 0.35355338, %v14827_v34  ;;  %v6252_v34 = vsel %vm1502_vm1, %v14850_v4, 0 }
0x1785   :  { %5887 = vadd.xlane.f32.xlu0 %v5886_v31 }
0x1786   :  { %v14878_v13 = vpop.eup %11980 }
0x1787   :  { %v5889_v12 = vsel %vm1709_vm2, %v14878_v13, 0.0 }
0x1789   :  { %5881 = vadd.xlane.f32.xlu0 %v5880_v51 }
0x178a   :  { %v14880_v62 = vpop.eup %11982 }
0x178b   :  { %v5883_v28 = vsel %vm1709_vm2, %v14880_v62, 0.0 }
0x178c   :  { %5884 = vadd.xlane.f32.xlu1 %v5883_v28 }
0x178d   :  { %5890 = vadd.xlane.f32.xlu0 %v5889_v12 }
0x1791   :  { %5749 = vmax.xlane.f32.xlu0 %v5748_v43 }
0x1795   :  { %5755 = vmax.xlane.f32.xlu0 %v5754_v19  ;;  %v14930_v19 = vmul.f32 0.35355338, %v14829_v59  ;;  %v6255_v59 = vsel %vm1502_vm1, %v14866_v55, 0 }
0x1799   :  { %5758 = vmax.xlane.f32.xlu0 %v5757_v48  ;;  %v5760_v48 = vsel %vm1709_vm2, %v14924_v39, -inf }
0x179d   :  { %6225 = vrot.lane.b32.xlu1 %v14750_v50, %s12323_s30 }
0x17af   :  { %6227 = vrot.lane.b32.xlu0 %v14764_v30, %s12323_s30 }
0x17c1   :  { %5752 = vmax.xlane.f32.xlu1 %v5751_v7 }
0x17ce   :  { %5764 = vmax.xlane.f32.xlu0 %v5763_v36 }
0x17d2   :  { %6229 = vrot.lane.b32.xlu1 %v14762_v47, %s12323_s30  ;;  %5767 = vmax.xlane.f32.xlu0 %v5766_v40 }
0x17d9   :  { %v5876_v49 = vpop.xlane.xlu0 %5875 }
0x17dd   :  { %v5870_v5 = vpop.xlane.xlu0 %5869 }
0x17e1   :  { %v5879_v61 = vpop.xlane.xlu1 %5878  ;;  %v6224_v4 = vpop.permute.xlu0 %6223 }
0x17e2   :  { %11984 = vrcp.f32 %v5879_v61 }
0x17e3   :  { %11986 = vrcp.f32 %v5870_v5 }
0x17e4   :  { %11988 = vrcp.f32 %v5876_v49 }
0x17e5   :  { %v5873_v18 = vpop.xlane.xlu1 %5872 }
0x17e6   :  { %11990 = vrcp.f32 %v5873_v18 }
0x17ec   :  { %v11985_v45 = vpop.eup %11984 }
0x17ed   :  { %v11987_v54 = vpop.eup %11986  ;;  %v5919_v46 = vmul.f32 %v11985_v45, %v14856_v17  ;;  %v6261_v17 = vsel %vm1502_vm1, %v6238_v33, 0 }
0x17ee   :  { %v11989_v8 = vpop.eup %11988  ;;  %v5916_v31 = vmul.f32 %v11987_v54, %v14848_v6  ;;  %v6258_v6 = vsel %vm1502_vm1, %v14868_v44, 0 }
0x17ef   :  { %v5918_v28 = vmul.f32 %v11989_v8, %v14844_v15  ;;  %v5769_v15 = vsel %vm1709_vm2, %v14930_v19, -inf }
0x17f0   :  { %v11991_v0 = vpop.eup %11990 }
0x17f1   :  { %v5917_v51 = vmul.f32 %v11991_v0, %v14860_v11  ;;  %v5929_v43 = vpack.c.bf16 %v5919_v46, %v5918_v28 }
0x17f3   :  { %v5928_v12 = vpack.c.bf16 %v5917_v51, %v5916_v31 }
0x17f5   :  { %10936 = vmatprep.mubr.msk.bf16.mxu0 %vm1709_vm2, %v5928_v12 }
0x17f6   :  { %5761 = vmax.xlane.f32.xlu1 %v5760_v48  ;;  %10937 = vmatmul.mubr.msk.bf16.vlgmr.msra.gmra.mrb[144].mxu0 %vm1709_vm2, %v5929_v43 }
0x17f7   :  { %10961 = vmatpush3.bf16.xpose.msra.mxu0 %v6252_v34 }
0x17f8   :  { %11413 = vmatprep.subr.msk.bf16.mxu0 %vm1502_vm1, %v14866_v55 }
0x17fa   :  { %5770 = vmax.xlane.f32.xlu1 %v5769_v15 }
0x17ff   :  { %10963 = vmatpush3.bf16.xpose.msra.mxu0 %v6255_v59 }
0x1800   :  { %11414 = vmatprep.subr.msk.bf16.mxu0 %vm1502_vm1, %v14868_v44 }
0x1807   :  { %10965 = vmatpush3.bf16.xpose.msra.mxu0 %v6258_v6 }
0x1808   :  { %11415 = vmatprep.subr.msk.bf16.mxu0 %vm1502_vm1, %v6238_v33 }
0x180f   :  { %10967 = vmatpush3.bf16.xpose.msra.mxu0 %v6261_v17 }
0x1812   :  { %v5888_v11 = vpop.xlane.xlu0 %5887 }
0x1816   :  { %v5882_v7 = vpop.xlane.xlu0 %5881 }
0x1817   :  { %11992 = vrcp.f32 %v5882_v7 }
0x1818   :  { %11994 = vrcp.f32 %v5888_v11 }
0x1819   :  { %v5885_v36 = vpop.xlane.xlu1 %5884 }
0x181a   :  { %11996 = vrcp.f32 %v5885_v36  ;;  %v5891_v55 = vpop.xlane.xlu0 %5890 }
0x181b   :  { %11998 = vrcp.f32 %v5891_v55 }
0x181e   :  { %v5750_v40 = vpop.xlane.xlu0 %5749 }
0x181f   :  { %v5796_v49 = vsub.f32 %v14885_v26, %v5750_v40 }
0x1821   :  { %v5812_v5 = vmul.f32 1.442695, %v5796_v49  ;;  %v11993_v44 = vpop.eup %11992 }
0x1822   :  { %v5756_v61 = vpop.xlane.xlu0 %5755  ;;  %v11995_v18 = vpop.eup %11994  ;;  %v5920_v0 = vmul.f32 %v11993_v44, %v14874_v22 }
0x1823   :  { %12000 = vpow2.f32 %v5812_v5  ;;  %v5798_v45 = vsub.f32 %v14890_v1, %v5756_v61  ;;  %v5922_v31 = vmul.f32 %v11995_v18, %v14870_v56  ;;  %v6226_v56 = vpop.permute.xlu1 %6225 }
0x1824   :  { %v11997_v33 = vpop.eup %11996 }
0x1825   :  { %v11999_v54 = vpop.eup %11998  ;;  %v5816_v8 = vmul.f32 1.442695, %v5798_v45  ;;  %v5921_v46 = vmul.f32 %v11997_v33, %v14880_v62 }
0x1826   :  { %v5923_v51 = vmul.f32 %v11999_v54, %v14878_v13  ;;  %v5759_v1 = vpop.xlane.xlu0 %5758 }
0x1827   :  { %12002 = vpow2.f32 %v5816_v8  ;;  %v5930_v26 = vpack.c.bf16 %v5921_v46, %v5920_v0  ;;  %v5799_v48 = vsub.f32 %v14895_v38, %v5759_v1 }
0x1828   :  { %v5931_v28 = vpack.c.bf16 %v5923_v51, %v5922_v31 }
0x1829   :  { %10940 = vmatprep.mubr.msk.bf16.mxu0 %vm1709_vm2, %v5930_v26  ;;  %v5818_v59 = vmul.f32 1.442695, %v5799_v48 }
0x182a   :  { %10941 = vmatmul.mubr.msk.bf16.gmra.mrb[148].mxu0 %vm1709_vm2, %v5931_v28  ;;  %v6228_v13 = vpop.permute.xlu0 %6227 }
0x182b   :  { %10968 = vmatprep.mubr.msk.bf16.mxu0 %vm1502_vm1, %v6224_v4 }
0x182d   :  { %v14959_v12 = vpop.eup %12000 }
0x182e   :  { %v5844_v22 = vsel %vm1709_vm2, %v14959_v12, 0.0 }
0x182f   :  { %5845 = vadd.xlane.f32.xlu0 %v5844_v22 }
0x1831   :  { %v14963_v62 = vpop.eup %12002 }
0x1832   :  { %10969 = vmatmul.mubr.msk.bf16.vlgmr.msra.gmra.mrb[152].mxu0 %vm1502_vm1, %v6226_v56  ;;  %v5850_v43 = vsel %vm1709_vm2, %v14963_v62, 0.0 }
0x1833   :  { %5851 = vadd.xlane.f32.xlu0 %v5850_v43  ;;  %10972 = vmatprep.mubr.msk.bf16.mxu0 %vm1502_vm1, %v6228_v13 }
0x1849   :  { %5932 = vrot.lane.b32.xlu0 %v14742_v35, %s12321_s28 }
0x184e   :  { %v5753_v34 = vpop.xlane.xlu1 %5752 }
0x184f   :  { %v5797_v15 = vsub.f32 %v14906_v58, %v5753_v34 }
0x1851   :  { %v5814_v6 = vmul.f32 1.442695, %v5797_v15 }
0x1852   :  { %v6230_v4 = vpop.permute.xlu1 %6229 }
0x1853   :  { %12004 = vpow2.f32 %v5814_v6  ;;  %10973 = vmatmul.mubr.msk.bf16.gmra.mrb[156].mxu0 %vm1502_vm1, %v6230_v4 }
0x1854   :  { %12006 = vpow2.f32 %v5818_v59 }
0x185b   :  { %v5765_v58 = vpop.xlane.xlu0 %5764 }
0x185c   :  { %v5801_v45 = vsub.f32 %v14911_v29, %v5765_v58 }
0x185d   :  { %v14974_v17 = vpop.eup %12004 }
0x185e   :  { %v5847_v11 = vsel %vm1709_vm2, %v14974_v17, 0.0  ;;  %v14978_v7 = vpop.eup %12006  ;;  %v5822_v54 = vmul.f32 1.442695, %v5801_v45 }
0x185f   :  { %5848 = vadd.xlane.f32.xlu1 %v5847_v11  ;;  %v5853_v38 = vsel %vm1709_vm2, %v14978_v7, 0.0  ;;  %v5768_v36 = vpop.xlane.xlu0 %5767 }
0x1860   :  { %v5802_v55 = vsub.f32 %v14914_v24, %v5768_v36 }
0x1862   :  { %v5824_v5 = vmul.f32 1.442695, %v5802_v55 }
0x1863   :  { %5854 = vadd.xlane.f32.xlu1 %v5853_v38 }
0x1874   :  { %5934 = vrot.lane.b32.xlu1 %v14740_v2, %s12321_s28 }
0x1878   :  { %5936 = vrot.lane.b32.xlu1 %v14748_v23, %s12321_s28 }
0x187c   :  { %5938 = vrot.lane.b32.xlu1 %v14746_v32, %s12321_s28 }
0x1883   :  { %v5762_v40 = vpop.xlane.xlu1 %5761 }
0x1884   :  { %v5800_v49 = vsub.f32 %v14924_v39, %v5762_v40 }
0x1886   :  { %v5820_v44 = vmul.f32 1.442695, %v5800_v49 }
0x1887   :  { %v5771_v61 = vpop.xlane.xlu1 %5770 }
0x1888   :  { %12008 = vpow2.f32 %v5820_v44  ;;  %v5803_v18 = vsub.f32 %v14930_v19, %v5771_v61 }
0x1889   :  { %12010 = vpow2.f32 %v5824_v5 }
0x188a   :  { %v5826_v33 = vmul.f32 1.442695, %v5803_v18 }
0x188c   :  { %12012 = vpow2.f32 %v5826_v33 }
0x188d   :  { %12014 = vpow2.f32 %v5822_v54 }
0x1892   :  { %v14992_v8 = vpop.eup %12008 }
0x1893   :  { %v5856_v24 = vsel %vm1709_vm2, %v14992_v8, 0.0  ;;  %v14996_v0 = vpop.eup %12010 }
0x1894   :  { %5857 = vadd.xlane.f32.xlu0 %v5856_v24  ;;  %v5862_v39 = vsel %vm1709_vm2, %v14996_v0, 0.0 }
0x1896   :  { %v15000_v46 = vpop.eup %12012 }
0x1897   :  { %v5865_v29 = vsel %vm1709_vm2, %v15000_v46, 0.0  ;;  %v15004_v19 = vpop.eup %12014 }
0x1898   :  { %5863 = vadd.xlane.f32.xlu0 %v5862_v39  ;;  %v5859_v31 = vsel %vm1709_vm2, %v15004_v19, 0.0 }
0x189c   :  { %5866 = vadd.xlane.f32.xlu0 %v5865_v29 }
0x18a0   :  { %5860 = vadd.xlane.f32.xlu1 %v5859_v31 }
0x18b1   :  { %6128 = vrot.lane.b32.xlu1 %v14740_v2, %s12322_s23 }
0x18b2   :  { %6126 = vrot.lane.b32.xlu0 %v14742_v35, %s12322_s23 }
0x18b5   :  { %6130 = vrot.lane.b32.xlu1 %v14748_v23, %s12322_s23 }
0x18b6   :  { %6118 = vrot.lane.b32.xlu0 %v14742_v35, %s12323_s30 }
0x18b9   :  { %6132 = vrot.lane.b32.xlu1 %v14746_v32, %s12322_s23 }
0x18ba   :  { %6122 = vrot.lane.b32.xlu0 %v14748_v23, %s12323_s30 }
0x18bc   :  { %v5846_v51 = vpop.xlane.xlu0 %5845 }
0x18bd   :  { %6120 = vrot.lane.b32.xlu1 %v14740_v2, %s12323_s30  ;;  %12016 = vrcp.f32 %v5846_v51 }
0x18be   :  { %6617 = vrot.lane.b32.xlu0 %v14752_v10, %s12324_s1 }
0x18c0   :  { %v5852_v26 = vpop.xlane.xlu0 %5851 }
0x18c1   :  { %6124 = vrot.lane.b32.xlu1 %v14746_v32, %s12323_s30 }
0x18c2   :  { %6970 = vrot.lane.b32.xlu0 %v14742_v35, %s12325_s19 }
0x18c4   :  { %v5933_v28 = vpop.permute.xlu0 %5932 }
0x18c5   :  { %6619 = vrot.lane.b32.xlu1 %v14750_v50, %s12324_s1  ;;  %10912 = vmatprep.subr.bf16.mxu1 %v5933_v28 }
0x18c6   :  { %10913 = vmatpush3.bf16.msra.mxu1 %v5933_v28 }
0x18c7   :  { %v12017_v6 = vpop.eup %12016 }
0x18c8   :  { %v5908_v38 = vmul.f32 %v12017_v6, %v14959_v12 }
0x18c9   :  { %v15030_v1 = vpop.f32.mrb[144].mxu0  ;;  %6621 = vrot.lane.b32.xlu1 %v14764_v30, %s12324_s1 }
0x18ca   :  { %v15034_v22 = vpop.f32.mrb[145].mxu0 }
0x18cb   :  { %v15036_v56 = vpop.f32.mrb[146].mxu0 }
0x18cc   :  { %v15040_v43 = vpop.f32.mrb[147].mxu0 }
0x18cd   :  { %6623 = vrot.lane.b32.xlu1 %v14762_v47, %s12324_s1 }
0x18d1   :  { %6972 = vrot.lane.b32.xlu1 %v14740_v2, %s12325_s19 }
0x18d5   :  { %6974 = vrot.lane.b32.xlu1 %v14748_v23, %s12325_s19 }
0x18d9   :  { %6976 = vrot.lane.b32.xlu1 %v14746_v32, %s12325_s19 }
0x18ec   :  { %v5849_v34 = vpop.xlane.xlu1 %5848 }
0x18ed   :  { %12018 = vrcp.f32 %v5849_v34 }
0x18ee   :  { %12020 = vrcp.f32 %v5852_v26 }
0x18f0   :  { %v5855_v15 = vpop.xlane.xlu1 %5854 }
0x18f1   :  { %12022 = vrcp.f32 %v5855_v15 }
0x18f4   :  { %v5935_v59 = vpop.permute.xlu1 %5934 }
0x18f5   :  { %10914 = vmatprep.subr.bf16.mxu1 %v5935_v59 }
0x18f6   :  { %10915 = vmatpush3.bf16.msra.mxu1 %v5935_v59 }
0x18f7   :  { %v12019_v4 = vpop.eup %12018 }
0x18f8   :  { %v5937_v11 = vpop.permute.xlu1 %5936  ;;  %v5909_v58 = vmul.f32 %v12019_v4, %v14974_v17  ;;  %v12021_v36 = vpop.eup %12020 }
0x18f9   :  { %10916 = vmatprep.subr.bf16.mxu1 %v5937_v11  ;;  %v5910_v49 = vmul.f32 %v12021_v36, %v14963_v62 }
0x18fa   :  { %10917 = vmatpush3.bf16.msra.mxu1 %v5937_v11  ;;  %v5924_v55 = vpack.c.bf16 %v5909_v58, %v5908_v38 }
0x18fb   :  { %v12023_v40 = vpop.eup %12022 }
0x18fc   :  { %v5911_v5 = vmul.f32 %v12023_v40, %v14978_v7  ;;  %v5939_v44 = vpop.permute.xlu1 %5938  ;;  %10920 = vmatprep.mubr.msk.bf16.mxu1 %vm1709_vm2, %v5924_v55 }
0x18fd   :  { %10918 = vmatprep.subr.bf16.mxu1 %v5939_v44  ;;  %v15057_v61 = vpop.f32.mrb[148].mxu0 }
0x18fe   :  { %v5925_v18 = vpack.c.bf16 %v5911_v5, %v5910_v49  ;;  %10919 = vmatpush3.bf16.msra.mxu1 %v5939_v44  ;;  %v15059_v12 = vpop.f32.mrb[149].mxu0 }
0x18ff   :  { %v15061_v17 = vpop.f32.mrb[150].mxu0 }
0x1900   :  { %v15065_v33 = vpop.f32.mrb[151].mxu0 }
0x1901   :  { %10921 = vmatmul.mubr.msk.bf16.vlgmr.msra.gmra.mrb[176].mxu1 %vm1709_vm2, %v5925_v18 }
0x1905   :  { %v10970_v7 = vpop.f32.mrb[152].mxu0 }
0x1906   :  { %v15070_v54 = vmul.f32 0.35355338, %v10970_v7  ;;  %v6297_v24 = vpop.f32.mrb[153].mxu0 }
0x1907   :  { %v10971_v39 = vpop.f32.mrb[154].mxu0  ;;  %v15072_v29 = vmul.f32 0.35355338, %v6297_v24 }
0x1908   :  { %v6300_v31 = vpop.f32.mrb[155].mxu0  ;;  %v6374_v51 = vsel %vm1709_vm2, %v15070_v54, -inf  ;;  %v15080_v34 = vmul.f32 0.35355338, %v10971_v39 }
0x1909   :  { %v15076_v26 = vmul.f32 0.35355338, %v6300_v31  ;;  %6375 = vmax.xlane.f32.xlu0 %v6374_v51  ;;  %v6368_v15 = vsel %vm1709_vm2, %v15072_v29, -inf }
0x190a   :  { %v6377_v59 = vsel %vm1709_vm2, %v15080_v34, -inf }
0x190b   :  { %v6371_v28 = vsel %vm1709_vm2, %v15076_v26, -inf }
0x190c   :  { %6372 = vmax.xlane.f32.xlu1 %v6371_v28 }
0x190d   :  { %6369 = vmax.xlane.f32.xlu0 %v6368_v15 }
0x1911   :  { %6378 = vmax.xlane.f32.xlu0 %v6377_v59 }
0x1921   :  { %v5858_v6 = vpop.xlane.xlu0 %5857 }
0x1925   :  { %v5864_v4 = vpop.xlane.xlu0 %5863 }
0x1926   :  { %v10974_v11 = vpop.f32.mrb[156].mxu0 }
0x1927   :  { %v15086_v38 = vmul.f32 0.35355338, %v10974_v11  ;;  %v6313_v58 = vpop.f32.mrb[157].mxu0 }
0x1928   :  { %v10975_v36 = vpop.f32.mrb[158].mxu0  ;;  %v15088_v55 = vmul.f32 0.35355338, %v6313_v58 }
0x1929   :  { %v15090_v40 = vmul.f32 0.35355338, %v10975_v36  ;;  %v6316_v49 = vpop.f32.mrb[159].mxu0  ;;  %v5867_v5 = vpop.xlane.xlu0 %5866  ;;  %v6386_v44 = vsel %vm1709_vm2, %v15086_v38, -inf }
0x192a   :  { %6387 = vmax.xlane.f32.xlu0 %v6386_v44  ;;  %v15094_v18 = vmul.f32 0.35355338, %v6316_v49  ;;  %12024 = vrcp.f32 %v5867_v5  ;;  %v6380_v31 = vsel %vm1709_vm2, %v15088_v55, -inf }
0x192b   :  { %v6389_v7 = vsel %vm1709_vm2, %v15090_v40, -inf  ;;  %12026 = vrcp.f32 %v5858_v6 }
0x192c   :  { %6390 = vmax.xlane.f32.xlu1 %v6389_v7  ;;  %12028 = vrcp.f32 %v5864_v4  ;;  %v6383_v28 = vsel %vm1709_vm2, %v15094_v18, -inf }
0x192d   :  { %v5861_v24 = vpop.xlane.xlu1 %5860  ;;  %v6127_v39 = vpop.permute.xlu0 %6126 }
0x192e   :  { %12030 = vrcp.f32 %v5861_v24  ;;  %6381 = vmax.xlane.f32.xlu0 %v6380_v31  ;;  %11408 = vmatprep.subr.msk.bf16.mxu1 %vm1502_vm1, %v6127_v39  ;;  %v6147_v51 = vsel %vm1502_vm1, %v6127_v39, 0 }
0x192f   :  { %10945 = vmatpush3.bf16.xpose.msra.mxu1 %v6147_v51 }
0x1930   :  { %6384 = vmax.xlane.f32.xlu1 %v6383_v28 }
0x1931   :  { %v6129_v15 = vpop.permute.xlu1 %6128  ;;  %v6119_v59 = vpop.permute.xlu0 %6118 }
0x1932   :  { %11409 = vmatprep.subr.msk.bf16.mxu1 %vm1502_vm1, %v6129_v15  ;;  %v6150_v36 = vsel %vm1502_vm1, %v6129_v15, 0 }
0x1934   :  { %v12025_v6 = vpop.eup %12024 }
0x1935   :  { %v6131_v4 = vpop.permute.xlu1 %6130  ;;  %v6123_v11 = vpop.permute.xlu0 %6122  ;;  %v5915_v44 = vmul.f32 %v12025_v6, %v15000_v46 }
0x1936   :  { %v12027_v58 = vpop.eup %12026 }
0x1937   :  { %v12029_v49 = vpop.eup %12028  ;;  %10947 = vmatpush3.bf16.xpose.msra.mxu1 %v6150_v36  ;;  %v5912_v39 = vmul.f32 %v12027_v58, %v14992_v8  ;;  %v6153_v36 = vsel %vm1502_vm1, %v6131_v4, 0 }
0x1938   :  { %v12031_v5 = vpop.eup %12030  ;;  %11410 = vmatprep.subr.msk.bf16.mxu1 %vm1502_vm1, %v6131_v4  ;;  %v5914_v51 = vmul.f32 %v12029_v49, %v14996_v0 }
0x1939   :  { %v6133_v7 = vpop.permute.xlu1 %6132  ;;  %v6618_v24 = vpop.permute.xlu0 %6617  ;;  %v5913_v31 = vmul.f32 %v12031_v5, %v15004_v19 }
0x193a   :  { %10992 = vmatprep.subr.bf16.mxu0 %v6618_v24  ;;  %v5927_v45 = vpack.c.bf16 %v5915_v44, %v5914_v51  ;;  %v6156_v46 = vsel %vm1502_vm1, %v6133_v7, 0 }
0x193b   :  { %10993 = vmatpush3.bf16.msra.mxu0 %v6618_v24  ;;  %v5926_v28 = vpack.c.bf16 %v5913_v31, %v5912_v39 }
0x193d   :  { %v6121_v15 = vpop.permute.xlu1 %6120  ;;  %10924 = vmatprep.mubr.msk.bf16.mxu1 %vm1709_vm2, %v5926_v28 }
0x193e   :  { %10925 = vmatmul.mubr.msk.bf16.gmra.mrb[180].mxu1 %vm1709_vm2, %v5927_v45 }
0x193f   :  { %10949 = vmatpush3.bf16.xpose.msra.mxu1 %v6153_v36  ;;  %10952 = vmatprep.mubr.msk.bf16.mxu1 %vm1502_vm1, %v6119_v59  ;;  %v15122_v59 = vpop.permute.xlu0 %6970 }
0x1940   :  { %11411 = vmatprep.subr.msk.bf16.mxu1 %vm1502_vm1, %v6133_v7 }
0x1941   :  { %7075 = vrot.lane.b32.xlu1 %v14752_v10, %s12325_s19  ;;  %v6125_v8 = vpop.permute.xlu1 %6124 }
0x1944   :  { %6962 = vrot.lane.b32.xlu0 %v14742_v35, %s12326_s3 }
0x1945   :  { %v6620_v0 = vpop.permute.xlu1 %6619 }
0x1946   :  { %10994 = vmatprep.subr.bf16.mxu0 %v6620_v0 }
0x1947   :  { %10951 = vmatpush3.bf16.xpose.msra.mxu1 %v6156_v46  ;;  %10995 = vmatpush3.bf16.msra.mxu0 %v6620_v0 }
0x1949   :  { %v6622_v19 = vpop.permute.xlu1 %6621 }
0x194a   :  { %10996 = vmatprep.subr.bf16.mxu0 %v6622_v19 }
0x194b   :  { %10997 = vmatpush3.bf16.msra.mxu0 %v6622_v19 }
0x194d   :  { %v6624_v45 = vpop.permute.xlu1 %6623 }
0x194e   :  { %10953 = vmatmul.mubr.msk.bf16.vlgmr.msra.gmra.mrb[184].mxu1 %vm1502_vm1, %v6121_v15  ;;  %10998 = vmatprep.subr.bf16.mxu0 %v6624_v45 }
0x194f   :  { %10956 = vmatprep.mubr.msk.bf16.mxu1 %vm1502_vm1, %v6123_v11  ;;  %10999 = vmatpush3.bf16.msra.mxu0 %v6624_v45 }
0x1950   :  { %11418 = vmatprep.subr.msk.bf16.mxu0 %vm1502_vm1, %v15122_v59 }
0x1951   :  { %v15128_v6 = vpop.permute.xlu1 %6972 }
0x1955   :  { %v15130_v4 = vpop.permute.xlu1 %6974 }
0x1956   :  { %10957 = vmatmul.mubr.msk.bf16.gmra.mrb[188].mxu1 %vm1502_vm1, %v6125_v8 }
0x1959   :  { %v15132_v58 = vpop.permute.xlu1 %6976 }
0x1996   :  { %v6376_v49 = vpop.xlane.xlu0 %6375 }
0x1997   :  { %v6402_v5 = vsub.f32 %v15070_v54, %v6376_v49 }
0x1999   :  { %v6428_v44 = vmul.f32 1.442695, %v6402_v5  ;;  %v6373_v7 = vpop.xlane.xlu1 %6372 }
0x199a   :  { %v6370_v24 = vpop.xlane.xlu0 %6369  ;;  %v6401_v39 = vsub.f32 %v15076_v26, %v6373_v7 }
0x199b   :  { %12032 = vpow2.f32 %v6428_v44  ;;  %v6400_v11 = vsub.f32 %v15072_v29, %v6370_v24 }
0x199c   :  { %v6426_v15 = vmul.f32 1.442695, %v6401_v39 }
0x199d   :  { %v6424_v31 = vmul.f32 1.442695, %v6400_v11 }
0x199e   :  { %v6379_v51 = vpop.xlane.xlu0 %6378 }
0x199f   :  { %12034 = vpow2.f32 %v6424_v31  ;;  %v6403_v28 = vsub.f32 %v15080_v34, %v6379_v51 }
0x19a1   :  { %v6430_v36 = vmul.f32 1.442695, %v6403_v28 }
0x19a3   :  { %12036 = vpow2.f32 %v6430_v36 }
0x19a4   :  { %12038 = vpow2.f32 %v6426_v15 }
0x19a5   :  { %v15138_v8 = vpop.eup %12032 }
0x19a6   :  { %v6470_v54 = vsel %vm1709_vm2, %v15138_v8, 0.0 }
0x19a7   :  { %6471 = vadd.xlane.f32.xlu0 %v6470_v54 }
0x19a9   :  { %v15142_v0 = vpop.eup %12034 }
0x19aa   :  { %v6464_v29 = vsel %vm1709_vm2, %v15142_v0, 0.0 }
0x19ab   :  { %6465 = vadd.xlane.f32.xlu0 %v6464_v29 }
0x19ad   :  { %v15146_v26 = vpop.eup %12036 }
0x19ae   :  { %v6473_v34 = vsel %vm1709_vm2, %v15146_v26, 0.0  ;;  %v15150_v46 = vpop.eup %12038 }
0x19af   :  { %6474 = vadd.xlane.f32.xlu1 %v6473_v34  ;;  %v6467_v19 = vsel %vm1709_vm2, %v15150_v46, 0.0 }
0x19b3   :  { %6468 = vadd.xlane.f32.xlu1 %v6467_v19 }
0x19b7   :  { %v6388_v45 = vpop.xlane.xlu0 %6387 }
0x19b8   :  { %v6406_v49 = vsub.f32 %v15086_v38, %v6388_v45 }
0x19b9   :  { %v6391_v5 = vpop.xlane.xlu1 %6390 }
0x19ba   :  { %v6436_v44 = vmul.f32 1.442695, %v6406_v49  ;;  %v6407_v7 = vsub.f32 %v15090_v40, %v6391_v5 }
0x19bb   :  { %v6382_v24 = vpop.xlane.xlu0 %6381 }
0x19bc   :  { %12040 = vpow2.f32 %v6436_v44  ;;  %v6404_v11 = vsub.f32 %v15088_v55, %v6382_v24  ;;  %v6438_v39 = vmul.f32 1.442695, %v6407_v7 }
0x19bd   :  { %v6385_v31 = vpop.xlane.xlu1 %6384 }
0x19be   :  { %v6432_v51 = vmul.f32 1.442695, %v6404_v11  ;;  %v6405_v28 = vsub.f32 %v15094_v18, %v6385_v31 }
0x19c0   :  { %12042 = vpow2.f32 %v6432_v51  ;;  %v6434_v15 = vmul.f32 1.442695, %v6405_v28 }
0x19c1   :  { %12044 = vpow2.f32 %v6438_v39  ;;  %v15234_v37 = vpop.permute.xlu1 %7075 }
0x19c2   :  { %12046 = vpow2.f32 %v6434_v15 }
0x19c6   :  { %v15158_v36 = vpop.eup %12040 }
0x19c7   :  { %v6482_v38 = vsel %vm1709_vm2, %v15158_v36, 0.0 }
0x19c8   :  { %6483 = vadd.xlane.f32.xlu0 %v6482_v38 }
0x19ca   :  { %v15162_v40 = vpop.eup %12042 }
0x19cb   :  { %v15164_v54 = vpop.eup %12044  ;;  %v6476_v55 = vsel %vm1709_vm2, %v15162_v40, 0.0 }
0x19cc   :  { %v15168_v29 = vpop.eup %12046  ;;  %6477 = vadd.xlane.f32.xlu0 %v6476_v55  ;;  %v6485_v34 = vsel %vm1709_vm2, %v15164_v54, 0.0 }
0x19cd   :  { %v6479_v18 = vsel %vm1709_vm2, %v15168_v29, 0.0 }
0x19ce   :  { %6480 = vadd.xlane.f32.xlu1 %v6479_v18 }
0x19d0   :  { %6486 = vadd.xlane.f32.xlu0 %v6485_v34 }
0x19d4   :  { %v15174_v19 = vpop.f32.mrb[176].mxu1 }
0x19d5   :  { %v15176_v45 = vpop.f32.mrb[177].mxu1 }
0x19d6   :  { %v15178_v49 = vpop.f32.mrb[178].mxu1 }
0x19d7   :  { %v15182_v44 = vpop.f32.mrb[179].mxu1 }
0x19df   :  { %7077 = vrot.lane.b32.xlu1 %v14750_v50, %s12325_s19 }
0x19e6   :  { %6964 = vrot.lane.b32.xlu0 %v14740_v2, %s12326_s3 }
0x1a11   :  { %v15190_v24 = vpop.f32.mrb[180].mxu1 }
0x1a12   :  { %v15192_v11 = vpop.f32.mrb[181].mxu1 }
0x1a13   :  { %v15194_v39 = vpop.f32.mrb[182].mxu1 }
0x1a14   :  { %v15198_v51 = vpop.f32.mrb[183].mxu1 }
0x1a21   :  { %v10954_v15 = vpop.f32.mrb[184].mxu1 }
0x1a22   :  { %v6192_v38 = vpop.f32.mrb[185].mxu1  ;;  %v15204_v62 = vmul.f32 0.35355338, %v10954_v15 }
0x1a23   :  { %v15202_v55 = vmul.f32 0.35355338, %v6192_v38  ;;  %v10955_v18 = vpop.f32.mrb[186].mxu1 }
0x1a24   :  { %v6195_v34 = vpop.f32.mrb[187].mxu1  ;;  %v15212_v5 = vmul.f32 0.35355338, %v10955_v18  ;;  %v6350_v38 = vsel %vm1709_vm2, %v15204_v62, -inf }
0x1a25   :  { %v15206_v13 = vmul.f32 0.35355338, %v6195_v34  ;;  %v6344_v48 = vsel %vm1709_vm2, %v15202_v55, -inf }
0x1a26   :  { %6345 = vmax.xlane.f32.xlu0 %v6344_v48 }
0x1a27   :  { %v6347_v31 = vsel %vm1709_vm2, %v15206_v13, -inf }
0x1a28   :  { %6348 = vmax.xlane.f32.xlu1 %v6347_v31  ;;  %v6353_v31 = vsel %vm1709_vm2, %v15212_v5, -inf }
0x1a29   :  { %v10958_v28 = vpop.f32.mrb[188].mxu1 }
0x1a2a   :  { %v6208_v7 = vpop.f32.mrb[189].mxu1  ;;  %6351 = vmax.xlane.f32.xlu0 %v6350_v38  ;;  %v15224_v18 = vmul.f32 0.35355338, %v10958_v28  ;;  %v15228_v38 = vpop.permute.xlu0 %6962 }
0x1a2b   :  { %v15216_v15 = vmul.f32 0.35355338, %v6208_v7  ;;  %v10959_v34 = vpop.f32.mrb[190].mxu1 }
0x1a2c   :  { %v6211_v20 = vpop.f32.mrb[191].mxu1  ;;  %v15230_v7 = vmul.f32 0.35355338, %v10959_v34 }
0x1a2d   :  { %v15218_v53 = vmul.f32 0.35355338, %v6211_v20  ;;  %v6356_v48 = vsel %vm1709_vm2, %v15216_v15, -inf  ;;  %v6362_v20 = vsel %vm1709_vm2, %v15224_v18, -inf }
0x1a2e   :  { %6357 = vmax.xlane.f32.xlu1 %v6356_v48  ;;  %6354 = vmax.xlane.f32.xlu0 %v6353_v31  ;;  %v6365_v48 = vsel %vm1709_vm2, %v15230_v7, -inf }
0x1a2f   :  { %v6359_v3 = vsel %vm1709_vm2, %v15218_v53, -inf }
0x1a32   :  { %6360 = vmax.xlane.f32.xlu1 %v6359_v3 }
0x1a34   :  { %v6472_v25 = vpop.xlane.xlu0 %6471 }
0x1a36   :  { %6363 = vmax.xlane.f32.xlu1 %v6362_v20 }
0x1a38   :  { %v6466_v28 = vpop.xlane.xlu0 %6465 }
0x1a3a   :  { %6366 = vmax.xlane.f32.xlu1 %v6365_v48 }
0x1a3c   :  { %v6475_v31 = vpop.xlane.xlu1 %6474 }
0x1a3d   :  { %12048 = vrcp.f32 %v6475_v31 }
0x1a3e   :  { %12050 = vrcp.f32 %v6466_v28 }
0x1a3f   :  { %12052 = vrcp.f32 %v6472_v25 }
0x1a40   :  { %v6469_v52 = vpop.xlane.xlu1 %6468 }
0x1a41   :  { %12054 = vrcp.f32 %v6469_v52 }
0x1a44   :  { %7079 = vrot.lane.b32.xlu0 %v14764_v30, %s12325_s19 }
0x1a47   :  { %v12049_v3 = vpop.eup %12048 }
0x1a48   :  { %6968 = vrot.lane.b32.xlu0 %v14746_v32, %s12326_s3  ;;  %v12051_v34 = vpop.eup %12050  ;;  %v6515_v16 = vmul.f32 %v12049_v3, %v15146_v26  ;;  %v6991_v26 = vsel %vm1502_vm1, %v15122_v59, 0 }
0x1a49   :  { %v12053_v20 = vpop.eup %12052  ;;  %v6512_v52 = vmul.f32 %v12051_v34, %v15142_v0 }
0x1a4a   :  { %v6514_v48 = vmul.f32 %v12053_v20, %v15138_v8 }
0x1a4b   :  { %v12055_v63 = vpop.eup %12054  ;;  %6966 = vrot.lane.b32.xlu1 %v14748_v23, %s12326_s3 }
0x1a4c   :  { %7081 = vrot.lane.b32.xlu0 %v14762_v47, %s12325_s19  ;;  %v6513_v25 = vmul.f32 %v12055_v63, %v15150_v46  ;;  %v6525_v31 = vpack.c.bf16 %v6515_v16, %v6514_v48  ;;  %v6994_v63 = vsel %vm1502_vm1, %v15128_v6, 0  ;;  %v6997_v46 = vsel %vm1502_vm1, %v15130_v4, 0  ;;  %s16603_s19 = smov 104  }
0x1a4d   :  { %v7000_v48 = vsel %vm1502_vm1, %v15132_v58, 0 }
0x1a4e   :  { %v6524_v28 = vpack.c.bf16 %v6513_v25, %v6512_v52 }
0x1a4f   :  { %7069 = vrot.lane.b32.xlu1 %v14750_v50, %s12326_s3 }
0x1a50   :  { %7067 = vrot.lane.b32.xlu0 %v14752_v10, %s12326_s3  ;;  %11000 = vmatprep.mubr.msk.bf16.mxu0 %vm1709_vm2, %v6524_v28 }
0x1a51   :  { %11001 = vmatmul.mubr.msk.bf16.vlgmr.msra.gmra.mrb[160].mxu0 %vm1709_vm2, %v6525_v31 }
0x1a52   :  { %11045 = vmatpush3.bf16.xpose.msra.mxu0 %v6991_v26 }
0x1a53   :  { %11419 = vmatprep.subr.msk.bf16.mxu0 %vm1502_vm1, %v15128_v6  ;;  %7073 = vrot.lane.b32.xlu1 %v14762_v47, %s12326_s3 }
0x1a54   :  { %7071 = vrot.lane.b32.xlu0 %v14764_v30, %s12326_s3  ;;  %s16606_s3 = smov 40  }
0x1a55   :  { %v6484_v16 = vpop.xlane.xlu0 %6483 }
0x1a59   :  { %v6478_v8 = vpop.xlane.xlu0 %6477 }
0x1a5a   :  { %11047 = vmatpush3.bf16.xpose.msra.mxu0 %v6994_v63  ;;  %12056 = vrcp.f32 %v6478_v8 }
0x1a5b   :  { %12058 = vrcp.f32 %v6484_v16  ;;  %11420 = vmatprep.subr.msk.bf16.mxu0 %vm1502_vm1, %v15130_v4  ;;  %v6481_v59 = vpop.xlane.xlu1 %6480 }
0x1a5c   :  { %12060 = vrcp.f32 %v6481_v59 }
0x1a5d   :  { %v6487_v0 = vpop.xlane.xlu0 %6486 }
0x1a5e   :  { %12062 = vrcp.f32 %v6487_v0 }
0x1a62   :  { %11049 = vmatpush3.bf16.xpose.msra.mxu0 %v6997_v46 }
0x1a63   :  { %11421 = vmatprep.subr.msk.bf16.mxu0 %vm1502_vm1, %v15132_v58  ;;  %v7096_v58 = vsel %vm1502_vm1, %v15234_v37, 0 }
0x1a64   :  { %v12057_v3 = vpop.eup %12056 }
0x1a65   :  { %v12059_v6 = vpop.eup %12058  ;;  %v6516_v20 = vmul.f32 %v12057_v3, %v15162_v40  ;;  %v6965_v40 = vpop.permute.xlu0 %6964 }
0x1a66   :  { %v12061_v34 = vpop.eup %12060  ;;  %v6518_v31 = vmul.f32 %v12059_v6, %v15158_v36  ;;  %v7078_v36 = vpop.permute.xlu1 %7077 }
0x1a67   :  { %v6517_v52 = vmul.f32 %v12061_v34, %v15168_v29 }
0x1a68   :  { %v12063_v25 = vpop.eup %12062 }
0x1a69   :  { %v6526_v28 = vpack.c.bf16 %v6517_v52, %v6516_v20  ;;  %v6519_v4 = vmul.f32 %v12063_v25, %v15164_v54  ;;  %v7099_v54 = vsel %vm1502_vm1, %v7078_v36, 0 }
0x1a6a   :  { %11051 = vmatpush3.bf16.xpose.msra.mxu0 %v7000_v48 }
0x1a6b   :  { %11422 = vmatprep.subr.msk.bf16.mxu0 %vm1502_vm1, %v15234_v37  ;;  %11004 = vmatprep.mubr.msk.bf16.mxu0 %vm1709_vm2, %v6526_v28  ;;  %v6527_v26 = vpack.c.bf16 %v6519_v4, %v6518_v31 }
0x1a6d   :  { %11005 = vmatmul.mubr.msk.bf16.gmra.mrb[164].mxu0 %vm1709_vm2, %v6527_v26 }
0x1a6e   :  { %11052 = vmatprep.mubr.msk.bf16.mxu0 %vm1502_vm1, %v15228_v38 }
0x1a75   :  { %11053 = vmatmul.mubr.msk.bf16.vlgmr.msra.gmra.mrb[168].mxu0 %vm1502_vm1, %v6965_v40 }
0x1a76   :  { %11061 = vmatpush3.bf16.xpose.msra.mxu0 %v7096_v58 }
0x1a77   :  { %11423 = vmatprep.subr.msk.bf16.mxu0 %vm1502_vm1, %v7078_v36 }
0x1a7e   :  { %11063 = vmatpush3.bf16.xpose.msra.mxu0 %v7099_v54 }
0x1ab3   :  { %v6346_v29 = vpop.xlane.xlu0 %6345 }
0x1ab4   :  { %v6392_v16 = vsub.f32 %v15202_v55, %v6346_v29 }
0x1ab5   :  { %v6349_v63 = vpop.xlane.xlu1 %6348 }
0x1ab6   :  { %v6408_v8 = vmul.f32 1.442695, %v6392_v16  ;;  %v6393_v38 = vsub.f32 %v15206_v13, %v6349_v63 }
0x1ab7   :  { %v6352_v59 = vpop.xlane.xlu0 %6351 }
0x1ab8   :  { %12064 = vpow2.f32 %v6408_v8  ;;  %v6410_v0 = vmul.f32 1.442695, %v6393_v38  ;;  %v6394_v46 = vsub.f32 %v15204_v62, %v6352_v59 }
0x1aba   :  { %12066 = vpow2.f32 %v6410_v0  ;;  %v6412_v37 = vmul.f32 1.442695, %v6394_v46 }
0x1abb   :  { %v6358_v3 = vpop.xlane.xlu1 %6357  ;;  %v6355_v6 = vpop.xlane.xlu0 %6354 }
0x1abc   :  { %12068 = vpow2.f32 %v6412_v37  ;;  %v6396_v34 = vsub.f32 %v15216_v15, %v6358_v3  ;;  %v6395_v20 = vsub.f32 %v15212_v5, %v6355_v6 }
0x1abe   :  { %v6414_v52 = vmul.f32 1.442695, %v6395_v20  ;;  %v6416_v55 = vmul.f32 1.442695, %v6396_v34 }
0x1abf   :  { %v6361_v25 = vpop.xlane.xlu1 %6360  ;;  %v7080_v48 = vpop.permute.xlu0 %7079 }
0x1ac0   :  { %v6397_v13 = vsub.f32 %v15218_v53, %v6361_v25  ;;  %11424 = vmatprep.subr.msk.bf16.mxu0 %vm1502_vm1, %v7080_v48  ;;  %v7102_v28 = vsel %vm1502_vm1, %v7080_v48, 0  ;;  %12070 = vpow2.f32 %v6414_v52 }
0x1ac1   :  { %11065 = vmatpush3.bf16.xpose.msra.mxu0 %v7102_v28  ;;  %12072 = vpow2.f32 %v6416_v55 }
0x1ac2   :  { %v15297_v62 = vpop.eup %12064  ;;  %v6418_v31 = vmul.f32 1.442695, %v6397_v13 }
0x1ac3   :  { %v6364_v4 = vpop.xlane.xlu1 %6363  ;;  %v6969_v15 = vpop.permute.xlu0 %6968  ;;  %v6440_v5 = vsel %vm1709_vm2, %v15297_v62, 0.0 }
0x1ac4   :  { %v15301_v26 = vpop.eup %12066  ;;  %12074 = vpow2.f32 %v6418_v31  ;;  %v6398_v53 = vsub.f32 %v15224_v18, %v6364_v4  ;;  %6441 = vadd.xlane.f32.xlu0 %v6440_v5 }
0x1ac5   :  { %v6443_v40 = vsel %vm1709_vm2, %v15301_v26, 0.0 }
0x1ac6   :  { %v15306_v58 = vpop.eup %12068  ;;  %v6420_v36 = vmul.f32 1.442695, %v6398_v53  ;;  %6444 = vadd.xlane.f32.xlu1 %v6443_v40 }
0x1ac7   :  { %v6367_v54 = vpop.xlane.xlu1 %6366  ;;  %v7082_v29 = vpop.permute.xlu0 %7081  ;;  %v6446_v16 = vsel %vm1709_vm2, %v15306_v58, 0.0 }
0x1ac8   :  { %12076 = vpow2.f32 %v6420_v36  ;;  %v6399_v63 = vsub.f32 %v15230_v7, %v6367_v54  ;;  %6447 = vadd.xlane.f32.xlu0 %v6446_v16  ;;  %11425 = vmatprep.subr.msk.bf16.mxu0 %vm1502_vm1, %v7082_v29  ;;  %v7105_v18 = vsel %vm1502_vm1, %v7082_v29, 0 }
0x1ac9   :  { %11067 = vmatpush3.bf16.xpose.msra.mxu0 %v7105_v18 }
0x1aca   :  { %v6422_v8 = vmul.f32 1.442695, %v6399_v63  ;;  %v15313_v38 = vpop.eup %12070 }
0x1acb   :  { %v6967_v59 = vpop.permute.xlu1 %6966  ;;  %v6449_v0 = vsel %vm1709_vm2, %v15313_v38, 0.0  ;;  %v15318_v46 = vpop.eup %12072 }
0x1acc   :  { %12078 = vpow2.f32 %v6422_v8  ;;  %11056 = vmatprep.mubr.msk.bf16.mxu0 %vm1502_vm1, %v6967_v59  ;;  %v7068_v37 = vpop.permute.xlu0 %7067  ;;  %6450 = vadd.xlane.f32.xlu0 %v6449_v0  ;;  %v6452_v6 = vsel %vm1709_vm2, %v15318_v46, 0.0 }
0x1acd   :  { %11057 = vmatmul.mubr.msk.bf16.gmra.mrb[172].mxu0 %vm1502_vm1, %v6969_v15 }
0x1ace   :  { %v15321_v7 = vpop.eup %12074  ;;  %11068 = vmatprep.mubr.msk.bf16.mxu0 %vm1502_vm1, %v7068_v37 }
0x1acf   :  { %v6455_v3 = vsel %vm1709_vm2, %v15321_v7, 0.0  ;;  %v7070_v52 = vpop.permute.xlu1 %7069 }
0x1ad0   :  { %6456 = vadd.xlane.f32.xlu1 %v6455_v3  ;;  %6453 = vadd.xlane.f32.xlu0 %v6452_v6  ;;  %v7072_v55 = vpop.permute.xlu0 %7071 }
0x1ad2   :  { %v15328_v34 = vpop.eup %12076 }
0x1ad3   :  { %v6458_v20 = vsel %vm1709_vm2, %v15328_v34, 0.0  ;;  %v7074_v13 = vpop.permute.xlu1 %7073 }
0x1ad4   :  { %6459 = vadd.xlane.f32.xlu0 %v6458_v20 }
0x1ad5   :  { %11069 = vmatmul.mubr.msk.bf16.vlgmr.msra.gmra.mrb[176].mxu0 %vm1502_vm1, %v7070_v52 }
0x1ad6   :  { %v15333_v25 = vpop.eup %12078  ;;  %11072 = vmatprep.mubr.msk.bf16.mxu0 %vm1502_vm1, %v7072_v55 }
0x1ad7   :  { %v6461_v48 = vsel %vm1709_vm2, %v15333_v25, 0.0 }
0x1ad8   :  { %6462 = vadd.xlane.f32.xlu1 %v6461_v48 }
0x1add   :  { %11073 = vmatmul.mubr.msk.bf16.gmra.mrb[180].mxu0 %vm1502_vm1, %v7074_v13 }
0x1ae9   :  { %6530 = vrot.lane.b32.xlu1 %v14740_v2, %s12324_s1 }
0x1aea   :  { %6528 = vrot.lane.b32.xlu0 %v14742_v35, %s12324_s1 }
0x1aed   :  { %6532 = vrot.lane.b32.xlu1 %v14748_v23, %s12324_s1 }
0x1aee   :  { %7372 = vrot.lane.b32.xlu0 %v14742_v35, %s12327_s0 }
0x1af1   :  { %6534 = vrot.lane.b32.xlu1 %v14746_v32, %s12324_s1 }
0x1af2   :  { %7376 = vrot.lane.b32.xlu0 %v14748_v23, %s12327_s0 }
0x1af5   :  { %7374 = vrot.lane.b32.xlu1 %v14740_v2, %s12327_s0 }
0x1b24   :  { %v15353_v28 = vpop.f32.mrb[160].mxu0 }
0x1b25   :  { %v15355_v31 = vpop.f32.mrb[161].mxu0 }
0x1b26   :  { %v15357_v4 = vpop.f32.mrb[162].mxu0 }
0x1b27   :  { %v15361_v5 = vpop.f32.mrb[163].mxu0 }
0x1b40   :  { %v15365_v40 = vpop.f32.mrb[164].mxu0 }
0x1b41   :  { %v15367_v36 = vpop.f32.mrb[165].mxu0 }
0x1b42   :  { %v15369_v54 = vpop.f32.mrb[166].mxu0 }
0x1b43   :  { %v15373_v16 = vpop.f32.mrb[167].mxu0 }
0x1b48   :  { %v11054_v18 = vpop.f32.mrb[168].mxu0 }
0x1b49   :  { %v15377_v8 = vmul.f32 0.35355338, %v11054_v18  ;;  %v7036_v59 = vpop.f32.mrb[169].mxu0 }
0x1b4a   :  { %v11055_v0 = vpop.f32.mrb[170].mxu0  ;;  %v15379_v37 = vmul.f32 0.35355338, %v7036_v59 }
0x1b4b   :  { %v7039_v3 = vpop.f32.mrb[171].mxu0  ;;  %v7194_v6 = vsel %vm1709_vm2, %v15377_v8, -inf  ;;  %v15387_v55 = vmul.f32 0.35355338, %v11055_v0 }
0x1b4c   :  { %v15383_v20 = vmul.f32 0.35355338, %v7039_v3  ;;  %7195 = vmax.xlane.f32.xlu0 %v7194_v6  ;;  %v7188_v48 = vsel %vm1709_vm2, %v15379_v37, -inf }
0x1b4d   :  { %v7197_v59 = vsel %vm1709_vm2, %v15387_v55, -inf }
0x1b4e   :  { %v7191_v52 = vsel %vm1709_vm2, %v15383_v20, -inf }
0x1b4f   :  { %7192 = vmax.xlane.f32.xlu1 %v7191_v52 }
0x1b50   :  { %7189 = vmax.xlane.f32.xlu0 %v7188_v48 }
0x1b51   :  { %v6442_v13 = vpop.xlane.xlu0 %6441 }
0x1b52   :  { %12080 = vrcp.f32 %v6442_v13 }
0x1b53   :  { %v6445_v18 = vpop.xlane.xlu1 %6444 }
0x1b54   :  { %12082 = vrcp.f32 %v6445_v18  ;;  %7198 = vmax.xlane.f32.xlu0 %v7197_v59 }
0x1b55   :  { %v6448_v3 = vpop.xlane.xlu0 %6447 }
0x1b59   :  { %v6451_v6 = vpop.xlane.xlu0 %6450 }
0x1b5a   :  { %12084 = vrcp.f32 %v6451_v6 }
0x1b5c   :  { %v12081_v29 = vpop.eup %12080 }
0x1b5d   :  { %v6454_v15 = vpop.xlane.xlu0 %6453  ;;  %v6504_v0 = vmul.f32 %v12081_v29, %v15297_v62  ;;  %v6457_v53 = vpop.xlane.xlu1 %6456 }
0x1b5e   :  { %v12083_v63 = vpop.eup %12082  ;;  %12086 = vrcp.f32 %v6457_v53 }
0x1b5f   :  { %v6505_v52 = vmul.f32 %v12083_v63, %v15301_v26  ;;  %12088 = vrcp.f32 %v6454_v15 }
0x1b60   :  { %12090 = vrcp.f32 %v6448_v3 }
0x1b61   :  { %v6520_v14 = vpack.c.bf16 %v6505_v52, %v6504_v0  ;;  %v6460_v48 = vpop.xlane.xlu0 %6459 }
0x1b63   :  { %10984 = vmatprep.mubr.msk.bf16.mxu1 %vm1709_vm2, %v6520_v14 }
0x1b64   :  { %v12085_v62 = vpop.eup %12084 }
0x1b65   :  { %v6463_v13 = vpop.xlane.xlu1 %6462  ;;  %v6529_v18 = vpop.permute.xlu0 %6528  ;;  %v6507_v14 = vmul.f32 %v12085_v62, %v15313_v38 }
0x1b66   :  { %10976 = vmatprep.subr.bf16.mxu1 %v6529_v18  ;;  %12092 = vrcp.f32 %v6463_v13 }
0x1b67   :  { %10977 = vmatpush3.bf16.msra.mxu1 %v6529_v18  ;;  %12094 = vrcp.f32 %v6460_v48 }
0x1b68   :  { %v12087_v26 = vpop.eup %12086 }
0x1b69   :  { %v6531_v59 = vpop.permute.xlu1 %6530  ;;  %v12089_v63 = vpop.eup %12088  ;;  %v6509_v3 = vmul.f32 %v12087_v26, %v15321_v7 }
0x1b6a   :  { %10978 = vmatprep.subr.bf16.mxu1 %v6531_v59  ;;  %v12091_v6 = vpop.eup %12090  ;;  %v6508_v53 = vmul.f32 %v12089_v63, %v15318_v46 }
0x1b6b   :  { %10979 = vmatpush3.bf16.msra.mxu1 %v6531_v59  ;;  %v6506_v0 = vmul.f32 %v12091_v6, %v15306_v58 }
0x1b6c   :  { %v6522_v18 = vpack.c.bf16 %v6509_v3, %v6508_v53 }
0x1b6d   :  { %v6533_v29 = vpop.permute.xlu1 %6532  ;;  %v6521_v52 = vpack.c.bf16 %v6507_v14, %v6506_v0 }
0x1b6e   :  { %10980 = vmatprep.subr.bf16.mxu1 %v6533_v29 }
0x1b6f   :  { %10981 = vmatpush3.bf16.msra.mxu1 %v6533_v29 }
0x1b70   :  { %v12093_v13 = vpop.eup %12092 }
0x1b71   :  { %v6535_v15 = vpop.permute.xlu1 %6534  ;;  %v12095_v48 = vpop.eup %12094  ;;  %v6511_v59 = vmul.f32 %v12093_v13, %v15333_v25 }
0x1b72   :  { %10982 = vmatprep.subr.bf16.mxu1 %v6535_v15  ;;  %v6510_v38 = vmul.f32 %v12095_v48, %v15328_v34 }
0x1b73   :  { %10983 = vmatpush3.bf16.msra.mxu1 %v6535_v15 }
0x1b74   :  { %v6523_v62 = vpack.c.bf16 %v6511_v59, %v6510_v38 }
0x1b76   :  { %10985 = vmatmul.mubr.msk.bf16.vlgmr.msra.gmra.mrb[192].mxu1 %vm1709_vm2, %v6521_v52 }
0x1b77   :  { %10988 = vmatprep.mubr.msk.bf16.mxu1 %vm1709_vm2, %v6522_v18 }
0x1b7e   :  { %10989 = vmatmul.mubr.msk.bf16.gmra.mrb[196].mxu1 %vm1709_vm2, %v6523_v62 }
0x1ba0   :  { %v11058_v46 = vpop.f32.mrb[172].mxu0 }
0x1ba1   :  { %v15405_v7 = vmul.f32 0.35355338, %v11058_v46  ;;  %v7052_v58 = vpop.f32.mrb[173].mxu0 }
0x1ba2   :  { %v11059_v29 = vpop.f32.mrb[174].mxu0  ;;  %v15407_v26 = vmul.f32 0.35355338, %v7052_v58 }
0x1ba3   :  { %v15409_v63 = vmul.f32 0.35355338, %v11059_v29  ;;  %v7055_v6 = vpop.f32.mrb[175].mxu0  ;;  %v7206_v14 = vsel %vm1709_vm2, %v15405_v7, -inf }
0x1ba4   :  { %7207 = vmax.xlane.f32.xlu0 %v7206_v14  ;;  %v15413_v25 = vmul.f32 0.35355338, %v7055_v6  ;;  %v7200_v15 = vsel %vm1709_vm2, %v15407_v26, -inf }
0x1ba5   :  { %v7209_v34 = vsel %vm1709_vm2, %v15409_v63, -inf }
0x1ba6   :  { %7210 = vmax.xlane.f32.xlu1 %v7209_v34  ;;  %v7203_v52 = vsel %vm1709_vm2, %v15413_v25, -inf }
0x1ba8   :  { %7201 = vmax.xlane.f32.xlu0 %v7200_v15  ;;  %v11070_v53 = vpop.f32.mrb[176].mxu0 }
0x1ba9   :  { %v15419_v3 = vmul.f32 0.35355338, %v11070_v53  ;;  %v7141_v0 = vpop.f32.mrb[177].mxu0 }
0x1baa   :  { %7204 = vmax.xlane.f32.xlu1 %v7203_v52  ;;  %v11071_v13 = vpop.f32.mrb[178].mxu0  ;;  %v15423_v18 = vmul.f32 0.35355338, %v7141_v0 }
0x1bab   :  { %v15425_v48 = vmul.f32 0.35355338, %v11071_v13  ;;  %v7144_v59 = vpop.f32.mrb[179].mxu0  ;;  %v7218_v38 = vsel %vm1709_vm2, %v15419_v3, -inf }
0x1bac   :  { %7219 = vmax.xlane.f32.xlu0 %v7218_v38  ;;  %v15429_v62 = vmul.f32 0.35355338, %v7144_v59  ;;  %v7212_v58 = vsel %vm1709_vm2, %v15423_v18, -inf  ;;  %v9735_v59 = vld [vmem:[%s16468_s8 + $0x14] sm:$0xf] }
0x1bad   :  { %v7221_v46 = vsel %vm1709_vm2, %v15425_v48, -inf  ;;  %11416 = vmatprep.subr.msk.bf16.mxu1 %vm2700_vm3, %v9735_v59  ;;  %v6739_v38 = vsel %vm2700_vm3, %v9735_v59, 0 }
0x1bae   :  { %7222 = vmax.xlane.f32.xlu1 %v7221_v46  ;;  %v7215_v34 = vsel %vm1709_vm2, %v15429_v62, -inf  ;;  %11009 = vmatpush3.bf16.msra.mxu1 %v6739_v38  ;;  %v15454_v46 = vpop.permute.xlu0 %7372 }
0x1bb0   :  { %7213 = vmax.xlane.f32.xlu0 %v7212_v58  ;;  %v11074_v29 = vpop.f32.mrb[180].mxu0  ;;  %v15459_v58 = vld [vmem:[%s16468_s8 + $0x10] sm:$0xf] }
0x1bb1   :  { %v15435_v6 = vmul.f32 0.35355338, %v11074_v29  ;;  %v7157_v14 = vpop.f32.mrb[181].mxu0  ;;  %11417 = vmatprep.subr.msk.bf16.mxu1 %vm2700_vm3, %v15459_v58 }
0x1bb2   :  { %7216 = vmax.xlane.f32.xlu1 %v7215_v34  ;;  %v11075_v15 = vpop.f32.mrb[182].mxu0  ;;  %v15439_v53 = vmul.f32 0.35355338, %v7157_v14  ;;  %v15463_v29 = vpop.permute.xlu0 %7376 }
0x1bb3   :  { %v7160_v0 = vpop.f32.mrb[183].mxu0  ;;  %v7230_v52 = vsel %vm1709_vm2, %v15435_v6, -inf  ;;  %v15467_v9 = vmul.f32 0.35355338, %v11075_v15 }
0x1bb4   :  { %7231 = vmax.xlane.f32.xlu0 %v7230_v52  ;;  %v7224_v13 = vsel %vm1709_vm2, %v15439_v53, -inf  ;;  %v15469_v57 = vmul.f32 0.35355338, %v7160_v0 }
0x1bb5   :  { %v7233_v42 = vsel %vm1709_vm2, %v15467_v9, -inf }
0x1bb8   :  { %7225 = vmax.xlane.f32.xlu0 %v7224_v13 }
0x1bc3   :  { %7461 = vrot.lane.b32.xlu1 %v14752_v10, %s12327_s0 }
0x1bce   :  { %7378 = vrot.lane.b32.xlu0 %v14746_v32, %s12327_s0 }
0x1bd9   :  { %v7196_v14 = vpop.xlane.xlu0 %7195 }
0x1bda   :  { %v7238_v34 = vsub.f32 %v15377_v8, %v7196_v14  ;;  %v7227_v8 = vsel %vm1709_vm2, %v15469_v57, -inf }
0x1bdc   :  { %v7256_v52 = vmul.f32 1.442695, %v7238_v34 }
0x1bdd   :  { %v7190_v13 = vpop.xlane.xlu0 %7189 }
0x1bde   :  { %v7236_v59 = vsub.f32 %v15379_v37, %v7190_v13  ;;  %12096 = vpow2.f32 %v7256_v52 }
0x1be0   :  { %v7252_v38 = vmul.f32 1.442695, %v7236_v59 }
0x1be1   :  { %v7199_v0 = vpop.xlane.xlu0 %7198 }
0x1be2   :  { %12098 = vpow2.f32 %v7252_v38  ;;  %v7239_v34 = vsub.f32 %v15387_v55, %v7199_v0 }
0x1be4   :  { %v7258_v59 = vmul.f32 1.442695, %v7239_v34 }
0x1be6   :  { %12100 = vpow2.f32 %v7258_v59 }
0x1be7   :  { %7234 = vmax.xlane.f32.xlu1 %v7233_v42  ;;  %v15485_v42 = vpop.permute.xlu1 %7374 }
0x1be8   :  { %v15473_v27 = vpop.eup %12096 }
0x1be9   :  { %16589 = vst [vmem:[#allocation17_spill] sm:$0xff] %v15473_v27  ;;  %v7290_v37 = vsel %vm1709_vm2, %v15473_v27, 0.0 }
0x1beb   :  { %7228 = vmax.xlane.f32.xlu1 %v7227_v8  ;;  %v7193_v52 = vpop.xlane.xlu1 %7192 }
0x1bec   :  { %v15479_v14 = vpop.eup %12098  ;;  %v7237_v13 = vsub.f32 %v15383_v20, %v7193_v52 }
0x1bed   :  { %7291 = vadd.xlane.f32.xlu0 %v7290_v37  ;;  %v7284_v15 = vsel %vm1709_vm2, %v15479_v14, 0.0 }
0x1bee   :  { %v7254_v38 = vmul.f32 1.442695, %v7237_v13 }
0x1bf0   :  { %12102 = vpow2.f32 %v7254_v38  ;;  %v15489_v8 = vpop.eup %12100 }
0x1bf1   :  { %7285 = vadd.xlane.f32.xlu0 %v7284_v15  ;;  %v7293_v37 = vsel %vm1709_vm2, %v15489_v8, 0.0 }
0x1bfa   :  { %v15493_v15 = vpop.eup %12102 }
0x1bfb   :  { %16590 = vst [vmem:[#allocation19_spill] sm:$0xff] %v15493_v15  ;;  %v7287_v21 = vsel %vm1709_vm2, %v15493_v15, 0.0 }
0x1bfc   :  { %7463 = vrot.lane.b32.xlu1 %v14750_v50, %s12327_s0 }
0x1c20   :  { %7294 = vadd.xlane.f32.xlu1 %v7293_v37 }
0x1c24   :  { %7288 = vadd.xlane.f32.xlu1 %v7287_v21 }
0x1c31   :  { %v7208_v55 = vpop.xlane.xlu0 %7207 }
0x1c32   :  { %v7242_v0 = vsub.f32 %v15405_v7, %v7208_v55 }
0x1c33   :  { %v7211_v20 = vpop.xlane.xlu1 %7210 }
0x1c34   :  { %v7264_v34 = vmul.f32 1.442695, %v7242_v0  ;;  %v7243_v52 = vsub.f32 %v15409_v63, %v7211_v20 }
0x1c35   :  { %v7202_v13 = vpop.xlane.xlu0 %7201 }
0x1c36   :  { %12104 = vpow2.f32 %v7264_v34  ;;  %v7266_v59 = vmul.f32 1.442695, %v7243_v52  ;;  %v7240_v38 = vsub.f32 %v15407_v26, %v7202_v13 }
0x1c37   :  { %v7205_v60 = vpop.xlane.xlu1 %7204 }
0x1c38   :  { %12106 = vpow2.f32 %v7266_v59  ;;  %v7260_v41 = vmul.f32 1.442695, %v7240_v38  ;;  %v7241_v37 = vsub.f32 %v15413_v25, %v7205_v60 }
0x1c39   :  { %v7220_v27 = vpop.xlane.xlu0 %7219 }
0x1c3a   :  { %12108 = vpow2.f32 %v7260_v41  ;;  %v7262_v21 = vmul.f32 1.442695, %v7241_v37  ;;  %v7246_v15 = vsub.f32 %v15419_v3, %v7220_v27 }
0x1c3b   :  { %v7223_v7 = vpop.xlane.xlu1 %7222 }
0x1c3c   :  { %12110 = vpow2.f32 %v7262_v21  ;;  %v7272_v55 = vmul.f32 1.442695, %v7246_v15  ;;  %v7247_v63 = vsub.f32 %v15425_v48, %v7223_v7 }
0x1c3d   :  { %v7214_v0 = vpop.xlane.xlu0 %7213 }
0x1c3e   :  { %12112 = vpow2.f32 %v7272_v55  ;;  %v7244_v20 = vsub.f32 %v15423_v18, %v7214_v0  ;;  %v7274_v13 = vmul.f32 1.442695, %v7247_v63 }
0x1c3f   :  { %v7217_v26 = vpop.xlane.xlu1 %7216 }
0x1c40   :  { %v15504_v34 = vpop.eup %12104  ;;  %v7268_v52 = vmul.f32 1.442695, %v7244_v20  ;;  %v7245_v60 = vsub.f32 %v15429_v62, %v7217_v26 }
0x1c41   :  { %v7232_v41 = vpop.xlane.xlu0 %7231  ;;  %v7302_v27 = vsel %vm1709_vm2, %v15504_v34, 0.0 }
0x1c42   :  { %v15509_v25 = vpop.eup %12106  ;;  %12114 = vpow2.f32 %v7268_v52  ;;  %v7250_v3 = vsub.f32 %v15435_v6, %v7232_v41  ;;  %7303 = vadd.xlane.f32.xlu0 %v7302_v27  ;;  %v7270_v62 = vmul.f32 1.442695, %v7245_v60 }
0x1c43   :  { %v7462_v48 = vpop.permute.xlu1 %7461  ;;  %v7305_v18 = vsel %vm1709_vm2, %v15509_v25, 0.0  ;;  %12116 = vpow2.f32 %v7274_v13 }
0x1c44   :  { %v15514_v15 = vpop.eup %12108  ;;  %v7280_v59 = vmul.f32 1.442695, %v7250_v3  ;;  %11092 = vmatprep.subr.bf16.mxu0 %v7462_v48  ;;  %7306 = vadd.xlane.f32.xlu1 %v7305_v18  ;;  %v6863_v3 = vsel %vm2700_vm3, %v15459_v58, 0 }
0x1c45   :  { %11093 = vmatpush3.bf16.msra.mxu0 %v7462_v48  ;;  %v7226_v38 = vpop.xlane.xlu0 %7225  ;;  %v7296_v37 = vsel %vm1709_vm2, %v15514_v15, 0.0 }
0x1c46   :  { %v15518_v21 = vpop.eup %12110  ;;  %12118 = vpow2.f32 %v7280_v59  ;;  %v7248_v6 = vsub.f32 %v15439_v53, %v7226_v38  ;;  %7297 = vadd.xlane.f32.xlu0 %v7296_v37 }
0x1c47   :  { %v7299_v7 = vsel %vm1709_vm2, %v15518_v21, 0.0  ;;  %12120 = vpow2.f32 %v7270_v62 }
0x1c48   :  { %v15523_v55 = vpop.eup %12112  ;;  %v7276_v63 = vmul.f32 1.442695, %v7248_v6  ;;  %7300 = vadd.xlane.f32.xlu1 %v7299_v7 }
0x1c49   :  { %v10986_v0 = vpop.f32.mrb[192].mxu1  ;;  %v7314_v26 = vsel %vm1709_vm2, %v15523_v55, 0.0 }
0x1c4a   :  { %12122 = vpow2.f32 %v7276_v63  ;;  %v6586_v20 = vpop.f32.mrb[193].mxu1 }
0x1c4b   :  { %v10987_v13 = vpop.f32.mrb[194].mxu1 }
0x1c4c   :  { %v15527_v52 = vpop.eup %12114  ;;  %7315 = vadd.xlane.f32.xlu1 %v7314_v26  ;;  %v6707_v53 = vpack.c.bf16 %v10987_v13, %v10986_v0  ;;  %v6589_v60 = vpop.f32.mrb[195].mxu1 }
0x1c4d   :  { %v6706_v41 = vpack.c.bf16 %v6589_v60, %v6586_v20  ;;  %v15529_v27 = vpop.eup %12116  ;;  %v7308_v48 = vsel %vm1709_vm2, %v15527_v52, 0.0  ;;  %v16592_v60 = vpack.c.bf16 %v15357_v4, %v15353_v28  ;;  %v16596_v28 = vpack.c.bf16 %v15178_v49, %v15174_v19 }
0x1c4e   :  { %v7317_v37 = vsel %vm1709_vm2, %v15529_v27, 0.0  ;;  %v16597_v4 = vpack.c.bf16 %v15198_v51, %v15192_v11  ;;  %v7379_v11 = vpop.permute.xlu0 %7378 }
0x1c4f   :  { %11010 = vmatprep.mubr.msk.bf16.mxu1 %vm1502_vm1, %v6706_v41  ;;  %v16593_v41 = vpack.c.bf16 %v15373_v16, %v15367_v36 }
0x1c50   :  { %v15535_v18 = vpop.eup %12118  ;;  %7309 = vadd.xlane.f32.xlu1 %v7308_v48  ;;  %11011 = vmatmul.mubr.msk.bf16.vlgmr.msra.gmra.mrb[200].mxu1 %vm1502_vm1, %v6707_v53  ;;  %v16591_v53 = vpack.c.bf16 %v15361_v5, %v15355_v31  ;;  %v16595_v31 = vpack.c.bf16 %v15182_v44, %v15176_v45  ;;  %v16598_v44 = vpack.c.bf16 %v15194_v39, %v15190_v24 }
0x1c51   :  { %v7326_v59 = vsel %vm1709_vm2, %v15535_v18, 0.0  ;;  %11027 = vmatpush3.bf16.msra.mxu1 %v6863_v3  ;;  %v10990_v62 = vpop.f32.mrb[196].mxu1  ;;  %v15541_v38 = vpop.eup %12120  ;;  %v16594_v3 = vpack.c.bf16 %v15369_v54, %v15365_v40  ;;  %v16601_v24 = vpack.c.bf16 %v15065_v33, %v15059_v12 }
0x1c52   :  { %7327 = vadd.xlane.f32.xlu0 %v7326_v59  ;;  %11076 = vmatprep.subr.bf16.mxu1 %v15454_v46  ;;  %v6602_v58 = vpop.f32.mrb[197].mxu1  ;;  %v7311_v13 = vsel %vm1709_vm2, %v15541_v38, 0.0 }
0x1c53   :  { %v10991_v7 = vpop.f32.mrb[198].mxu1 }
0x1c54   :  { %v15546_v6 = vpop.eup %12122  ;;  %7318 = vadd.xlane.f32.xlu1 %v7317_v37  ;;  %v6709_v63 = vpack.c.bf16 %v10991_v7, %v10990_v62  ;;  %v6605_v0 = vpop.f32.mrb[199].mxu1  ;;  %v16604_v62 = vld [vmem:[#allocation19_spill] sm:$0xff]  ;;  %v16605_v37 = vld [vmem:[#allocation17_spill] sm:$0xff] }
0x1c55   :  { %v7320_v20 = vsel %vm1709_vm2, %v15546_v6, 0.0  ;;  %v6708_v26 = vpack.c.bf16 %v6605_v0, %v6602_v58 }
0x1c56   :  { %7321 = vadd.xlane.f32.xlu0 %v7320_v20 }
0x1c57   :  { %11014 = vmatprep.mubr.msk.bf16.mxu1 %vm1502_vm1, %v6708_v26 }
0x1c58   :  { %7312 = vadd.xlane.f32.xlu1 %v7311_v13  ;;  %11015 = vmatmul.mubr.msk.bf16.gmra.mrb[204].mxu1 %vm1502_vm1, %v6709_v63 }
0x1c59   :  { %11018 = vmatprep.mubr.msk.bf16.mxu1 %vm1502_vm1, %v16591_v53 }
0x1c60   :  { %11019 = vmatmul.mubr.msk.bf16.gmra.mrb[208].mxu1 %vm1502_vm1, %v16592_v60 }
0x1c61   :  { %11022 = vmatprep.mubr.msk.bf16.mxu1 %vm1502_vm1, %v16593_v41 }
0x1c68   :  { %11023 = vmatmul.mubr.msk.bf16.gmra.mrb[212].mxu1 %vm1502_vm1, %v16594_v3 }
0x1c69   :  { %11028 = vmatprep.mubr.msk.bf16.mxu1 %vm1502_vm1, %v16595_v31 }
0x1c70   :  { %11029 = vmatmul.mubr.msk.bf16.vlgmr.msra.gmra.mrb[200].mxu1 %vm1502_vm1, %v16596_v28 }
0x1c71   :  { %11077 = vmatpush3.bf16.msra.mxu1 %v15454_v46  ;;  %11032 = vmatprep.mubr.msk.bf16.mxu1 %vm1502_vm1, %v16597_v4 }
0x1c72   :  { %11078 = vmatprep.subr.bf16.mxu1 %v15485_v42 }
0x1c74   :  { %v7235_v5 = vpop.xlane.xlu1 %7234 }
0x1c75   :  { %v7251_v40 = vsub.f32 %v15467_v9, %v7235_v5  ;;  %11079 = vmatpush3.bf16.msra.mxu1 %v15485_v42  ;;  %v16599_v9 = vpack.c.bf16 %v15040_v43, %v15034_v22 }
0x1c76   :  { %11080 = vmatprep.subr.bf16.mxu1 %v15463_v29 }
0x1c77   :  { %v7282_v45 = vmul.f32 1.442695, %v7251_v40 }
0x1c78   :  { %v7229_v19 = vpop.xlane.xlu1 %7228  ;;  %11033 = vmatmul.mubr.msk.bf16.gmra.mrb[204].mxu1 %vm1502_vm1, %v16598_v44 }
0x1c79   :  { %12124 = vpow2.f32 %v7282_v45  ;;  %v7249_v49 = vsub.f32 %v15469_v57, %v7229_v19  ;;  %11081 = vmatpush3.bf16.msra.mxu1 %v15463_v29  ;;  %11036 = vmatprep.mubr.msk.bf16.mxu1 %vm1502_vm1, %v16599_v9  ;;  %v16600_v57 = vpack.c.bf16 %v15036_v56, %v15030_v1  ;;  %v16602_v1 = vpack.c.bf16 %v15061_v17, %v15057_v61  ;;  %v9736_v56 = vld [vmem:[%s16468_s8 + $0x18] sm:$0xf] }
0x1c7a   :  { %11082 = vmatprep.subr.bf16.mxu1 %v7379_v11  ;;  %v7292_v61 = vpop.xlane.xlu0 %7291  ;;  %v7583_v20 = vsel %vm2700_vm3, %v9736_v56, 0 }
0x1c7b   :  { %v7278_v51 = vmul.f32 1.442695, %v7249_v49 }
0x1c7c   :  { %v7464_v36 = vpop.permute.xlu1 %7463 }
0x1c7d   :  { %12126 = vpow2.f32 %v7278_v51  ;;  %11094 = vmatprep.subr.bf16.mxu0 %v7464_v36  ;;  %11083 = vmatpush3.bf16.msra.mxu1 %v7379_v11 }
0x1c7e   :  { %11095 = vmatpush3.bf16.msra.mxu0 %v7464_v36  ;;  %11426 = vmatprep.subr.msk.bf16.mxu1 %vm2700_vm3, %v9736_v56  ;;  %v7286_v12 = vpop.xlane.xlu0 %7285 }
0x1c80   :  { %11037 = vmatmul.mubr.msk.bf16.gmra.mrb[208].mxu1 %vm1502_vm1, %v16600_v57 }
0x1c81   :  { %11040 = vmatprep.mubr.msk.bf16.mxu1 %vm1502_vm1, %v16601_v24 }
0x1c83   :  { %v15605_v22 = vpop.eup %12124 }
0x1c84   :  { %v7329_v43 = vsel %vm1709_vm2, %v15605_v22, 0.0 }
0x1c85   :  { %7330 = vadd.xlane.f32.xlu0 %v7329_v43 }
0x1c87   :  { %v15609_v39 = vpop.eup %12126 }
0x1c88   :  { %v7323_v54 = vsel %vm1709_vm2, %v15609_v39, 0.0  ;;  %11041 = vmatmul.mubr.msk.bf16.gmra.mrb[212].mxu1 %vm1502_vm1, %v16602_v1 }
0x1c89   :  { %7324 = vadd.xlane.f32.xlu1 %v7323_v54 }
0x1c9a   :  { %7467 = vrot.lane.b32.xlu1 %v14762_v47, %s12327_s0 }
0x1c9b   :  { %7465 = vrot.lane.b32.xlu0 %v14764_v30, %s12327_s0 }
0x1c9e   :  { %7708 = vrot.lane.b32.xlu1 %v14740_v2, %s12328_s24 }
0x1c9f   :  { %7706 = vrot.lane.b32.xlu0 %v14742_v35, %s12328_s24 }
0x1ca2   :  { %7811 = vrot.lane.b32.xlu1 %v14752_v10, %s12328_s24 }
0x1ca3   :  { %7710 = vrot.lane.b32.xlu0 %v14748_v23, %s12328_s24 }
0x1ca6   :  { %7813 = vrot.lane.b32.xlu1 %v14750_v50, %s12328_s24 }
0x1ca7   :  { %7712 = vrot.lane.b32.xlu0 %v14746_v32, %s12328_s24 }
0x1caa   :  { %7700 = vrot.lane.b32.xlu1 %v14740_v2, %s16603_s19 }
0x1cab   :  { %7698 = vrot.lane.b32.xlu0 %v14742_v35, %s16603_s19 }
0x1cad   :  { %v7295_v17 = vpop.xlane.xlu1 %7294 }
0x1cae   :  { %7702 = vrot.lane.b32.xlu1 %v14748_v23, %s16603_s19  ;;  %12128 = vrcp.f32 %v7295_v17 }
0x1caf   :  { %7815 = vrot.lane.b32.xlu0 %v14764_v30, %s12328_s24  ;;  %12130 = vrcp.f32 %v7286_v12 }
0x1cb0   :  { %12132 = vrcp.f32 %v7292_v61 }
0x1cb1   :  { %v7289_v33 = vpop.xlane.xlu1 %7288 }
0x1cb2   :  { %12134 = vrcp.f32 %v7289_v33  ;;  %7817 = vrot.lane.b32.xlu1 %v14762_v47, %s12328_s24 }
0x1cb3   :  { %7704 = vrot.lane.b32.xlu0 %v14746_v32, %s16603_s19 }
0x1cb6   :  { %7805 = vrot.lane.b32.xlu1 %v14750_v50, %s16603_s19 }
0x1cb7   :  { %7803 = vrot.lane.b32.xlu0 %v14752_v10, %s16603_s19 }
0x1cb8   :  { %v12129_v16 = vpop.eup %12128 }
0x1cb9   :  { %v12131_v46 = vpop.eup %12130  ;;  %v7351_v48 = vmul.f32 %v12129_v16, %v15489_v8 }
0x1cba   :  { %7809 = vrot.lane.b32.xlu1 %v14762_v47, %s16603_s19  ;;  %v12133_v29 = vpop.eup %12132  ;;  %v7348_v59 = vmul.f32 %v12131_v46, %v15479_v14 }
0x1cbb   :  { %7807 = vrot.lane.b32.xlu0 %v14764_v30, %s16603_s19  ;;  %v7350_v7 = vmul.f32 %v12133_v29, %v16605_v37 }
0x1cbc   :  { %v12135_v42 = vpop.eup %12134 }
0x1cbd   :  { %v7349_v58 = vmul.f32 %v12135_v42, %v16604_v62  ;;  %v7365_v0 = vpack.c.bf16 %v7351_v48, %v7350_v7 }
0x1cbf   :  { %v7364_v63 = vpack.c.bf16 %v7349_v58, %v7348_v59 }
0x1cc1   :  { %11084 = vmatprep.mubr.msk.bf16.mxu1 %vm1709_vm2, %v7364_v63 }
0x1cc2   :  { %11085 = vmatmul.mubr.msk.bf16.vlgmr.msra.gmra.mrb[216].mxu1 %vm1709_vm2, %v7365_v0 }
0x1cc3   :  { %11109 = vmatpush3.bf16.msra.mxu1 %v7583_v20 }
0x1ccf   :  { %v7304_v26 = vpop.xlane.xlu0 %7303 }
0x1cd1   :  { %v7307_v13 = vpop.xlane.xlu1 %7306 }
0x1cd2   :  { %12136 = vrcp.f32 %v7307_v13 }
0x1cd3   :  { %v7298_v53 = vpop.xlane.xlu0 %7297 }
0x1cd4   :  { %12138 = vrcp.f32 %v7298_v53 }
0x1cd5   :  { %12140 = vrcp.f32 %v7304_v26  ;;  %v7301_v14 = vpop.xlane.xlu1 %7300 }
0x1cd6   :  { %12142 = vrcp.f32 %v7301_v14 }
0x1cd9   :  { %v7316_v8 = vpop.xlane.xlu1 %7315 }
0x1cdc   :  { %v12137_v60 = vpop.eup %12136 }
0x1cdd   :  { %v7310_v41 = vpop.xlane.xlu1 %7309  ;;  %v7355_v4 = vmul.f32 %v12137_v60, %v15509_v25 }
0x1cde   :  { %v12139_v3 = vpop.eup %12138  ;;  %12144 = vrcp.f32 %v7310_v41 }
0x1cdf   :  { %v12141_v31 = vpop.eup %12140  ;;  %v7352_v40 = vmul.f32 %v12139_v3, %v15514_v15 }
0x1ce0   :  { %v12143_v28 = vpop.eup %12142  ;;  %v7354_v19 = vmul.f32 %v12141_v31, %v15504_v34 }
0x1ce1   :  { %v7319_v5 = vpop.xlane.xlu1 %7318  ;;  %v7353_v45 = vmul.f32 %v12143_v28, %v15518_v21  ;;  %v7328_v21 = vpop.xlane.xlu0 %7327 }
0x1ce2   :  { %v7367_v44 = vpack.c.bf16 %v7355_v4, %v7354_v19 }
0x1ce3   :  { %v7366_v49 = vpack.c.bf16 %v7353_v45, %v7352_v40 }
0x1ce5   :  { %v7313_v11 = vpop.xlane.xlu1 %7312  ;;  %11088 = vmatprep.mubr.msk.bf16.mxu1 %vm1709_vm2, %v7366_v49  ;;  %v7322_v34 = vpop.xlane.xlu0 %7321 }
0x1ce6   :  { %12146 = vrcp.f32 %v7313_v11  ;;  %11089 = vmatmul.mubr.msk.bf16.gmra.mrb[220].mxu1 %vm1709_vm2, %v7367_v44 }
0x1ce7   :  { %12148 = vrcp.f32 %v7319_v5 }
0x1ce8   :  { %v12145_v9 = vpop.eup %12144  ;;  %12150 = vrcp.f32 %v7316_v8 }
0x1ce9   :  { %v7356_v25 = vmul.f32 %v12145_v9, %v15527_v52 }
0x1cf0   :  { %v12147_v51 = vpop.eup %12146 }
0x1cf1   :  { %v7357_v36 = vmul.f32 %v12147_v51, %v15541_v38  ;;  %v12149_v24 = vpop.eup %12148 }
0x1cf2   :  { %v12151_v1 = vpop.eup %12150  ;;  %v7359_v52 = vmul.f32 %v12149_v24, %v15529_v27 }
0x1cf3   :  { %v7368_v15 = vpack.c.bf16 %v7357_v36, %v7356_v25  ;;  %v7358_v61 = vmul.f32 %v12151_v1, %v15523_v55 }
0x1cf5   :  { %11100 = vmatprep.mubr.msk.bf16.mxu0 %vm1709_vm2, %v7368_v15  ;;  %v7369_v12 = vpack.c.bf16 %v7359_v52, %v7358_v61 }
0x1d12   :  { %v7331_v57 = vpop.xlane.xlu0 %7330 }
0x1d13   :  { %12152 = vrcp.f32 %v7331_v57 }
0x1d14   :  { %12154 = vrcp.f32 %v7322_v34 }
0x1d15   :  { %12156 = vrcp.f32 %v7328_v21 }
0x1d16   :  { %v7325_v43 = vpop.xlane.xlu1 %7324  ;;  %v7466_v54 = vpop.permute.xlu0 %7465 }
0x1d17   :  { %12158 = vrcp.f32 %v7325_v43  ;;  %11096 = vmatprep.subr.bf16.mxu0 %v7466_v54 }
0x1d18   :  { %11097 = vmatpush3.bf16.msra.mxu0 %v7466_v54 }
0x1d1a   :  { %v7468_v38 = vpop.permute.xlu1 %7467  ;;  %v7707_v56 = vpop.permute.xlu0 %7706 }
0x1d1b   :  { %11098 = vmatprep.subr.bf16.mxu0 %v7468_v38  ;;  %v7727_v37 = vsel %vm1502_vm1, %v7707_v56, 0 }
0x1d1c   :  { %11099 = vmatpush3.bf16.msra.mxu0 %v7468_v38 }
0x1d1d   :  { %11427 = vmatprep.subr.msk.bf16.mxu0 %vm1502_vm1, %v7707_v56  ;;  %v12153_v17 = vpop.eup %12152 }
0x1d1e   :  { %v7709_v33 = vpop.permute.xlu1 %7708  ;;  %v7711_v16 = vpop.permute.xlu0 %7710  ;;  %v7363_v48 = vmul.f32 %v12153_v17, %v15605_v22 }
0x1d1f   :  { %v12155_v46 = vpop.eup %12154  ;;  %11101 = vmatmul.mubr.msk.bf16.vlgmr.msra.gmra.mrb[184].mxu0 %vm1709_vm2, %v7369_v12 }
0x1d20   :  { %v12157_v29 = vpop.eup %12156  ;;  %v7360_v62 = vmul.f32 %v12155_v46, %v15546_v6  ;;  %v7730_v6 = vsel %vm1502_vm1, %v7709_v33, 0 }
0x1d21   :  { %v12159_v42 = vpop.eup %12158  ;;  %v7362_v58 = vmul.f32 %v12157_v29, %v15535_v18  ;;  %v7733_v18 = vsel %vm1502_vm1, %v7711_v16, 0 }
0x1d22   :  { %v7812_v27 = vpop.permute.xlu1 %7811  ;;  %v7713_v59 = vpop.permute.xlu0 %7712  ;;  %v7361_v55 = vmul.f32 %v12159_v42, %v15609_v39 }
0x1d23   :  { %11431 = vmatprep.subr.msk.bf16.mxu1 %vm1502_vm1, %v7812_v27  ;;  %v7371_v63 = vpack.c.bf16 %v7363_v48, %v7362_v58  ;;  %v7736_v0 = vsel %vm1502_vm1, %v7713_v59, 0  ;;  %v7832_v28 = vsel %vm1502_vm1, %v7812_v27, 0 }
0x1d24   :  { %v7370_v7 = vpack.c.bf16 %v7361_v55, %v7360_v62 }
0x1d25   :  { %11127 = vmatpush3.bf16.xpose.msra.mxu0 %v7727_v37 }
0x1d26   :  { %11104 = vmatprep.mubr.msk.bf16.mxu0 %vm1709_vm2, %v7370_v7  ;;  %11428 = vmatprep.subr.msk.bf16.mxu0 %vm1502_vm1, %v7709_v33  ;;  %v7699_v22 = vpop.permute.xlu0 %7698  ;;  %v7814_v39 = vpop.permute.xlu1 %7813 }
0x1d27   :  { %11105 = vmatmul.mubr.msk.bf16.gmra.mrb[188].mxu0 %vm1709_vm2, %v7371_v63  ;;  %v7835_v4 = vsel %vm1502_vm1, %v7814_v39, 0 }
0x1d28   :  { %11134 = vmatprep.mubr.msk.bf16.mxu0 %vm1502_vm1, %v7699_v22 }
0x1d2a   :  { %v7701_v20 = vpop.permute.xlu1 %7700  ;;  %v7816_v13 = vpop.permute.xlu0 %7815 }
0x1d2b   :  { %v7838_v5 = vsel %vm1502_vm1, %v7816_v13, 0 }
0x1d2d   :  { %11129 = vmatpush3.bf16.xpose.msra.mxu0 %v7730_v6 }
0x1d2e   :  { %11429 = vmatprep.subr.msk.bf16.mxu0 %vm1502_vm1, %v7711_v16  ;;  %v7703_v26 = vpop.permute.xlu1 %7702  ;;  %v7705_v53 = vpop.permute.xlu0 %7704 }
0x1d32   :  { %v7818_v40 = vpop.permute.xlu1 %7817  ;;  %v7804_v56 = vpop.permute.xlu0 %7803 }
0x1d33   :  { %v7841_v45 = vsel %vm1502_vm1, %v7818_v40, 0 }
0x1d35   :  { %11131 = vmatpush3.bf16.xpose.msra.mxu0 %v7733_v18 }
0x1d36   :  { %11430 = vmatprep.subr.msk.bf16.mxu0 %vm1502_vm1, %v7713_v59  ;;  %v7806_v61 = vpop.permute.xlu1 %7805  ;;  %v7808_v12 = vpop.permute.xlu0 %7807 }
0x1d3a   :  { %v7810_v17 = vpop.permute.xlu1 %7809 }
0x1d3d   :  { %11133 = vmatpush3.bf16.xpose.msra.mxu0 %v7736_v0 }
0x1d44   :  { %11135 = vmatmul.mubr.msk.bf16.vlgmr.msra.gmra.mrb[192].mxu0 %vm1502_vm1, %v7701_v20 }
0x1d45   :  { %11138 = vmatprep.mubr.msk.bf16.mxu0 %vm1502_vm1, %v7703_v26 }
0x1d4c   :  { %11139 = vmatmul.mubr.msk.bf16.gmra.mrb[196].mxu0 %vm1502_vm1, %v7705_v53 }
0x1d95   :  { %v11086_v14 = vpop.f32.mrb[216].mxu1 }
0x1d96   :  { %v7430_v8 = vpop.f32.mrb[217].mxu1 }
0x1d97   :  { %v11087_v60 = vpop.f32.mrb[218].mxu1 }
0x1d98   :  { %v7551_v41 = vpack.c.bf16 %v11087_v60, %v11086_v14  ;;  %v7433_v3 = vpop.f32.mrb[219].mxu1 }
0x1d99   :  { %v7550_v31 = vpack.c.bf16 %v7433_v3, %v7430_v8 }
0x1d9b   :  { %11110 = vmatprep.mubr.msk.bf16.mxu1 %vm1502_vm1, %v7550_v31 }
0x1d9c   :  { %11111 = vmatmul.mubr.msk.bf16.vlgmr.msra.gmra.mrb[200].mxu1 %vm1502_vm1, %v7551_v41 }
0x1d9d   :  { %11143 = vmatpush3.bf16.xpose.msra.mxu1 %v7832_v28 }
0x1d9e   :  { %11432 = vmatprep.subr.msk.bf16.mxu1 %vm1502_vm1, %v7814_v39 }
0x1da5   :  { %11145 = vmatpush3.bf16.xpose.msra.mxu1 %v7835_v4 }
0x1da6   :  { %11433 = vmatprep.subr.msk.bf16.mxu1 %vm1502_vm1, %v7816_v13 }
0x1dad   :  { %11147 = vmatpush3.bf16.xpose.msra.mxu1 %v7838_v5 }
0x1dae   :  { %11434 = vmatprep.subr.msk.bf16.mxu1 %vm1502_vm1, %v7818_v40 }
0x1db5   :  { %11149 = vmatpush3.bf16.xpose.msra.mxu1 %v7841_v45 }
0x1db9   :  { %v11090_v19 = vpop.f32.mrb[220].mxu1 }
0x1dba   :  { %v7446_v49 = vpop.f32.mrb[221].mxu1 }
0x1dbb   :  { %v11091_v44 = vpop.f32.mrb[222].mxu1 }
0x1dbc   :  { %v7553_v11 = vpack.c.bf16 %v11091_v44, %v11090_v19  ;;  %v7449_v9 = vpop.f32.mrb[223].mxu1 }
0x1dbd   :  { %v7552_v51 = vpack.c.bf16 %v7449_v9, %v7446_v49 }
0x1dbf   :  { %11114 = vmatprep.mubr.msk.bf16.mxu1 %vm1502_vm1, %v7552_v51 }
0x1dc0   :  { %11115 = vmatmul.mubr.msk.bf16.gmra.mrb[204].mxu1 %vm1502_vm1, %v7553_v11 }
0x1df2   :  { %v11102_v25 = vpop.f32.mrb[184].mxu0 }
0x1df3   :  { %v7519_v36 = vpop.f32.mrb[185].mxu0 }
0x1df4   :  { %v11103_v15 = vpop.f32.mrb[186].mxu0 }
0x1df5   :  { %v7555_v21 = vpack.c.bf16 %v11103_v15, %v11102_v25  ;;  %v7522_v34 = vpop.f32.mrb[187].mxu0 }
0x1df6   :  { %v7554_v57 = vpack.c.bf16 %v7522_v34, %v7519_v36 }
0x1df8   :  { %11118 = vmatprep.mubr.msk.bf16.mxu1 %vm1502_vm1, %v7554_v57 }
0x1df9   :  { %11119 = vmatmul.mubr.msk.bf16.gmra.mrb[208].mxu1 %vm1502_vm1, %v7555_v21 }
0x1dfa   :  { %v11106_v24 = vpop.f32.mrb[188].mxu0 }
0x1dfb   :  { %v7535_v43 = vpop.f32.mrb[189].mxu0 }
0x1dfc   :  { %v11107_v54 = vpop.f32.mrb[190].mxu0 }
0x1dfd   :  { %v7557_v1 = vpack.c.bf16 %v11107_v54, %v11106_v24  ;;  %v7538_v52 = vpop.f32.mrb[191].mxu0 }
0x1dfe   :  { %v7556_v38 = vpack.c.bf16 %v7538_v52, %v7535_v43 }
0x1e00   :  { %11122 = vmatprep.mubr.msk.bf16.mxu1 %vm1502_vm1, %v7556_v38 }
0x1e01   :  { %11123 = vmatmul.mubr.msk.bf16.gmra.mrb[212].mxu1 %vm1502_vm1, %v7557_v1 }
0x1e02   :  { %11150 = vmatprep.mubr.msk.bf16.mxu1 %vm1502_vm1, %v7804_v56 }
0x1e09   :  { %11151 = vmatmul.mubr.msk.bf16.vlgmr.msra.gmra.mrb[224].mxu1 %vm1502_vm1, %v7806_v61 }
0x1e0a   :  { %11154 = vmatprep.mubr.msk.bf16.mxu1 %vm1502_vm1, %v7808_v12 }
0x1e11   :  { %11155 = vmatmul.mubr.msk.bf16.gmra.mrb[228].mxu1 %vm1502_vm1, %v7810_v17 }
0x1e17   :  { %v11136_v33 = vpop.f32.mrb[192].mxu0 }
0x1e18   :  { %v7910_v16 = vmul.f32 0.35355338, %v11136_v33  ;;  %v7772_v46 = vpop.f32.mrb[193].mxu0 }
0x1e19   :  { %v11137_v29 = vpop.f32.mrb[194].mxu0  ;;  %v7908_v42 = vmul.f32 0.35355338, %v7772_v46 }
0x1e1a   :  { %v7775_v48 = vpop.f32.mrb[195].mxu0  ;;  %v7930_v27 = vsel %vm1709_vm2, %v7910_v16, -inf  ;;  %v7911_v55 = vmul.f32 0.35355338, %v11137_v29 }
0x1e1b   :  { %v7909_v59 = vmul.f32 0.35355338, %v7775_v48  ;;  %7931 = vmax.xlane.f32.xlu0 %v7930_v27  ;;  %v7924_v58 = vsel %vm1709_vm2, %v7908_v42, -inf }
0x1e1c   :  { %v7933_v39 = vsel %vm1709_vm2, %v7911_v55, -inf }
0x1e1d   :  { %v7927_v62 = vsel %vm1709_vm2, %v7909_v59, -inf }
0x1e1e   :  { %7928 = vmax.xlane.f32.xlu1 %v7927_v62 }
0x1e1f   :  { %7925 = vmax.xlane.f32.xlu0 %v7924_v58  ;;  %v11140_v37 = vpop.f32.mrb[196].mxu0 }
0x1e20   :  { %v7788_v7 = vpop.f32.mrb[197].mxu0  ;;  %v15717_v22 = vmul.f32 0.35355338, %v11140_v37 }
0x1e21   :  { %v11141_v63 = vpop.f32.mrb[198].mxu0  ;;  %v7912_v26 = vmul.f32 0.35355338, %v7788_v7 }
0x1e22   :  { %v7915_v6 = vmul.f32 0.35355338, %v11141_v63  ;;  %v7791_v18 = vpop.f32.mrb[199].mxu0  ;;  %v7942_v13 = vsel %vm1709_vm2, %v15717_v22, -inf }
0x1e23   :  { %7934 = vmax.xlane.f32.xlu0 %v7933_v39  ;;  %v7913_v0 = vmul.f32 0.35355338, %v7791_v18  ;;  %v7936_v14 = vsel %vm1709_vm2, %v7912_v26, -inf }
0x1e24   :  { %v7945_v20 = vsel %vm1709_vm2, %v7915_v6, -inf }
0x1e25   :  { %7946 = vmax.xlane.f32.xlu1 %v7945_v20  ;;  %v7939_v53 = vsel %vm1709_vm2, %v7913_v0, -inf }
0x1e27   :  { %7943 = vmax.xlane.f32.xlu0 %v7942_v13 }
0x1e29   :  { %7940 = vmax.xlane.f32.xlu1 %v7939_v53 }
0x1e2b   :  { %7937 = vmax.xlane.f32.xlu0 %v7936_v14 }
0x1ea8   :  { %v7932_v8 = vpop.xlane.xlu0 %7931 }
0x1ea9   :  { %v7974_v60 = vsub.f32 %v7910_v16, %v7932_v8 }
0x1eab   :  { %v7992_v41 = vmul.f32 1.442695, %v7974_v60  ;;  %v7929_v3 = vpop.xlane.xlu1 %7928 }
0x1eac   :  { %v7926_v31 = vpop.xlane.xlu0 %7925  ;;  %v7973_v4 = vsub.f32 %v7909_v59, %v7929_v3 }
0x1ead   :  { %12160 = vpow2.f32 %v7992_v41  ;;  %v7972_v28 = vsub.f32 %v7908_v42, %v7926_v31 }
0x1eae   :  { %v7990_v49 = vmul.f32 1.442695, %v7973_v4 }
0x1eaf   :  { %v7988_v5 = vmul.f32 1.442695, %v7972_v28 }
0x1eb0   :  { %v7935_v40 = vpop.xlane.xlu0 %7934 }
0x1eb1   :  { %12162 = vpow2.f32 %v7988_v5  ;;  %v7975_v45 = vsub.f32 %v7911_v55, %v7935_v40 }
0x1eb2   :  { %v7947_v19 = vpop.xlane.xlu1 %7946 }
0x1eb3   :  { %v7994_v44 = vmul.f32 1.442695, %v7975_v45  ;;  %v7979_v33 = vsub.f32 %v7915_v6, %v7947_v19 }
0x1eb4   :  { %v7944_v11 = vpop.xlane.xlu0 %7943 }
0x1eb5   :  { %12164 = vpow2.f32 %v7994_v44  ;;  %v8002_v16 = vmul.f32 1.442695, %v7979_v33  ;;  %v7978_v46 = vsub.f32 %v15717_v22, %v7944_v11 }
0x1eb6   :  { %v7941_v9 = vpop.xlane.xlu1 %7940  ;;  %12166 = vpow2.f32 %v7990_v49 }
0x1eb7   :  { %v15725_v51 = vpop.eup %12160  ;;  %v7977_v25 = vsub.f32 %v7913_v0, %v7941_v9  ;;  %v8000_v27 = vmul.f32 1.442695, %v7978_v46 }
0x1eb8   :  { %v7938_v36 = vpop.xlane.xlu0 %7937  ;;  %v8026_v15 = vsel %vm1709_vm2, %v15725_v51, 0.0 }
0x1eb9   :  { %v7998_v21 = vmul.f32 1.442695, %v7977_v25  ;;  %v7976_v34 = vsub.f32 %v7912_v26, %v7938_v36  ;;  %8027 = vadd.xlane.f32.xlu0 %v8026_v15 }
0x1ebb   :  { %v15729_v57 = vpop.eup %12162  ;;  %12168 = vpow2.f32 %v7998_v21  ;;  %v7996_v24 = vmul.f32 1.442695, %v7976_v34 }
0x1ebc   :  { %v8020_v43 = vsel %vm1709_vm2, %v15729_v57, 0.0 }
0x1ebd   :  { %12170 = vpow2.f32 %v7996_v24  ;;  %8021 = vadd.xlane.f32.xlu0 %v8020_v43 }
0x1ebe   :  { %12172 = vpow2.f32 %v8002_v16 }
0x1ebf   :  { %v15733_v54 = vpop.eup %12164  ;;  %12174 = vpow2.f32 %v8000_v27 }
0x1ec0   :  { %v8029_v1 = vsel %vm1709_vm2, %v15733_v54, 0.0  ;;  %v15737_v52 = vpop.eup %12166 }
0x1ec1   :  { %8030 = vadd.xlane.f32.xlu1 %v8029_v1  ;;  %v8023_v38 = vsel %vm1709_vm2, %v15737_v52, 0.0 }
0x1ec5   :  { %v15741_v56 = vpop.eup %12168  ;;  %8024 = vadd.xlane.f32.xlu1 %v8023_v38 }
0x1ec6   :  { %v8035_v12 = vsel %vm1709_vm2, %v15741_v56, 0.0 }
0x1ec7   :  { %v15743_v61 = vpop.eup %12170 }
0x1ec8   :  { %v8032_v17 = vsel %vm1709_vm2, %v15743_v61, 0.0  ;;  %v15763_v20 = vpop.eup %12172 }
0x1ec9   :  { %8036 = vadd.xlane.f32.xlu1 %v8035_v12  ;;  %8033 = vadd.xlane.f32.xlu0 %v8032_v17  ;;  %v8041_v8 = vsel %vm1709_vm2, %v15763_v20, 0.0  ;;  %v15769_v41 = vpop.eup %12174 }
0x1eca   :  { %v8038_v3 = vsel %vm1709_vm2, %v15769_v41, 0.0 }
0x1edc   :  { %v11152_v29 = vpop.f32.mrb[224].mxu1 }
0x1edd   :  { %v7918_v42 = vmul.f32 0.35355338, %v11152_v29  ;;  %v7877_v48 = vpop.f32.mrb[225].mxu1 }
0x1ede   :  { %v11153_v59 = vpop.f32.mrb[226].mxu1  ;;  %v15750_v62 = vmul.f32 0.35355338, %v7877_v48 }
0x1edf   :  { %v15752_v55 = vmul.f32 0.35355338, %v11153_v59  ;;  %v7880_v58 = vpop.f32.mrb[227].mxu1  ;;  %v7954_v37 = vsel %vm1709_vm2, %v7918_v42, -inf }
0x1ee0   :  { %7955 = vmax.xlane.f32.xlu0 %v7954_v37  ;;  %v15755_v7 = vmul.f32 0.35355338, %v7880_v58  ;;  %v7948_v22 = vsel %vm1709_vm2, %v15750_v62, -inf }
0x1ee1   :  { %v7957_v63 = vsel %vm1709_vm2, %v15752_v55, -inf }
0x1ee2   :  { %7958 = vmax.xlane.f32.xlu1 %v7957_v63  ;;  %v7951_v0 = vsel %vm1709_vm2, %v15755_v7, -inf }
0x1ee4   :  { %v11156_v6 = vpop.f32.mrb[228].mxu1  ;;  %7949 = vmax.xlane.f32.xlu0 %v7948_v22 }
0x1ee5   :  { %v7922_v18 = vmul.f32 0.35355338, %v11156_v6  ;;  %v7893_v39 = vpop.f32.mrb[229].mxu1 }
0x1ee6   :  { %v11157_v26 = vpop.f32.mrb[230].mxu1  ;;  %7952 = vmax.xlane.f32.xlu1 %v7951_v0  ;;  %v7920_v13 = vmul.f32 0.35355338, %v7893_v39 }
0x1ee7   :  { %v7896_v53 = vpop.f32.mrb[231].mxu1  ;;  %v7966_v14 = vsel %vm1709_vm2, %v7922_v18, -inf  ;;  %v15781_v31 = vmul.f32 0.35355338, %v11157_v26 }
0x1ee8   :  { %7967 = vmax.xlane.f32.xlu0 %v7966_v14  ;;  %v7960_v60 = vsel %vm1709_vm2, %v7920_v13, -inf  ;;  %v15783_v28 = vmul.f32 0.35355338, %v7896_v53 }
0x1ee9   :  { %v7969_v4 = vsel %vm1709_vm2, %v15781_v31, -inf }
0x1eea   :  { %8042 = vadd.xlane.f32.xlu1 %v8041_v8 }
0x1eec   :  { %7961 = vmax.xlane.f32.xlu0 %v7960_v60 }
0x1ef0   :  { %8039 = vadd.xlane.f32.xlu0 %v8038_v3 }
0x1efb   :  { %8110 = vrot.lane.b32.xlu1 %v14740_v2, %s16606_s3  ;;  %v7963_v2 = vsel %vm1709_vm2, %v15783_v28, -inf }
0x1f06   :  { %8108 = vrot.lane.b32.xlu0 %v14742_v35, %s16606_s3 }
0x1f0a   :  { %8112 = vrot.lane.b32.xlu0 %v14748_v23, %s16606_s3 }
0x1f0e   :  { %8114 = vrot.lane.b32.xlu0 %v14746_v32, %s16606_s3 }
0x1f1f   :  { %7970 = vmax.xlane.f32.xlu1 %v7969_v4 }
0x1f23   :  { %7964 = vmax.xlane.f32.xlu1 %v7963_v2 }
0x1f34   :  { %8197 = vrot.lane.b32.xlu1 %v14752_v10, %s16606_s3 }
0x1f38   :  { %8199 = vrot.lane.b32.xlu1 %v14750_v50, %s16606_s3 }
0x1f46   :  { %v8028_v35 = vpop.xlane.xlu0 %8027 }
0x1f4a   :  { %v8022_v32 = vpop.xlane.xlu0 %8021 }
0x1f4b   :  { %12176 = vrcp.f32 %v8022_v32 }
0x1f4e   :  { %v8031_v23 = vpop.xlane.xlu1 %8030 }
0x1f52   :  { %v8025_v5 = vpop.xlane.xlu1 %8024 }
0x1f53   :  { %12178 = vrcp.f32 %v8025_v5 }
0x1f55   :  { %v12177_v40 = vpop.eup %12176 }
0x1f56   :  { %v8084_v19 = vmul.f32 %v12177_v40, %v15729_v57  ;;  %v8034_v11 = vpop.xlane.xlu0 %8033  ;;  %v8037_v10 = vpop.xlane.xlu1 %8036 }
0x1f5d   :  { %v12179_v45 = vpop.eup %12178 }
0x1f5e   :  { %v8085_v49 = vmul.f32 %v12179_v45, %v15737_v52 }
0x1f60   :  { %v8100_v44 = vpack.c.bf16 %v8085_v49, %v8084_v19 }
0x1f62   :  { %11166 = vmatprep.mubr.msk.bf16.mxu0 %vm1709_vm2, %v8100_v44 }
0x1f6d   :  { %v7956_v9 = vpop.xlane.xlu0 %7955 }
0x1f6e   :  { %v7982_v25 = vsub.f32 %v7918_v42, %v7956_v9 }
0x1f6f   :  { %v7959_v50 = vpop.xlane.xlu1 %7958 }
0x1f70   :  { %v8008_v36 = vmul.f32 1.442695, %v7982_v25  ;;  %v7983_v15 = vsub.f32 %v15752_v55, %v7959_v50 }
0x1f71   :  { %v7950_v21 = vpop.xlane.xlu0 %7949 }
0x1f72   :  { %12180 = vpow2.f32 %v8008_v36  ;;  %v7980_v34 = vsub.f32 %v15750_v62, %v7950_v21  ;;  %v8010_v43 = vmul.f32 1.442695, %v7983_v15 }
0x1f73   :  { %v7953_v24 = vpop.xlane.xlu1 %7952 }
0x1f74   :  { %v8004_v57 = vmul.f32 1.442695, %v7980_v34  ;;  %v7981_v1 = vsub.f32 %v15755_v7, %v7953_v24 }
0x1f75   :  { %v7968_v52 = vpop.xlane.xlu0 %7967 }
0x1f76   :  { %12182 = vpow2.f32 %v8004_v57  ;;  %v7986_v38 = vsub.f32 %v7922_v18, %v7968_v52  ;;  %v8006_v12 = vmul.f32 1.442695, %v7981_v1 }
0x1f77   :  { %12184 = vpow2.f32 %v8010_v43  ;;  %v8043_v42 = vpop.xlane.xlu1 %8042 }
0x1f78   :  { %v8016_v17 = vmul.f32 1.442695, %v7986_v38 }
0x1f79   :  { %v7962_v33 = vpop.xlane.xlu0 %7961 }
0x1f7a   :  { %12186 = vpow2.f32 %v8016_v17  ;;  %v7984_v16 = vsub.f32 %v7920_v13, %v7962_v33 }
0x1f7b   :  { %12188 = vpow2.f32 %v8006_v12  ;;  %v8111_v37 = vpop.permute.xlu1 %8110 }
0x1f7c   :  { %v15799_v46 = vpop.eup %12180  ;;  %v8012_v29 = vmul.f32 1.442695, %v7984_v16  ;;  %12190 = vrcp.f32 %v8031_v23 }
0x1f7d   :  { %v8040_v48 = vpop.xlane.xlu0 %8039  ;;  %v8050_v27 = vsel %vm1709_vm2, %v15799_v46, 0.0 }
0x1f7e   :  { %12192 = vpow2.f32 %v8012_v29  ;;  %8051 = vadd.xlane.f32.xlu1 %v8050_v27  ;;  %v9737_v29 = vld [vmem:[%s16468_s8 + $0x1c] sm:$0xf] }
0x1f7f   :  { %12194 = vrcp.f32 %v8037_v10  ;;  %v8319_v27 = vsel %vm2700_vm3, %v9737_v29, 0 }
0x1f80   :  { %v15803_v59 = vpop.eup %12182  ;;  %12196 = vrcp.f32 %v8034_v11 }
0x1f81   :  { %12198 = vrcp.f32 %v8028_v35  ;;  %v8109_v62 = vpop.permute.xlu0 %8108  ;;  %v8044_v55 = vsel %vm1709_vm2, %v15803_v59, 0.0  ;;  %v15807_v58 = vpop.eup %12184 }
0x1f82   :  { %8045 = vadd.xlane.f32.xlu1 %v8044_v55  ;;  %11158 = vmatprep.subr.bf16.mxu0 %v8109_v62  ;;  %v8053_v22 = vsel %vm1709_vm2, %v15807_v58, 0.0  ;;  %12200 = vrcp.f32 %v8040_v48 }
0x1f83   :  { %11159 = vmatpush3.bf16.msra.mxu0 %v8109_v62  ;;  %12202 = vrcp.f32 %v8043_v42 }
0x1f84   :  { %v15809_v7 = vpop.eup %12186  ;;  %11160 = vmatprep.subr.bf16.mxu0 %v8111_v37 }
0x1f85   :  { %v8113_v63 = vpop.permute.xlu0 %8112  ;;  %v8062_v6 = vsel %vm1709_vm2, %v15809_v7, 0.0  ;;  %v15815_v18 = vpop.eup %12188 }
0x1f86   :  { %8054 = vadd.xlane.f32.xlu1 %v8053_v22  ;;  %8063 = vadd.xlane.f32.xlu0 %v8062_v6  ;;  %v12191_v39 = vpop.eup %12190  ;;  %v8047_v13 = vsel %vm1709_vm2, %v15815_v18, 0.0 }
0x1f87   :  { %11161 = vmatpush3.bf16.msra.mxu0 %v8111_v37  ;;  %v8087_v3 = vmul.f32 %v12191_v39, %v15733_v54 }
0x1f88   :  { %v15817_v0 = vpop.eup %12192  ;;  %11162 = vmatprep.subr.bf16.mxu0 %v8113_v63 }
0x1f89   :  { %v12195_v26 = vpop.eup %12194  ;;  %v8056_v53 = vsel %vm1709_vm2, %v15817_v0, 0.0  ;;  %v8115_v60 = vpop.permute.xlu0 %8114 }
0x1f8a   :  { %v12197_v14 = vpop.eup %12196  ;;  %8048 = vadd.xlane.f32.xlu1 %v8047_v13  ;;  %8057 = vadd.xlane.f32.xlu0 %v8056_v53  ;;  %v8089_v2 = vmul.f32 %v12195_v26, %v15741_v56 }
0x1f8b   :  { %v12199_v8 = vpop.eup %12198  ;;  %11163 = vmatpush3.bf16.msra.mxu0 %v8113_v63  ;;  %v8088_v4 = vmul.f32 %v12197_v14, %v15743_v61 }
0x1f8c   :  { %11164 = vmatprep.subr.bf16.mxu0 %v8115_v60  ;;  %v8086_v35 = vmul.f32 %v12199_v8, %v15725_v51  ;;  %v12201_v23 = vpop.eup %12200 }
0x1f8d   :  { %v8102_v5 = vpack.c.bf16 %v8089_v2, %v8088_v4  ;;  %v12203_v40 = vpop.eup %12202  ;;  %v8090_v45 = vmul.f32 %v12201_v23, %v15769_v41 }
0x1f8e   :  { %v8101_v32 = vpack.c.bf16 %v8087_v3, %v8086_v35  ;;  %v8091_v54 = vmul.f32 %v12203_v40, %v15763_v20 }
0x1f8f   :  { %11165 = vmatpush3.bf16.msra.mxu0 %v8115_v60 }
0x1f90   :  { %v8103_v19 = vpack.c.bf16 %v8091_v54, %v8090_v45 }
0x1f92   :  { %11167 = vmatmul.mubr.msk.bf16.vlgmr.msra.gmra.mrb[200].mxu0 %vm1709_vm2, %v8101_v32 }
0x1f93   :  { %11170 = vmatprep.mubr.msk.bf16.mxu0 %vm1709_vm2, %v8102_v5 }
0x1f9a   :  { %11171 = vmatmul.mubr.msk.bf16.gmra.mrb[204].mxu0 %vm1709_vm2, %v8103_v19 }
0x1fac   :  { %v7971_v61 = vpop.xlane.xlu1 %7970 }
0x1fad   :  { %v7987_v56 = vsub.f32 %v15781_v31, %v7971_v61 }
0x1faf   :  { %v8018_v51 = vmul.f32 1.442695, %v7987_v56 }
0x1fb0   :  { %v7965_v49 = vpop.xlane.xlu1 %7964 }
0x1fb1   :  { %12204 = vpow2.f32 %v8018_v51  ;;  %v7985_v44 = vsub.f32 %v15783_v28, %v7965_v49 }
0x1fb3   :  { %v8014_v11 = vmul.f32 1.442695, %v7985_v44  ;;  %v15866_v44 = vld [vmem:[%s16469_s9 + $0x1] ss:$0 sm:$0xff] }
0x1fb4   :  { %v8198_v10 = vpop.permute.xlu1 %8197 }
0x1fb5   :  { %12206 = vpow2.f32 %v8014_v11  ;;  %11174 = vmatprep.subr.bf16.mxu1 %v8198_v10 }
0x1fb6   :  { %11175 = vmatpush3.bf16.msra.mxu1 %v8198_v10 }
0x1fb8   :  { %v8200_v9 = vpop.permute.xlu1 %8199 }
0x1fb9   :  { %11176 = vmatprep.subr.bf16.mxu1 %v8200_v9 }
0x1fba   :  { %11177 = vmatpush3.bf16.msra.mxu1 %v8200_v9 }
0x1fbb   :  { %v12205_v20 = vpop.eup %12204 }
0x1fbc   :  { %v8065_v41 = vsel %vm1709_vm2, %v12205_v20, 0.0 }
0x1fbd   :  { %8066 = vadd.xlane.f32.xlu0 %v8065_v41 }
0x1fbf   :  { %v12207_v25 = vpop.eup %12206 }
0x1fc0   :  { %v8059_v31 = vsel %vm1709_vm2, %v12207_v25, 0.0 }
0x1fc1   :  { %8060 = vadd.xlane.f32.xlu1 %v8059_v31  ;;  %v16607_v31 = vld [vmem:[#allocation18_spill] sm:$0xff] }
0x1fd2   :  { %8203 = vrot.lane.b32.xlu1 %v14762_v47, %s16606_s3 }
0x1fd3   :  { %8201 = vrot.lane.b32.xlu0 %v14764_v30, %s16606_s3 }
0x200b   :  { %v8052_v28 = vpop.xlane.xlu1 %8051 }
0x200f   :  { %v8046_v50 = vpop.xlane.xlu1 %8045 }
0x2010   :  { %12208 = vrcp.f32 %v8046_v50 }
0x2013   :  { %v8055_v36 = vpop.xlane.xlu1 %8054  ;;  %v8064_v1 = vpop.xlane.xlu0 %8063 }
0x2017   :  { %v8049_v15 = vpop.xlane.xlu1 %8048  ;;  %v8058_v47 = vpop.xlane.xlu0 %8057 }
0x2018   :  { %12210 = vrcp.f32 %v8049_v15 }
0x2019   :  { %12212 = vrcp.f32 %v8055_v36  ;;  %v16608_v36 = vld [vmem:[#allocation2_spill] sm:$0xff] }
0x201a   :  { %v12209_v21 = vpop.eup %12208  ;;  %12214 = vrcp.f32 %v8052_v28 }
0x201b   :  { %v8092_v24 = vmul.f32 %v12209_v21, %v15803_v59 }
0x2022   :  { %v12211_v34 = vpop.eup %12210 }
0x2023   :  { %v8093_v43 = vmul.f32 %v12211_v34, %v15815_v18  ;;  %v12213_v52 = vpop.eup %12212  ;;  %v16609_v34 = vld [vmem:[#allocation5_spill] sm:$0xff] }
0x2024   :  { %v12215_v17 = vpop.eup %12214  ;;  %v8095_v33 = vmul.f32 %v12213_v52, %v15807_v58 }
0x2025   :  { %v8104_v57 = vpack.c.bf16 %v8093_v43, %v8092_v24  ;;  %v8094_v42 = vmul.f32 %v12215_v17, %v15799_v46 }
0x2027   :  { %11182 = vmatprep.mubr.msk.bf16.mxu1 %vm1709_vm2, %v8104_v57  ;;  %v8105_v48 = vpack.c.bf16 %v8095_v33, %v8094_v42 }
0x204a   :  { %v8067_v30 = vpop.xlane.xlu0 %8066 }
0x204b   :  { %12216 = vrcp.f32 %v8067_v30  ;;  %v16610_v30 = vld [vmem:[#allocation3_spill] sm:$0xff] }
0x204c   :  { %12218 = vrcp.f32 %v8058_v47 }
0x204d   :  { %12220 = vrcp.f32 %v8064_v1 }
0x204e   :  { %v8061_v38 = vpop.xlane.xlu1 %8060  ;;  %v8202_v12 = vpop.permute.xlu0 %8201 }
0x204f   :  { %12222 = vrcp.f32 %v8061_v38  ;;  %11178 = vmatprep.subr.bf16.mxu1 %v8202_v12 }
0x2050   :  { %11179 = vmatpush3.bf16.msra.mxu1 %v8202_v12 }
0x2052   :  { %v8204_v16 = vpop.permute.xlu1 %8203 }
0x2053   :  { %11180 = vmatprep.subr.bf16.mxu1 %v8204_v16 }
0x2054   :  { %11181 = vmatpush3.bf16.msra.mxu1 %v8204_v16 }
0x2055   :  { %11435 = vmatprep.subr.msk.bf16.mxu1 %vm2700_vm3, %v9737_v29  ;;  %v12217_v59 = vpop.eup %12216 }
0x2056   :  { %v12219_v62 = vpop.eup %12218  ;;  %v8099_v37 = vmul.f32 %v12217_v59, %v12205_v20  ;;  %v16612_v59 = vld [vmem:[#allocation7_spill] sm:$0xff] }
0x2057   :  { %11183 = vmatmul.mubr.msk.bf16.vlgmr.msra.gmra.mrb[232].mxu1 %vm1709_vm2, %v8105_v48  ;;  %v12221_v55 = vpop.eup %12220  ;;  %v8096_v63 = vmul.f32 %v12219_v62, %v15817_v0  ;;  %v16611_v48 = vld [vmem:[#allocation4_spill] sm:$0xff] }
0x2058   :  { %11191 = vmatpush3.bf16.msra.mxu1 %v8319_v27  ;;  %v8098_v46 = vmul.f32 %v12221_v55, %v15809_v7 }
0x2059   :  { %v12223_v58 = vpop.eup %12222 }
0x205a   :  { %v8097_v22 = vmul.f32 %v12223_v58, %v12207_v25  ;;  %v8107_v18 = vpack.c.bf16 %v8099_v37, %v8098_v46  ;;  %v16613_v58 = vld [vmem:[#allocation8_spill] sm:$0xff] }
0x205c   :  { %v8106_v6 = vpack.c.bf16 %v8097_v22, %v8096_v63  ;;  %v16614_v22 = vld [vmem:[#allocation6_spill] sm:$0xff] }
0x205e   :  { %11186 = vmatprep.mubr.msk.bf16.mxu1 %vm1709_vm2, %v8106_v6 }
0x205f   :  { %11187 = vmatmul.mubr.msk.bf16.gmra.mrb[236].mxu1 %vm1709_vm2, %v8107_v18 }
0x2065   :  { %v11168_v39 = vpop.f32.mrb[200].mxu0 }
0x2066   :  { %v8166_v26 = vpop.f32.mrb[201].mxu0 }
0x2067   :  { %v11169_v13 = vpop.f32.mrb[202].mxu0 }
0x2068   :  { %v8287_v53 = vpack.c.bf16 %v11169_v13, %v11168_v39  ;;  %v8169_v14 = vpop.f32.mrb[203].mxu0 }
0x2069   :  { %v8286_v8 = vpack.c.bf16 %v8169_v14, %v8166_v26 }
0x206b   :  { %11192 = vmatprep.mubr.msk.bf16.mxu1 %vm1502_vm1, %v8286_v8 }
0x206c   :  { %11193 = vmatmul.mubr.msk.bf16.vlgmr.msra.gmra.mrb[200].mxu1 %vm1502_vm1, %v8287_v53 }
0x206d   :  { %v11172_v0 = vpop.f32.mrb[204].mxu0 }
0x206e   :  { %v8182_v60 = vpop.f32.mrb[205].mxu0 }
0x206f   :  { %v11173_v3 = vpop.f32.mrb[206].mxu0 }
0x2070   :  { %v8289_v7 = vpack.c.bf16 %v11173_v3, %v11172_v0  ;;  %v8185_v4 = vpop.f32.mrb[207].mxu0 }
0x2071   :  { %v8288_v2 = vpack.c.bf16 %v8185_v4, %v8182_v60 }
0x2073   :  { %11196 = vmatprep.mubr.msk.bf16.mxu1 %vm1502_vm1, %v8288_v2 }
0x2074   :  { %11197 = vmatmul.mubr.msk.bf16.gmra.mrb[204].mxu1 %vm1502_vm1, %v8289_v7  ;;  %v16615_v7 = vld [vmem:[#allocation9_spill] sm:$0xff] }
0x212a   :  { %v11184_v35 = vpop.f32.mrb[232].mxu1 }
0x212b   :  { %v8255_v32 = vpop.f32.mrb[233].mxu1 }
0x212c   :  { %v11185_v23 = vpop.f32.mrb[234].mxu1 }
0x212d   :  { %v8291_v5 = vpack.c.bf16 %v11185_v23, %v11184_v35  ;;  %v8258_v40 = vpop.f32.mrb[235].mxu1 }
0x212e   :  { %v8290_v45 = vpack.c.bf16 %v8258_v40, %v8255_v32  ;;  %v16616_v32 = vld [vmem:[#allocation10_spill] sm:$0xff] }
0x2130   :  { %11200 = vmatprep.mubr.msk.bf16.mxu1 %vm1502_vm1, %v8290_v45 }
0x2131   :  { %11201 = vmatmul.mubr.msk.bf16.gmra.mrb[208].mxu1 %vm1502_vm1, %v8291_v5  ;;  %v16617_v5 = vld [vmem:[#allocation12_spill] sm:$0xff] }
0x2132   :  { %v11188_v54 = vpop.f32.mrb[236].mxu1 }
0x2133   :  { %v8271_v19 = vpop.f32.mrb[237].mxu1 }
0x2134   :  { %v11189_v61 = vpop.f32.mrb[238].mxu1 }
0x2135   :  { %v8293_v56 = vpack.c.bf16 %v11189_v61, %v11188_v54  ;;  %v8274_v51 = vpop.f32.mrb[239].mxu1  ;;  %v16618_v61 = vld [vmem:[#allocation11_spill] sm:$0xff] }
0x2136   :  { %v8292_v49 = vpack.c.bf16 %v8274_v51, %v8271_v19 }
0x2138   :  { %11204 = vmatprep.mubr.msk.bf16.mxu1 %vm1502_vm1, %v8292_v49 }
0x2139   :  { %11205 = vmatmul.mubr.msk.bf16.gmra.mrb[212].mxu1 %vm1502_vm1, %v8293_v56 }
0x213f   :  { %v11194_v11 = vpop.f32.mrb[200].mxu1 }
0x2140   :  { %v8355_v10 = vpop.f32.mrb[201].mxu1  ;;  %v8444_v9 = vadd.f32 %v11194_v11, %v15866_v44 }
0x2141   :  { %v8442_v20 = vadd.f32 %v15866_v44, %v8355_v10  ;;  %v11195_v41 = vpop.f32.mrb[202].mxu1 }
0x2142   :  { %v8358_v25 = vpop.f32.mrb[203].mxu1  ;;  %v15875_v15 = vadd.f32 %v8444_v9, %v16608_v36  ;;  %v8445_v21 = vadd.f32 %v11195_v41, %v15866_v44  ;;  %v16619_v36 = vld [vmem:[#allocation13_spill] sm:$0xff] }
0x2143   :  { %v15871_v28 = vadd.f32 %v8442_v20, %v16607_v31  ;;  %v8443_v50 = vadd.f32 %v15866_v44, %v8358_v25 }
0x2144   :  { %v15886_v52 = vadd.f32 %v8445_v21, %v16610_v30  ;;  %v8484_v17 = vsel %vm1072_vm0, %v15875_v15, 0.0 }
0x2145   :  { %v15879_v24 = vadd.f32 %v8443_v50, %v16609_v34  ;;  %v8478_v43 = vsel %vm1072_vm0, %v15871_v28, 0.0 }
0x2146   :  { %8479 = vadd.xlane.f32.xlu0 %v8478_v43  ;;  %v8487_v55 = vsel %vm1072_vm0, %v15886_v52, 0.0 }
0x2147   :  { %v11198_v57 = vpop.f32.mrb[204].mxu1  ;;  %v8481_v1 = vsel %vm1072_vm0, %v15879_v24, 0.0 }
0x2148   :  { %8482 = vadd.xlane.f32.xlu1 %v8481_v1  ;;  %v8371_v47 = vpop.f32.mrb[205].mxu1  ;;  %v8448_v42 = vadd.f32 %v11198_v57, %v15866_v44 }
0x2149   :  { %v8446_v38 = vadd.f32 %v15866_v44, %v8371_v47  ;;  %v11199_v12 = vpop.f32.mrb[206].mxu1 }
0x214a   :  { %8485 = vadd.xlane.f32.xlu0 %v8484_v17  ;;  %v8374_v33 = vpop.f32.mrb[207].mxu1  ;;  %v8449_v16 = vadd.f32 %v11199_v12, %v15866_v44  ;;  %v15908_v46 = vadd.f32 %v8448_v42, %v16614_v22  ;;  %v16621_v17 = vld [vmem:[#allocation16_spill] sm:$0xff] }
0x214b   :  { %v8447_v29 = vadd.f32 %v15866_v44, %v8374_v33  ;;  %v15895_v27 = vadd.f32 %v8446_v38, %v16611_v48  ;;  %v16620_v38 = vld [vmem:[#allocation14_spill] sm:$0xff]  ;;  %v16622_v48 = vld [vmem:[#allocation15_spill] sm:$0xff] }
0x214c   :  { %v15903_v37 = vadd.f32 %v8449_v16, %v16613_v58  ;;  %v8496_v39 = vsel %vm1072_vm0, %v15908_v46, 0.0 }
0x214d   :  { %v15898_v62 = vadd.f32 %v8447_v29, %v16612_v59  ;;  %v8490_v6 = vsel %vm1072_vm0, %v15895_v27, 0.0 }
0x214e   :  { %8488 = vadd.xlane.f32.xlu0 %v8487_v55  ;;  %v8499_v18 = vsel %vm1072_vm0, %v15903_v37, 0.0 }
0x214f   :  { %v8493_v63 = vsel %vm1072_vm0, %v15898_v62, 0.0 }
0x2150   :  { %8494 = vadd.xlane.f32.xlu1 %v8493_v63 }
0x2152   :  { %8491 = vadd.xlane.f32.xlu0 %v8490_v6 }
0x2154   :  { %8500 = vadd.xlane.f32.xlu1 %v8499_v18 }
0x2156   :  { %8497 = vadd.xlane.f32.xlu0 %v8496_v39 }
0x21d3   :  { %v8480_v26 = vpop.xlane.xlu0 %8479 }
0x21d4   :  { %v8526_v11 = vmul.f32 0.03125, %v8480_v26 }
0x21d5   :  { %v8483_v19 = vpop.xlane.xlu1 %8482 }
0x21d6   :  { %v8527_v31 = vmul.f32 0.03125, %v8483_v19  ;;  %v15948_v1 = vsub.f32 %v15871_v28, %v8526_v11 }
0x21d7   :  { %v8486_v53 = vpop.xlane.xlu0 %8485 }
0x21d8   :  { %v8528_v30 = vmul.f32 0.03125, %v8486_v53  ;;  %v8558_v6 = vmul.f32 %v15948_v1, %v15948_v1 }
0x21da   :  { %v15967_v58 = vsub.f32 %v15875_v15, %v8528_v30 }
0x21db   :  { %v8489_v54 = vpop.xlane.xlu0 %8488 }
0x21dc   :  { %v8529_v42 = vmul.f32 0.03125, %v8489_v54 }
0x21dd   :  { %v8495_v29 = vpop.xlane.xlu1 %8494 }
0x21de   :  { %v15974_v39 = vsub.f32 %v15886_v52, %v8529_v42  ;;  %v8531_v26 = vmul.f32 0.03125, %v8495_v29 }
0x21df   :  { %v8492_v47 = vpop.xlane.xlu0 %8491 }
0x21e0   :  { %v8530_v63 = vmul.f32 0.03125, %v8492_v47 }
0x21e3   :  { %v8498_v18 = vpop.xlane.xlu0 %8497 }
0x2204   :  { %v11202_v13 = vpop.f32.mrb[208].mxu1 }
0x2205   :  { %v8387_v14 = vpop.f32.mrb[209].mxu1  ;;  %v8452_v8 = vadd.f32 %v11202_v13, %v15866_v44 }
0x2206   :  { %v8450_v0 = vadd.f32 %v15866_v44, %v8387_v14  ;;  %v11203_v60 = vpop.f32.mrb[210].mxu1  ;;  %v8501_v14 = vpop.xlane.xlu1 %8500 }
0x2207   :  { %v8390_v3 = vpop.f32.mrb[211].mxu1  ;;  %v8453_v2 = vadd.f32 %v11203_v60, %v15866_v44  ;;  %v15924_v23 = vadd.f32 %v8452_v8, %v16616_v32  ;;  %v15981_v8 = vsub.f32 %v15895_v27, %v8530_v63  ;;  %v8574_v60 = vsel %vm1072_vm0, %v8558_v6, 0.0 }
0x2208   :  { %v15919_v4 = vadd.f32 %v8450_v0, %v16615_v7  ;;  %v8451_v35 = vadd.f32 %v15866_v44, %v8390_v3  ;;  %v8532_v0 = vmul.f32 0.03125, %v8498_v18  ;;  %v8560_v3 = vmul.f32 %v15967_v58, %v15967_v58 }
0x2209   :  { %v15932_v56 = vadd.f32 %v8453_v2, %v16618_v61  ;;  %v8508_v25 = vsel %vm1072_vm0, %v15924_v23, 0.0  ;;  %v15987_v7 = vsub.f32 %v15898_v62, %v8531_v26  ;;  %v8533_v2 = vmul.f32 0.03125, %v8501_v14 }
0x220a   :  { %v15927_v40 = vadd.f32 %v8451_v35, %v16617_v5  ;;  %v8502_v45 = vsel %vm1072_vm0, %v15919_v4, 0.0  ;;  %v8561_v32 = vmul.f32 %v15974_v39, %v15974_v39  ;;  %v15993_v5 = vsub.f32 %v15908_v46, %v8532_v0 }
0x220b   :  { %8503 = vadd.xlane.f32.xlu0 %v8502_v45  ;;  %v8511_v57 = vsel %vm1072_vm0, %v15932_v56, 0.0  ;;  %v8580_v45 = vsel %vm1072_vm0, %v8560_v3, 0.0  ;;  %v8562_v54 = vmul.f32 %v15981_v8, %v15981_v8  ;;  %v15999_v19 = vsub.f32 %v15903_v37, %v8533_v2 }
0x220c   :  { %v11206_v51 = vpop.f32.mrb[212].mxu1  ;;  %v8505_v49 = vsel %vm1072_vm0, %v15927_v40, 0.0  ;;  %v8583_v61 = vsel %vm1072_vm0, %v8561_v32, 0.0  ;;  %v8564_v11 = vmul.f32 %v15993_v5, %v15993_v5 }
0x220d   :  { %8506 = vadd.xlane.f32.xlu1 %v8505_v49  ;;  %v8403_v10 = vpop.f32.mrb[213].mxu1  ;;  %v8456_v9 = vadd.f32 %v11206_v51, %v15866_v44  ;;  %v8563_v51 = vmul.f32 %v15987_v7, %v15987_v7  ;;  %v8586_v49 = vsel %vm1072_vm0, %v8562_v54, 0.0 }
0x220e   :  { %v8454_v20 = vadd.f32 %v15866_v44, %v8403_v10  ;;  %v11207_v41 = vpop.f32.mrb[214].mxu1 }
0x220f   :  { %8509 = vadd.xlane.f32.xlu0 %v8508_v25  ;;  %v8406_v50 = vpop.f32.mrb[215].mxu1  ;;  %v8457_v34 = vadd.f32 %v11207_v41, %v15866_v44  ;;  %v15951_v12 = vadd.f32 %v8456_v9, %v16620_v38  ;;  %v8589_v10 = vsel %vm1072_vm0, %v8563_v51, 0.0  ;;  %v8565_v9 = vmul.f32 %v15999_v19, %v15999_v19  ;;  %v11578_v25 = vld [vmem:[%s16470_s12 + $0x10] sm:$0xff]  }
0x2210   :  { %v15941_v21 = vadd.f32 %v8454_v20, %v16619_v36  ;;  %v8455_v43 = vadd.f32 %v15866_v44, %v8406_v50  ;;  %v15959_v44 = vsub.f32 %v15879_v24, %v8527_v31  ;;  %v8592_v20 = vsel %vm1072_vm0, %v8564_v11, 0.0  ;;  %11208 = vmatprep.subr.bf16.mxu0 %v11578_v25  ;;  %v11579_v31 = vld [vmem:[%s16470_s12 + $0x18] sm:$0xff]  }
0x2211   :  { %8512 = vadd.xlane.f32.xlu1 %v8511_v57  ;;  %v15962_v59 = vadd.f32 %v8457_v34, %v16622_v48  ;;  %v8520_v22 = vsel %vm1072_vm0, %v15951_v12, 0.0  ;;  %v8595_v41 = vsel %vm1072_vm0, %v8565_v9, 0.0  ;;  %11209 = vmatpush3.bf16.msra.mxu0 %v11578_v25 }
0x2212   :  { %v15954_v33 = vadd.f32 %v8455_v43, %v16621_v17  ;;  %v8514_v16 = vsel %vm1072_vm0, %v15941_v21, 0.0  ;;  %v8559_v53 = vmul.f32 %v15959_v44, %v15959_v44  ;;  %11210 = vmatprep.subr.bf16.mxu0 %v11579_v31 }
0x2213   :  { %8515 = vadd.xlane.f32.xlu0 %v8514_v16  ;;  %v8523_v13 = vsel %vm1072_vm0, %v15962_v59, 0.0 }
0x2214   :  { %v8517_v55 = vsel %vm1072_vm0, %v15954_v33, 0.0  ;;  %v8577_v35 = vsel %vm1072_vm0, %v8559_v53, 0.0 }
0x2215   :  { %8518 = vadd.xlane.f32.xlu1 %v8517_v55  ;;  %11211 = vmatpush3.bf16.msra.mxu0 %v11579_v31 }
0x2217   :  { %8521 = vadd.xlane.f32.xlu0 %v8520_v22 }
0x2219   :  { %8524 = vadd.xlane.f32.xlu1 %v8523_v13 }
0x221b   :  { %8575 = vadd.xlane.f32.xlu0 %v8574_v60 }
0x221d   :  { %8578 = vadd.xlane.f32.xlu1 %v8577_v35 }
0x221f   :  { %8581 = vadd.xlane.f32.xlu0 %v8580_v45 }
0x2221   :  { %8584 = vadd.xlane.f32.xlu1 %v8583_v61 }
0x2223   :  { %8587 = vadd.xlane.f32.xlu0 %v8586_v49 }
0x2225   :  { %8590 = vadd.xlane.f32.xlu1 %v8589_v10 }
0x2227   :  { %8593 = vadd.xlane.f32.xlu0 %v8592_v20 }
0x2229   :  { %8596 = vadd.xlane.f32.xlu1 %v8595_v41 }
0x2298   :  { %v8504_v50 = vpop.xlane.xlu0 %8503 }
0x2299   :  { %v8534_v36 = vmul.f32 0.03125, %v8504_v50 }
0x229a   :  { %v8507_v34 = vpop.xlane.xlu1 %8506 }
0x229b   :  { %v16019_v43 = vsub.f32 %v15919_v4, %v8534_v36  ;;  %v8535_v57 = vmul.f32 0.03125, %v8507_v34 }
0x229c   :  { %v8510_v47 = vpop.xlane.xlu0 %8509 }
0x229d   :  { %v16022_v30 = vsub.f32 %v15927_v40, %v8535_v57  ;;  %v8536_v38 = vmul.f32 0.03125, %v8510_v47  ;;  %v8566_v17 = vmul.f32 %v16019_v43, %v16019_v43 }
0x229e   :  { %v8513_v16 = vpop.xlane.xlu1 %8512 }
0x229f   :  { %v16027_v29 = vsub.f32 %v15924_v23, %v8536_v38  ;;  %v8537_v42 = vmul.f32 0.03125, %v8513_v16  ;;  %v8598_v48 = vsel %vm1072_vm0, %v8566_v17, 0.0  ;;  %v8567_v55 = vmul.f32 %v16022_v30, %v16022_v30 }
0x22a0   :  { %8599 = vadd.xlane.f32.xlu0 %v8598_v48  ;;  %v8516_v63 = vpop.xlane.xlu0 %8515 }
0x22a1   :  { %v16033_v22 = vsub.f32 %v15932_v56, %v8537_v42  ;;  %v8538_v6 = vmul.f32 0.03125, %v8516_v63  ;;  %v8601_v18 = vsel %vm1072_vm0, %v8567_v55, 0.0  ;;  %v8568_v26 = vmul.f32 %v16027_v29, %v16027_v29 }
0x22a2   :  { %8602 = vadd.xlane.f32.xlu1 %v8601_v18  ;;  %v8519_v13 = vpop.xlane.xlu1 %8518 }
0x22a3   :  { %v16039_v53 = vsub.f32 %v15941_v21, %v8538_v6  ;;  %v8539_v14 = vmul.f32 0.03125, %v8519_v13  ;;  %v8604_v0 = vsel %vm1072_vm0, %v8568_v26, 0.0  ;;  %v8569_v60 = vmul.f32 %v16033_v22, %v16033_v22 }
0x22a4   :  { %8605 = vadd.xlane.f32.xlu0 %v8604_v0  ;;  %v8522_v3 = vpop.xlane.xlu0 %8521 }
0x22a5   :  { %v16045_v2 = vsub.f32 %v15954_v33, %v8539_v14  ;;  %v8540_v35 = vmul.f32 0.03125, %v8522_v3  ;;  %v8607_v32 = vsel %vm1072_vm0, %v8569_v60, 0.0  ;;  %v8570_v45 = vmul.f32 %v16039_v53, %v16039_v53 }
0x22a6   :  { %8608 = vadd.xlane.f32.xlu1 %v8607_v32  ;;  %v8525_v54 = vpop.xlane.xlu1 %8524 }
0x22a7   :  { %v16051_v61 = vsub.f32 %v15951_v12, %v8540_v35  ;;  %v8541_v51 = vmul.f32 0.03125, %v8525_v54  ;;  %v8610_v49 = vsel %vm1072_vm0, %v8570_v45, 0.0  ;;  %v8571_v11 = vmul.f32 %v16045_v2, %v16045_v2  ;;  %v16069_v45 = vld [vmem:[%s16471_s10 + $0x1] ss:$0 sm:$0xff] }
0x22a8   :  { %8611 = vadd.xlane.f32.xlu0 %v8610_v49  ;;  %v8576_v10 = vpop.xlane.xlu0 %8575 }
0x22a9   :  { %v16057_v9 = vsub.f32 %v15962_v59, %v8541_v51  ;;  %v8622_v20 = vmul.f32 0.03125, %v8576_v10  ;;  %v8613_v41 = vsel %vm1072_vm0, %v8571_v11, 0.0  ;;  %v8572_v25 = vmul.f32 %v16051_v61, %v16051_v61 }
0x22aa   :  { %8614 = vadd.xlane.f32.xlu1 %v8613_v41  ;;  %v8579_v31 = vpop.xlane.xlu1 %8578 }
0x22ab   :  { %v8638_v50 = vadd.f32 1e-06, %v8622_v20  ;;  %v8623_v36 = vmul.f32 0.03125, %v8579_v31  ;;  %v8616_v34 = vsel %vm1072_vm0, %v8572_v25, 0.0  ;;  %v8573_v57 = vmul.f32 %v16057_v9, %v16057_v9  ;;  %v16077_v31 = vld [vmem:[%s16472_s11 + $0x1] ss:$0 sm:$0xff] }
0x22ac   :  { %8617 = vadd.xlane.f32.xlu0 %v8616_v34  ;;  %v8582_v47 = vpop.xlane.xlu0 %8581 }
0x22ad   :  { %12224 = vrsqrt.f32 %v8638_v50  ;;  %v8639_v38 = vadd.f32 1e-06, %v8623_v36  ;;  %v8624_v17 = vmul.f32 0.03125, %v8582_v47  ;;  %v8619_v16 = vsel %vm1072_vm0, %v8573_v57, 0.0 }
0x22ae   :  { %8620 = vadd.xlane.f32.xlu1 %v8619_v16  ;;  %v8585_v42 = vpop.xlane.xlu1 %8584 }
0x22af   :  { %12226 = vrsqrt.f32 %v8639_v38  ;;  %v8640_v48 = vadd.f32 1e-06, %v8624_v17  ;;  %v8625_v55 = vmul.f32 0.03125, %v8585_v42 }
0x22b0   :  { %v8588_v63 = vpop.xlane.xlu0 %8587 }
0x22b1   :  { %12228 = vrsqrt.f32 %v8640_v48  ;;  %v8641_v6 = vadd.f32 1e-06, %v8625_v55  ;;  %v8626_v18 = vmul.f32 0.03125, %v8588_v63 }
0x22b2   :  { %v8591_v26 = vpop.xlane.xlu1 %8590 }
0x22b3   :  { %12230 = vrsqrt.f32 %v8641_v6  ;;  %v8642_v13 = vadd.f32 1e-06, %v8626_v18  ;;  %v8627_v14 = vmul.f32 0.03125, %v8591_v26 }
0x22b4   :  { %v8594_v0 = vpop.xlane.xlu0 %8593 }
0x22b5   :  { %12232 = vrsqrt.f32 %v8642_v13  ;;  %v8643_v60 = vadd.f32 1e-06, %v8627_v14  ;;  %v8628_v3 = vmul.f32 0.03125, %v8594_v0 }
0x22b6   :  { %v8597_v35 = vpop.xlane.xlu1 %8596 }
0x22b7   :  { %v12225_v32 = vpop.eup %12224  ;;  %12234 = vrsqrt.f32 %v8643_v60  ;;  %v8644_v54 = vadd.f32 1e-06, %v8628_v3  ;;  %v8629_v51 = vmul.f32 0.03125, %v8597_v35 }
0x22b8   :  { %v8670_v49 = vmul.f32 %v12225_v32, %v15948_v1 }
0x22b9   :  { %v12227_v11 = vpop.eup %12226  ;;  %12236 = vrsqrt.f32 %v8644_v54  ;;  %v8645_v10 = vadd.f32 1e-06, %v8629_v51  ;;  %v11581_v51 = vld [vmem:[%s16473_s14 + $0x28] sm:$0xff]  }
0x22ba   :  { %v8671_v20 = vmul.f32 %v12227_v11, %v15959_v44  ;;  %v8692_v41 = vmul.f32 %v16069_v45, %v8670_v49  ;;  %v11582_v49 = vld [vmem:[%s16473_s14 + $0x30] sm:$0xff]  }
0x22bb   :  { %v12229_v25 = vpop.eup %12228  ;;  %12238 = vrsqrt.f32 %v8645_v10 }
0x22bc   :  { %v8672_v50 = vmul.f32 %v12229_v25, %v15967_v58  ;;  %v8693_v36 = vmul.f32 %v16069_v45, %v8671_v20  ;;  %v8714_v44 = vadd.f32 %v16077_v31, %v8692_v41  ;;  %v11583_v41 = vld [vmem:[%s16473_s14 + $0x38] sm:$0xff]  }
0x22bd   :  { %v12231_v34 = vpop.eup %12230 }
0x22be   :  { %v8694_v1 = vmul.f32 %v16069_v45, %v8672_v50  ;;  %v8673_v57 = vmul.f32 %v12231_v34, %v15974_v39  ;;  %v8715_v47 = vadd.f32 %v16077_v31, %v8693_v36 }
0x22bf   :  { %v12233_v38 = vpop.eup %12232 }
0x22c0   :  { %v8695_v17 = vmul.f32 %v16069_v45, %v8673_v57  ;;  %v8674_v16 = vmul.f32 %v12233_v38, %v15981_v8  ;;  %v8730_v42 = vpack.c.bf16 %v8715_v47, %v8714_v44  ;;  %v8716_v58 = vadd.f32 %v16077_v31, %v8694_v1 }
0x22c1   :  { %v12235_v48 = vpop.eup %12234 }
0x22c2   :  { %v8717_v55 = vadd.f32 %v16077_v31, %v8695_v17  ;;  %v8675_v63 = vmul.f32 %v12235_v48, %v15987_v7  ;;  %11212 = vmatprep.mubr.msk.bf16.mxu0 %vm1072_vm0, %v8730_v42  ;;  %v8696_v39 = vmul.f32 %v16069_v45, %v8674_v16 }
0x22c3   :  { %v12237_v6 = vpop.eup %12236 }
0x22c4   :  { %v8676_v18 = vmul.f32 %v12237_v6, %v15993_v5  ;;  %v8731_v26 = vpack.c.bf16 %v8717_v55, %v8716_v58  ;;  %v8697_v13 = vmul.f32 %v16069_v45, %v8675_v63  ;;  %v8718_v0 = vadd.f32 %v16077_v31, %v8696_v39 }
0x22c5   :  { %v12239_v14 = vpop.eup %12238 }
0x22c6   :  { %v8677_v8 = vmul.f32 %v12239_v14, %v15999_v19  ;;  %11213 = vmatmul.mubr.msk.bf16.vlgmr.msra.gmra.mrb[208].mxu0 %vm1072_vm0, %v8731_v26  ;;  %v8719_v60 = vadd.f32 %v16077_v31, %v8697_v13  ;;  %v8698_v7 = vmul.f32 %v16069_v45, %v8676_v18  ;;  %v11580_v19 = vld [vmem:[%s16473_s14 + $0x20] sm:$0xff]  }
0x22c7   :  { %11228 = vmatprep.subr.bf16.mxu0 %v11580_v19 }
0x22c8   :  { %v8732_v3 = vpack.c.bf16 %v8719_v60, %v8718_v0  ;;  %v8699_v35 = vmul.f32 %v16069_v45, %v8677_v8  ;;  %v8720_v5 = vadd.f32 %v16077_v31, %v8698_v7  ;;  %11229 = vmatpush3.bf16.msra.mxu0 %v11580_v19 }
0x22c9   :  { %11230 = vmatprep.subr.bf16.mxu0 %v11581_v51 }
0x22ca   :  { %11216 = vmatprep.mubr.msk.bf16.mxu0 %vm1072_vm0, %v8732_v3  ;;  %v8721_v32 = vadd.f32 %v16077_v31, %v8699_v35 }
0x22cc   :  { %v8733_v54 = vpack.c.bf16 %v8721_v32, %v8720_v5  ;;  %11231 = vmatpush3.bf16.msra.mxu0 %v11581_v51 }
0x22cd   :  { %11232 = vmatprep.subr.bf16.mxu0 %v11582_v49 }
0x22ce   :  { %11217 = vmatmul.mubr.msk.bf16.gmra.mrb[212].mxu0 %vm1072_vm0, %v8733_v54 }
0x22d0   :  { %11233 = vmatpush3.bf16.msra.mxu0 %v11582_v49 }
0x22d1   :  { %11234 = vmatprep.subr.bf16.mxu0 %v11583_v41 }
0x22d4   :  { %11235 = vmatpush3.bf16.msra.mxu0 %v11583_v41 }
0x232d   :  { %v8600_v11 = vpop.xlane.xlu0 %8599 }
0x232e   :  { %v8630_v10 = vmul.f32 0.03125, %v8600_v11 }
0x232f   :  { %v8603_v20 = vpop.xlane.xlu1 %8602 }
0x2330   :  { %v8646_v25 = vadd.f32 1e-06, %v8630_v10  ;;  %v8631_v50 = vmul.f32 0.03125, %v8603_v20 }
0x2331   :  { %v8606_v36 = vpop.xlane.xlu0 %8605 }
0x2332   :  { %12240 = vrsqrt.f32 %v8646_v25  ;;  %v8647_v34 = vadd.f32 1e-06, %v8631_v50  ;;  %v8632_v1 = vmul.f32 0.03125, %v8606_v36 }
0x2333   :  { %v8609_v57 = vpop.xlane.xlu1 %8608 }
0x2334   :  { %12242 = vrsqrt.f32 %v8647_v34  ;;  %v8648_v44 = vadd.f32 1e-06, %v8632_v1  ;;  %v8633_v47 = vmul.f32 0.03125, %v8609_v57 }
0x2335   :  { %v8612_v38 = vpop.xlane.xlu0 %8611 }
0x2336   :  { %12244 = vrsqrt.f32 %v8648_v44  ;;  %v8649_v17 = vadd.f32 1e-06, %v8633_v47  ;;  %v8634_v16 = vmul.f32 0.03125, %v8612_v38 }
0x2337   :  { %v8615_v42 = vpop.xlane.xlu1 %8614 }
0x2338   :  { %12246 = vrsqrt.f32 %v8649_v17  ;;  %v8650_v48 = vadd.f32 1e-06, %v8634_v16  ;;  %v8635_v58 = vmul.f32 0.03125, %v8615_v42 }
0x2339   :  { %v8618_v55 = vpop.xlane.xlu0 %8617 }
0x233a   :  { %12248 = vrsqrt.f32 %v8650_v48  ;;  %v8651_v63 = vadd.f32 1e-06, %v8635_v58  ;;  %v8636_v39 = vmul.f32 0.03125, %v8618_v55 }
0x233b   :  { %v8621_v6 = vpop.xlane.xlu1 %8620 }
0x233c   :  { %v12241_v18 = vpop.eup %12240  ;;  %12250 = vrsqrt.f32 %v8651_v63  ;;  %v8652_v26 = vadd.f32 1e-06, %v8636_v39  ;;  %v8637_v13 = vmul.f32 0.03125, %v8621_v6 }
0x233d   :  { %v8678_v14 = vmul.f32 %v12241_v18, %v16019_v43 }
0x233e   :  { %v12243_v8 = vpop.eup %12242  ;;  %12252 = vrsqrt.f32 %v8652_v26  ;;  %v8653_v0 = vadd.f32 1e-06, %v8637_v13 }
0x233f   :  { %v8679_v60 = vmul.f32 %v12243_v8, %v16022_v30  ;;  %v8700_v7 = vmul.f32 %v16069_v45, %v8678_v14 }
0x2340   :  { %v12245_v3 = vpop.eup %12244  ;;  %12254 = vrsqrt.f32 %v8653_v0 }
0x2341   :  { %v8680_v35 = vmul.f32 %v12245_v3, %v16027_v29  ;;  %v8701_v5 = vmul.f32 %v16069_v45, %v8679_v60  ;;  %v8722_v19 = vadd.f32 %v16077_v31, %v8700_v7 }
0x2342   :  { %v12247_v32 = vpop.eup %12246 }
0x2343   :  { %v8681_v54 = vmul.f32 %v12247_v32, %v16033_v22  ;;  %v8723_v43 = vadd.f32 %v16077_v31, %v8701_v5  ;;  %v8702_v51 = vmul.f32 %v16069_v45, %v8680_v35 }
0x2344   :  { %v12249_v49 = vpop.eup %12248 }
0x2345   :  { %v8682_v30 = vmul.f32 %v12249_v49, %v16039_v53  ;;  %v8734_v11 = vpack.c.bf16 %v8723_v43, %v8722_v19  ;;  %v8703_v10 = vmul.f32 %v16069_v45, %v8681_v54  ;;  %v8724_v41 = vadd.f32 %v16077_v31, %v8702_v51 }
0x2346   :  { %v12251_v20 = vpop.eup %12250 }
0x2347   :  { %v8683_v29 = vmul.f32 %v12251_v20, %v16045_v2  ;;  %11220 = vmatprep.mubr.msk.bf16.mxu0 %vm1072_vm0, %v8734_v11  ;;  %v8725_v22 = vadd.f32 %v16077_v31, %v8703_v10  ;;  %v8704_v25 = vmul.f32 %v16069_v45, %v8682_v30 }
0x2348   :  { %v12253_v50 = vpop.eup %12252 }
0x2349   :  { %v8684_v36 = vmul.f32 %v12253_v50, %v16051_v61  ;;  %v8735_v34 = vpack.c.bf16 %v8725_v22, %v8724_v41  ;;  %v8705_v53 = vmul.f32 %v16069_v45, %v8683_v29  ;;  %v8726_v2 = vadd.f32 %v16077_v31, %v8704_v25 }
0x234a   :  { %v12255_v1 = vpop.eup %12254 }
0x234b   :  { %v8685_v57 = vmul.f32 %v12255_v1, %v16057_v9  ;;  %11221 = vmatmul.mubr.msk.bf16.gmra.mrb[216].mxu0 %vm1072_vm0, %v8735_v34  ;;  %v8727_v44 = vadd.f32 %v16077_v31, %v8705_v53  ;;  %v8706_v47 = vmul.f32 %v16069_v45, %v8684_v36  ;;  %v16147_v9 = vld [vmem:[%s16474_s13 + $0x1] ss:$0 sm:$0xff] }
0x234d   :  { %v8736_v38 = vpack.c.bf16 %v8727_v44, %v8726_v2  ;;  %v8707_v17 = vmul.f32 %v16069_v45, %v8685_v57  ;;  %v8728_v61 = vadd.f32 %v16077_v31, %v8706_v47 }
0x234f   :  { %11224 = vmatprep.mubr.msk.bf16.mxu0 %vm1072_vm0, %v8736_v38  ;;  %v8729_v16 = vadd.f32 %v16077_v31, %v8707_v17 }
0x2351   :  { %v8737_v42 = vpack.c.bf16 %v8729_v16, %v8728_v61 }
0x2353   :  { %11225 = vmatmul.mubr.msk.bf16.gmra.mrb[220].mxu0 %vm1072_vm0, %v8737_v42 }
0x2399   :  { %v11214_v48 = vpop.f32.mrb[208].mxu0 }
0x239a   :  { %v8830_v58 = vadd.f32 %v11214_v48, %v16147_v9  ;;  %v8821_v55 = vpop.f32.mrb[209].mxu0 }
0x239b   :  { %v8822_v45 = vadd.f32 %v16147_v9, %v8821_v55  ;;  %v11215_v63 = vpop.f32.mrb[210].mxu0 }
0x239c   :  { %v8902_v39 = vmul.f32 0.70710677, %v8830_v58  ;;  %v8833_v6 = vadd.f32 %v11215_v63, %v16147_v9  ;;  %v8824_v18 = vpop.f32.mrb[211].mxu0  ;;  %v8886_v41 = vmul.f32 0.5, %v8830_v58 }
0x239d   :  { %v8900_v31 = vmul.f32 0.70710677, %v8822_v45  ;;  %v8825_v26 = vadd.f32 %v16147_v9, %v8824_v18  ;;  %v8884_v50 = vmul.f32 0.5, %v8822_v45 }
0x239e   :  { %12256 = verf.f32 %v8902_v39  ;;  %v8903_v13 = vmul.f32 0.70710677, %v8833_v6  ;;  %v8887_v22 = vmul.f32 0.5, %v8833_v6 }
0x239f   :  { %12258 = verf.f32 %v8900_v31  ;;  %v8901_v14 = vmul.f32 0.70710677, %v8825_v26  ;;  %v8885_v36 = vmul.f32 0.5, %v8825_v26 }
0x23a0   :  { %12260 = verf.f32 %v8903_v13 }
0x23a1   :  { %12262 = verf.f32 %v8901_v14  ;;  %v11218_v8 = vpop.f32.mrb[212].mxu0 }
0x23a2   :  { %v8846_v0 = vadd.f32 %v11218_v8, %v16147_v9  ;;  %v8837_v60 = vpop.f32.mrb[213].mxu0 }
0x23a3   :  { %v8838_v7 = vadd.f32 %v16147_v9, %v8837_v60  ;;  %v11219_v3 = vpop.f32.mrb[214].mxu0 }
0x23a4   :  { %v8906_v35 = vmul.f32 0.70710677, %v8846_v0  ;;  %v8849_v5 = vadd.f32 %v11219_v3, %v16147_v9  ;;  %v8840_v32 = vpop.f32.mrb[215].mxu0  ;;  %v8890_v58 = vmul.f32 0.5, %v8846_v0 }
0x23a5   :  { %v8904_v54 = vmul.f32 0.70710677, %v8838_v7  ;;  %v8841_v19 = vadd.f32 %v16147_v9, %v8840_v32  ;;  %v8888_v45 = vmul.f32 0.5, %v8838_v7 }
0x23a6   :  { %12264 = verf.f32 %v8906_v35  ;;  %v8907_v43 = vmul.f32 0.70710677, %v8849_v5  ;;  %v8891_v55 = vmul.f32 0.5, %v8849_v5 }
0x23a7   :  { %12266 = verf.f32 %v8904_v54  ;;  %v8905_v51 = vmul.f32 0.70710677, %v8841_v19  ;;  %v8889_v39 = vmul.f32 0.5, %v8841_v19 }
0x23a8   :  { %v12257_v49 = vpop.eup %12256  ;;  %12268 = verf.f32 %v8907_v43 }
0x23a9   :  { %v12259_v30 = vpop.eup %12258  ;;  %v8934_v11 = vadd.f32 1.0, %v12257_v49  ;;  %12270 = verf.f32 %v8905_v51 }
0x23aa   :  { %v12261_v10 = vpop.eup %12260  ;;  %v8932_v20 = vadd.f32 1.0, %v12259_v30 }
0x23ab   :  { %v12263_v29 = vpop.eup %12262  ;;  %v8935_v25 = vadd.f32 1.0, %v12261_v10  ;;  %v8950_v53 = vmul.f32 %v8934_v11, %v8886_v41 }
0x23ac   :  { %v8933_v34 = vadd.f32 1.0, %v12263_v29  ;;  %v8948_v57 = vmul.f32 %v8932_v20, %v8884_v50 }
0x23ad   :  { %v8951_v1 = vmul.f32 %v8935_v25, %v8887_v22 }
0x23ae   :  { %v8949_v2 = vmul.f32 %v8933_v34, %v8885_v36 }
0x23af   :  { %v8965_v44 = vpack.c.bf16 %v8951_v1, %v8950_v53 }
0x23b0   :  { %v12265_v47 = vpop.eup %12264  ;;  %v8964_v38 = vpack.c.bf16 %v8949_v2, %v8948_v57 }
0x23b1   :  { %v12267_v17 = vpop.eup %12266  ;;  %v8938_v61 = vadd.f32 1.0, %v12265_v47 }
0x23b2   :  { %v12269_v16 = vpop.eup %12268  ;;  %v8936_v42 = vadd.f32 1.0, %v12267_v17  ;;  %11236 = vmatprep.mubr.msk.bf16.mxu0 %vm1709_vm2, %v8964_v38 }
0x23b3   :  { %v12271_v48 = vpop.eup %12270  ;;  %v8939_v63 = vadd.f32 1.0, %v12269_v16  ;;  %11237 = vmatmul.mubr.msk.bf16.vlgmr.msra.gmra.mrb[224].mxu0 %vm1709_vm2, %v8965_v44  ;;  %v8954_v18 = vmul.f32 %v8938_v61, %v8890_v58 }
0x23b4   :  { %v8937_v6 = vadd.f32 1.0, %v12271_v48  ;;  %v8952_v26 = vmul.f32 %v8936_v42, %v8888_v45 }
0x23b5   :  { %v8955_v31 = vmul.f32 %v8939_v63, %v8891_v55 }
0x23b6   :  { %v8953_v13 = vmul.f32 %v8937_v6, %v8889_v39 }
0x23b7   :  { %v8967_v14 = vpack.c.bf16 %v8955_v31, %v8954_v18 }
0x23b8   :  { %v8966_v8 = vpack.c.bf16 %v8953_v13, %v8952_v26 }
0x23ba   :  { %11240 = vmatprep.mubr.msk.bf16.mxu0 %vm1709_vm2, %v8966_v8 }
0x23bb   :  { %11241 = vmatmul.mubr.msk.bf16.gmra.mrb[228].mxu0 %vm1709_vm2, %v8967_v14 }
0x241e   :  { %v11222_v60 = vpop.f32.mrb[216].mxu0 }
0x241f   :  { %v8862_v0 = vadd.f32 %v11222_v60, %v16147_v9  ;;  %v8853_v3 = vpop.f32.mrb[217].mxu0 }
0x2420   :  { %v8854_v35 = vadd.f32 %v16147_v9, %v8853_v3  ;;  %v11223_v5 = vpop.f32.mrb[218].mxu0 }
0x2421   :  { %v8910_v7 = vmul.f32 0.70710677, %v8862_v0  ;;  %v8865_v32 = vadd.f32 %v11223_v5, %v16147_v9  ;;  %v8856_v54 = vpop.f32.mrb[219].mxu0  ;;  %v8894_v17 = vmul.f32 0.5, %v8862_v0 }
0x2422   :  { %v8908_v19 = vmul.f32 0.70710677, %v8854_v35  ;;  %v8857_v43 = vadd.f32 %v16147_v9, %v8856_v54  ;;  %v8892_v42 = vmul.f32 0.5, %v8854_v35 }
0x2423   :  { %12272 = verf.f32 %v8910_v7  ;;  %v8911_v51 = vmul.f32 0.70710677, %v8865_v32  ;;  %v8895_v61 = vmul.f32 0.5, %v8865_v32 }
0x2424   :  { %12274 = verf.f32 %v8908_v19  ;;  %v8909_v49 = vmul.f32 0.70710677, %v8857_v43  ;;  %v8893_v48 = vmul.f32 0.5, %v8857_v43 }
0x2425   :  { %12276 = verf.f32 %v8911_v51 }
0x2426   :  { %12278 = verf.f32 %v8909_v49  ;;  %v11226_v30 = vpop.f32.mrb[220].mxu0 }
0x2427   :  { %v8878_v11 = vadd.f32 %v11226_v30, %v16147_v9  ;;  %v8869_v10 = vpop.f32.mrb[221].mxu0  ;;  %v16176_v30 = vld [vmem:[%s16475_s15 + $0x1] ss:$0 sm:$0xff] }
0x2428   :  { %v8870_v20 = vadd.f32 %v16147_v9, %v8869_v10  ;;  %v11227_v29 = vpop.f32.mrb[222].mxu0 }
0x2429   :  { %v8914_v41 = vmul.f32 0.70710677, %v8878_v11  ;;  %v8881_v22 = vadd.f32 %v11227_v29, %v16147_v9  ;;  %v8872_v25 = vpop.f32.mrb[223].mxu0  ;;  %v8898_v60 = vmul.f32 0.5, %v8878_v11 }
0x242a   :  { %v8912_v50 = vmul.f32 0.70710677, %v8870_v20  ;;  %v8873_v36 = vadd.f32 %v16147_v9, %v8872_v25  ;;  %v8896_v35 = vmul.f32 0.5, %v8870_v20 }
0x242b   :  { %12280 = verf.f32 %v8914_v41  ;;  %v8915_v34 = vmul.f32 0.70710677, %v8881_v22  ;;  %v8899_v0 = vmul.f32 0.5, %v8881_v22 }
0x242c   :  { %12282 = verf.f32 %v8912_v50  ;;  %v8913_v53 = vmul.f32 0.70710677, %v8873_v36  ;;  %v8897_v5 = vmul.f32 0.5, %v8873_v36 }
0x242d   :  { %v12273_v1 = vpop.eup %12272  ;;  %12284 = verf.f32 %v8915_v34 }
0x242e   :  { %v12275_v57 = vpop.eup %12274  ;;  %v8942_v2 = vadd.f32 1.0, %v12273_v1  ;;  %12286 = verf.f32 %v8913_v53 }
0x242f   :  { %v12277_v44 = vpop.eup %12276  ;;  %v8940_v47 = vadd.f32 1.0, %v12275_v57 }
0x2430   :  { %v12279_v38 = vpop.eup %12278  ;;  %v8943_v16 = vadd.f32 1.0, %v12277_v44  ;;  %v8958_v55 = vmul.f32 %v8942_v2, %v8894_v17 }
0x2431   :  { %v8941_v58 = vadd.f32 1.0, %v12279_v38  ;;  %v8956_v63 = vmul.f32 %v8940_v47, %v8892_v42 }
0x2432   :  { %v8959_v9 = vmul.f32 %v8943_v16, %v8895_v61 }
0x2433   :  { %v8957_v45 = vmul.f32 %v8941_v58, %v8893_v48 }
0x2434   :  { %v8969_v39 = vpack.c.bf16 %v8959_v9, %v8958_v55 }
0x2435   :  { %v12281_v6 = vpop.eup %12280  ;;  %v8968_v18 = vpack.c.bf16 %v8957_v45, %v8956_v63 }
0x2436   :  { %v12283_v31 = vpop.eup %12282  ;;  %v8946_v26 = vadd.f32 1.0, %v12281_v6 }
0x2437   :  { %v12285_v13 = vpop.eup %12284  ;;  %v8944_v14 = vadd.f32 1.0, %v12283_v31  ;;  %11244 = vmatprep.mubr.msk.bf16.mxu0 %vm1709_vm2, %v8968_v18 }
0x2438   :  { %v12287_v8 = vpop.eup %12286  ;;  %v8947_v3 = vadd.f32 1.0, %v12285_v13  ;;  %11245 = vmatmul.mubr.msk.bf16.gmra.mrb[232].mxu0 %vm1709_vm2, %v8969_v39  ;;  %v8962_v32 = vmul.f32 %v8946_v26, %v8898_v60 }
0x2439   :  { %v8945_v7 = vadd.f32 1.0, %v12287_v8  ;;  %v8960_v19 = vmul.f32 %v8944_v14, %v8896_v35 }
0x243a   :  { %v8963_v54 = vmul.f32 %v8947_v3, %v8899_v0 }
0x243b   :  { %v8961_v43 = vmul.f32 %v8945_v7, %v8897_v5 }
0x243c   :  { %v8971_v51 = vpack.c.bf16 %v8963_v54, %v8962_v32 }
0x243d   :  { %v8970_v49 = vpack.c.bf16 %v8961_v43, %v8960_v19 }
0x243f   :  { %11248 = vmatprep.mubr.msk.bf16.mxu0 %vm1709_vm2, %v8970_v49 }
0x2440   :  { %11249 = vmatmul.mubr.msk.bf16.gmra.mrb[236].mxu0 %vm1709_vm2, %v8971_v51 }
0x2486   :  { %v11238_v11 = vpop.f32.mrb[224].mxu0 }
0x2487   :  { %v9080_v10 = vadd.f32 %v11238_v11, %v16176_v30  ;;  %v9071_v20 = vpop.f32.mrb[225].mxu0 }
0x2488   :  { %v9072_v29 = vadd.f32 %v16176_v30, %v9071_v20  ;;  %v11239_v41 = vpop.f32.mrb[226].mxu0 }
0x2489   :  { %v16181_v22 = vadd.f32 %v9080_v10, %v15875_v15  ;;  %v9074_v25 = vpop.f32.mrb[227].mxu0  ;;  %v9083_v36 = vadd.f32 %v11239_v41, %v16176_v30 }
0x248a   :  { %v16184_v50 = vadd.f32 %v9072_v29, %v15871_v28  ;;  %v9075_v57 = vadd.f32 %v16176_v30, %v9074_v25 }
0x248b   :  { %v9158_v34 = vsel %vm1072_vm0, %v16181_v22, 0.0  ;;  %v16190_v1 = vadd.f32 %v9083_v36, %v15886_v52 }
0x248c   :  { %9159 = vadd.xlane.f32.xlu0 %v9158_v34  ;;  %v9152_v15 = vsel %vm1072_vm0, %v16184_v50, 0.0  ;;  %v16196_v47 = vadd.f32 %v9075_v57, %v15879_v24 }
0x248d   :  { %v9161_v17 = vsel %vm1072_vm0, %v16190_v1, 0.0 }
0x248e   :  { %v11242_v53 = vpop.f32.mrb[228].mxu0  ;;  %v9155_v16 = vsel %vm1072_vm0, %v16196_v47, 0.0 }
0x248f   :  { %v9087_v2 = vpop.f32.mrb[229].mxu0  ;;  %v9096_v38 = vadd.f32 %v11242_v53, %v16176_v30 }
0x2490   :  { %v11243_v44 = vpop.f32.mrb[230].mxu0  ;;  %9153 = vadd.xlane.f32.xlu0 %v9152_v15  ;;  %v9088_v61 = vadd.f32 %v16176_v30, %v9087_v2 }
0x2491   :  { %v9090_v28 = vpop.f32.mrb[231].mxu0  ;;  %v16202_v52 = vadd.f32 %v9096_v38, %v15908_v46  ;;  %v9099_v58 = vadd.f32 %v11243_v44, %v16176_v30 }
0x2492   :  { %v16208_v42 = vadd.f32 %v9088_v61, %v15895_v27  ;;  %v9091_v24 = vadd.f32 %v16176_v30, %v9090_v28 }
0x2493   :  { %v9170_v48 = vsel %vm1072_vm0, %v16202_v52, 0.0  ;;  %v16220_v9 = vadd.f32 %v9099_v58, %v15903_v37 }
0x2494   :  { %9162 = vadd.xlane.f32.xlu0 %v9161_v17  ;;  %v16215_v46 = vadd.f32 %v9091_v24, %v15898_v62  ;;  %v9164_v55 = vsel %vm1072_vm0, %v16208_v42, 0.0 }
0x2495   :  { %v9173_v63 = vsel %vm1072_vm0, %v16220_v9, 0.0 }
0x2496   :  { %v9167_v27 = vsel %vm1072_vm0, %v16215_v46, 0.0 }
0x2498   :  { %9156 = vadd.xlane.f32.xlu0 %v9155_v16 }
0x249c   :  { %9171 = vadd.xlane.f32.xlu0 %v9170_v48 }
0x24a0   :  { %9165 = vadd.xlane.f32.xlu0 %v9164_v55 }
0x24a4   :  { %9168 = vadd.xlane.f32.xlu0 %v9167_v27 }
0x24a8   :  { %9174 = vadd.xlane.f32.xlu0 %v9173_v63 }
0x250b   :  { %v11246_v45 = vpop.f32.mrb[232].mxu0 }
0x250c   :  { %v9112_v39 = vadd.f32 %v11246_v45, %v16176_v30  ;;  %v9103_v62 = vpop.f32.mrb[233].mxu0 }
0x250d   :  { %v9104_v6 = vadd.f32 %v16176_v30, %v9103_v62  ;;  %v11247_v18 = vpop.f32.mrb[234].mxu0 }
0x250e   :  { %v16229_v31 = vadd.f32 %v9112_v39, %v15924_v23  ;;  %v9106_v37 = vpop.f32.mrb[235].mxu0  ;;  %v9115_v13 = vadd.f32 %v11247_v18, %v16176_v30 }
0x250f   :  { %v16232_v26 = vadd.f32 %v9104_v6, %v15919_v4  ;;  %v9107_v0 = vadd.f32 %v16176_v30, %v9106_v37 }
0x2510   :  { %v9182_v14 = vsel %vm1072_vm0, %v16229_v31, 0.0  ;;  %v16238_v60 = vadd.f32 %v9115_v13, %v15932_v56 }
0x2511   :  { %9183 = vadd.xlane.f32.xlu1 %v9182_v14  ;;  %v9176_v23 = vsel %vm1072_vm0, %v16232_v26, 0.0  ;;  %v16244_v5 = vadd.f32 %v9107_v0, %v15927_v40 }
0x2512   :  { %v9185_v32 = vsel %vm1072_vm0, %v16238_v60, 0.0 }
0x2513   :  { %v11250_v8 = vpop.f32.mrb[236].mxu0  ;;  %v9179_v43 = vsel %vm1072_vm0, %v16244_v5, 0.0 }
0x2514   :  { %v9119_v3 = vpop.f32.mrb[237].mxu0  ;;  %v9128_v7 = vadd.f32 %v11250_v8, %v16176_v30 }
0x2515   :  { %9177 = vadd.xlane.f32.xlu1 %v9176_v23  ;;  %v11251_v35 = vpop.f32.mrb[238].mxu0  ;;  %v9120_v19 = vadd.f32 %v16176_v30, %v9119_v3 }
0x2516   :  { %v9122_v4 = vpop.f32.mrb[239].mxu0  ;;  %v16250_v56 = vadd.f32 %v9128_v7, %v15951_v12  ;;  %v9131_v41 = vadd.f32 %v11251_v35, %v16176_v30 }
0x2517   :  { %v16256_v40 = vadd.f32 %v9120_v19, %v15941_v21  ;;  %v9123_v11 = vadd.f32 %v16176_v30, %v9122_v4 }
0x2518   :  { %v9194_v12 = vsel %vm1072_vm0, %v16250_v56, 0.0  ;;  %v16274_v57 = vadd.f32 %v9131_v41, %v15962_v59 }
0x2519   :  { %v9160_v54 = vpop.xlane.xlu0 %9159  ;;  %9186 = vadd.xlane.f32.xlu1 %v9185_v32  ;;  %v16268_v25 = vadd.f32 %v9123_v11, %v15954_v33 }
0x251a   :  { %v9202_v21 = vmul.f32 0.03125, %v9160_v54 }
0x251b   :  { %v9191_v15 = vsel %vm1072_vm0, %v16268_v25, 0.0 }
0x251c   :  { %v16277_v2 = vsub.f32 %v16181_v22, %v9202_v21  ;;  %v9197_v22 = vsel %vm1072_vm0, %v16274_v57, 0.0 }
0x251d   :  { %9180 = vadd.xlane.f32.xlu1 %v9179_v43  ;;  %v9154_v51 = vpop.xlane.xlu0 %9153 }
0x251e   :  { %v9200_v49 = vmul.f32 0.03125, %v9154_v51 }
0x2520   :  { %v16260_v10 = vsub.f32 %v16184_v50, %v9200_v49  ;;  %v9188_v50 = vsel %vm1072_vm0, %v16256_v40, 0.0 }
0x2521   :  { %v9163_v20 = vpop.xlane.xlu0 %9162  ;;  %9195 = vadd.xlane.f32.xlu1 %v9194_v12 }
0x2522   :  { %v9232_v29 = vmul.f32 %v16260_v10, %v16260_v10  ;;  %v9203_v30 = vmul.f32 0.03125, %v9163_v20 }
0x2524   :  { %v9248_v36 = vsel %vm1072_vm0, %v9232_v29, 0.0  ;;  %v16287_v38 = vsub.f32 %v16190_v1, %v9203_v30 }
0x2525   :  { %9249 = vadd.xlane.f32.xlu0 %v9248_v36  ;;  %v9157_v34 = vpop.xlane.xlu0 %9156  ;;  %9189 = vadd.xlane.f32.xlu1 %v9188_v50 }
0x2526   :  { %v9201_v53 = vmul.f32 0.03125, %v9157_v34  ;;  %v9235_v1 = vmul.f32 %v16287_v38, %v16287_v38 }
0x2528   :  { %v16280_v33 = vsub.f32 %v16196_v47, %v9201_v53  ;;  %v9234_v47 = vmul.f32 %v16277_v2, %v16277_v2  ;;  %v9257_v63 = vsel %vm1072_vm0, %v9235_v1, 0.0 }
0x2529   :  { %v9172_v44 = vpop.xlane.xlu0 %9171  ;;  %9192 = vadd.xlane.f32.xlu1 %v9191_v15 }
0x252a   :  { %v9233_v28 = vmul.f32 %v16280_v33, %v16280_v33  ;;  %v9254_v24 = vsel %vm1072_vm0, %v9234_v47, 0.0  ;;  %v9206_v55 = vmul.f32 0.03125, %v9172_v44 }
0x252c   :  { %v9251_v59 = vsel %vm1072_vm0, %v9233_v28, 0.0  ;;  %v16307_v39 = vsub.f32 %v16202_v52, %v9206_v55 }
0x252d   :  { %9252 = vadd.xlane.f32.xlu0 %v9251_v59  ;;  %v9166_v17 = vpop.xlane.xlu0 %9165  ;;  %9198 = vadd.xlane.f32.xlu1 %v9197_v22 }
0x252e   :  { %v9204_v61 = vmul.f32 0.03125, %v9166_v17  ;;  %v9238_v13 = vmul.f32 %v16307_v39, %v16307_v39 }
0x2530   :  { %v16295_v16 = vsub.f32 %v16208_v42, %v9204_v61  ;;  %v9266_v14 = vsel %vm1072_vm0, %v9238_v13, 0.0 }
0x2531   :  { %9255 = vadd.xlane.f32.xlu0 %v9254_v24  ;;  %v9169_v48 = vpop.xlane.xlu0 %9168 }
0x2532   :  { %v9205_v58 = vmul.f32 0.03125, %v9169_v48  ;;  %v9236_v45 = vmul.f32 %v16295_v16, %v16295_v16 }
0x2534   :  { %v16301_v27 = vsub.f32 %v16215_v46, %v9205_v58  ;;  %v9260_v6 = vsel %vm1072_vm0, %v9236_v45, 0.0 }
0x2535   :  { %9258 = vadd.xlane.f32.xlu0 %v9257_v63  ;;  %v9175_v42 = vpop.xlane.xlu0 %9174 }
0x2536   :  { %v9207_v62 = vmul.f32 0.03125, %v9175_v42  ;;  %v9237_v18 = vmul.f32 %v16301_v27, %v16301_v27 }
0x2538   :  { %v16313_v46 = vsub.f32 %v16220_v9, %v9207_v62  ;;  %v9263_v37 = vsel %vm1072_vm0, %v9237_v18, 0.0 }
0x2539   :  { %9261 = vadd.xlane.f32.xlu0 %v9260_v6 }
0x253a   :  { %v9239_v52 = vmul.f32 %v16313_v46, %v16313_v46 }
0x253c   :  { %v9269_v8 = vsel %vm1072_vm0, %v9239_v52, 0.0  ;;  %v16379_v52 = vld [vmem:[%s16477_s17] ss:$0 sm:$0xff] }
0x253d   :  { %9264 = vadd.xlane.f32.xlu0 %v9263_v37  ;;  %v16373_v37 = vld [vmem:[%s16476_s16] ss:$0 sm:$0xff] }
0x2541   :  { %9267 = vadd.xlane.f32.xlu0 %v9266_v14 }
0x2545   :  { %9270 = vadd.xlane.f32.xlu0 %v9269_v8 }
0x259e   :  { %v9184_v0 = vpop.xlane.xlu1 %9183 }
0x259f   :  { %v9210_v3 = vmul.f32 0.03125, %v9184_v0 }
0x25a1   :  { %v16323_v9 = vsub.f32 %v16229_v31, %v9210_v3 }
0x25a2   :  { %v9178_v23 = vpop.xlane.xlu1 %9177 }
0x25a3   :  { %v9208_v35 = vmul.f32 0.03125, %v9178_v23  ;;  %v9242_v4 = vmul.f32 %v16323_v9, %v16323_v9 }
0x25a5   :  { %v16328_v7 = vsub.f32 %v16232_v26, %v9208_v35  ;;  %v9278_v32 = vsel %vm1072_vm0, %v9242_v4, 0.0 }
0x25a6   :  { %v9187_v54 = vpop.xlane.xlu1 %9186  ;;  %9279 = vadd.xlane.f32.xlu1 %v9278_v32 }
0x25a7   :  { %v9211_v19 = vmul.f32 0.03125, %v9187_v54  ;;  %v9240_v43 = vmul.f32 %v16328_v7, %v16328_v7 }
0x25a9   :  { %v16334_v51 = vsub.f32 %v16238_v60, %v9211_v19  ;;  %v9272_v31 = vsel %vm1072_vm0, %v9240_v43, 0.0 }
0x25aa   :  { %v9181_v49 = vpop.xlane.xlu1 %9180  ;;  %9273 = vadd.xlane.f32.xlu1 %v9272_v31 }
0x25ab   :  { %v9209_v11 = vmul.f32 0.03125, %v9181_v49  ;;  %v9243_v26 = vmul.f32 %v16334_v51, %v16334_v51 }
0x25ad   :  { %v16340_v12 = vsub.f32 %v16244_v5, %v9209_v11  ;;  %v9281_v20 = vsel %vm1072_vm0, %v9243_v26, 0.0 }
0x25ae   :  { %v9196_v29 = vpop.xlane.xlu1 %9195  ;;  %9282 = vadd.xlane.f32.xlu1 %v9281_v20 }
0x25af   :  { %v9214_v41 = vmul.f32 0.03125, %v9196_v29  ;;  %v9241_v60 = vmul.f32 %v16340_v12, %v16340_v12 }
0x25b1   :  { %v16346_v21 = vsub.f32 %v16250_v56, %v9214_v41  ;;  %v9275_v36 = vsel %vm1072_vm0, %v9241_v60, 0.0 }
0x25b2   :  { %v9250_v50 = vpop.xlane.xlu0 %9249  ;;  %9276 = vadd.xlane.f32.xlu1 %v9275_v36  ;;  %v9190_v34 = vpop.xlane.xlu1 %9189 }
0x25b3   :  { %v9296_v53 = vmul.f32 0.03125, %v9250_v50  ;;  %v9212_v30 = vmul.f32 0.03125, %v9190_v34  ;;  %v9246_v5 = vmul.f32 %v16346_v21, %v16346_v21 }
0x25b5   :  { %v9312_v15 = vadd.f32 1e-06, %v9296_v53  ;;  %v16352_v44 = vsub.f32 %v16256_v40, %v9212_v30  ;;  %v9290_v28 = vsel %vm1072_vm0, %v9246_v5, 0.0 }
0x25b6   :  { %9291 = vadd.xlane.f32.xlu1 %v9290_v28  ;;  %v9193_v59 = vpop.xlane.xlu1 %9192 }
0x25b7   :  { %12288 = vrsqrt.f32 %v9312_v15  ;;  %v9213_v56 = vmul.f32 0.03125, %v9193_v59  ;;  %v9244_v22 = vmul.f32 %v16352_v44, %v16352_v44 }
0x25b9   :  { %v16358_v47 = vsub.f32 %v16268_v25, %v9213_v56  ;;  %v9284_v17 = vsel %vm1072_vm0, %v9244_v22, 0.0 }
0x25ba   :  { %v9253_v61 = vpop.xlane.xlu0 %9252  ;;  %9285 = vadd.xlane.f32.xlu1 %v9284_v17  ;;  %v9199_v24 = vpop.xlane.xlu1 %9198 }
0x25bb   :  { %v9297_v1 = vmul.f32 0.03125, %v9253_v61  ;;  %v9215_v40 = vmul.f32 0.03125, %v9199_v24  ;;  %v9245_v48 = vmul.f32 %v16358_v47, %v16358_v47 }
0x25bd   :  { %v9313_v58 = vadd.f32 1e-06, %v9297_v1  ;;  %v16364_v55 = vsub.f32 %v16274_v57, %v9215_v40  ;;  %v9287_v63 = vsel %vm1072_vm0, %v9245_v48, 0.0 }
0x25be   :  { %v9256_v45 = vpop.xlane.xlu0 %9255  ;;  %9288 = vadd.xlane.f32.xlu1 %v9287_v63 }
0x25bf   :  { %12290 = vrsqrt.f32 %v9313_v58  ;;  %v9298_v25 = vmul.f32 0.03125, %v9256_v45  ;;  %v9247_v42 = vmul.f32 %v16364_v55, %v16364_v55 }
0x25c1   :  { %v12289_v62 = vpop.eup %12288  ;;  %v9314_v6 = vadd.f32 1e-06, %v9298_v25  ;;  %v9293_v18 = vsel %vm1072_vm0, %v9247_v42, 0.0 }
0x25c2   :  { %v9259_v57 = vpop.xlane.xlu0 %9258  ;;  %9294 = vadd.xlane.f32.xlu1 %v9293_v18  ;;  %v9344_v13 = vmul.f32 %v12289_v62, %v16260_v10 }
0x25c3   :  { %12292 = vrsqrt.f32 %v9314_v6  ;;  %v9299_v14 = vmul.f32 0.03125, %v9259_v57 }
0x25c4   :  { %v9366_v8 = vmul.f32 %v16373_v37, %v9344_v13 }
0x25c5   :  { %v9315_v0 = vadd.f32 1e-06, %v9299_v14 }
0x25c6   :  { %v9262_v3 = vpop.xlane.xlu0 %9261  ;;  %v9388_v23 = vadd.f32 %v16379_v52, %v9366_v8 }
0x25c7   :  { %12294 = vrsqrt.f32 %v9315_v0  ;;  %v9300_v35 = vmul.f32 0.03125, %v9262_v3 }
0x25c8   :  { %9404 = vxpose.xlu0.b32.start [1/8] (short) (narrow) %v9388_v23, 32 }
0x25c9   :  { %v12291_v4 = vpop.eup %12290  ;;  %v9316_v32 = vadd.f32 1e-06, %v9300_v35 }
0x25ca   :  { %v9265_v54 = vpop.xlane.xlu0 %9264  ;;  %v9345_v10 = vmul.f32 %v12291_v4, %v16280_v33 }
0x25cb   :  { %12296 = vrsqrt.f32 %v9316_v32  ;;  %v9301_v19 = vmul.f32 0.03125, %v9265_v54 }
0x25cc   :  { %v9367_v43 = vmul.f32 %v16373_v37, %v9345_v10 }
0x25cd   :  { %v12293_v31 = vpop.eup %12292  ;;  %v9317_v49 = vadd.f32 1e-06, %v9301_v19 }
0x25ce   :  { %v9268_v11 = vpop.xlane.xlu0 %9267  ;;  %v9389_v26 = vadd.f32 %v16379_v52, %v9367_v43  ;;  %v9346_v20 = vmul.f32 %v12293_v31, %v16277_v2 }
0x25cf   :  { %12298 = vrsqrt.f32 %v9317_v49  ;;  %v9302_v29 = vmul.f32 0.03125, %v9268_v11 }
0x25d0   :  { %9405 = vxpose.xlu0.b32.cont [2/8] (short) (narrow) %v9389_v26, 32  ;;  %v9368_v41 = vmul.f32 %v16373_v37, %v9346_v20 }
0x25d1   :  { %v12295_v60 = vpop.eup %12294  ;;  %v9318_v36 = vadd.f32 1e-06, %v9302_v29 }
0x25d2   :  { %v9271_v50 = vpop.xlane.xlu0 %9270  ;;  %v9390_v33 = vadd.f32 %v16379_v52, %v9368_v41  ;;  %v9347_v34 = vmul.f32 %v12295_v60, %v16287_v38 }
0x25d3   :  { %12300 = vrsqrt.f32 %v9318_v36  ;;  %v9303_v53 = vmul.f32 0.03125, %v9271_v50 }
0x25d4   :  { %9406 = vxpose.xlu0.b32.cont [3/8] (short) (narrow) %v9390_v33, 32  ;;  %v9369_v30 = vmul.f32 %v16373_v37, %v9347_v34 }
0x25d5   :  { %v12297_v5 = vpop.eup %12296  ;;  %v9319_v15 = vadd.f32 1e-06, %v9303_v53 }
0x25d6   :  { %v9391_v2 = vadd.f32 %v16379_v52, %v9369_v30  ;;  %v9348_v28 = vmul.f32 %v12297_v5, %v16295_v16 }
0x25d7   :  { %12302 = vrsqrt.f32 %v9319_v15 }
0x25d8   :  { %9407 = vxpose.xlu0.b32.cont [4/8] (short) (narrow) %v9391_v2, 32  ;;  %v9370_v59 = vmul.f32 %v16373_v37, %v9348_v28 }
0x25d9   :  { %v12299_v56 = vpop.eup %12298 }
0x25da   :  { %v9392_v22 = vadd.f32 %v16379_v52, %v9370_v59  ;;  %v9349_v38 = vmul.f32 %v12299_v56, %v16301_v27 }
0x25dc   :  { %9408 = vxpose.xlu0.b32.cont [5/8] (short) (narrow) %v9392_v22, 32  ;;  %v9371_v17 = vmul.f32 %v16373_v37, %v9349_v38 }
0x25dd   :  { %v12301_v61 = vpop.eup %12300 }
0x25de   :  { %v9393_v24 = vadd.f32 %v16379_v52, %v9371_v17  ;;  %v9350_v1 = vmul.f32 %v12301_v61, %v16307_v39 }
0x25e0   :  { %9409 = vxpose.xlu0.b32.cont [6/8] (short) (narrow) %v9393_v24, 32  ;;  %v9372_v16 = vmul.f32 %v16373_v37, %v9350_v1 }
0x25e1   :  { %v12303_v40 = vpop.eup %12302 }
0x25e2   :  { %v9394_v48 = vadd.f32 %v16379_v52, %v9372_v16  ;;  %v9351_v58 = vmul.f32 %v12303_v40, %v16313_v46 }
0x25e4   :  { %9410 = vxpose.xlu0.b32.cont [7/8] (short) (narrow) %v9394_v48, 32  ;;  %v9373_v63 = vmul.f32 %v16373_v37, %v9351_v58 }
0x25e6   :  { %v9395_v27 = vadd.f32 %v16379_v52, %v9373_v63 }
0x25e8   :  { %9411 = vxpose.xlu0.b32.end [8/8] (short) (narrow) %v9395_v27, 32 }
0x2633   :  { %v9280_v45 = vpop.xlane.xlu1 %9279 }
0x2634   :  { %v9306_v62 = vmul.f32 0.03125, %v9280_v45 }
0x2636   :  { %v9322_v18 = vadd.f32 1e-06, %v9306_v62 }
0x2637   :  { %v9274_v25 = vpop.xlane.xlu1 %9273 }
0x2638   :  { %v9304_v42 = vmul.f32 0.03125, %v9274_v25 }
0x263a   :  { %v9320_v6 = vadd.f32 1e-06, %v9304_v42 }
0x263b   :  { %v9283_v39 = vpop.xlane.xlu1 %9282 }
0x263c   :  { %12304 = vrsqrt.f32 %v9320_v6  ;;  %v9307_v57 = vmul.f32 0.03125, %v9283_v39 }
0x263d   :  { %12306 = vrsqrt.f32 %v9322_v18 }
0x263e   :  { %v9323_v8 = vadd.f32 1e-06, %v9307_v57 }
0x263f   :  { %v9277_v13 = vpop.xlane.xlu1 %9276 }
0x2640   :  { %v9305_v14 = vmul.f32 0.03125, %v9277_v13 }
0x2642   :  { %v9321_v46 = vadd.f32 1e-06, %v9305_v14 }
0x2643   :  { %v9292_v0 = vpop.xlane.xlu1 %9291 }
0x2644   :  { %12308 = vrsqrt.f32 %v9321_v46  ;;  %v9310_v54 = vmul.f32 0.03125, %v9292_v0 }
0x2645   :  { %12310 = vrsqrt.f32 %v9323_v8 }
0x2646   :  { %v12305_v3 = vpop.eup %12304 }
0x2647   :  { %v9286_v23 = vpop.xlane.xlu1 %9285  ;;  %v9352_v35 = vmul.f32 %v12305_v3, %v16328_v7  ;;  %v12307_v31 = vpop.eup %12306  ;;  %v9326_v7 = vadd.f32 1e-06, %v9310_v54 }
0x2648   :  { %v9308_v4 = vmul.f32 0.03125, %v9286_v23  ;;  %v9354_v60 = vmul.f32 %v12307_v31, %v16323_v9 }
0x2649   :  { %v9374_v32 = vmul.f32 %v16373_v37, %v9352_v35 }
0x264a   :  { %v9324_v10 = vadd.f32 1e-06, %v9308_v4  ;;  %v9376_v5 = vmul.f32 %v16373_v37, %v9354_v60 }
0x264b   :  { %v9289_v19 = vpop.xlane.xlu1 %9288  ;;  %v9396_v43 = vadd.f32 %v16379_v52, %v9374_v32 }
0x264c   :  { %12312 = vrsqrt.f32 %v9324_v10  ;;  %v9309_v49 = vmul.f32 0.03125, %v9289_v19  ;;  %v9420_v11 = vpop.trf.xlu0  ;;  %v9398_v2 = vadd.f32 %v16379_v52, %v9376_v5 }
0x264d   :  { %9440 = vxpose.xlu1.b32.start [1/8] (short) (narrow) %v9396_v43, 32  ;;  %9436 = vst.msk [vmem:[%s16478_s18] sm:$0xff] %vm1709_vm2, %v9420_v11 }
0x264e   :  { %v12309_v26 = vpop.eup %12308  ;;  %v9325_v20 = vadd.f32 1e-06, %v9309_v49 }
0x264f   :  { %v9295_v29 = vpop.xlane.xlu1 %9294  ;;  %v9353_v41 = vmul.f32 %v12309_v26, %v16340_v12  ;;  %v12311_v36 = vpop.eup %12310 }
0x2650   :  { %12314 = vrsqrt.f32 %v9325_v20  ;;  %v9311_v50 = vmul.f32 0.03125, %v9295_v29  ;;  %v9421_v53 = vpop.trf.xlu0  ;;  %v9355_v15 = vmul.f32 %v12311_v36, %v16334_v51 }
0x2651   :  { %v9375_v33 = vmul.f32 %v16373_v37, %v9353_v41  ;;  %12316 = vrsqrt.f32 %v9326_v7  ;;  %9437 = vst.msk [vmem:[%s16478_s18 + $0x8] sm:$0xff] %vm1709_vm2, %v9421_v53 }
0x2652   :  { %v9327_v34 = vadd.f32 1e-06, %v9311_v50  ;;  %v9377_v28 = vmul.f32 %v16373_v37, %v9355_v15 }
0x2653   :  { %v9397_v30 = vadd.f32 %v16379_v52, %v9375_v33 }
0x2654   :  { %12318 = vrsqrt.f32 %v9327_v34  ;;  %v9422_v12 = vpop.trf.xlu0  ;;  %v9399_v22 = vadd.f32 %v16379_v52, %v9377_v28 }
0x2655   :  { %9441 = vxpose.xlu1.b32.cont [2/8] (short) (narrow) %v9397_v30, 32  ;;  %9438 = vst.msk [vmem:[%s16478_s18 + $0x10] sm:$0xff] %vm1709_vm2, %v9422_v12 }
0x2656   :  { %v12313_v9 = vpop.eup %12312 }
0x2657   :  { %v9356_v59 = vmul.f32 %v12313_v9, %v16352_v44 }
0x2658   :  { %v9423_v56 = vpop.trf.xlu0 }
0x2659   :  { %9442 = vxpose.xlu1.b32.cont [3/8] (short) (narrow) %v9398_v2, 32  ;;  %v9378_v38 = vmul.f32 %v16373_v37, %v9356_v59  ;;  %9439 = vst.msk [vmem:[%s16478_s18 + $0x18] sm:$0xff] %vm1709_vm2, %v9423_v56 }
0x265a   :  { %v12315_v51 = vpop.eup %12314 }
0x265b   :  { %v9357_v17 = vmul.f32 %v12315_v51, %v16358_v47  ;;  %v12317_v44 = vpop.eup %12316  ;;  %v9400_v61 = vadd.f32 %v16379_v52, %v9378_v38 }
0x265c   :  { %v9358_v1 = vmul.f32 %v12317_v44, %v16346_v21 }
0x265d   :  { %9443 = vxpose.xlu1.b32.cont [4/8] (short) (narrow) %v9399_v22, 32  ;;  %v9379_v24 = vmul.f32 %v16373_v37, %v9357_v17 }
0x265e   :  { %v12319_v16 = vpop.eup %12318  ;;  %v9380_v48 = vmul.f32 %v16373_v37, %v9358_v1 }
0x265f   :  { %v9401_v40 = vadd.f32 %v16379_v52, %v9379_v24  ;;  %v9359_v47 = vmul.f32 %v12319_v16, %v16364_v55 }
0x2660   :  { %v9402_v58 = vadd.f32 %v16379_v52, %v9380_v48 }
0x2661   :  { %9444 = vxpose.xlu1.b32.cont [5/8] (short) (narrow) %v9400_v61, 32  ;;  %v9381_v63 = vmul.f32 %v16373_v37, %v9359_v47 }
0x2663   :  { %v9403_v27 = vadd.f32 %v16379_v52, %v9381_v63 }
0x2665   :  { %9445 = vxpose.xlu1.b32.cont [6/8] (short) (narrow) %v9401_v40, 32 }
0x2669   :  { %9446 = vxpose.xlu1.b32.cont [7/8] (short) (narrow) %v9402_v58, 32 }
0x266d   :  { %9447 = vxpose.xlu1.b32.end [8/8] (short) (narrow) %v9403_v27, 32 }
0x26d1   :  { %v9456_v45 = vpop.trf.xlu1 }
0x26d2   :  { %9880 = vst.msk [vmem:[%s16478_s18 + $0x20] sm:$0xff] %vm1709_vm2, %v9456_v45 }
0x26d5   :  { %v9457_v21 = vpop.trf.xlu1 }
0x26d6   :  { %9881 = vst.msk [vmem:[%s16478_s18 + $0x28] sm:$0xff] %vm1709_vm2, %v9457_v21 }
0x26d9   :  { %v9458_v55 = vpop.trf.xlu1 }
0x26da   :  { %9882 = vst.msk [vmem:[%s16478_s18 + $0x30] sm:$0xff] %vm1709_vm2, %v9458_v55 }
0x26dd   :  { %v9459_v37 = vpop.trf.xlu1 }
0x26de   :  { %9883 = vst.msk [vmem:[%s16478_s18 + $0x38] sm:$0xff] %vm1709_vm2, %v9459_v37 }

</bundles_post_ra>
